<compile_context>
chip_gen: v7x
topology: tpu7x:2x2x1
jax: 0.10.0
libtpu: 0.0.40
codegen_flags: <defaults>
</compile_context>

<pallas_src>
import functools

import numpy as np
import jax
import jax.numpy as jnp
from jax.experimental import pallas as pl
from jax.experimental.pallas import tpu as pltpu


# ---------------------------------------------------------------------------
# Fused kernel: conv stack -> warp pooled statistic -> SE -> residual combine
# Channels-first (C, H*W) activations (lane-dense, 256-wide loads/stores).
# ---------------------------------------------------------------------------
def _warp_bottleneck_kernel(x_ref, w1_ref, w2_ref, w3_ref, mask_ref,
                            grid_ref, wse1_ref, wse2_ref, out_ref,
                            ixy_ref, dsimg_ref, *, H, W, C2):
    HW = H * W
    x = x_ref[...]                                               # (C, HW) f32

    # ---- conv1 (1x1) + relu : bf16 MXU operands, f32 accumulation ----------
    h1 = jnp.maximum(
        jnp.dot(w1_ref[...], x.astype(jnp.bfloat16),
                preferred_element_type=jnp.float32), 0.0)        # (C4, HW)

    # ---- conv2 (3x3, pad=1) + relu : in-register taps via lane rolls -------
    # Taps stacked along the contraction axis -> single K = 9*C4 matmul.
    taps = []
    for ky in range(3):
        for kx in range(3):
            k = ky * 3 + kx
            s = (ky - 1) * W + (kx - 1)                # flat source offset
            t = h1 if s == 0 else pltpu.roll(h1, shift=(-s) % HW, axis=1)
            if k != 4:                                 # centre mask is all-ones
                t = t * mask_ref[k:k + 1, :]           # zero wrapped-off pixels
            taps.append(t)
    cols = jnp.concatenate(taps, axis=0).astype(jnp.bfloat16)    # (9*C4, HW)
    h2 = jnp.maximum(
        jnp.dot(w2_ref[...], cols,
                preferred_element_type=jnp.float32), 0.0)        # (C4, HW)

    # ---- conv3 (1x1); output channels pre-permuted to [ws | ds] order ------
    y = jnp.dot(w3_ref[...], h2.astype(jnp.bfloat16),
                preferred_element_type=jnp.float32)              # (C, HW)

    ws = y[0:C2, :]                                              # flow rows
    ds = y[C2:, :]                                               # warped-image rows

    # ---- grid_sample coordinates, vectorized over all C2 flow rows ---------
    # Row 2k is the x-coordinate of flow pair k, row 2k+1 the y-coordinate
    # (exactly torch's ws.reshape(-1, 2, h, w) consecutive-channel pairing).
    row_iota = jax.lax.broadcasted_iota(jnp.int32, (C2, 1), 0)
    size_col = jnp.where((row_iota & 1) == 0, float(W), float(H))
    # torch: shift = grid - ws ; unnorm = ((shift + 1) * size - 1) / 2
    ixy_ref[...] = (((grid_ref[...] - ws) + 1.0) * size_col - 1.0) * 0.5

    # Stage the ds half as (H, C2, W) images in VMEM (no in-register lane-split
    # reshape needed: H narrow stores of contiguous lane slices).
    for ys in range(H):
        dsimg_ref[ys] = ds[:, ys * W:(ys + 1) * W]               # (C2, W)

    xs_f = jax.lax.broadcasted_iota(jnp.int32, (W, HW), 0).astype(jnp.float32)
    ys_f = jax.lax.broadcasted_iota(jnp.int32, (H, HW), 0).astype(jnp.float32)

    inv_hw = 1.0 / HW
    pooled_parts = []
    for k in range(C2 // 2):                     # one iteration per flow pair
        ix = ixy_ref[2 * k:2 * k + 1, :]                         # (1, HW)
        iy = ixy_ref[2 * k + 1:2 * k + 2, :]                     # (1, HW)
        # Bilinear col/row weights; out-of-range taps give 0 => zeros padding.
        rx = jnp.maximum(1.0 - jnp.abs(xs_f - ix), 0.0)          # (W, HW)
        ry = jnp.maximum(1.0 - jnp.abs(ys_f - iy), 0.0)          # (H, HW)
        # Mass matrix shared by both channels of the pair (K = HW contraction).
        mk = jax.lax.dot_general(ry, rx, (((1,), (1,)), ((), ())),
                                 preferred_element_type=jnp.float32)  # (H, W)
        for c in range(2):
            img = dsimg_ref[:, 2 * k + c, :]                     # (H, W)
            p = img * mk
            s = jnp.sum(jnp.sum(p, axis=1, keepdims=True),
                        axis=0, keepdims=True)                   # (1, 1)
            pooled_parts.append(s)
    pooled = jnp.concatenate(pooled_parts, axis=0) * inv_hw      # (C2, 1)

    # ---- SE (bias-free): fc1 + relu -> fc2 + sigmoid -----------------------
    hid = jnp.maximum(
        jnp.dot(wse1_ref[...], pooled, preferred_element_type=jnp.float32), 0.0)
    att = jax.nn.sigmoid(
        jnp.dot(wse2_ref[...], hid, preferred_element_type=jnp.float32))  # (C2,1)

    # ---- residual combine: out = x + y * [1,...,1 | att] -------------------
    scale = jnp.concatenate([jnp.ones((C2, 1), jnp.float32), att], axis=0)
    out_ref[...] = x + y * scale


def warp_bottleneck_fused(x3, w1, w2big, w3p, tap_mask, grid_tiled,
                          w_se1, w_se2, H, W):
    B, C, HW = x3.shape
    C4, C2 = C // 4, C // 2
    r = w_se1.shape[0]
    kern = functools.partial(_warp_bottleneck_kernel, H=H, W=W, C2=C2)
    return pl.pallas_call(
        kern,
        out_shape=jax.ShapeDtypeStruct((B, C, HW), jnp.float32),
        grid=(B,),
        in_specs=[
            pl.BlockSpec((None, C, HW), lambda b: (b, 0, 0)),     # x
            pl.BlockSpec((C4, C), lambda b: (0, 0)),              # conv1 weight (bf16)
            pl.BlockSpec((C4, 9 * C4), lambda b: (0, 0)),         # conv2 folded (bf16)
            pl.BlockSpec((C, C4), lambda b: (0, 0)),              # conv3 permuted (bf16)
            pl.BlockSpec((9, HW), lambda b: (0, 0)),              # 3x3 edge masks
            pl.BlockSpec((C2, HW), lambda b: (0, 0)),             # constant warp grid
            pl.BlockSpec((r, C2), lambda b: (0, 0)),              # SE fc1
            pl.BlockSpec((C2, r), lambda b: (0, 0)),              # SE fc2
        ],
        out_specs=pl.BlockSpec((None, C, HW), lambda b: (b, 0, 0)),
        scratch_shapes=[
            pltpu.VMEM((C2, HW), jnp.float32),      # unnormalized sample coords
            pltpu.VMEM((H, C2, W), jnp.float32),    # ds half as (H, W) images
        ],
        compiler_params=pltpu.CompilerParams(
            dimension_semantics=("parallel",)),
    )(x3, w1, w2big, w3p, tap_mask, grid_tiled, w_se1, w_se2)


# ---------------------------------------------------------------------------
# Host-side constants / one-time weight layout transforms
# ---------------------------------------------------------------------------
def _warp_grid(H, W):
    # Replicates torch: cat(meshgrid([linspace(-1,1,H), linspace(-1,1,W)]), dim=1)
    #                   .reshape(1, 2, H, W)  (including its interleaving reshape)
    g0 = np.linspace(-1.0, 1.0, H, dtype=np.float32)
    g1 = np.linspace(-1.0, 1.0, W, dtype=np.float32)
    G0, G1 = np.meshgrid(g0, g1, indexing='ij')                   # each (H, W)
    return np.concatenate([G0, G1], axis=1).reshape(2, H, W)


def _tap_masks(H, W):
    ys, xs = np.meshgrid(np.arange(H), np.arange(W), indexing='ij')
    m = []
    for ky in range(3):
        for kx in range(3):
            dy, dx = ky - 1, kx - 1
            valid = ((ys + dy >= 0) & (ys + dy < H) &
                     (xs + dx >= 0) & (xs + dx < W))
            m.append(valid.reshape(-1))
    return np.stack(m).astype(np.float32)                         # (9, HW)


def init_params(dim, reduction=16):
    key = jax.random.PRNGKey(0)
    k1, k2, k3, k4, k5 = jax.random.split(key, 5)
    c4, c2 = dim // 4, dim // 2
    r = max(c2 // reduction, 1)

    # torch-layout synthetic weights (f32), then one-time layout transforms
    w1_t = 0.1 * jax.random.normal(k1, (c4, dim), jnp.float32)       # conv1 (Cout, Cin)
    w2_t = 0.1 * jax.random.normal(k2, (c4, c4, 3, 3), jnp.float32)  # conv2 (Cout, Cin, 3, 3)
    w3_t = 0.1 * jax.random.normal(k3, (dim, c4), jnp.float32)       # conv3 (Cout, Cin)
    w_se1 = 0.1 * jax.random.normal(k4, (r, c2), jnp.float32)        # SE fc1 (out, in)
    w_se2 = 0.1 * jax.random.normal(k5, (c2, r), jnp.float32)        # SE fc2 (out, in)

    # fold the 3x3 taps into one K = 9*c4 contraction; column (ky*3+kx)*c4 + ci
    w2big = jnp.transpose(w2_t, (0, 2, 3, 1)).reshape(c4, 9 * c4)

    # permute conv3 output channels into [ws | ds] order (= torch's cat(u,v),
    # cat(y,z)) so the WarpLayer's strided split costs nothing at runtime.
    ws_list = list(range(0, dim, 4)) + list(range(1, dim, 4))
    ds_list = list(range(2, dim, 4)) + list(range(3, dim, 4))
    perm = np.asarray(ws_list + ds_list, dtype=np.int32)
    w3p = w3_t[perm, :]

    return {
        # kernel-layout weights (MXU operands in bf16, f32 accumulation)
        'w1': w1_t.astype(jnp.bfloat16),
        'w2': w2big.astype(jnp.bfloat16),
        'w3p': w3p.astype(jnp.bfloat16),
        'w_se1': w_se1, 'w_se2': w_se2,
        # torch-layout f32 originals, for the pure-JAX reference
        'ref': {'w1': w1_t, 'w2': w2_t, 'w3': w3_t,
                'w_se1': w_se1, 'w_se2': w_se2},
    }


# ---------------------------------------------------------------------------
# WarpBottleneck forward (single fused pallas_call)
# ---------------------------------------------------------------------------
def warp_bottleneck(x_nchw, params):
    B, C, H, W = x_nchw.shape
    HW = H * W
    C2 = C // 2
    grid_np = _warp_grid(H, W)                                    # (2, H, W)
    grid_tiled = jnp.asarray(np.tile(grid_np.reshape(2, HW), (C2 // 2, 1)))
    tap_mask = jnp.asarray(_tap_masks(H, W))

    x3 = x_nchw.reshape(B, C, HW)                                 # free metadata reshape
    out = warp_bottleneck_fused(x3, params['w1'], params['w2'], params['w3p'],
                                tap_mask, grid_tiled,
                                params['w_se1'], params['w_se2'], H, W)
    return out.reshape(B, C, H, W)


# ---------------------------------------------------------------------------
# Pure-JAX reference (torch semantics, f32) for numeric verification
# ---------------------------------------------------------------------------
def _reference_forward(x, rp):
    B, C, H, W = x.shape
    C2 = C // 2
    y = jnp.einsum('oc,bchw->bohw', rp['w1'], x)
    y = jax.nn.relu(y)
    y = jax.lax.conv_general_dilated(y, rp['w2'], (1, 1), 'SAME',
                                     dimension_numbers=('NCHW', 'OIHW', 'NCHW'))
    y = jax.nn.relu(y)
    y = jnp.einsum('oc,bchw->bohw', rp['w3'], y)
    # WarpLayer
    u, v = y[:, 0::4], y[:, 1::4]
    yy, z = y[:, 2::4], y[:, 3::4]
    ws = jnp.concatenate([u, v], axis=1)
    ds = jnp.concatenate([yy, z], axis=1)
    gridj = jnp.asarray(_warp_grid(H, W))                         # (2, H, W)
    wsr = ws.reshape(B * C2 // 2, 2, H, W)
    dsr = ds.reshape(B * C2 // 2, 2, H, W)
    shift = gridj[None] - wsr
    ix = ((shift[:, 0] + 1.0) * W - 1.0) * 0.5                    # (N, H, W)
    iy = ((shift[:, 1] + 1.0) * H - 1.0) * 0.5
    xs = jnp.arange(W, dtype=jnp.float32)
    ysv = jnp.arange(H, dtype=jnp.float32)
    wx = jnp.maximum(1.0 - jnp.abs(ix[..., None] - xs), 0.0)      # (N, H, W, Wsrc)
    wy = jnp.maximum(1.0 - jnp.abs(iy[..., None] - ysv), 0.0)     # (N, H, W, Hsrc)
    pst = jnp.einsum('nijy,nijx,ncyx->ncij', wy, wx, dsr)
    pst = pst.reshape(B, C2, H, W)
    pooled = jnp.mean(pst, axis=(2, 3))                           # (B, C2)
    hid = jax.nn.relu(pooled @ rp['w_se1'].T)
    att = jax.nn.sigmoid(hid @ rp['w_se2'].T)                     # (B, C2)
    out_wp = jnp.concatenate([ws, ds * att[:, :, None, None]], axis=1)
    return x + out_wp


if __name__ == "__main__":
    B, C, H, W = 2, 64, 16, 16        # dim divisible by 4; dim//2 >= reduction
    key = jax.random.PRNGKey(0)
    x = jax.random.normal(key, (B, C, H, W), jnp.float32)
    params = init_params(C)

    fwd = jax.jit(lambda xx: warp_bottleneck(xx, params))
    out = fwd(x)
    jax.block_until_ready(out)
    assert out.shape == (B, C, H, W) and out.dtype == jnp.float32
    assert bool(jnp.isfinite(out).all())

    ref = _reference_forward(x, params['ref'])
    max_diff = float(jnp.max(jnp.abs(out - ref)))
    # bf16 MXU operands in the kernel vs f32 reference -> small tolerance
    assert max_diff < 5e-2, f"mismatch vs reference: {max_diff}"

    print("KERNEL_OK")
</pallas_src>

<mosaic_0001>
module attributes {stable_mosaic.version = 11 : i64} {
  func.func @_warp_bottleneck_kernel(%arg0: i32, %arg1: memref<1x64x256xf32, #tpu.memory_space<vmem>>, %arg2: memref<16x64xbf16, #tpu.memory_space<vmem>>, %arg3: memref<16x144xbf16, #tpu.memory_space<vmem>>, %arg4: memref<64x16xbf16, #tpu.memory_space<vmem>>, %arg5: memref<9x256xf32, #tpu.memory_space<vmem>>, %arg6: memref<32x256xf32, #tpu.memory_space<vmem>>, %arg7: memref<2x32xf32, #tpu.memory_space<vmem>>, %arg8: memref<32x2xf32, #tpu.memory_space<vmem>>, %arg9: memref<1x64x256xf32, #tpu.memory_space<vmem>>, %arg10: memref<32x256xf32, #tpu.memory_space<vmem>>, %arg11: memref<16x32x16xf32, #tpu.memory_space<vmem>>) attributes {dimension_semantics = [#tpu.dimension_semantics<parallel>], iteration_bounds = array<i64: 2>, scalar_prefetch = 0 : i64, scratch_operands = 2 : i64, tpu.core_type = #tpu.core_type<tc>, window_params = [{transform_indices = @transform_0, window_bounds = array<i64: 1, 64, 256>}, {pipeline_mode = #tpu.pipeline_mode<synchronous>, transform_indices = @transform_1, window_bounds = array<i64: 16, 64>}, {pipeline_mode = #tpu.pipeline_mode<synchronous>, transform_indices = @transform_2, window_bounds = array<i64: 16, 144>}, {pipeline_mode = #tpu.pipeline_mode<synchronous>, transform_indices = @transform_3, window_bounds = array<i64: 64, 16>}, {pipeline_mode = #tpu.pipeline_mode<synchronous>, transform_indices = @transform_4, window_bounds = array<i64: 9, 256>}, {pipeline_mode = #tpu.pipeline_mode<synchronous>, transform_indices = @transform_5, window_bounds = array<i64: 32, 256>}, {pipeline_mode = #tpu.pipeline_mode<synchronous>, transform_indices = @transform_6, window_bounds = array<i64: 2, 32>}, {pipeline_mode = #tpu.pipeline_mode<synchronous>, transform_indices = @transform_7, window_bounds = array<i64: 32, 2>}, {transform_indices = @transform_8, window_bounds = array<i64: 1, 64, 256>}]} {
    %c0 = arith.constant 0 : index
    %c0_0 = arith.constant 0 : index
    %c0_1 = arith.constant 0 : index
    %0 = vector.load %arg1[%c0, %c0_0, %c0_1] : memref<1x64x256xf32, #tpu.memory_space<vmem>>, vector<1x64x256xf32>
    %1 = vector.shape_cast %0 : vector<1x64x256xf32> to vector<64x256xf32>
    %c0_2 = arith.constant 0 : index
    %c0_3 = arith.constant 0 : index
    %2 = vector.load %arg2[%c0_2, %c0_3] : memref<16x64xbf16, #tpu.memory_space<vmem>>, vector<16x64xbf16>
    %3 = arith.truncf %1 : vector<64x256xf32> to vector<64x256xbf16>
    %cst = arith.constant dense<0.000000e+00> : vector<16x256xf32>
    %4 = tpu.matmul %2, %3, %cst {dimension_numbers = #tpu.dot_dimension_numbers<[1], [0], [0], [1], [0, 0, 1, 1], [], []>} : vector<16x64xbf16>, vector<64x256xbf16>, vector<16x256xf32> -> vector<16x256xf32>
    %cst_4 = arith.constant 0.000000e+00 : f32
    %5 = vector.broadcast %cst_4 : f32 to vector<16x256xf32>
    %6 = arith.maximumf %4, %5 : vector<16x256xf32>
    %c17_i32 = arith.constant 17 : i32
    %7 = tpu.dynamic_rotate %6 by %c17_i32 dim 1 : vector<16x256xf32>, i32 -> vector<16x256xf32>
    %c0_5 = arith.constant 0 : index
    %c0_6 = arith.constant 0 : index
    %8 = vector.load %arg5[%c0_5, %c0_6] : memref<9x256xf32, #tpu.memory_space<vmem>>, vector<1x256xf32>
    %9 = vector.broadcast %8 : vector<1x256xf32> to vector<16x256xf32>
    %10 = arith.mulf %7, %9 : vector<16x256xf32>
    %c16_i32 = arith.constant 16 : i32
    %11 = tpu.dynamic_rotate %6 by %c16_i32 dim 1 : vector<16x256xf32>, i32 -> vector<16x256xf32>
    %c1 = arith.constant 1 : index
    %c0_7 = arith.constant 0 : index
    %12 = vector.load %arg5[%c1, %c0_7] : memref<9x256xf32, #tpu.memory_space<vmem>>, vector<1x256xf32>
    %13 = vector.broadcast %12 : vector<1x256xf32> to vector<16x256xf32>
    %14 = arith.mulf %11, %13 : vector<16x256xf32>
    %c15_i32 = arith.constant 15 : i32
    %15 = tpu.dynamic_rotate %6 by %c15_i32 dim 1 : vector<16x256xf32>, i32 -> vector<16x256xf32>
    %c2 = arith.constant 2 : index
    %c0_8 = arith.constant 0 : index
    %16 = vector.load %arg5[%c2, %c0_8] : memref<9x256xf32, #tpu.memory_space<vmem>>, vector<1x256xf32>
    %17 = vector.broadcast %16 : vector<1x256xf32> to vector<16x256xf32>
    %18 = arith.mulf %15, %17 : vector<16x256xf32>
    %c1_i32 = arith.constant 1 : i32
    %19 = tpu.dynamic_rotate %6 by %c1_i32 dim 1 : vector<16x256xf32>, i32 -> vector<16x256xf32>
    %c3 = arith.constant 3 : index
    %c0_9 = arith.constant 0 : index
    %20 = vector.load %arg5[%c3, %c0_9] : memref<9x256xf32, #tpu.memory_space<vmem>>, vector<1x256xf32>
    %21 = vector.broadcast %20 : vector<1x256xf32> to vector<16x256xf32>
    %22 = arith.mulf %19, %21 : vector<16x256xf32>
    %c255_i32 = arith.constant 255 : i32
    %23 = tpu.dynamic_rotate %6 by %c255_i32 dim 1 : vector<16x256xf32>, i32 -> vector<16x256xf32>
    %c5 = arith.constant 5 : index
    %c0_10 = arith.constant 0 : index
    %24 = vector.load %arg5[%c5, %c0_10] : memref<9x256xf32, #tpu.memory_space<vmem>>, vector<1x256xf32>
    %25 = vector.broadcast %24 : vector<1x256xf32> to vector<16x256xf32>
    %26 = arith.mulf %23, %25 : vector<16x256xf32>
    %c241_i32 = arith.constant 241 : i32
    %27 = tpu.dynamic_rotate %6 by %c241_i32 dim 1 : vector<16x256xf32>, i32 -> vector<16x256xf32>
    %c6 = arith.constant 6 : index
    %c0_11 = arith.constant 0 : index
    %28 = vector.load %arg5[%c6, %c0_11] : memref<9x256xf32, #tpu.memory_space<vmem>>, vector<1x256xf32>
    %29 = vector.broadcast %28 : vector<1x256xf32> to vector<16x256xf32>
    %30 = arith.mulf %27, %29 : vector<16x256xf32>
    %c240_i32 = arith.constant 240 : i32
    %31 = tpu.dynamic_rotate %6 by %c240_i32 dim 1 : vector<16x256xf32>, i32 -> vector<16x256xf32>
    %c7 = arith.constant 7 : index
    %c0_12 = arith.constant 0 : index
    %32 = vector.load %arg5[%c7, %c0_12] : memref<9x256xf32, #tpu.memory_space<vmem>>, vector<1x256xf32>
    %33 = vector.broadcast %32 : vector<1x256xf32> to vector<16x256xf32>
    %34 = arith.mulf %31, %33 : vector<16x256xf32>
    %c239_i32 = arith.constant 239 : i32
    %35 = tpu.dynamic_rotate %6 by %c239_i32 dim 1 : vector<16x256xf32>, i32 -> vector<16x256xf32>
    %c8 = arith.constant 8 : index
    %c0_13 = arith.constant 0 : index
    %36 = vector.load %arg5[%c8, %c0_13] : memref<9x256xf32, #tpu.memory_space<vmem>>, vector<1x256xf32>
    %37 = vector.broadcast %36 : vector<1x256xf32> to vector<16x256xf32>
    %38 = arith.mulf %35, %37 : vector<16x256xf32>
    %39 = tpu.concatenate %10, %14, %18, %22, %6, %26, %30, %34, %38 in 0 : vector<16x256xf32>, vector<16x256xf32>, vector<16x256xf32>, vector<16x256xf32>, vector<16x256xf32>, vector<16x256xf32>, vector<16x256xf32>, vector<16x256xf32>, vector<16x256xf32> -> vector<144x256xf32>
    %40 = arith.truncf %39 : vector<144x256xf32> to vector<144x256xbf16>
    %c0_14 = arith.constant 0 : index
    %c0_15 = arith.constant 0 : index
    %41 = vector.load %arg3[%c0_14, %c0_15] : memref<16x144xbf16, #tpu.memory_space<vmem>>, vector<16x144xbf16>
    %cst_16 = arith.constant dense<0.000000e+00> : vector<16x256xf32>
    %42 = tpu.matmul %41, %40, %cst_16 {dimension_numbers = #tpu.dot_dimension_numbers<[1], [0], [0], [1], [0, 0, 1, 1], [], []>} : vector<16x144xbf16>, vector<144x256xbf16>, vector<16x256xf32> -> vector<16x256xf32>
    %cst_17 = arith.constant 0.000000e+00 : f32
    %43 = vector.broadcast %cst_17 : f32 to vector<16x256xf32>
    %44 = arith.maximumf %42, %43 : vector<16x256xf32>
    %c0_18 = arith.constant 0 : index
    %c0_19 = arith.constant 0 : index
    %45 = vector.load %arg4[%c0_18, %c0_19] : memref<64x16xbf16, #tpu.memory_space<vmem>>, vector<64x16xbf16>
    %46 = arith.truncf %44 : vector<16x256xf32> to vector<16x256xbf16>
    %cst_20 = arith.constant dense<0.000000e+00> : vector<64x256xf32>
    %47 = tpu.matmul %45, %46, %cst_20 {dimension_numbers = #tpu.dot_dimension_numbers<[1], [0], [0], [1], [0, 0, 1, 1], [], []>} : vector<64x16xbf16>, vector<16x256xbf16>, vector<64x256xf32> -> vector<64x256xf32>
    %48 = vector.extract_strided_slice %47 {offsets = [0, 0], sizes = [32, 256], strides = [1, 1]} : vector<64x256xf32> to vector<32x256xf32>
    %49 = vector.extract_strided_slice %47 {offsets = [32, 0], sizes = [32, 256], strides = [1, 1]} : vector<64x256xf32> to vector<32x256xf32>
    %50 = tpu.iota {dimensions = array<i32: 0>} : vector<32x1xi32>
    %c1_i32_21 = arith.constant 1 : i32
    %51 = vector.broadcast %c1_i32_21 : i32 to vector<32x1xi32>
    %52 = arith.andi %50, %51 : vector<32x1xi32>
    %c0_i32 = arith.constant 0 : i32
    %53 = vector.broadcast %c0_i32 : i32 to vector<32x1xi32>
    %54 = arith.cmpi eq, %52, %53 : vector<32x1xi32>
    %cst_22 = arith.constant 1.600000e+01 : f32
    %cst_23 = arith.constant 1.600000e+01 : f32
    %55 = vector.broadcast %cst_22 : f32 to vector<32x1xf32>
    %56 = vector.broadcast %cst_23 : f32 to vector<32x1xf32>
    %57 = arith.select %54, %55, %56 : vector<32x1xi1>, vector<32x1xf32>
    %c0_24 = arith.constant 0 : index
    %c0_25 = arith.constant 0 : index
    %58 = vector.load %arg6[%c0_24, %c0_25] : memref<32x256xf32, #tpu.memory_space<vmem>>, vector<32x256xf32>
    %59 = arith.subf %58, %48 : vector<32x256xf32>
    %cst_26 = arith.constant 1.000000e+00 : f32
    %60 = vector.broadcast %cst_26 : f32 to vector<32x256xf32>
    %61 = arith.addf %59, %60 : vector<32x256xf32>
    %62 = vector.broadcast %57 : vector<32x1xf32> to vector<32x256xf32>
    %63 = arith.mulf %61, %62 : vector<32x256xf32>
    %cst_27 = arith.constant 1.000000e+00 : f32
    %64 = vector.broadcast %cst_27 : f32 to vector<32x256xf32>
    %65 = arith.subf %63, %64 : vector<32x256xf32>
    %cst_28 = arith.constant 5.000000e-01 : f32
    %66 = vector.broadcast %cst_28 : f32 to vector<32x256xf32>
    %67 = arith.mulf %65, %66 : vector<32x256xf32>
    %c0_29 = arith.constant 0 : index
    %c0_30 = arith.constant 0 : index
    %68 = vector.load %arg10[%c0_29, %c0_30] : memref<32x256xf32, #tpu.memory_space<vmem>>, vector<32x256xf32>
    tpu.vector_store %arg10[%c0_29, %c0_30], %67 {strides = array<i32>} : memref<32x256xf32, #tpu.memory_space<vmem>>, vector<32x256xf32>,
    %69 = vector.extract_strided_slice %49 {offsets = [0, 0], sizes = [32, 16], strides = [1, 1]} : vector<32x256xf32> to vector<32x16xf32>
    %c0_31 = arith.constant 0 : index
    %c0_32 = arith.constant 0 : index
    %c0_33 = arith.constant 0 : index
    %70 = vector.load %arg11[%c0_31, %c0_32, %c0_33] : memref<16x32x16xf32, #tpu.memory_space<vmem>>, vector<1x32x16xf32>
    %71 = vector.shape_cast %70 : vector<1x32x16xf32> to vector<32x16xf32>
    %72 = vector.shape_cast %69 : vector<32x16xf32> to vector<1x32x16xf32>
    tpu.vector_store %arg11[%c0_31, %c0_32, %c0_33], %72 {strides = array<i32>} : memref<16x32x16xf32, #tpu.memory_space<vmem>>, vector<1x32x16xf32>,
    %73 = vector.extract_strided_slice %49 {offsets = [0, 16], sizes = [32, 16], strides = [1, 1]} : vector<32x256xf32> to vector<32x16xf32>
    %c1_34 = arith.constant 1 : index
    %c0_35 = arith.constant 0 : index
    %c0_36 = arith.constant 0 : index
    %74 = vector.load %arg11[%c1_34, %c0_35, %c0_36] : memref<16x32x16xf32, #tpu.memory_space<vmem>>, vector<1x32x16xf32>
    %75 = vector.shape_cast %74 : vector<1x32x16xf32> to vector<32x16xf32>
    %76 = vector.shape_cast %73 : vector<32x16xf32> to vector<1x32x16xf32>
    tpu.vector_store %arg11[%c1_34, %c0_35, %c0_36], %76 {strides = array<i32>} : memref<16x32x16xf32, #tpu.memory_space<vmem>>, vector<1x32x16xf32>,
    %77 = vector.extract_strided_slice %49 {offsets = [0, 32], sizes = [32, 16], strides = [1, 1]} : vector<32x256xf32> to vector<32x16xf32>
    %c2_37 = arith.constant 2 : index
    %c0_38 = arith.constant 0 : index
    %c0_39 = arith.constant 0 : index
    %78 = vector.load %arg11[%c2_37, %c0_38, %c0_39] : memref<16x32x16xf32, #tpu.memory_space<vmem>>, vector<1x32x16xf32>
    %79 = vector.shape_cast %78 : vector<1x32x16xf32> to vector<32x16xf32>
    %80 = vector.shape_cast %77 : vector<32x16xf32> to vector<1x32x16xf32>
    tpu.vector_store %arg11[%c2_37, %c0_38, %c0_39], %80 {strides = array<i32>} : memref<16x32x16xf32, #tpu.memory_space<vmem>>, vector<1x32x16xf32>,
    %81 = vector.extract_strided_slice %49 {offsets = [0, 48], sizes = [32, 16], strides = [1, 1]} : vector<32x256xf32> to vector<32x16xf32>
    %c3_40 = arith.constant 3 : index
    %c0_41 = arith.constant 0 : index
    %c0_42 = arith.constant 0 : index
    %82 = vector.load %arg11[%c3_40, %c0_41, %c0_42] : memref<16x32x16xf32, #tpu.memory_space<vmem>>, vector<1x32x16xf32>
    %83 = vector.shape_cast %82 : vector<1x32x16xf32> to vector<32x16xf32>
    %84 = vector.shape_cast %81 : vector<32x16xf32> to vector<1x32x16xf32>
    tpu.vector_store %arg11[%c3_40, %c0_41, %c0_42], %84 {strides = array<i32>} : memref<16x32x16xf32, #tpu.memory_space<vmem>>, vector<1x32x16xf32>,
    %85 = vector.extract_strided_slice %49 {offsets = [0, 64], sizes = [32, 16], strides = [1, 1]} : vector<32x256xf32> to vector<32x16xf32>
    %c4 = arith.constant 4 : index
    %c0_43 = arith.constant 0 : index
    %c0_44 = arith.constant 0 : index
    %86 = vector.load %arg11[%c4, %c0_43, %c0_44] : memref<16x32x16xf32, #tpu.memory_space<vmem>>, vector<1x32x16xf32>
    %87 = vector.shape_cast %86 : vector<1x32x16xf32> to vector<32x16xf32>
    %88 = vector.shape_cast %85 : vector<32x16xf32> to vector<1x32x16xf32>
    tpu.vector_store %arg11[%c4, %c0_43, %c0_44], %88 {strides = array<i32>} : memref<16x32x16xf32, #tpu.memory_space<vmem>>, vector<1x32x16xf32>,
    %89 = vector.extract_strided_slice %49 {offsets = [0, 80], sizes = [32, 16], strides = [1, 1]} : vector<32x256xf32> to vector<32x16xf32>
    %c5_45 = arith.constant 5 : index
    %c0_46 = arith.constant 0 : index
    %c0_47 = arith.constant 0 : index
    %90 = vector.load %arg11[%c5_45, %c0_46, %c0_47] : memref<16x32x16xf32, #tpu.memory_space<vmem>>, vector<1x32x16xf32>
    %91 = vector.shape_cast %90 : vector<1x32x16xf32> to vector<32x16xf32>
    %92 = vector.shape_cast %89 : vector<32x16xf32> to vector<1x32x16xf32>
    tpu.vector_store %arg11[%c5_45, %c0_46, %c0_47], %92 {strides = array<i32>} : memref<16x32x16xf32, #tpu.memory_space<vmem>>, vector<1x32x16xf32>,
    %93 = vector.extract_strided_slice %49 {offsets = [0, 96], sizes = [32, 16], strides = [1, 1]} : vector<32x256xf32> to vector<32x16xf32>
    %c6_48 = arith.constant 6 : index
    %c0_49 = arith.constant 0 : index
    %c0_50 = arith.constant 0 : index
    %94 = vector.load %arg11[%c6_48, %c0_49, %c0_50] : memref<16x32x16xf32, #tpu.memory_space<vmem>>, vector<1x32x16xf32>
    %95 = vector.shape_cast %94 : vector<1x32x16xf32> to vector<32x16xf32>
    %96 = vector.shape_cast %93 : vector<32x16xf32> to vector<1x32x16xf32>
    tpu.vector_store %arg11[%c6_48, %c0_49, %c0_50], %96 {strides = array<i32>} : memref<16x32x16xf32, #tpu.memory_space<vmem>>, vector<1x32x16xf32>,
    %97 = vector.extract_strided_slice %49 {offsets = [0, 112], sizes = [32, 16], strides = [1, 1]} : vector<32x256xf32> to vector<32x16xf32>
    %c7_51 = arith.constant 7 : index
    %c0_52 = arith.constant 0 : index
    %c0_53 = arith.constant 0 : index
    %98 = vector.load %arg11[%c7_51, %c0_52, %c0_53] : memref<16x32x16xf32, #tpu.memory_space<vmem>>, vector<1x32x16xf32>
    %99 = vector.shape_cast %98 : vector<1x32x16xf32> to vector<32x16xf32>
    %100 = vector.shape_cast %97 : vector<32x16xf32> to vector<1x32x16xf32>
    tpu.vector_store %arg11[%c7_51, %c0_52, %c0_53], %100 {strides = array<i32>} : memref<16x32x16xf32, #tpu.memory_space<vmem>>, vector<1x32x16xf32>,
    %101 = vector.extract_strided_slice %49 {offsets = [0, 128], sizes = [32, 16], strides = [1, 1]} : vector<32x256xf32> to vector<32x16xf32>
    %c8_54 = arith.constant 8 : index
    %c0_55 = arith.constant 0 : index
    %c0_56 = arith.constant 0 : index
    %102 = vector.load %arg11[%c8_54, %c0_55, %c0_56] : memref<16x32x16xf32, #tpu.memory_space<vmem>>, vector<1x32x16xf32>
    %103 = vector.shape_cast %102 : vector<1x32x16xf32> to vector<32x16xf32>
    %104 = vector.shape_cast %101 : vector<32x16xf32> to vector<1x32x16xf32>
    tpu.vector_store %arg11[%c8_54, %c0_55, %c0_56], %104 {strides = array<i32>} : memref<16x32x16xf32, #tpu.memory_space<vmem>>, vector<1x32x16xf32>,
    %105 = vector.extract_strided_slice %49 {offsets = [0, 144], sizes = [32, 16], strides = [1, 1]} : vector<32x256xf32> to vector<32x16xf32>
    %c9 = arith.constant 9 : index
    %c0_57 = arith.constant 0 : index
    %c0_58 = arith.constant 0 : index
    %106 = vector.load %arg11[%c9, %c0_57, %c0_58] : memref<16x32x16xf32, #tpu.memory_space<vmem>>, vector<1x32x16xf32>
    %107 = vector.shape_cast %106 : vector<1x32x16xf32> to vector<32x16xf32>
    %108 = vector.shape_cast %105 : vector<32x16xf32> to vector<1x32x16xf32>
    tpu.vector_store %arg11[%c9, %c0_57, %c0_58], %108 {strides = array<i32>} : memref<16x32x16xf32, #tpu.memory_space<vmem>>, vector<1x32x16xf32>,
    %109 = vector.extract_strided_slice %49 {offsets = [0, 160], sizes = [32, 16], strides = [1, 1]} : vector<32x256xf32> to vector<32x16xf32>
    %c10 = arith.constant 10 : index
    %c0_59 = arith.constant 0 : index
    %c0_60 = arith.constant 0 : index
    %110 = vector.load %arg11[%c10, %c0_59, %c0_60] : memref<16x32x16xf32, #tpu.memory_space<vmem>>, vector<1x32x16xf32>
    %111 = vector.shape_cast %110 : vector<1x32x16xf32> to vector<32x16xf32>
    %112 = vector.shape_cast %109 : vector<32x16xf32> to vector<1x32x16xf32>
    tpu.vector_store %arg11[%c10, %c0_59, %c0_60], %112 {strides = array<i32>} : memref<16x32x16xf32, #tpu.memory_space<vmem>>, vector<1x32x16xf32>,
    %113 = vector.extract_strided_slice %49 {offsets = [0, 176], sizes = [32, 16], strides = [1, 1]} : vector<32x256xf32> to vector<32x16xf32>
    %c11 = arith.constant 11 : index
    %c0_61 = arith.constant 0 : index
    %c0_62 = arith.constant 0 : index
    %114 = vector.load %arg11[%c11, %c0_61, %c0_62] : memref<16x32x16xf32, #tpu.memory_space<vmem>>, vector<1x32x16xf32>
    %115 = vector.shape_cast %114 : vector<1x32x16xf32> to vector<32x16xf32>
    %116 = vector.shape_cast %113 : vector<32x16xf32> to vector<1x32x16xf32>
    tpu.vector_store %arg11[%c11, %c0_61, %c0_62], %116 {strides = array<i32>} : memref<16x32x16xf32, #tpu.memory_space<vmem>>, vector<1x32x16xf32>,
    %117 = vector.extract_strided_slice %49 {offsets = [0, 192], sizes = [32, 16], strides = [1, 1]} : vector<32x256xf32> to vector<32x16xf32>
    %c12 = arith.constant 12 : index
    %c0_63 = arith.constant 0 : index
    %c0_64 = arith.constant 0 : index
    %118 = vector.load %arg11[%c12, %c0_63, %c0_64] : memref<16x32x16xf32, #tpu.memory_space<vmem>>, vector<1x32x16xf32>
    %119 = vector.shape_cast %118 : vector<1x32x16xf32> to vector<32x16xf32>
    %120 = vector.shape_cast %117 : vector<32x16xf32> to vector<1x32x16xf32>
    tpu.vector_store %arg11[%c12, %c0_63, %c0_64], %120 {strides = array<i32>} : memref<16x32x16xf32, #tpu.memory_space<vmem>>, vector<1x32x16xf32>,
    %121 = vector.extract_strided_slice %49 {offsets = [0, 208], sizes = [32, 16], strides = [1, 1]} : vector<32x256xf32> to vector<32x16xf32>
    %c13 = arith.constant 13 : index
    %c0_65 = arith.constant 0 : index
    %c0_66 = arith.constant 0 : index
    %122 = vector.load %arg11[%c13, %c0_65, %c0_66] : memref<16x32x16xf32, #tpu.memory_space<vmem>>, vector<1x32x16xf32>
    %123 = vector.shape_cast %122 : vector<1x32x16xf32> to vector<32x16xf32>
    %124 = vector.shape_cast %121 : vector<32x16xf32> to vector<1x32x16xf32>
    tpu.vector_store %arg11[%c13, %c0_65, %c0_66], %124 {strides = array<i32>} : memref<16x32x16xf32, #tpu.memory_space<vmem>>, vector<1x32x16xf32>,
    %125 = vector.extract_strided_slice %49 {offsets = [0, 224], sizes = [32, 16], strides = [1, 1]} : vector<32x256xf32> to vector<32x16xf32>
    %c14 = arith.constant 14 : index
    %c0_67 = arith.constant 0 : index
    %c0_68 = arith.constant 0 : index
    %126 = vector.load %arg11[%c14, %c0_67, %c0_68] : memref<16x32x16xf32, #tpu.memory_space<vmem>>, vector<1x32x16xf32>
    %127 = vector.shape_cast %126 : vector<1x32x16xf32> to vector<32x16xf32>
    %128 = vector.shape_cast %125 : vector<32x16xf32> to vector<1x32x16xf32>
    tpu.vector_store %arg11[%c14, %c0_67, %c0_68], %128 {strides = array<i32>} : memref<16x32x16xf32, #tpu.memory_space<vmem>>, vector<1x32x16xf32>,
    %129 = vector.extract_strided_slice %49 {offsets = [0, 240], sizes = [32, 16], strides = [1, 1]} : vector<32x256xf32> to vector<32x16xf32>
    %c15 = arith.constant 15 : index
    %c0_69 = arith.constant 0 : index
    %c0_70 = arith.constant 0 : index
    %130 = vector.load %arg11[%c15, %c0_69, %c0_70] : memref<16x32x16xf32, #tpu.memory_space<vmem>>, vector<1x32x16xf32>
    %131 = vector.shape_cast %130 : vector<1x32x16xf32> to vector<32x16xf32>
    %132 = vector.shape_cast %129 : vector<32x16xf32> to vector<1x32x16xf32>
    tpu.vector_store %arg11[%c15, %c0_69, %c0_70], %132 {strides = array<i32>} : memref<16x32x16xf32, #tpu.memory_space<vmem>>, vector<1x32x16xf32>,
    %133 = tpu.iota {dimensions = array<i32: 0>} : vector<16x256xi32>
    %134 = arith.sitofp %133 : vector<16x256xi32> to vector<16x256xf32>
    %135 = tpu.iota {dimensions = array<i32: 0>} : vector<16x256xi32>
    %136 = arith.sitofp %135 : vector<16x256xi32> to vector<16x256xf32>
    %c0_71 = arith.constant 0 : index
    %c0_72 = arith.constant 0 : index
    %137 = vector.load %arg10[%c0_71, %c0_72] : memref<32x256xf32, #tpu.memory_space<vmem>>, vector<1x256xf32>
    %c1_73 = arith.constant 1 : index
    %c0_74 = arith.constant 0 : index
    %138 = vector.load %arg10[%c1_73, %c0_74] : memref<32x256xf32, #tpu.memory_space<vmem>>, vector<1x256xf32>
    %139 = vector.broadcast %137 : vector<1x256xf32> to vector<16x256xf32>
    %140 = arith.subf %134, %139 : vector<16x256xf32>
    %141 = math.absf %140 : vector<16x256xf32>
    %cst_75 = arith.constant 1.000000e+00 : f32
    %142 = vector.broadcast %cst_75 : f32 to vector<16x256xf32>
    %143 = arith.subf %142, %141 : vector<16x256xf32>
    %cst_76 = arith.constant 0.000000e+00 : f32
    %144 = vector.broadcast %cst_76 : f32 to vector<16x256xf32>
    %145 = arith.maximumf %143, %144 : vector<16x256xf32>
    %146 = vector.broadcast %138 : vector<1x256xf32> to vector<16x256xf32>
    %147 = arith.subf %136, %146 : vector<16x256xf32>
    %148 = math.absf %147 : vector<16x256xf32>
    %cst_77 = arith.constant 1.000000e+00 : f32
    %149 = vector.broadcast %cst_77 : f32 to vector<16x256xf32>
    %150 = arith.subf %149, %148 : vector<16x256xf32>
    %cst_78 = arith.constant 0.000000e+00 : f32
    %151 = vector.broadcast %cst_78 : f32 to vector<16x256xf32>
    %152 = arith.maximumf %150, %151 : vector<16x256xf32>
    %cst_79 = arith.constant dense<0.000000e+00> : vector<16x16xf32>
    %153 = tpu.matmul %152, %145, %cst_79 {dimension_numbers = #tpu.dot_dimension_numbers<[1], [1], [0], [0], [0, 0, 1, 0], [], []>} : vector<16x256xf32>, vector<16x256xf32>, vector<16x16xf32> -> vector<16x16xf32>
    %c0_80 = arith.constant 0 : index
    %c0_81 = arith.constant 0 : index
    %c0_82 = arith.constant 0 : index
    %154 = vector.load %arg11[%c0_80, %c0_81, %c0_82] : memref<16x32x16xf32, #tpu.memory_space<vmem>>, vector<16x1x16xf32>
    %155 = vector.shape_cast %154 : vector<16x1x16xf32> to vector<16x16xf32>
    %156 = arith.mulf %155, %153 : vector<16x16xf32>
    %cst_83 = arith.constant dense<0.000000e+00> : vector<16xf32>
    %157 = vector.multi_reduction <add>, %156, %cst_83 [1] : vector<16x16xf32> to vector<16xf32>
    %158 = vector.shape_cast %157 : vector<16xf32> to vector<16x1xf32>
    %cst_84 = arith.constant dense<0.000000e+00> : vector<1xf32>
    %159 = vector.multi_reduction <add>, %158, %cst_84 [0] : vector<16x1xf32> to vector<1xf32>
    %160 = vector.shape_cast %159 : vector<1xf32> to vector<1x1xf32>
    %c0_85 = arith.constant 0 : index
    %c1_86 = arith.constant 1 : index
    %c0_87 = arith.constant 0 : index
    %161 = vector.load %arg11[%c0_85, %c1_86, %c0_87] : memref<16x32x16xf32, #tpu.memory_space<vmem>>, vector<16x1x16xf32>
    %162 = vector.shape_cast %161 : vector<16x1x16xf32> to vector<16x16xf32>
    %163 = arith.mulf %162, %153 : vector<16x16xf32>
    %cst_88 = arith.constant dense<0.000000e+00> : vector<16xf32>
    %164 = vector.multi_reduction <add>, %163, %cst_88 [1] : vector<16x16xf32> to vector<16xf32>
    %165 = vector.shape_cast %164 : vector<16xf32> to vector<16x1xf32>
    %cst_89 = arith.constant dense<0.000000e+00> : vector<1xf32>
    %166 = vector.multi_reduction <add>, %165, %cst_89 [0] : vector<16x1xf32> to vector<1xf32>
    %167 = vector.shape_cast %166 : vector<1xf32> to vector<1x1xf32>
    %c2_90 = arith.constant 2 : index
    %c0_91 = arith.constant 0 : index
    %168 = vector.load %arg10[%c2_90, %c0_91] : memref<32x256xf32, #tpu.memory_space<vmem>>, vector<1x256xf32>
    %c3_92 = arith.constant 3 : index
    %c0_93 = arith.constant 0 : index
    %169 = vector.load %arg10[%c3_92, %c0_93] : memref<32x256xf32, #tpu.memory_space<vmem>>, vector<1x256xf32>
    %170 = vector.broadcast %168 : vector<1x256xf32> to vector<16x256xf32>
    %171 = arith.subf %134, %170 : vector<16x256xf32>
    %172 = math.absf %171 : vector<16x256xf32>
    %cst_94 = arith.constant 1.000000e+00 : f32
    %173 = vector.broadcast %cst_94 : f32 to vector<16x256xf32>
    %174 = arith.subf %173, %172 : vector<16x256xf32>
    %cst_95 = arith.constant 0.000000e+00 : f32
    %175 = vector.broadcast %cst_95 : f32 to vector<16x256xf32>
    %176 = arith.maximumf %174, %175 : vector<16x256xf32>
    %177 = vector.broadcast %169 : vector<1x256xf32> to vector<16x256xf32>
    %178 = arith.subf %136, %177 : vector<16x256xf32>
    %179 = math.absf %178 : vector<16x256xf32>
    %cst_96 = arith.constant 1.000000e+00 : f32
    %180 = vector.broadcast %cst_96 : f32 to vector<16x256xf32>
    %181 = arith.subf %180, %179 : vector<16x256xf32>
    %cst_97 = arith.constant 0.000000e+00 : f32
    %182 = vector.broadcast %cst_97 : f32 to vector<16x256xf32>
    %183 = arith.maximumf %181, %182 : vector<16x256xf32>
    %cst_98 = arith.constant dense<0.000000e+00> : vector<16x16xf32>
    %184 = tpu.matmul %183, %176, %cst_98 {dimension_numbers = #tpu.dot_dimension_numbers<[1], [1], [0], [0], [0, 0, 1, 0], [], []>} : vector<16x256xf32>, vector<16x256xf32>, vector<16x16xf32> -> vector<16x16xf32>
    %c0_99 = arith.constant 0 : index
    %c2_100 = arith.constant 2 : index
    %c0_101 = arith.constant 0 : index
    %185 = vector.load %arg11[%c0_99, %c2_100, %c0_101] : memref<16x32x16xf32, #tpu.memory_space<vmem>>, vector<16x1x16xf32>
    %186 = vector.shape_cast %185 : vector<16x1x16xf32> to vector<16x16xf32>
    %187 = arith.mulf %186, %184 : vector<16x16xf32>
    %cst_102 = arith.constant dense<0.000000e+00> : vector<16xf32>
    %188 = vector.multi_reduction <add>, %187, %cst_102 [1] : vector<16x16xf32> to vector<16xf32>
    %189 = vector.shape_cast %188 : vector<16xf32> to vector<16x1xf32>
    %cst_103 = arith.constant dense<0.000000e+00> : vector<1xf32>
    %190 = vector.multi_reduction <add>, %189, %cst_103 [0] : vector<16x1xf32> to vector<1xf32>
    %191 = vector.shape_cast %190 : vector<1xf32> to vector<1x1xf32>
    %c0_104 = arith.constant 0 : index
    %c3_105 = arith.constant 3 : index
    %c0_106 = arith.constant 0 : index
    %192 = vector.load %arg11[%c0_104, %c3_105, %c0_106] : memref<16x32x16xf32, #tpu.memory_space<vmem>>, vector<16x1x16xf32>
    %193 = vector.shape_cast %192 : vector<16x1x16xf32> to vector<16x16xf32>
    %194 = arith.mulf %193, %184 : vector<16x16xf32>
    %cst_107 = arith.constant dense<0.000000e+00> : vector<16xf32>
    %195 = vector.multi_reduction <add>, %194, %cst_107 [1] : vector<16x16xf32> to vector<16xf32>
    %196 = vector.shape_cast %195 : vector<16xf32> to vector<16x1xf32>
    %cst_108 = arith.constant dense<0.000000e+00> : vector<1xf32>
    %197 = vector.multi_reduction <add>, %196, %cst_108 [0] : vector<16x1xf32> to vector<1xf32>
    %198 = vector.shape_cast %197 : vector<1xf32> to vector<1x1xf32>
    %c4_109 = arith.constant 4 : index
    %c0_110 = arith.constant 0 : index
    %199 = vector.load %arg10[%c4_109, %c0_110] : memref<32x256xf32, #tpu.memory_space<vmem>>, vector<1x256xf32>
    %c5_111 = arith.constant 5 : index
    %c0_112 = arith.constant 0 : index
    %200 = vector.load %arg10[%c5_111, %c0_112] : memref<32x256xf32, #tpu.memory_space<vmem>>, vector<1x256xf32>
    %201 = vector.broadcast %199 : vector<1x256xf32> to vector<16x256xf32>
    %202 = arith.subf %134, %201 : vector<16x256xf32>
    %203 = math.absf %202 : vector<16x256xf32>
    %cst_113 = arith.constant 1.000000e+00 : f32
    %204 = vector.broadcast %cst_113 : f32 to vector<16x256xf32>
    %205 = arith.subf %204, %203 : vector<16x256xf32>
    %cst_114 = arith.constant 0.000000e+00 : f32
    %206 = vector.broadcast %cst_114 : f32 to vector<16x256xf32>
    %207 = arith.maximumf %205, %206 : vector<16x256xf32>
    %208 = vector.broadcast %200 : vector<1x256xf32> to vector<16x256xf32>
    %209 = arith.subf %136, %208 : vector<16x256xf32>
    %210 = math.absf %209 : vector<16x256xf32>
    %cst_115 = arith.constant 1.000000e+00 : f32
    %211 = vector.broadcast %cst_115 : f32 to vector<16x256xf32>
    %212 = arith.subf %211, %210 : vector<16x256xf32>
    %cst_116 = arith.constant 0.000000e+00 : f32
    %213 = vector.broadcast %cst_116 : f32 to vector<16x256xf32>
    %214 = arith.maximumf %212, %213 : vector<16x256xf32>
    %cst_117 = arith.constant dense<0.000000e+00> : vector<16x16xf32>
    %215 = tpu.matmul %214, %207, %cst_117 {dimension_numbers = #tpu.dot_dimension_numbers<[1], [1], [0], [0], [0, 0, 1, 0], [], []>} : vector<16x256xf32>, vector<16x256xf32>, vector<16x16xf32> -> vector<16x16xf32>
    %c0_118 = arith.constant 0 : index
    %c4_119 = arith.constant 4 : index
    %c0_120 = arith.constant 0 : index
    %216 = vector.load %arg11[%c0_118, %c4_119, %c0_120] : memref<16x32x16xf32, #tpu.memory_space<vmem>>, vector<16x1x16xf32>
    %217 = vector.shape_cast %216 : vector<16x1x16xf32> to vector<16x16xf32>
    %218 = arith.mulf %217, %215 : vector<16x16xf32>
    %cst_121 = arith.constant dense<0.000000e+00> : vector<16xf32>
    %219 = vector.multi_reduction <add>, %218, %cst_121 [1] : vector<16x16xf32> to vector<16xf32>
    %220 = vector.shape_cast %219 : vector<16xf32> to vector<16x1xf32>
    %cst_122 = arith.constant dense<0.000000e+00> : vector<1xf32>
    %221 = vector.multi_reduction <add>, %220, %cst_122 [0] : vector<16x1xf32> to vector<1xf32>
    %222 = vector.shape_cast %221 : vector<1xf32> to vector<1x1xf32>
    %c0_123 = arith.constant 0 : index
    %c5_124 = arith.constant 5 : index
    %c0_125 = arith.constant 0 : index
    %223 = vector.load %arg11[%c0_123, %c5_124, %c0_125] : memref<16x32x16xf32, #tpu.memory_space<vmem>>, vector<16x1x16xf32>
    %224 = vector.shape_cast %223 : vector<16x1x16xf32> to vector<16x16xf32>
    %225 = arith.mulf %224, %215 : vector<16x16xf32>
    %cst_126 = arith.constant dense<0.000000e+00> : vector<16xf32>
    %226 = vector.multi_reduction <add>, %225, %cst_126 [1] : vector<16x16xf32> to vector<16xf32>
    %227 = vector.shape_cast %226 : vector<16xf32> to vector<16x1xf32>
    %cst_127 = arith.constant dense<0.000000e+00> : vector<1xf32>
    %228 = vector.multi_reduction <add>, %227, %cst_127 [0] : vector<16x1xf32> to vector<1xf32>
    %229 = vector.shape_cast %228 : vector<1xf32> to vector<1x1xf32>
    %c6_128 = arith.constant 6 : index
    %c0_129 = arith.constant 0 : index
    %230 = vector.load %arg10[%c6_128, %c0_129] : memref<32x256xf32, #tpu.memory_space<vmem>>, vector<1x256xf32>
    %c7_130 = arith.constant 7 : index
    %c0_131 = arith.constant 0 : index
    %231 = vector.load %arg10[%c7_130, %c0_131] : memref<32x256xf32, #tpu.memory_space<vmem>>, vector<1x256xf32>
    %232 = vector.broadcast %230 : vector<1x256xf32> to vector<16x256xf32>
    %233 = arith.subf %134, %232 : vector<16x256xf32>
    %234 = math.absf %233 : vector<16x256xf32>
    %cst_132 = arith.constant 1.000000e+00 : f32
    %235 = vector.broadcast %cst_132 : f32 to vector<16x256xf32>
    %236 = arith.subf %235, %234 : vector<16x256xf32>
    %cst_133 = arith.constant 0.000000e+00 : f32
    %237 = vector.broadcast %cst_133 : f32 to vector<16x256xf32>
    %238 = arith.maximumf %236, %237 : vector<16x256xf32>
    %239 = vector.broadcast %231 : vector<1x256xf32> to vector<16x256xf32>
    %240 = arith.subf %136, %239 : vector<16x256xf32>
    %241 = math.absf %240 : vector<16x256xf32>
    %cst_134 = arith.constant 1.000000e+00 : f32
    %242 = vector.broadcast %cst_134 : f32 to vector<16x256xf32>
    %243 = arith.subf %242, %241 : vector<16x256xf32>
    %cst_135 = arith.constant 0.000000e+00 : f32
    %244 = vector.broadcast %cst_135 : f32 to vector<16x256xf32>
    %245 = arith.maximumf %243, %244 : vector<16x256xf32>
    %cst_136 = arith.constant dense<0.000000e+00> : vector<16x16xf32>
    %246 = tpu.matmul %245, %238, %cst_136 {dimension_numbers = #tpu.dot_dimension_numbers<[1], [1], [0], [0], [0, 0, 1, 0], [], []>} : vector<16x256xf32>, vector<16x256xf32>, vector<16x16xf32> -> vector<16x16xf32>
    %c0_137 = arith.constant 0 : index
    %c6_138 = arith.constant 6 : index
    %c0_139 = arith.constant 0 : index
    %247 = vector.load %arg11[%c0_137, %c6_138, %c0_139] : memref<16x32x16xf32, #tpu.memory_space<vmem>>, vector<16x1x16xf32>
    %248 = vector.shape_cast %247 : vector<16x1x16xf32> to vector<16x16xf32>
    %249 = arith.mulf %248, %246 : vector<16x16xf32>
    %cst_140 = arith.constant dense<0.000000e+00> : vector<16xf32>
    %250 = vector.multi_reduction <add>, %249, %cst_140 [1] : vector<16x16xf32> to vector<16xf32>
    %251 = vector.shape_cast %250 : vector<16xf32> to vector<16x1xf32>
    %cst_141 = arith.constant dense<0.000000e+00> : vector<1xf32>
    %252 = vector.multi_reduction <add>, %251, %cst_141 [0] : vector<16x1xf32> to vector<1xf32>
    %253 = vector.shape_cast %252 : vector<1xf32> to vector<1x1xf32>
    %c0_142 = arith.constant 0 : index
    %c7_143 = arith.constant 7 : index
    %c0_144 = arith.constant 0 : index
    %254 = vector.load %arg11[%c0_142, %c7_143, %c0_144] : memref<16x32x16xf32, #tpu.memory_space<vmem>>, vector<16x1x16xf32>
    %255 = vector.shape_cast %254 : vector<16x1x16xf32> to vector<16x16xf32>
    %256 = arith.mulf %255, %246 : vector<16x16xf32>
    %cst_145 = arith.constant dense<0.000000e+00> : vector<16xf32>
    %257 = vector.multi_reduction <add>, %256, %cst_145 [1] : vector<16x16xf32> to vector<16xf32>
    %258 = vector.shape_cast %257 : vector<16xf32> to vector<16x1xf32>
    %cst_146 = arith.constant dense<0.000000e+00> : vector<1xf32>
    %259 = vector.multi_reduction <add>, %258, %cst_146 [0] : vector<16x1xf32> to vector<1xf32>
    %260 = vector.shape_cast %259 : vector<1xf32> to vector<1x1xf32>
    %c8_147 = arith.constant 8 : index
    %c0_148 = arith.constant 0 : index
    %261 = vector.load %arg10[%c8_147, %c0_148] : memref<32x256xf32, #tpu.memory_space<vmem>>, vector<1x256xf32>
    %c9_149 = arith.constant 9 : index
    %c0_150 = arith.constant 0 : index
    %262 = vector.load %arg10[%c9_149, %c0_150] : memref<32x256xf32, #tpu.memory_space<vmem>>, vector<1x256xf32>
    %263 = vector.broadcast %261 : vector<1x256xf32> to vector<16x256xf32>
    %264 = arith.subf %134, %263 : vector<16x256xf32>
    %265 = math.absf %264 : vector<16x256xf32>
    %cst_151 = arith.constant 1.000000e+00 : f32
    %266 = vector.broadcast %cst_151 : f32 to vector<16x256xf32>
    %267 = arith.subf %266, %265 : vector<16x256xf32>
    %cst_152 = arith.constant 0.000000e+00 : f32
    %268 = vector.broadcast %cst_152 : f32 to vector<16x256xf32>
    %269 = arith.maximumf %267, %268 : vector<16x256xf32>
    %270 = vector.broadcast %262 : vector<1x256xf32> to vector<16x256xf32>
    %271 = arith.subf %136, %270 : vector<16x256xf32>
    %272 = math.absf %271 : vector<16x256xf32>
    %cst_153 = arith.constant 1.000000e+00 : f32
    %273 = vector.broadcast %cst_153 : f32 to vector<16x256xf32>
    %274 = arith.subf %273, %272 : vector<16x256xf32>
    %cst_154 = arith.constant 0.000000e+00 : f32
    %275 = vector.broadcast %cst_154 : f32 to vector<16x256xf32>
    %276 = arith.maximumf %274, %275 : vector<16x256xf32>
    %cst_155 = arith.constant dense<0.000000e+00> : vector<16x16xf32>
    %277 = tpu.matmul %276, %269, %cst_155 {dimension_numbers = #tpu.dot_dimension_numbers<[1], [1], [0], [0], [0, 0, 1, 0], [], []>} : vector<16x256xf32>, vector<16x256xf32>, vector<16x16xf32> -> vector<16x16xf32>
    %c0_156 = arith.constant 0 : index
    %c8_157 = arith.constant 8 : index
    %c0_158 = arith.constant 0 : index
    %278 = vector.load %arg11[%c0_156, %c8_157, %c0_158] : memref<16x32x16xf32, #tpu.memory_space<vmem>>, vector<16x1x16xf32>
    %279 = vector.shape_cast %278 : vector<16x1x16xf32> to vector<16x16xf32>
    %280 = arith.mulf %279, %277 : vector<16x16xf32>
    %cst_159 = arith.constant dense<0.000000e+00> : vector<16xf32>
    %281 = vector.multi_reduction <add>, %280, %cst_159 [1] : vector<16x16xf32> to vector<16xf32>
    %282 = vector.shape_cast %281 : vector<16xf32> to vector<16x1xf32>
    %cst_160 = arith.constant dense<0.000000e+00> : vector<1xf32>
    %283 = vector.multi_reduction <add>, %282, %cst_160 [0] : vector<16x1xf32> to vector<1xf32>
    %284 = vector.shape_cast %283 : vector<1xf32> to vector<1x1xf32>
    %c0_161 = arith.constant 0 : index
    %c9_162 = arith.constant 9 : index
    %c0_163 = arith.constant 0 : index
    %285 = vector.load %arg11[%c0_161, %c9_162, %c0_163] : memref<16x32x16xf32, #tpu.memory_space<vmem>>, vector<16x1x16xf32>
    %286 = vector.shape_cast %285 : vector<16x1x16xf32> to vector<16x16xf32>
    %287 = arith.mulf %286, %277 : vector<16x16xf32>
    %cst_164 = arith.constant dense<0.000000e+00> : vector<16xf32>
    %288 = vector.multi_reduction <add>, %287, %cst_164 [1] : vector<16x16xf32> to vector<16xf32>
    %289 = vector.shape_cast %288 : vector<16xf32> to vector<16x1xf32>
    %cst_165 = arith.constant dense<0.000000e+00> : vector<1xf32>
    %290 = vector.multi_reduction <add>, %289, %cst_165 [0] : vector<16x1xf32> to vector<1xf32>
    %291 = vector.shape_cast %290 : vector<1xf32> to vector<1x1xf32>
    %c10_166 = arith.constant 10 : index
    %c0_167 = arith.constant 0 : index
    %292 = vector.load %arg10[%c10_166, %c0_167] : memref<32x256xf32, #tpu.memory_space<vmem>>, vector<1x256xf32>
    %c11_168 = arith.constant 11 : index
    %c0_169 = arith.constant 0 : index
    %293 = vector.load %arg10[%c11_168, %c0_169] : memref<32x256xf32, #tpu.memory_space<vmem>>, vector<1x256xf32>
    %294 = vector.broadcast %292 : vector<1x256xf32> to vector<16x256xf32>
    %295 = arith.subf %134, %294 : vector<16x256xf32>
    %296 = math.absf %295 : vector<16x256xf32>
    %cst_170 = arith.constant 1.000000e+00 : f32
    %297 = vector.broadcast %cst_170 : f32 to vector<16x256xf32>
    %298 = arith.subf %297, %296 : vector<16x256xf32>
    %cst_171 = arith.constant 0.000000e+00 : f32
    %299 = vector.broadcast %cst_171 : f32 to vector<16x256xf32>
    %300 = arith.maximumf %298, %299 : vector<16x256xf32>
    %301 = vector.broadcast %293 : vector<1x256xf32> to vector<16x256xf32>
    %302 = arith.subf %136, %301 : vector<16x256xf32>
    %303 = math.absf %302 : vector<16x256xf32>
    %cst_172 = arith.constant 1.000000e+00 : f32
    %304 = vector.broadcast %cst_172 : f32 to vector<16x256xf32>
    %305 = arith.subf %304, %303 : vector<16x256xf32>
    %cst_173 = arith.constant 0.000000e+00 : f32
    %306 = vector.broadcast %cst_173 : f32 to vector<16x256xf32>
    %307 = arith.maximumf %305, %306 : vector<16x256xf32>
    %cst_174 = arith.constant dense<0.000000e+00> : vector<16x16xf32>
    %308 = tpu.matmul %307, %300, %cst_174 {dimension_numbers = #tpu.dot_dimension_numbers<[1], [1], [0], [0], [0, 0, 1, 0], [], []>} : vector<16x256xf32>, vector<16x256xf32>, vector<16x16xf32> -> vector<16x16xf32>
    %c0_175 = arith.constant 0 : index
    %c10_176 = arith.constant 10 : index
    %c0_177 = arith.constant 0 : index
    %309 = vector.load %arg11[%c0_175, %c10_176, %c0_177] : memref<16x32x16xf32, #tpu.memory_space<vmem>>, vector<16x1x16xf32>
    %310 = vector.shape_cast %309 : vector<16x1x16xf32> to vector<16x16xf32>
    %311 = arith.mulf %310, %308 : vector<16x16xf32>
    %cst_178 = arith.constant dense<0.000000e+00> : vector<16xf32>
    %312 = vector.multi_reduction <add>, %311, %cst_178 [1] : vector<16x16xf32> to vector<16xf32>
    %313 = vector.shape_cast %312 : vector<16xf32> to vector<16x1xf32>
    %cst_179 = arith.constant dense<0.000000e+00> : vector<1xf32>
    %314 = vector.multi_reduction <add>, %313, %cst_179 [0] : vector<16x1xf32> to vector<1xf32>
    %315 = vector.shape_cast %314 : vector<1xf32> to vector<1x1xf32>
    %c0_180 = arith.constant 0 : index
    %c11_181 = arith.constant 11 : index
    %c0_182 = arith.constant 0 : index
    %316 = vector.load %arg11[%c0_180, %c11_181, %c0_182] : memref<16x32x16xf32, #tpu.memory_space<vmem>>, vector<16x1x16xf32>
    %317 = vector.shape_cast %316 : vector<16x1x16xf32> to vector<16x16xf32>
    %318 = arith.mulf %317, %308 : vector<16x16xf32>
    %cst_183 = arith.constant dense<0.000000e+00> : vector<16xf32>
    %319 = vector.multi_reduction <add>, %318, %cst_183 [1] : vector<16x16xf32> to vector<16xf32>
    %320 = vector.shape_cast %319 : vector<16xf32> to vector<16x1xf32>
    %cst_184 = arith.constant dense<0.000000e+00> : vector<1xf32>
    %321 = vector.multi_reduction <add>, %320, %cst_184 [0] : vector<16x1xf32> to vector<1xf32>
    %322 = vector.shape_cast %321 : vector<1xf32> to vector<1x1xf32>
    %c12_185 = arith.constant 12 : index
    %c0_186 = arith.constant 0 : index
    %323 = vector.load %arg10[%c12_185, %c0_186] : memref<32x256xf32, #tpu.memory_space<vmem>>, vector<1x256xf32>
    %c13_187 = arith.constant 13 : index
    %c0_188 = arith.constant 0 : index
    %324 = vector.load %arg10[%c13_187, %c0_188] : memref<32x256xf32, #tpu.memory_space<vmem>>, vector<1x256xf32>
    %325 = vector.broadcast %323 : vector<1x256xf32> to vector<16x256xf32>
    %326 = arith.subf %134, %325 : vector<16x256xf32>
    %327 = math.absf %326 : vector<16x256xf32>
    %cst_189 = arith.constant 1.000000e+00 : f32
    %328 = vector.broadcast %cst_189 : f32 to vector<16x256xf32>
    %329 = arith.subf %328, %327 : vector<16x256xf32>
    %cst_190 = arith.constant 0.000000e+00 : f32
    %330 = vector.broadcast %cst_190 : f32 to vector<16x256xf32>
    %331 = arith.maximumf %329, %330 : vector<16x256xf32>
    %332 = vector.broadcast %324 : vector<1x256xf32> to vector<16x256xf32>
    %333 = arith.subf %136, %332 : vector<16x256xf32>
    %334 = math.absf %333 : vector<16x256xf32>
    %cst_191 = arith.constant 1.000000e+00 : f32
    %335 = vector.broadcast %cst_191 : f32 to vector<16x256xf32>
    %336 = arith.subf %335, %334 : vector<16x256xf32>
    %cst_192 = arith.constant 0.000000e+00 : f32
    %337 = vector.broadcast %cst_192 : f32 to vector<16x256xf32>
    %338 = arith.maximumf %336, %337 : vector<16x256xf32>
    %cst_193 = arith.constant dense<0.000000e+00> : vector<16x16xf32>
    %339 = tpu.matmul %338, %331, %cst_193 {dimension_numbers = #tpu.dot_dimension_numbers<[1], [1], [0], [0], [0, 0, 1, 0], [], []>} : vector<16x256xf32>, vector<16x256xf32>, vector<16x16xf32> -> vector<16x16xf32>
    %c0_194 = arith.constant 0 : index
    %c12_195 = arith.constant 12 : index
    %c0_196 = arith.constant 0 : index
    %340 = vector.load %arg11[%c0_194, %c12_195, %c0_196] : memref<16x32x16xf32, #tpu.memory_space<vmem>>, vector<16x1x16xf32>
    %341 = vector.shape_cast %340 : vector<16x1x16xf32> to vector<16x16xf32>
    %342 = arith.mulf %341, %339 : vector<16x16xf32>
    %cst_197 = arith.constant dense<0.000000e+00> : vector<16xf32>
    %343 = vector.multi_reduction <add>, %342, %cst_197 [1] : vector<16x16xf32> to vector<16xf32>
    %344 = vector.shape_cast %343 : vector<16xf32> to vector<16x1xf32>
    %cst_198 = arith.constant dense<0.000000e+00> : vector<1xf32>
    %345 = vector.multi_reduction <add>, %344, %cst_198 [0] : vector<16x1xf32> to vector<1xf32>
    %346 = vector.shape_cast %345 : vector<1xf32> to vector<1x1xf32>
    %c0_199 = arith.constant 0 : index
    %c13_200 = arith.constant 13 : index
    %c0_201 = arith.constant 0 : index
    %347 = vector.load %arg11[%c0_199, %c13_200, %c0_201] : memref<16x32x16xf32, #tpu.memory_space<vmem>>, vector<16x1x16xf32>
    %348 = vector.shape_cast %347 : vector<16x1x16xf32> to vector<16x16xf32>
    %349 = arith.mulf %348, %339 : vector<16x16xf32>
    %cst_202 = arith.constant dense<0.000000e+00> : vector<16xf32>
    %350 = vector.multi_reduction <add>, %349, %cst_202 [1] : vector<16x16xf32> to vector<16xf32>
    %351 = vector.shape_cast %350 : vector<16xf32> to vector<16x1xf32>
    %cst_203 = arith.constant dense<0.000000e+00> : vector<1xf32>
    %352 = vector.multi_reduction <add>, %351, %cst_203 [0] : vector<16x1xf32> to vector<1xf32>
    %353 = vector.shape_cast %352 : vector<1xf32> to vector<1x1xf32>
    %c14_204 = arith.constant 14 : index
    %c0_205 = arith.constant 0 : index
    %354 = vector.load %arg10[%c14_204, %c0_205] : memref<32x256xf32, #tpu.memory_space<vmem>>, vector<1x256xf32>
    %c15_206 = arith.constant 15 : index
    %c0_207 = arith.constant 0 : index
    %355 = vector.load %arg10[%c15_206, %c0_207] : memref<32x256xf32, #tpu.memory_space<vmem>>, vector<1x256xf32>
    %356 = vector.broadcast %354 : vector<1x256xf32> to vector<16x256xf32>
    %357 = arith.subf %134, %356 : vector<16x256xf32>
    %358 = math.absf %357 : vector<16x256xf32>
    %cst_208 = arith.constant 1.000000e+00 : f32
    %359 = vector.broadcast %cst_208 : f32 to vector<16x256xf32>
    %360 = arith.subf %359, %358 : vector<16x256xf32>
    %cst_209 = arith.constant 0.000000e+00 : f32
    %361 = vector.broadcast %cst_209 : f32 to vector<16x256xf32>
    %362 = arith.maximumf %360, %361 : vector<16x256xf32>
    %363 = vector.broadcast %355 : vector<1x256xf32> to vector<16x256xf32>
    %364 = arith.subf %136, %363 : vector<16x256xf32>
    %365 = math.absf %364 : vector<16x256xf32>
    %cst_210 = arith.constant 1.000000e+00 : f32
    %366 = vector.broadcast %cst_210 : f32 to vector<16x256xf32>
    %367 = arith.subf %366, %365 : vector<16x256xf32>
    %cst_211 = arith.constant 0.000000e+00 : f32
    %368 = vector.broadcast %cst_211 : f32 to vector<16x256xf32>
    %369 = arith.maximumf %367, %368 : vector<16x256xf32>
    %cst_212 = arith.constant dense<0.000000e+00> : vector<16x16xf32>
    %370 = tpu.matmul %369, %362, %cst_212 {dimension_numbers = #tpu.dot_dimension_numbers<[1], [1], [0], [0], [0, 0, 1, 0], [], []>} : vector<16x256xf32>, vector<16x256xf32>, vector<16x16xf32> -> vector<16x16xf32>
    %c0_213 = arith.constant 0 : index
    %c14_214 = arith.constant 14 : index
    %c0_215 = arith.constant 0 : index
    %371 = vector.load %arg11[%c0_213, %c14_214, %c0_215] : memref<16x32x16xf32, #tpu.memory_space<vmem>>, vector<16x1x16xf32>
    %372 = vector.shape_cast %371 : vector<16x1x16xf32> to vector<16x16xf32>
    %373 = arith.mulf %372, %370 : vector<16x16xf32>
    %cst_216 = arith.constant dense<0.000000e+00> : vector<16xf32>
    %374 = vector.multi_reduction <add>, %373, %cst_216 [1] : vector<16x16xf32> to vector<16xf32>
    %375 = vector.shape_cast %374 : vector<16xf32> to vector<16x1xf32>
    %cst_217 = arith.constant dense<0.000000e+00> : vector<1xf32>
    %376 = vector.multi_reduction <add>, %375, %cst_217 [0] : vector<16x1xf32> to vector<1xf32>
    %377 = vector.shape_cast %376 : vector<1xf32> to vector<1x1xf32>
    %c0_218 = arith.constant 0 : index
    %c15_219 = arith.constant 15 : index
    %c0_220 = arith.constant 0 : index
    %378 = vector.load %arg11[%c0_218, %c15_219, %c0_220] : memref<16x32x16xf32, #tpu.memory_space<vmem>>, vector<16x1x16xf32>
    %379 = vector.shape_cast %378 : vector<16x1x16xf32> to vector<16x16xf32>
    %380 = arith.mulf %379, %370 : vector<16x16xf32>
    %cst_221 = arith.constant dense<0.000000e+00> : vector<16xf32>
    %381 = vector.multi_reduction <add>, %380, %cst_221 [1] : vector<16x16xf32> to vector<16xf32>
    %382 = vector.shape_cast %381 : vector<16xf32> to vector<16x1xf32>
    %cst_222 = arith.constant dense<0.000000e+00> : vector<1xf32>
    %383 = vector.multi_reduction <add>, %382, %cst_222 [0] : vector<16x1xf32> to vector<1xf32>
    %384 = vector.shape_cast %383 : vector<1xf32> to vector<1x1xf32>
    %c16 = arith.constant 16 : index
    %c0_223 = arith.constant 0 : index
    %385 = vector.load %arg10[%c16, %c0_223] : memref<32x256xf32, #tpu.memory_space<vmem>>, vector<1x256xf32>
    %c17 = arith.constant 17 : index
    %c0_224 = arith.constant 0 : index
    %386 = vector.load %arg10[%c17, %c0_224] : memref<32x256xf32, #tpu.memory_space<vmem>>, vector<1x256xf32>
    %387 = vector.broadcast %385 : vector<1x256xf32> to vector<16x256xf32>
    %388 = arith.subf %134, %387 : vector<16x256xf32>
    %389 = math.absf %388 : vector<16x256xf32>
    %cst_225 = arith.constant 1.000000e+00 : f32
    %390 = vector.broadcast %cst_225 : f32 to vector<16x256xf32>
    %391 = arith.subf %390, %389 : vector<16x256xf32>
    %cst_226 = arith.constant 0.000000e+00 : f32
    %392 = vector.broadcast %cst_226 : f32 to vector<16x256xf32>
    %393 = arith.maximumf %391, %392 : vector<16x256xf32>
    %394 = vector.broadcast %386 : vector<1x256xf32> to vector<16x256xf32>
    %395 = arith.subf %136, %394 : vector<16x256xf32>
    %396 = math.absf %395 : vector<16x256xf32>
    %cst_227 = arith.constant 1.000000e+00 : f32
    %397 = vector.broadcast %cst_227 : f32 to vector<16x256xf32>
    %398 = arith.subf %397, %396 : vector<16x256xf32>
    %cst_228 = arith.constant 0.000000e+00 : f32
    %399 = vector.broadcast %cst_228 : f32 to vector<16x256xf32>
    %400 = arith.maximumf %398, %399 : vector<16x256xf32>
    %cst_229 = arith.constant dense<0.000000e+00> : vector<16x16xf32>
    %401 = tpu.matmul %400, %393, %cst_229 {dimension_numbers = #tpu.dot_dimension_numbers<[1], [1], [0], [0], [0, 0, 1, 0], [], []>} : vector<16x256xf32>, vector<16x256xf32>, vector<16x16xf32> -> vector<16x16xf32>
    %c0_230 = arith.constant 0 : index
    %c16_231 = arith.constant 16 : index
    %c0_232 = arith.constant 0 : index
    %402 = vector.load %arg11[%c0_230, %c16_231, %c0_232] : memref<16x32x16xf32, #tpu.memory_space<vmem>>, vector<16x1x16xf32>
    %403 = vector.shape_cast %402 : vector<16x1x16xf32> to vector<16x16xf32>
    %404 = arith.mulf %403, %401 : vector<16x16xf32>
    %cst_233 = arith.constant dense<0.000000e+00> : vector<16xf32>
    %405 = vector.multi_reduction <add>, %404, %cst_233 [1] : vector<16x16xf32> to vector<16xf32>
    %406 = vector.shape_cast %405 : vector<16xf32> to vector<16x1xf32>
    %cst_234 = arith.constant dense<0.000000e+00> : vector<1xf32>
    %407 = vector.multi_reduction <add>, %406, %cst_234 [0] : vector<16x1xf32> to vector<1xf32>
    %408 = vector.shape_cast %407 : vector<1xf32> to vector<1x1xf32>
    %c0_235 = arith.constant 0 : index
    %c17_236 = arith.constant 17 : index
    %c0_237 = arith.constant 0 : index
    %409 = vector.load %arg11[%c0_235, %c17_236, %c0_237] : memref<16x32x16xf32, #tpu.memory_space<vmem>>, vector<16x1x16xf32>
    %410 = vector.shape_cast %409 : vector<16x1x16xf32> to vector<16x16xf32>
    %411 = arith.mulf %410, %401 : vector<16x16xf32>
    %cst_238 = arith.constant dense<0.000000e+00> : vector<16xf32>
    %412 = vector.multi_reduction <add>, %411, %cst_238 [1] : vector<16x16xf32> to vector<16xf32>
    %413 = vector.shape_cast %412 : vector<16xf32> to vector<16x1xf32>
    %cst_239 = arith.constant dense<0.000000e+00> : vector<1xf32>
    %414 = vector.multi_reduction <add>, %413, %cst_239 [0] : vector<16x1xf32> to vector<1xf32>
    %415 = vector.shape_cast %414 : vector<1xf32> to vector<1x1xf32>
    %c18 = arith.constant 18 : index
    %c0_240 = arith.constant 0 : index
    %416 = vector.load %arg10[%c18, %c0_240] : memref<32x256xf32, #tpu.memory_space<vmem>>, vector<1x256xf32>
    %c19 = arith.constant 19 : index
    %c0_241 = arith.constant 0 : index
    %417 = vector.load %arg10[%c19, %c0_241] : memref<32x256xf32, #tpu.memory_space<vmem>>, vector<1x256xf32>
    %418 = vector.broadcast %416 : vector<1x256xf32> to vector<16x256xf32>
    %419 = arith.subf %134, %418 : vector<16x256xf32>
    %420 = math.absf %419 : vector<16x256xf32>
    %cst_242 = arith.constant 1.000000e+00 : f32
    %421 = vector.broadcast %cst_242 : f32 to vector<16x256xf32>
    %422 = arith.subf %421, %420 : vector<16x256xf32>
    %cst_243 = arith.constant 0.000000e+00 : f32
    %423 = vector.broadcast %cst_243 : f32 to vector<16x256xf32>
    %424 = arith.maximumf %422, %423 : vector<16x256xf32>
    %425 = vector.broadcast %417 : vector<1x256xf32> to vector<16x256xf32>
    %426 = arith.subf %136, %425 : vector<16x256xf32>
    %427 = math.absf %426 : vector<16x256xf32>
    %cst_244 = arith.constant 1.000000e+00 : f32
    %428 = vector.broadcast %cst_244 : f32 to vector<16x256xf32>
    %429 = arith.subf %428, %427 : vector<16x256xf32>
    %cst_245 = arith.constant 0.000000e+00 : f32
    %430 = vector.broadcast %cst_245 : f32 to vector<16x256xf32>
    %431 = arith.maximumf %429, %430 : vector<16x256xf32>
    %cst_246 = arith.constant dense<0.000000e+00> : vector<16x16xf32>
    %432 = tpu.matmul %431, %424, %cst_246 {dimension_numbers = #tpu.dot_dimension_numbers<[1], [1], [0], [0], [0, 0, 1, 0], [], []>} : vector<16x256xf32>, vector<16x256xf32>, vector<16x16xf32> -> vector<16x16xf32>
    %c0_247 = arith.constant 0 : index
    %c18_248 = arith.constant 18 : index
    %c0_249 = arith.constant 0 : index
    %433 = vector.load %arg11[%c0_247, %c18_248, %c0_249] : memref<16x32x16xf32, #tpu.memory_space<vmem>>, vector<16x1x16xf32>
    %434 = vector.shape_cast %433 : vector<16x1x16xf32> to vector<16x16xf32>
    %435 = arith.mulf %434, %432 : vector<16x16xf32>
    %cst_250 = arith.constant dense<0.000000e+00> : vector<16xf32>
    %436 = vector.multi_reduction <add>, %435, %cst_250 [1] : vector<16x16xf32> to vector<16xf32>
    %437 = vector.shape_cast %436 : vector<16xf32> to vector<16x1xf32>
    %cst_251 = arith.constant dense<0.000000e+00> : vector<1xf32>
    %438 = vector.multi_reduction <add>, %437, %cst_251 [0] : vector<16x1xf32> to vector<1xf32>
    %439 = vector.shape_cast %438 : vector<1xf32> to vector<1x1xf32>
    %c0_252 = arith.constant 0 : index
    %c19_253 = arith.constant 19 : index
    %c0_254 = arith.constant 0 : index
    %440 = vector.load %arg11[%c0_252, %c19_253, %c0_254] : memref<16x32x16xf32, #tpu.memory_space<vmem>>, vector<16x1x16xf32>
    %441 = vector.shape_cast %440 : vector<16x1x16xf32> to vector<16x16xf32>
    %442 = arith.mulf %441, %432 : vector<16x16xf32>
    %cst_255 = arith.constant dense<0.000000e+00> : vector<16xf32>
    %443 = vector.multi_reduction <add>, %442, %cst_255 [1] : vector<16x16xf32> to vector<16xf32>
    %444 = vector.shape_cast %443 : vector<16xf32> to vector<16x1xf32>
    %cst_256 = arith.constant dense<0.000000e+00> : vector<1xf32>
    %445 = vector.multi_reduction <add>, %444, %cst_256 [0] : vector<16x1xf32> to vector<1xf32>
    %446 = vector.shape_cast %445 : vector<1xf32> to vector<1x1xf32>
    %c20 = arith.constant 20 : index
    %c0_257 = arith.constant 0 : index
    %447 = vector.load %arg10[%c20, %c0_257] : memref<32x256xf32, #tpu.memory_space<vmem>>, vector<1x256xf32>
    %c21 = arith.constant 21 : index
    %c0_258 = arith.constant 0 : index
    %448 = vector.load %arg10[%c21, %c0_258] : memref<32x256xf32, #tpu.memory_space<vmem>>, vector<1x256xf32>
    %449 = vector.broadcast %447 : vector<1x256xf32> to vector<16x256xf32>
    %450 = arith.subf %134, %449 : vector<16x256xf32>
    %451 = math.absf %450 : vector<16x256xf32>
    %cst_259 = arith.constant 1.000000e+00 : f32
    %452 = vector.broadcast %cst_259 : f32 to vector<16x256xf32>
    %453 = arith.subf %452, %451 : vector<16x256xf32>
    %cst_260 = arith.constant 0.000000e+00 : f32
    %454 = vector.broadcast %cst_260 : f32 to vector<16x256xf32>
    %455 = arith.maximumf %453, %454 : vector<16x256xf32>
    %456 = vector.broadcast %448 : vector<1x256xf32> to vector<16x256xf32>
    %457 = arith.subf %136, %456 : vector<16x256xf32>
    %458 = math.absf %457 : vector<16x256xf32>
    %cst_261 = arith.constant 1.000000e+00 : f32
    %459 = vector.broadcast %cst_261 : f32 to vector<16x256xf32>
    %460 = arith.subf %459, %458 : vector<16x256xf32>
    %cst_262 = arith.constant 0.000000e+00 : f32
    %461 = vector.broadcast %cst_262 : f32 to vector<16x256xf32>
    %462 = arith.maximumf %460, %461 : vector<16x256xf32>
    %cst_263 = arith.constant dense<0.000000e+00> : vector<16x16xf32>
    %463 = tpu.matmul %462, %455, %cst_263 {dimension_numbers = #tpu.dot_dimension_numbers<[1], [1], [0], [0], [0, 0, 1, 0], [], []>} : vector<16x256xf32>, vector<16x256xf32>, vector<16x16xf32> -> vector<16x16xf32>
    %c0_264 = arith.constant 0 : index
    %c20_265 = arith.constant 20 : index
    %c0_266 = arith.constant 0 : index
    %464 = vector.load %arg11[%c0_264, %c20_265, %c0_266] : memref<16x32x16xf32, #tpu.memory_space<vmem>>, vector<16x1x16xf32>
    %465 = vector.shape_cast %464 : vector<16x1x16xf32> to vector<16x16xf32>
    %466 = arith.mulf %465, %463 : vector<16x16xf32>
    %cst_267 = arith.constant dense<0.000000e+00> : vector<16xf32>
    %467 = vector.multi_reduction <add>, %466, %cst_267 [1] : vector<16x16xf32> to vector<16xf32>
    %468 = vector.shape_cast %467 : vector<16xf32> to vector<16x1xf32>
    %cst_268 = arith.constant dense<0.000000e+00> : vector<1xf32>
    %469 = vector.multi_reduction <add>, %468, %cst_268 [0] : vector<16x1xf32> to vector<1xf32>
    %470 = vector.shape_cast %469 : vector<1xf32> to vector<1x1xf32>
    %c0_269 = arith.constant 0 : index
    %c21_270 = arith.constant 21 : index
    %c0_271 = arith.constant 0 : index
    %471 = vector.load %arg11[%c0_269, %c21_270, %c0_271] : memref<16x32x16xf32, #tpu.memory_space<vmem>>, vector<16x1x16xf32>
    %472 = vector.shape_cast %471 : vector<16x1x16xf32> to vector<16x16xf32>
    %473 = arith.mulf %472, %463 : vector<16x16xf32>
    %cst_272 = arith.constant dense<0.000000e+00> : vector<16xf32>
    %474 = vector.multi_reduction <add>, %473, %cst_272 [1] : vector<16x16xf32> to vector<16xf32>
    %475 = vector.shape_cast %474 : vector<16xf32> to vector<16x1xf32>
    %cst_273 = arith.constant dense<0.000000e+00> : vector<1xf32>
    %476 = vector.multi_reduction <add>, %475, %cst_273 [0] : vector<16x1xf32> to vector<1xf32>
    %477 = vector.shape_cast %476 : vector<1xf32> to vector<1x1xf32>
    %c22 = arith.constant 22 : index
    %c0_274 = arith.constant 0 : index
    %478 = vector.load %arg10[%c22, %c0_274] : memref<32x256xf32, #tpu.memory_space<vmem>>, vector<1x256xf32>
    %c23 = arith.constant 23 : index
    %c0_275 = arith.constant 0 : index
    %479 = vector.load %arg10[%c23, %c0_275] : memref<32x256xf32, #tpu.memory_space<vmem>>, vector<1x256xf32>
    %480 = vector.broadcast %478 : vector<1x256xf32> to vector<16x256xf32>
    %481 = arith.subf %134, %480 : vector<16x256xf32>
    %482 = math.absf %481 : vector<16x256xf32>
    %cst_276 = arith.constant 1.000000e+00 : f32
    %483 = vector.broadcast %cst_276 : f32 to vector<16x256xf32>
    %484 = arith.subf %483, %482 : vector<16x256xf32>
    %cst_277 = arith.constant 0.000000e+00 : f32
    %485 = vector.broadcast %cst_277 : f32 to vector<16x256xf32>
    %486 = arith.maximumf %484, %485 : vector<16x256xf32>
    %487 = vector.broadcast %479 : vector<1x256xf32> to vector<16x256xf32>
    %488 = arith.subf %136, %487 : vector<16x256xf32>
    %489 = math.absf %488 : vector<16x256xf32>
    %cst_278 = arith.constant 1.000000e+00 : f32
    %490 = vector.broadcast %cst_278 : f32 to vector<16x256xf32>
    %491 = arith.subf %490, %489 : vector<16x256xf32>
    %cst_279 = arith.constant 0.000000e+00 : f32
    %492 = vector.broadcast %cst_279 : f32 to vector<16x256xf32>
    %493 = arith.maximumf %491, %492 : vector<16x256xf32>
    %cst_280 = arith.constant dense<0.000000e+00> : vector<16x16xf32>
    %494 = tpu.matmul %493, %486, %cst_280 {dimension_numbers = #tpu.dot_dimension_numbers<[1], [1], [0], [0], [0, 0, 1, 0], [], []>} : vector<16x256xf32>, vector<16x256xf32>, vector<16x16xf32> -> vector<16x16xf32>
    %c0_281 = arith.constant 0 : index
    %c22_282 = arith.constant 22 : index
    %c0_283 = arith.constant 0 : index
    %495 = vector.load %arg11[%c0_281, %c22_282, %c0_283] : memref<16x32x16xf32, #tpu.memory_space<vmem>>, vector<16x1x16xf32>
    %496 = vector.shape_cast %495 : vector<16x1x16xf32> to vector<16x16xf32>
    %497 = arith.mulf %496, %494 : vector<16x16xf32>
    %cst_284 = arith.constant dense<0.000000e+00> : vector<16xf32>
    %498 = vector.multi_reduction <add>, %497, %cst_284 [1] : vector<16x16xf32> to vector<16xf32>
    %499 = vector.shape_cast %498 : vector<16xf32> to vector<16x1xf32>
    %cst_285 = arith.constant dense<0.000000e+00> : vector<1xf32>
    %500 = vector.multi_reduction <add>, %499, %cst_285 [0] : vector<16x1xf32> to vector<1xf32>
    %501 = vector.shape_cast %500 : vector<1xf32> to vector<1x1xf32>
    %c0_286 = arith.constant 0 : index
    %c23_287 = arith.constant 23 : index
    %c0_288 = arith.constant 0 : index
    %502 = vector.load %arg11[%c0_286, %c23_287, %c0_288] : memref<16x32x16xf32, #tpu.memory_space<vmem>>, vector<16x1x16xf32>
    %503 = vector.shape_cast %502 : vector<16x1x16xf32> to vector<16x16xf32>
    %504 = arith.mulf %503, %494 : vector<16x16xf32>
    %cst_289 = arith.constant dense<0.000000e+00> : vector<16xf32>
    %505 = vector.multi_reduction <add>, %504, %cst_289 [1] : vector<16x16xf32> to vector<16xf32>
    %506 = vector.shape_cast %505 : vector<16xf32> to vector<16x1xf32>
    %cst_290 = arith.constant dense<0.000000e+00> : vector<1xf32>
    %507 = vector.multi_reduction <add>, %506, %cst_290 [0] : vector<16x1xf32> to vector<1xf32>
    %508 = vector.shape_cast %507 : vector<1xf32> to vector<1x1xf32>
    %c24 = arith.constant 24 : index
    %c0_291 = arith.constant 0 : index
    %509 = vector.load %arg10[%c24, %c0_291] : memref<32x256xf32, #tpu.memory_space<vmem>>, vector<1x256xf32>
    %c25 = arith.constant 25 : index
    %c0_292 = arith.constant 0 : index
    %510 = vector.load %arg10[%c25, %c0_292] : memref<32x256xf32, #tpu.memory_space<vmem>>, vector<1x256xf32>
    %511 = vector.broadcast %509 : vector<1x256xf32> to vector<16x256xf32>
    %512 = arith.subf %134, %511 : vector<16x256xf32>
    %513 = math.absf %512 : vector<16x256xf32>
    %cst_293 = arith.constant 1.000000e+00 : f32
    %514 = vector.broadcast %cst_293 : f32 to vector<16x256xf32>
    %515 = arith.subf %514, %513 : vector<16x256xf32>
    %cst_294 = arith.constant 0.000000e+00 : f32
    %516 = vector.broadcast %cst_294 : f32 to vector<16x256xf32>
    %517 = arith.maximumf %515, %516 : vector<16x256xf32>
    %518 = vector.broadcast %510 : vector<1x256xf32> to vector<16x256xf32>
    %519 = arith.subf %136, %518 : vector<16x256xf32>
    %520 = math.absf %519 : vector<16x256xf32>
    %cst_295 = arith.constant 1.000000e+00 : f32
    %521 = vector.broadcast %cst_295 : f32 to vector<16x256xf32>
    %522 = arith.subf %521, %520 : vector<16x256xf32>
    %cst_296 = arith.constant 0.000000e+00 : f32
    %523 = vector.broadcast %cst_296 : f32 to vector<16x256xf32>
    %524 = arith.maximumf %522, %523 : vector<16x256xf32>
    %cst_297 = arith.constant dense<0.000000e+00> : vector<16x16xf32>
    %525 = tpu.matmul %524, %517, %cst_297 {dimension_numbers = #tpu.dot_dimension_numbers<[1], [1], [0], [0], [0, 0, 1, 0], [], []>} : vector<16x256xf32>, vector<16x256xf32>, vector<16x16xf32> -> vector<16x16xf32>
    %c0_298 = arith.constant 0 : index
    %c24_299 = arith.constant 24 : index
    %c0_300 = arith.constant 0 : index
    %526 = vector.load %arg11[%c0_298, %c24_299, %c0_300] : memref<16x32x16xf32, #tpu.memory_space<vmem>>, vector<16x1x16xf32>
    %527 = vector.shape_cast %526 : vector<16x1x16xf32> to vector<16x16xf32>
    %528 = arith.mulf %527, %525 : vector<16x16xf32>
    %cst_301 = arith.constant dense<0.000000e+00> : vector<16xf32>
    %529 = vector.multi_reduction <add>, %528, %cst_301 [1] : vector<16x16xf32> to vector<16xf32>
    %530 = vector.shape_cast %529 : vector<16xf32> to vector<16x1xf32>
    %cst_302 = arith.constant dense<0.000000e+00> : vector<1xf32>
    %531 = vector.multi_reduction <add>, %530, %cst_302 [0] : vector<16x1xf32> to vector<1xf32>
    %532 = vector.shape_cast %531 : vector<1xf32> to vector<1x1xf32>
    %c0_303 = arith.constant 0 : index
    %c25_304 = arith.constant 25 : index
    %c0_305 = arith.constant 0 : index
    %533 = vector.load %arg11[%c0_303, %c25_304, %c0_305] : memref<16x32x16xf32, #tpu.memory_space<vmem>>, vector<16x1x16xf32>
    %534 = vector.shape_cast %533 : vector<16x1x16xf32> to vector<16x16xf32>
    %535 = arith.mulf %534, %525 : vector<16x16xf32>
    %cst_306 = arith.constant dense<0.000000e+00> : vector<16xf32>
    %536 = vector.multi_reduction <add>, %535, %cst_306 [1] : vector<16x16xf32> to vector<16xf32>
    %537 = vector.shape_cast %536 : vector<16xf32> to vector<16x1xf32>
    %cst_307 = arith.constant dense<0.000000e+00> : vector<1xf32>
    %538 = vector.multi_reduction <add>, %537, %cst_307 [0] : vector<16x1xf32> to vector<1xf32>
    %539 = vector.shape_cast %538 : vector<1xf32> to vector<1x1xf32>
    %c26 = arith.constant 26 : index
    %c0_308 = arith.constant 0 : index
    %540 = vector.load %arg10[%c26, %c0_308] : memref<32x256xf32, #tpu.memory_space<vmem>>, vector<1x256xf32>
    %c27 = arith.constant 27 : index
    %c0_309 = arith.constant 0 : index
    %541 = vector.load %arg10[%c27, %c0_309] : memref<32x256xf32, #tpu.memory_space<vmem>>, vector<1x256xf32>
    %542 = vector.broadcast %540 : vector<1x256xf32> to vector<16x256xf32>
    %543 = arith.subf %134, %542 : vector<16x256xf32>
    %544 = math.absf %543 : vector<16x256xf32>
    %cst_310 = arith.constant 1.000000e+00 : f32
    %545 = vector.broadcast %cst_310 : f32 to vector<16x256xf32>
    %546 = arith.subf %545, %544 : vector<16x256xf32>
    %cst_311 = arith.constant 0.000000e+00 : f32
    %547 = vector.broadcast %cst_311 : f32 to vector<16x256xf32>
    %548 = arith.maximumf %546, %547 : vector<16x256xf32>
    %549 = vector.broadcast %541 : vector<1x256xf32> to vector<16x256xf32>
    %550 = arith.subf %136, %549 : vector<16x256xf32>
    %551 = math.absf %550 : vector<16x256xf32>
    %cst_312 = arith.constant 1.000000e+00 : f32
    %552 = vector.broadcast %cst_312 : f32 to vector<16x256xf32>
    %553 = arith.subf %552, %551 : vector<16x256xf32>
    %cst_313 = arith.constant 0.000000e+00 : f32
    %554 = vector.broadcast %cst_313 : f32 to vector<16x256xf32>
    %555 = arith.maximumf %553, %554 : vector<16x256xf32>
    %cst_314 = arith.constant dense<0.000000e+00> : vector<16x16xf32>
    %556 = tpu.matmul %555, %548, %cst_314 {dimension_numbers = #tpu.dot_dimension_numbers<[1], [1], [0], [0], [0, 0, 1, 0], [], []>} : vector<16x256xf32>, vector<16x256xf32>, vector<16x16xf32> -> vector<16x16xf32>
    %c0_315 = arith.constant 0 : index
    %c26_316 = arith.constant 26 : index
    %c0_317 = arith.constant 0 : index
    %557 = vector.load %arg11[%c0_315, %c26_316, %c0_317] : memref<16x32x16xf32, #tpu.memory_space<vmem>>, vector<16x1x16xf32>
    %558 = vector.shape_cast %557 : vector<16x1x16xf32> to vector<16x16xf32>
    %559 = arith.mulf %558, %556 : vector<16x16xf32>
    %cst_318 = arith.constant dense<0.000000e+00> : vector<16xf32>
    %560 = vector.multi_reduction <add>, %559, %cst_318 [1] : vector<16x16xf32> to vector<16xf32>
    %561 = vector.shape_cast %560 : vector<16xf32> to vector<16x1xf32>
    %cst_319 = arith.constant dense<0.000000e+00> : vector<1xf32>
    %562 = vector.multi_reduction <add>, %561, %cst_319 [0] : vector<16x1xf32> to vector<1xf32>
    %563 = vector.shape_cast %562 : vector<1xf32> to vector<1x1xf32>
    %c0_320 = arith.constant 0 : index
    %c27_321 = arith.constant 27 : index
    %c0_322 = arith.constant 0 : index
    %564 = vector.load %arg11[%c0_320, %c27_321, %c0_322] : memref<16x32x16xf32, #tpu.memory_space<vmem>>, vector<16x1x16xf32>
    %565 = vector.shape_cast %564 : vector<16x1x16xf32> to vector<16x16xf32>
    %566 = arith.mulf %565, %556 : vector<16x16xf32>
    %cst_323 = arith.constant dense<0.000000e+00> : vector<16xf32>
    %567 = vector.multi_reduction <add>, %566, %cst_323 [1] : vector<16x16xf32> to vector<16xf32>
    %568 = vector.shape_cast %567 : vector<16xf32> to vector<16x1xf32>
    %cst_324 = arith.constant dense<0.000000e+00> : vector<1xf32>
    %569 = vector.multi_reduction <add>, %568, %cst_324 [0] : vector<16x1xf32> to vector<1xf32>
    %570 = vector.shape_cast %569 : vector<1xf32> to vector<1x1xf32>
    %c28 = arith.constant 28 : index
    %c0_325 = arith.constant 0 : index
    %571 = vector.load %arg10[%c28, %c0_325] : memref<32x256xf32, #tpu.memory_space<vmem>>, vector<1x256xf32>
    %c29 = arith.constant 29 : index
    %c0_326 = arith.constant 0 : index
    %572 = vector.load %arg10[%c29, %c0_326] : memref<32x256xf32, #tpu.memory_space<vmem>>, vector<1x256xf32>
    %573 = vector.broadcast %571 : vector<1x256xf32> to vector<16x256xf32>
    %574 = arith.subf %134, %573 : vector<16x256xf32>
    %575 = math.absf %574 : vector<16x256xf32>
    %cst_327 = arith.constant 1.000000e+00 : f32
    %576 = vector.broadcast %cst_327 : f32 to vector<16x256xf32>
    %577 = arith.subf %576, %575 : vector<16x256xf32>
    %cst_328 = arith.constant 0.000000e+00 : f32
    %578 = vector.broadcast %cst_328 : f32 to vector<16x256xf32>
    %579 = arith.maximumf %577, %578 : vector<16x256xf32>
    %580 = vector.broadcast %572 : vector<1x256xf32> to vector<16x256xf32>
    %581 = arith.subf %136, %580 : vector<16x256xf32>
    %582 = math.absf %581 : vector<16x256xf32>
    %cst_329 = arith.constant 1.000000e+00 : f32
    %583 = vector.broadcast %cst_329 : f32 to vector<16x256xf32>
    %584 = arith.subf %583, %582 : vector<16x256xf32>
    %cst_330 = arith.constant 0.000000e+00 : f32
    %585 = vector.broadcast %cst_330 : f32 to vector<16x256xf32>
    %586 = arith.maximumf %584, %585 : vector<16x256xf32>
    %cst_331 = arith.constant dense<0.000000e+00> : vector<16x16xf32>
    %587 = tpu.matmul %586, %579, %cst_331 {dimension_numbers = #tpu.dot_dimension_numbers<[1], [1], [0], [0], [0, 0, 1, 0], [], []>} : vector<16x256xf32>, vector<16x256xf32>, vector<16x16xf32> -> vector<16x16xf32>
    %c0_332 = arith.constant 0 : index
    %c28_333 = arith.constant 28 : index
    %c0_334 = arith.constant 0 : index
    %588 = vector.load %arg11[%c0_332, %c28_333, %c0_334] : memref<16x32x16xf32, #tpu.memory_space<vmem>>, vector<16x1x16xf32>
    %589 = vector.shape_cast %588 : vector<16x1x16xf32> to vector<16x16xf32>
    %590 = arith.mulf %589, %587 : vector<16x16xf32>
    %cst_335 = arith.constant dense<0.000000e+00> : vector<16xf32>
    %591 = vector.multi_reduction <add>, %590, %cst_335 [1] : vector<16x16xf32> to vector<16xf32>
    %592 = vector.shape_cast %591 : vector<16xf32> to vector<16x1xf32>
    %cst_336 = arith.constant dense<0.000000e+00> : vector<1xf32>
    %593 = vector.multi_reduction <add>, %592, %cst_336 [0] : vector<16x1xf32> to vector<1xf32>
    %594 = vector.shape_cast %593 : vector<1xf32> to vector<1x1xf32>
    %c0_337 = arith.constant 0 : index
    %c29_338 = arith.constant 29 : index
    %c0_339 = arith.constant 0 : index
    %595 = vector.load %arg11[%c0_337, %c29_338, %c0_339] : memref<16x32x16xf32, #tpu.memory_space<vmem>>, vector<16x1x16xf32>
    %596 = vector.shape_cast %595 : vector<16x1x16xf32> to vector<16x16xf32>
    %597 = arith.mulf %596, %587 : vector<16x16xf32>
    %cst_340 = arith.constant dense<0.000000e+00> : vector<16xf32>
    %598 = vector.multi_reduction <add>, %597, %cst_340 [1] : vector<16x16xf32> to vector<16xf32>
    %599 = vector.shape_cast %598 : vector<16xf32> to vector<16x1xf32>
    %cst_341 = arith.constant dense<0.000000e+00> : vector<1xf32>
    %600 = vector.multi_reduction <add>, %599, %cst_341 [0] : vector<16x1xf32> to vector<1xf32>
    %601 = vector.shape_cast %600 : vector<1xf32> to vector<1x1xf32>
    %c30 = arith.constant 30 : index
    %c0_342 = arith.constant 0 : index
    %602 = vector.load %arg10[%c30, %c0_342] : memref<32x256xf32, #tpu.memory_space<vmem>>, vector<1x256xf32>
    %c31 = arith.constant 31 : index
    %c0_343 = arith.constant 0 : index
    %603 = vector.load %arg10[%c31, %c0_343] : memref<32x256xf32, #tpu.memory_space<vmem>>, vector<1x256xf32>
    %604 = vector.broadcast %602 : vector<1x256xf32> to vector<16x256xf32>
    %605 = arith.subf %134, %604 : vector<16x256xf32>
    %606 = math.absf %605 : vector<16x256xf32>
    %cst_344 = arith.constant 1.000000e+00 : f32
    %607 = vector.broadcast %cst_344 : f32 to vector<16x256xf32>
    %608 = arith.subf %607, %606 : vector<16x256xf32>
    %cst_345 = arith.constant 0.000000e+00 : f32
    %609 = vector.broadcast %cst_345 : f32 to vector<16x256xf32>
    %610 = arith.maximumf %608, %609 : vector<16x256xf32>
    %611 = vector.broadcast %603 : vector<1x256xf32> to vector<16x256xf32>
    %612 = arith.subf %136, %611 : vector<16x256xf32>
    %613 = math.absf %612 : vector<16x256xf32>
    %cst_346 = arith.constant 1.000000e+00 : f32
    %614 = vector.broadcast %cst_346 : f32 to vector<16x256xf32>
    %615 = arith.subf %614, %613 : vector<16x256xf32>
    %cst_347 = arith.constant 0.000000e+00 : f32
    %616 = vector.broadcast %cst_347 : f32 to vector<16x256xf32>
    %617 = arith.maximumf %615, %616 : vector<16x256xf32>
    %cst_348 = arith.constant dense<0.000000e+00> : vector<16x16xf32>
    %618 = tpu.matmul %617, %610, %cst_348 {dimension_numbers = #tpu.dot_dimension_numbers<[1], [1], [0], [0], [0, 0, 1, 0], [], []>} : vector<16x256xf32>, vector<16x256xf32>, vector<16x16xf32> -> vector<16x16xf32>
    %c0_349 = arith.constant 0 : index
    %c30_350 = arith.constant 30 : index
    %c0_351 = arith.constant 0 : index
    %619 = vector.load %arg11[%c0_349, %c30_350, %c0_351] : memref<16x32x16xf32, #tpu.memory_space<vmem>>, vector<16x1x16xf32>
    %620 = vector.shape_cast %619 : vector<16x1x16xf32> to vector<16x16xf32>
    %621 = arith.mulf %620, %618 : vector<16x16xf32>
    %cst_352 = arith.constant dense<0.000000e+00> : vector<16xf32>
    %622 = vector.multi_reduction <add>, %621, %cst_352 [1] : vector<16x16xf32> to vector<16xf32>
    %623 = vector.shape_cast %622 : vector<16xf32> to vector<16x1xf32>
    %cst_353 = arith.constant dense<0.000000e+00> : vector<1xf32>
    %624 = vector.multi_reduction <add>, %623, %cst_353 [0] : vector<16x1xf32> to vector<1xf32>
    %625 = vector.shape_cast %624 : vector<1xf32> to vector<1x1xf32>
    %c0_354 = arith.constant 0 : index
    %c31_355 = arith.constant 31 : index
    %c0_356 = arith.constant 0 : index
    %626 = vector.load %arg11[%c0_354, %c31_355, %c0_356] : memref<16x32x16xf32, #tpu.memory_space<vmem>>, vector<16x1x16xf32>
    %627 = vector.shape_cast %626 : vector<16x1x16xf32> to vector<16x16xf32>
    %628 = arith.mulf %627, %618 : vector<16x16xf32>
    %cst_357 = arith.constant dense<0.000000e+00> : vector<16xf32>
    %629 = vector.multi_reduction <add>, %628, %cst_357 [1] : vector<16x16xf32> to vector<16xf32>
    %630 = vector.shape_cast %629 : vector<16xf32> to vector<16x1xf32>
    %cst_358 = arith.constant dense<0.000000e+00> : vector<1xf32>
    %631 = vector.multi_reduction <add>, %630, %cst_358 [0] : vector<16x1xf32> to vector<1xf32>
    %632 = vector.shape_cast %631 : vector<1xf32> to vector<1x1xf32>
    %633 = tpu.concatenate %160, %167, %191, %198, %222, %229, %253, %260, %284, %291, %315, %322, %346, %353, %377, %384 in 0 : vector<1x1xf32>, vector<1x1xf32>, vector<1x1xf32>, vector<1x1xf32>, vector<1x1xf32>, vector<1x1xf32>, vector<1x1xf32>, vector<1x1xf32>, vector<1x1xf32>, vector<1x1xf32>, vector<1x1xf32>, vector<1x1xf32>, vector<1x1xf32>, vector<1x1xf32>, vector<1x1xf32>, vector<1x1xf32> -> vector<16x1xf32>
    %634 = tpu.concatenate %408, %415, %439, %446, %470, %477, %501, %508, %532, %539, %563, %570, %594, %601, %625, %632 in 0 : vector<1x1xf32>, vector<1x1xf32>, vector<1x1xf32>, vector<1x1xf32>, vector<1x1xf32>, vector<1x1xf32>, vector<1x1xf32>, vector<1x1xf32>, vector<1x1xf32>, vector<1x1xf32>, vector<1x1xf32>, vector<1x1xf32>, vector<1x1xf32>, vector<1x1xf32>, vector<1x1xf32>, vector<1x1xf32> -> vector<16x1xf32>
    %635 = tpu.concatenate %633, %634 in 0 : vector<16x1xf32>, vector<16x1xf32> -> vector<32x1xf32>
    %cst_359 = arith.constant 3.906250e-03 : f32
    %636 = vector.broadcast %cst_359 : f32 to vector<32x1xf32>
    %637 = arith.mulf %635, %636 : vector<32x1xf32>
    %c0_360 = arith.constant 0 : index
    %c0_361 = arith.constant 0 : index
    %638 = vector.load %arg7[%c0_360, %c0_361] : memref<2x32xf32, #tpu.memory_space<vmem>>, vector<2x32xf32>
    %cst_362 = arith.constant dense<0.000000e+00> : vector<2x1xf32>
    %639 = tpu.matmul %638, %637, %cst_362 {dimension_numbers = #tpu.dot_dimension_numbers<[1], [0], [0], [1], [0, 0, 1, 1], [], []>} : vector<2x32xf32>, vector<32x1xf32>, vector<2x1xf32> -> vector<2x1xf32>
    %cst_363 = arith.constant 0.000000e+00 : f32
    %640 = vector.broadcast %cst_363 : f32 to vector<2x1xf32>
    %641 = arith.maximumf %639, %640 : vector<2x1xf32>
    %c0_364 = arith.constant 0 : index
    %c0_365 = arith.constant 0 : index
    %642 = vector.load %arg8[%c0_364, %c0_365] : memref<32x2xf32, #tpu.memory_space<vmem>>, vector<32x2xf32>
    %cst_366 = arith.constant dense<0.000000e+00> : vector<32x1xf32>
    %643 = tpu.matmul %642, %641, %cst_366 {dimension_numbers = #tpu.dot_dimension_numbers<[1], [0], [0], [1], [0, 0, 1, 1], [], []>} : vector<32x2xf32>, vector<2x1xf32>, vector<32x1xf32> -> vector<32x1xf32>
    %644 = arith.negf %643 : vector<32x1xf32>
    %645 = math.exp %644 : vector<32x1xf32>
    %cst_367 = arith.constant 1.000000e+00 : f32
    %646 = vector.broadcast %cst_367 : f32 to vector<32x1xf32>
    %647 = arith.addf %646, %645 : vector<32x1xf32>
    %648 = arith.divf %646, %647 : vector<32x1xf32>
    %cst_368 = arith.constant 1.000000e+00 : f32
    %649 = vector.broadcast %cst_368 : f32 to vector<32x1xf32>
    %650 = tpu.concatenate %649, %648 in 0 : vector<32x1xf32>, vector<32x1xf32> -> vector<64x1xf32>
    %651 = vector.broadcast %650 : vector<64x1xf32> to vector<64x256xf32>
    %652 = arith.mulf %47, %651 : vector<64x256xf32>
    %653 = arith.addf %1, %652 : vector<64x256xf32>
    %c0_369 = arith.constant 0 : index
    %c0_370 = arith.constant 0 : index
    %c0_371 = arith.constant 0 : index
    %654 = vector.load %arg9[%c0_369, %c0_370, %c0_371] : memref<1x64x256xf32, #tpu.memory_space<vmem>>, vector<1x64x256xf32>
    %655 = vector.shape_cast %654 : vector<1x64x256xf32> to vector<64x256xf32>
    %656 = vector.shape_cast %653 : vector<64x256xf32> to vector<1x64x256xf32>
    tpu.vector_store %arg9[%c0_369, %c0_370, %c0_371], %656 {strides = array<i32>} : memref<1x64x256xf32, #tpu.memory_space<vmem>>, vector<1x64x256xf32>,
    return
  }
  func.func @transform_0(%arg0: i32) -> (i32, i32, i32) {
    %c0_i32 = arith.constant 0 : i32
    %c0_i32_0 = arith.constant 0 : i32
    %c0_i32_1 = arith.constant 0 : i32
    return %arg0, %c0_i32, %c0_i32_0 : i32, i32, i32
  }
  func.func @transform_1(%arg0: i32) -> (i32, i32) {
    %c0_i32 = arith.constant 0 : i32
    %c0_i32_0 = arith.constant 0 : i32
    %c0_i32_1 = arith.constant 0 : i32
    return %c0_i32, %c0_i32_0 : i32, i32
  }
  func.func @transform_2(%arg0: i32) -> (i32, i32) {
    %c0_i32 = arith.constant 0 : i32
    %c0_i32_0 = arith.constant 0 : i32
    %c0_i32_1 = arith.constant 0 : i32
    return %c0_i32, %c0_i32_0 : i32, i32
  }
  func.func @transform_3(%arg0: i32) -> (i32, i32) {
    %c0_i32 = arith.constant 0 : i32
    %c0_i32_0 = arith.constant 0 : i32
    %c0_i32_1 = arith.constant 0 : i32
    return %c0_i32, %c0_i32_0 : i32, i32
  }
  func.func @transform_4(%arg0: i32) -> (i32, i32) {
    %c0_i32 = arith.constant 0 : i32
    %c0_i32_0 = arith.constant 0 : i32
    %c0_i32_1 = arith.constant 0 : i32
    return %c0_i32, %c0_i32_0 : i32, i32
  }
  func.func @transform_5(%arg0: i32) -> (i32, i32) {
    %c0_i32 = arith.constant 0 : i32
    %c0_i32_0 = arith.constant 0 : i32
    %c0_i32_1 = arith.constant 0 : i32
    return %c0_i32, %c0_i32_0 : i32, i32
  }
  func.func @transform_6(%arg0: i32) -> (i32, i32) {
    %c0_i32 = arith.constant 0 : i32
    %c0_i32_0 = arith.constant 0 : i32
    %c0_i32_1 = arith.constant 0 : i32
    return %c0_i32, %c0_i32_0 : i32, i32
  }
  func.func @transform_7(%arg0: i32) -> (i32, i32) {
    %c0_i32 = arith.constant 0 : i32
    %c0_i32_0 = arith.constant 0 : i32
    %c0_i32_1 = arith.constant 0 : i32
    return %c0_i32, %c0_i32_0 : i32, i32
  }
  func.func @transform_8(%arg0: i32) -> (i32, i32, i32) {
    %c0_i32 = arith.constant 0 : i32
    %c0_i32_0 = arith.constant 0 : i32
    %c0_i32_1 = arith.constant 0 : i32
    return %arg0, %c0_i32, %c0_i32_0 : i32, i32, i32
  }
}

</mosaic_0001>

<bundles_post_ra>
// kernel: _lambda_.1
= control target key start
LH: loop header
LB: loop body
LE: loop exit
PB: predicated region body
PF: predicated region fallthrough
CT: control target
= control target key end

     0   :  { %s7350_s27 = smov 0   ;;  %s10054_s0 = inlined_call_operand.vmem [shape: f32[2,64,256], index: 0, kind: input, shape index: {}]   ;;  %s10055_s1 = inlined_call_operand.vmem [shape: bf16[16,64], index: 1, kind: input, shape index: {}]   ;;  %s10056_s2 = inlined_call_operand.vmem [shape: bf16[16,144], index: 2, kind: input, shape index: {}]   ;;  %s10057_s3 = inlined_call_operand.vmem [shape: bf16[64,16], index: 3, kind: input, shape index: {}]   ;;  %s10058_s4 = inlined_call_operand.vmem [shape: f32[9,256], index: 4, kind: input, shape index: {}]   ;;  %s10059_s5 = inlined_call_operand.vmem [shape: f32[32,256], index: 5, kind: input, shape index: {}]   ;;  %s10060_s6 = inlined_call_operand.vmem [shape: f32[2,32], index: 6, kind: input, shape index: {}]   ;;  %s10061_s7 = inlined_call_operand.vmem [shape: f32[32,2], index: 7, kind: input, shape index: {}]   ;;  %s10062_s8 = inlined_call_operand.vmem [shape: f32[2,64,256], index: 8, kind: output, shape index: {}]  }
   0x1 LB: > { %s7071_s28 = sadd.s32 4294967295, %s7286_s27   ;;  %p7075_p0 = scmp.ge.s32.totalorder %s7286_s27, 1  ;;  %s7286_s27 = sphi %s7350_s27, %s18_s27  }
   0x2   : > { %p262_p1 = scmp.lt.s32.totalorder %s7286_s27, 3 }
   0x4   : > { %p263_p2 = pnand %p7075_p0, %p262_p1 }
   0x6   : > { %266 = sbr.rel (%p263_p2) target bundleno = 2317 (0x90d), region = 52 }
   0xd   : > { %p296_p3 = scmp.lt.s32.totalorder %s7071_s28, 1  ;;  %v7288_v0 = vmov 0   ;;  %v7248_v25 = vld [vmem:[%s10055_s1] sm:$0xff]   ;;  %vm338_vm0 = vcmask 523264   ;;  %s7289_s13 = smov 17   ;;  %vm659_vm1 = vcmask 130048   ;;  %v397_v45 = vlaneseq }
   0xe   : > { %374 = vmatprep.mubr.bf16.mxu0 %v7288_v0  ;;  %7247 = vset.pattern.permute.xlu0 %v7288_v0  ;;  %s7290_s14 = smov 16   ;;  %s7291_s15 = smov 15   ;;  %v7251_v36 = vld [vmem:[%s10056_s2 + $0x4] ss:$8 sps:$4 sm:$0xff]   ;;  %vm1354_vm10 = vcmask 1041409   ;;  %vm1357_vm11 = vcmask 1042434  }
   0xf   : > { %s10094_s28 = smov (!%p296_p3, %s7071_s28), 1  ;;  %7246 = vset.pattern.permute.xlu1 %v7288_v0  ;;  %s7292_s16 = smov 1   ;;  %7091 = vmatprep.mubr.msk.bf16.mxu1 %vm659_vm1, %v7251_v36  ;;  %v7477_v48 = vshrl.u32 %v397_v45, 7  ;;  %v7479_v50 = vand.u32 127, %v397_v45  ;;  %vm1360_vm12 = vcmask 1043459   ;;  %vm1363_vm13 = vcmask 1044484  }
  0x10   : > { %s7120_s29 = sshll.u32 %s10094_s28, 7  ;;  %s7293_s17 = smov 127   ;;  %v404_v55 = vld [vmem:[%s10058_s4] ss:$8 sm:$0x3]  ;;  %vm1366_vm14 = vcmask 1045509  }
  0x11   : > { %s7369_s10 = scalar_lea.vmem %s10054_s0, %s7120_s29  ;;  %s7294_s18 = smov 113   ;;  %v7484_v52 = vsub.s32 0, %v7477_v48  ;;  %v7487_v53 = vsub.s32 1, %v7477_v48  ;;  %vm399_vm2 = vcmp.lt.s32.totalorder %v7479_v50, 17  ;;  %vm428_vm3 = vcmp.lt.s32.totalorder %v7479_v50, 16 }
  0x12   : > { %v7372_v1 = vld [vmem:[%s7369_s10 + $0x8] sm:$0xff]  ;;  %v7375_v2 = vld [vmem:[%s7369_s10 + $0x18] sm:$0xff]  ;;  %v7378_v3 = vld [vmem:[%s7369_s10] sm:$0xff]  ;;  %s7295_s19 = smov 112   ;;  %s7296_s20 = smov 111   ;;  %vm458_vm4 = vcmp.lt.s32.totalorder %v7479_v50, 15 }
  0x13   : > { %v326_v4 = vpack.c.bf16 %v7375_v2, %v7372_v1  ;;  %v7383_v5 = vld [vmem:[%s7369_s10 + $0x10] sm:$0xff]  ;;  %v7386_v6 = vld [vmem:[%s7369_s10 + $0x28] sm:$0xff]  ;;  %v7389_v7 = vld [vmem:[%s7369_s10 + $0x38] sm:$0xff]  ;;  %v413_v58 = vrot.slane %v404_v55, %v7487_v53  ;;  %v409_v59 = vrot.slane %v404_v55, %v7484_v52  ;;  %vm488_vm5 = vcmp.lt.s32.totalorder %v7479_v50, 1  ;;  %s7648_s23 = scalar_lea.vmem %s10062_s8, %s7120_s29  ;;  %s7300_s21 = smov 48  }
  0x14   : > { %v325_v8 = vpack.c.bf16 %v7383_v5, %v7378_v3  ;;  %v328_v9 = vpack.c.bf16 %v7389_v7, %v7386_v6  ;;  %v7396_v10 = vld [vmem:[%s7369_s10 + $0x20] sm:$0xff]  ;;  %v7399_v11 = vld [vmem:[%s7369_s10 + $0x30] sm:$0xff]  ;;  %v316_v12 = vld [vmem:[%s7369_s10 + $0x48] sm:$0xff]  ;;  %vm518_vm6 = vcmp.lt.s32.totalorder %v7479_v50, 127  ;;  %vm548_vm7 = vcmp.lt.s32.totalorder %v7479_v50, 113  ;;  %s7301_s22 = smov 32  }
  0x15   : > { %342 = vmatprep.subr.bf16.mxu0 %v326_v4  ;;  %v318_v13 = vld [vmem:[%s7369_s10 + $0x58] sm:$0xff]  ;;  %v327_v14 = vpack.c.bf16 %v7399_v11, %v7396_v10  ;;  %v315_v16 = vld [vmem:[%s7369_s10 + $0x40] sm:$0xff]  ;;  %v317_v17 = vld [vmem:[%s7369_s10 + $0x50] sm:$0xff]  ;;  %vm578_vm8 = vcmp.lt.s32.totalorder %v7479_v50, 112  ;;  %vm608_vm9 = vcmp.lt.s32.totalorder %v7479_v50, 111  ;;  %vm1369_vm15 = vcmask 1046534  }
  0x16   : > { %343 = vmatpush1.bf16.msra.mxu0 %v325_v8  ;;  %v330_v15 = vpack.c.bf16 %v318_v13, %v316_v12  ;;  %v320_v18 = vld [vmem:[%s7369_s10 + $0x68] sm:$0xff]  ;;  %v322_v19 = vld [vmem:[%s7369_s10 + $0x78] sm:$0xff]  ;;  %v329_v20 = vpack.c.bf16 %v317_v17, %v315_v16  ;;  %v319_v22 = vld [vmem:[%s7369_s10 + $0x60] sm:$0xff] }
  0x17   : > { %344 = vmatprep.subr.bf16.mxu0 %v328_v9  ;;  %v332_v21 = vpack.c.bf16 %v322_v19, %v320_v18  ;;  %v321_v23 = vld [vmem:[%s7369_s10 + $0x70] sm:$0xff]  ;;  %v7082_v57 = vld [vmem:[%s10058_s4 + $0x1] ss:$8 sm:$0x3] }
  0x18   : > { %v331_v24 = vpack.c.bf16 %v321_v23, %v319_v22  ;;  %v439_v4 = vrot.slane %v7082_v57, %v7484_v52  ;;  %v443_v8 = vrot.slane %v7082_v57, %v7487_v53  ;;  %v7083_v13 = vld [vmem:[%s10058_s4 + $0x2] ss:$8 sm:$0x3]  ;;  %v7084_v36 = vld [vmem:[%s10058_s4 + $0x3] ss:$8 sm:$0x3] }
  0x1a   : > { %345 = vmatpush1.bf16.msra.mxu0 %v327_v14 }
  0x1b   : > { %346 = vmatprep.subr.bf16.mxu0 %v330_v15 }
  0x1e   : > { %347 = vmatpush1.bf16.msra.mxu0 %v329_v20 }
  0x1f   : > { %348 = vmatprep.subr.bf16.mxu0 %v332_v21 }
  0x22   : > { %349 = vmatpush1.bf16.msra.mxu0 %v331_v24  ;;  %v469_v24 = vrot.slane %v7083_v13, %v7484_v52 }
  0x25   : > { %7081 = vmatmul.mubr.msk.bf16.vlgmr.msra.gmra.mrb[0].mxu0 %vm338_vm0, %v7248_v25  ;;  %v473_v25 = vrot.slane %v7083_v13, %v7487_v53  ;;  %vm1372_vm0 = vcmask 1047559  }
  0x26   : > { %784 = vmatprep.mubr.bf16.mxu0 %v7288_v0 }
  0xf8   : > { %v376_v26 = vpop.f32.mrb[0].mxu0 }
  0xf9   : > { %v7415_v27 = vmax.f32 %v376_v26, 0.0  ;;  %v378_v28 = vpop.f32.mrb[1].mxu0 }
  0xfa   : > { %v7417_v29 = vmax.f32 %v378_v28, 0.0  ;;  %v380_v30 = vpop.f32.mrb[2].mxu0 }
  0xfb   : > { %v7419_v31 = vmax.f32 %v380_v30, 0.0  ;;  %389 = vrot.lane.b32.xlu0 %v7415_v27, %s7289_s13  ;;  %v382_v32 = vpop.f32.mrb[3].mxu0 }
  0xfc   : > { %v7422_v33 = vmax.f32 %v382_v32, 0.0  ;;  %393 = vrot.lane.b32.xlu1 %v7417_v29, %s7289_s13 }
  0xfd   : > { %v638_v34 = vpack.c.bf16 %v7419_v31, %v7415_v27 }
  0xfe   : > { %v639_v35 = vpack.c.bf16 %v7422_v33, %v7417_v29 }
  0xff   : > { %420 = vrot.lane.b32.xlu0 %v7415_v27, %s7290_s14 }
 0x100   : > { %422 = vrot.lane.b32.xlu1 %v7419_v31, %s7290_s14 }
 0x103   : > { %450 = vrot.lane.b32.xlu0 %v7415_v27, %s7291_s15 }
 0x104   : > { %452 = vrot.lane.b32.xlu1 %v7419_v31, %s7291_s15 }
 0x107   : > { %480 = vrot.lane.b32.xlu0 %v7415_v27, %s7292_s16 }
 0x108   : > { %482 = vrot.lane.b32.xlu1 %v7419_v31, %s7292_s16 }
 0x10b   : > { %424 = vrot.lane.b32.xlu0 %v7417_v29, %s7290_s14 }
 0x10c   : > { %512 = vrot.lane.b32.xlu1 %v7419_v31, %s7293_s17 }
 0x10f   : > { %454 = vrot.lane.b32.xlu0 %v7417_v29, %s7291_s15 }
 0x110   : > { %542 = vrot.lane.b32.xlu1 %v7419_v31, %s7294_s18 }
 0x113   : > { %484 = vrot.lane.b32.xlu0 %v7417_v29, %s7292_s16 }
 0x114   : > { %572 = vrot.lane.b32.xlu1 %v7419_v31, %s7295_s19 }
 0x117   : > { %391 = vrot.lane.b32.xlu0 %v7419_v31, %s7289_s13 }
 0x118   : > { %395 = vrot.lane.b32.xlu1 %v7422_v33, %s7289_s13 }
 0x11b   : > { %510 = vrot.lane.b32.xlu0 %v7415_v27, %s7293_s17 }
 0x11c   : > { %426 = vrot.lane.b32.xlu1 %v7422_v33, %s7290_s14 }
 0x11f   : > { %514 = vrot.lane.b32.xlu0 %v7417_v29, %s7293_s17 }
 0x120   : > { %456 = vrot.lane.b32.xlu1 %v7422_v33, %s7291_s15 }
 0x123   : > { %540 = vrot.lane.b32.xlu0 %v7415_v27, %s7294_s18 }
 0x124   : > { %486 = vrot.lane.b32.xlu1 %v7422_v33, %s7292_s16 }
 0x127   : > { %544 = vrot.lane.b32.xlu0 %v7417_v29, %s7294_s18 }
 0x128   : > { %602 = vrot.lane.b32.xlu1 %v7419_v31, %s7296_s20 }
 0x12b   : > { %570 = vrot.lane.b32.xlu0 %v7415_v27, %s7295_s19 }
 0x12c   : > { %516 = vrot.lane.b32.xlu1 %v7422_v33, %s7293_s17  ;;  %s7297_s17 = smov 96  }
 0x12f   : > { %574 = vrot.lane.b32.xlu0 %v7417_v29, %s7295_s19 }
 0x130   : > { %546 = vrot.lane.b32.xlu1 %v7422_v33, %s7294_s18  ;;  %s7298_s18 = smov 80  }
 0x133   : > { %600 = vrot.lane.b32.xlu0 %v7415_v27, %s7296_s20 }
 0x134   : > { %576 = vrot.lane.b32.xlu1 %v7422_v33, %s7295_s19 }
 0x137   : > { %604 = vrot.lane.b32.xlu0 %v7417_v29, %s7296_s20  ;;  %v7087_v29 = vld [vmem:[%s10058_s4 + $0x7] ss:$8 sm:$0x3] }
 0x138   : > { %606 = vrot.lane.b32.xlu1 %v7422_v33, %s7296_s20  ;;  %s7299_s20 = smov 64  }
 0x16d   : > { %v390_v37 = vpop.permute.xlu0 %389 }
 0x16e   : > { %v394_v38 = vpop.permute.xlu1 %393 }
 0x16f   : > { %v402_v60 = vsel %vm399_vm2, %v394_v38, %v390_v37  ;;  %v400_v62 = vsel %vm399_vm2, %v390_v37, %v394_v38 }
 0x170   : > { %v417_v14 = vmul.f32 %v413_v58, %v400_v62  ;;  %v416_v16 = vmul.f32 %v409_v59, %v402_v60 }
 0x171   : > { %v421_v39 = vpop.permute.xlu0 %420 }
 0x172   : > { %v423_v40 = vpop.permute.xlu1 %422 }
 0x175   : > { %v451_v41 = vpop.permute.xlu0 %450 }
 0x176   : > { %v453_v42 = vpop.permute.xlu1 %452 }
 0x179   : > { %v7471_v43 = vpop.permute.xlu0 %480 }
 0x17a   : > { %v7473_v44 = vpop.permute.xlu1 %482 }
 0x17d   : > { %v425_v46 = vpop.permute.xlu0 %424 }
 0x17e   : > { %v7475_v47 = vpop.permute.xlu1 %512  ;;  %v429_v18 = vsel %vm428_vm3, %v421_v39, %v425_v46  ;;  %v431_v19 = vsel %vm428_vm3, %v425_v46, %v421_v39 }
 0x17f   : > { %v446_v30 = vmul.f32 %v439_v4, %v431_v19  ;;  %v447_v32 = vmul.f32 %v443_v8, %v429_v18 }
 0x181   : > { %v455_v49 = vpop.permute.xlu0 %454 }
 0x182   : > { %v7481_v51 = vpop.permute.xlu1 %542  ;;  %v459_v39 = vsel %vm458_vm4, %v451_v41, %v455_v49  ;;  %v461_v45 = vsel %vm458_vm4, %v455_v49, %v451_v41 }
 0x183   : > { %v476_v62 = vmul.f32 %v469_v24, %v461_v45 }
 0x185   : > { %v485_v54 = vpop.permute.xlu0 %484 }
 0x186   : > { %v7493_v56 = vpop.permute.xlu1 %572 }
 0x189   : > { %v392_v61 = vpop.permute.xlu0 %391 }
 0x18a   : > { %v396_v63 = vpop.permute.xlu1 %395 }
 0x18b   : > { %v403_v9 = vsel %vm399_vm2, %v396_v63, %v392_v61  ;;  %v401_v12 = vsel %vm399_vm2, %v392_v61, %v396_v63  ;;  %v477_v63 = vmul.f32 %v473_v25, %v459_v39  ;;  %vm6701_vm2 = vcmask 1041408  }
 0x18c   : > { %v419_v15 = vmul.f32 %v413_v58, %v401_v12  ;;  %v418_v17 = vmul.f32 %v409_v59, %v403_v9  ;;  %v499_v58 = vrot.slane %v7084_v36, %v7484_v52  ;;  %v503_v59 = vrot.slane %v7084_v36, %v7487_v53 }
 0x18d   : > { %v511_v20 = vpop.permute.xlu0 %510 }
 0x18e   : > { %v427_v21 = vpop.permute.xlu1 %426  ;;  %v631_v22 = vpack.c.bf16 %v419_v15, %v417_v14  ;;  %v630_v23 = vpack.c.bf16 %v418_v17, %v416_v16 }
 0x18f   : > { %v430_v26 = vsel %vm428_vm3, %v423_v40, %v427_v21  ;;  %v432_v28 = vsel %vm428_vm3, %v427_v21, %v423_v40  ;;  %vm6703_vm3 = vcmask 1042432  }
 0x190   : > { %v448_v37 = vmul.f32 %v439_v4, %v432_v28  ;;  %v449_v38 = vmul.f32 %v443_v8, %v430_v26  ;;  %663 = vmatprep.subr.bf16.mxu1 %v631_v22  ;;  %v489_v4 = vsel %vm488_vm5, %v7471_v43, %v485_v54  ;;  %v491_v8 = vsel %vm488_vm5, %v485_v54, %v7471_v43  ;;  %v7085_v43 = vld [vmem:[%s10058_s4 + $0x5] ss:$8 sm:$0x3] }
 0x191   : > { %v515_v46 = vpop.permute.xlu0 %514  ;;  %664 = vmatpush1.bf16.msra.mxu1 %v630_v23  ;;  %v506_v16 = vmul.f32 %v499_v58, %v491_v8  ;;  %v507_v17 = vmul.f32 %v503_v59, %v489_v4 }
 0x192   : > { %v457_v40 = vpop.permute.xlu1 %456  ;;  %v633_v55 = vpack.c.bf16 %v449_v38, %v447_v32  ;;  %v632_v57 = vpack.c.bf16 %v448_v37, %v446_v30  ;;  %v519_v26 = vsel %vm518_vm6, %v511_v20, %v515_v46  ;;  %v521_v28 = vsel %vm518_vm6, %v515_v46, %v511_v20 }
 0x193   : > { %v460_v60 = vsel %vm458_vm4, %v453_v42, %v457_v40  ;;  %v462_v61 = vsel %vm458_vm4, %v457_v40, %v453_v42  ;;  %vm6705_vm4 = vcmask 1043456  }
 0x194   : > { %v478_v41 = vmul.f32 %v469_v24, %v462_v61  ;;  %v479_v49 = vmul.f32 %v473_v25, %v460_v60  ;;  %665 = vmatprep.subr.bf16.mxu1 %v633_v55  ;;  %v529_v24 = vrot.slane %v7085_v43, %v7484_v52  ;;  %v7086_v25 = vld [vmem:[%s10058_s4 + $0x6] ss:$8 sm:$0x3]  ;;  %v593_v60 = vrot.slane %v7087_v29, %v7487_v53 }
 0x195   : > { %v541_v9 = vpop.permute.xlu0 %540  ;;  %666 = vmatpush1.bf16.msra.mxu1 %v632_v57  ;;  %v559_v36 = vrot.slane %v7086_v25, %v7484_v52  ;;  %v563_v37 = vrot.slane %v7086_v25, %v7487_v53 }
 0x196   : > { %v487_v12 = vpop.permute.xlu1 %486  ;;  %v635_v13 = vpack.c.bf16 %v479_v49, %v477_v63  ;;  %v634_v14 = vpack.c.bf16 %v478_v41, %v476_v62  ;;  %v536_v39 = vmul.f32 %v529_v24, %v519_v26  ;;  %v7088_v41 = vld [vmem:[%s10058_s4 + $0x10] ss:$8 sm:$0x3] }
 0x197   : > { %v490_v42 = vsel %vm488_vm5, %v7473_v44, %v487_v12  ;;  %v492_v15 = vsel %vm488_vm5, %v487_v12, %v7473_v44  ;;  %v533_v44 = vrot.slane %v7085_v43, %v7487_v53  ;;  %vm6707_vm5 = vcmask 1044480  }
 0x198   : > { %v508_v18 = vmul.f32 %v499_v58, %v492_v15  ;;  %v509_v19 = vmul.f32 %v503_v59, %v490_v42  ;;  %667 = vmatprep.subr.bf16.mxu1 %v635_v13  ;;  %v589_v59 = vrot.slane %v7087_v29, %v7484_v52  ;;  %v619_v42 = vrot.slane %v7088_v41, %v7484_v52 }
 0x199   : > { %v545_v54 = vpop.permute.xlu0 %544  ;;  %668 = vmatpush1.bf16.msra.mxu1 %v634_v14  ;;  %v537_v45 = vmul.f32 %v533_v44, %v521_v28  ;;  %v623_v15 = vrot.slane %v7088_v41, %v7487_v53 }
 0x19a   : > { %v7547_v21 = vpop.permute.xlu1 %602  ;;  %v637_v22 = vpack.c.bf16 %v509_v19, %v507_v17  ;;  %v636_v23 = vpack.c.bf16 %v508_v18, %v506_v16  ;;  %v549_v33 = vsel %vm548_vm7, %v541_v9, %v545_v54 }
 0x19b   : > { %v566_v63 = vmul.f32 %v559_v36, %v549_v33 }
 0x19c   : > { %669 = vmatprep.subr.bf16.mxu1 %v637_v22 }
 0x19d   : > { %v571_v30 = vpop.permute.xlu0 %570  ;;  %670 = vmatpush1.bf16.msra.mxu1 %v636_v23 }
 0x19e   : > { %v517_v32 = vpop.permute.xlu1 %516  ;;  %671 = vmatprep.subr.bf16.mxu1 %v639_v35  ;;  %v551_v35 = vsel %vm548_vm7, %v545_v54, %v541_v9 }
 0x19f   : > { %v520_v38 = vsel %vm518_vm6, %v7475_v47, %v517_v32  ;;  %v522_v20 = vsel %vm518_vm6, %v517_v32, %v7475_v47  ;;  %v567_v27 = vmul.f32 %v563_v37, %v551_v35  ;;  %vm6709_vm6 = vcmask 1045504  }
 0x1a0   : > { %v538_v46 = vmul.f32 %v529_v24, %v520_v38  ;;  %v539_v40 = vmul.f32 %v533_v44, %v522_v20  ;;  %v7249_v38 = vld [vmem:[%s10056_s2] ss:$8 sps:$4 sm:$0xff]  }
 0x1a1   : > { %v575_v55 = vpop.permute.xlu0 %574  ;;  %672 = vmatpush1.bf16.msra.mxu1 %v638_v34 }
 0x1a2   : > { %v547_v47 = vpop.permute.xlu1 %546  ;;  %v641_v57 = vpack.c.bf16 %v539_v40, %v537_v45  ;;  %v640_v58 = vpack.c.bf16 %v538_v46, %v536_v39  ;;  %v579_v49 = vsel %vm578_vm8, %v571_v30, %v575_v55  ;;  %v581_v4 = vsel %vm578_vm8, %v575_v55, %v571_v30  ;;  %v7252_v55 = vld [vmem:[%s10057_s3] sm:$0xff]  }
 0x1a3   : > { %v550_v61 = vsel %vm548_vm7, %v7481_v51, %v547_v47  ;;  %v552_v62 = vsel %vm548_vm7, %v547_v47, %v7481_v51  ;;  %v596_v16 = vmul.f32 %v589_v59, %v579_v49  ;;  %v597_v17 = vmul.f32 %v593_v60, %v581_v4  ;;  %v7253_v47 = vld [vmem:[%s10057_s3 + $0x8] sm:$0xff]  }
 0x1a4   : > { %v568_v31 = vmul.f32 %v559_v36, %v550_v61  ;;  %v569_v34 = vmul.f32 %v563_v37, %v552_v62  ;;  %673 = vmatprep.subr.bf16.mxu1 %v641_v57  ;;  %v7254_v57 = vld [vmem:[%s10057_s3 + $0x10] sm:$0xff]   ;;  %vm6711_vm7 = vcmask 1046528  }
 0x1a5   : > { %v601_v8 = vpop.permute.xlu0 %600  ;;  %674 = vmatpush1.bf16.msra.mxu1 %v640_v58  ;;  %v7255_v58 = vld [vmem:[%s10057_s3 + $0x18] sm:$0xff]   ;;  %v827_v61 = vld [vmem:[%s10059_s5 + $0x10] sm:$0xff] }
 0x1a6   : > { %v577_v9 = vpop.permute.xlu1 %576  ;;  %v643_v12 = vpack.c.bf16 %v569_v34, %v567_v27  ;;  %v642_v51 = vpack.c.bf16 %v568_v31, %v566_v63  ;;  %v828_v31 = vld [vmem:[%s10059_s5 + $0x18] sm:$0xff] }
 0x1a7   : > { %v580_v13 = vsel %vm578_vm8, %v7493_v56, %v577_v9  ;;  %v582_v14 = vsel %vm578_vm8, %v577_v9, %v7493_v56  ;;  %vm7303_vm8 = vmmov 0  }
 0x1a8   : > { %v598_v18 = vmul.f32 %v589_v59, %v580_v13  ;;  %v599_v19 = vmul.f32 %v593_v60, %v582_v14  ;;  %675 = vmatprep.subr.bf16.mxu1 %v643_v12  ;;  %v825_v59 = vld [vmem:[%s10059_s5] sm:$0xff]  ;;  %v826_v60 = vld [vmem:[%s10059_s5 + $0x8] sm:$0xff] }
 0x1a9   : > { %v605_v43 = vpop.permute.xlu0 %604  ;;  %676 = vmatpush1.bf16.msra.mxu1 %v642_v51 }
 0x1aa   : > { %v609_v54 = vsel %vm608_vm9, %v601_v8, %v605_v43  ;;  %v611_v22 = vsel %vm608_vm9, %v605_v43, %v601_v8  ;;  %v607_v23 = vpop.permute.xlu1 %606  ;;  %v645_v24 = vpack.c.bf16 %v599_v19, %v597_v17  ;;  %v644_v56 = vpack.c.bf16 %v598_v18, %v596_v16 }
 0x1ab   : > { %v626_v44 = vmul.f32 %v619_v42, %v609_v54  ;;  %v627_v25 = vmul.f32 %v623_v15, %v611_v22  ;;  %v610_v26 = vsel %vm608_vm9, %v7547_v21, %v607_v23  ;;  %v612_v28 = vsel %vm608_vm9, %v607_v23, %v7547_v21 }
 0x1ac   : > { %v628_v30 = vmul.f32 %v619_v42, %v610_v26  ;;  %v629_v32 = vmul.f32 %v623_v15, %v612_v28  ;;  %677 = vmatprep.subr.bf16.mxu1 %v645_v24  ;;  %vm6739_vm9 = vcmask 261120  }
 0x1ad   : > { %678 = vmatpush1.bf16.msra.mxu1 %v644_v56 }
 0x1ae   : > { %v647_v36 = vpack.c.bf16 %v629_v32, %v627_v25  ;;  %v646_v37 = vpack.c.bf16 %v628_v30, %v626_v44  ;;  %v832_v25 = vld [vmem:[%s10059_s5 + $0x38] sm:$0xff] }
 0x1b0   : > { %679 = vmatprep.subr.bf16.mxu1 %v647_v36 }
 0x1b1   : > { %680 = vmatpush1.bf16.msra.mxu1 %v646_v37 }
 0x1b4   : > { %696 = vmatmul.mubr.bf16.vlgmr.msra.gmra.mrb[0].mxu1 %v7249_v38 }
 0x287   : > { %v697_v20 = vpop.f32.mrb[0].mxu1 }
 0x288   : > { %v699_v39 = vpop.f32.mrb[1].mxu1  ;;  %v706_v46 = vmax.f32 %v697_v20, 0.0 }
 0x289   : > { %v701_v45 = vpop.f32.mrb[2].mxu1  ;;  %v707_v21 = vmax.f32 %v699_v39, 0.0 }
 0x28a   : > { %v708_v40 = vmax.f32 %v701_v45, 0.0  ;;  %v703_v50 = vpop.f32.mrb[3].mxu1 }
 0x28b   : > { %v709_v29 = vmax.f32 %v703_v50, 0.0 }
 0x28c   : > { %v718_v33 = vpack.c.bf16 %v708_v40, %v706_v46 }
 0x28d   : > { %v719_v35 = vpack.c.bf16 %v709_v29, %v707_v21 }
 0x28f   : > { %752 = vmatprep.subr.bf16.mxu0 %v719_v35  ;;  %v1138_v35 = vadd.s32 8, %v7477_v48 }
 0x290   : > { %753 = vmatpush1.bf16.msra.mxu0 %v718_v33 }
 0x293   : > { %7096 = vmatmul.mubr.msk.bf16.vlgmr.msra.gmra.mrb[4].mxu0 %vm659_vm1, %v7252_v55 }
 0x294   : > { %794 = vmatprep.mubr.bf16.mxu0 %v7288_v0 }
 0x29b   : > { %7097 = vmatmul.mubr.msk.bf16.gmra.mrb[8].mxu0 %vm659_vm1, %v7253_v47 }
 0x29c   : > { %804 = vmatprep.mubr.bf16.mxu0 %v7288_v0 }
 0x2a3   : > { %7098 = vmatmul.mubr.msk.bf16.gmra.mrb[12].mxu0 %vm659_vm1, %v7254_v57 }
 0x2a4   : > { %814 = vmatprep.mubr.bf16.mxu0 %v7288_v0 }
 0x2ab   : > { %7099 = vmatmul.mubr.msk.bf16.gmra.mrb[16].mxu0 %vm659_vm1, %v7255_v58 }
 0x366   : > { %v786_v0 = vpop.f32.mrb[4].mxu0 }
 0x367   : > { %v833_v62 = vsub.f32 %v825_v59, %v786_v0  ;;  %v6984_v63 = vadd.f32 %v786_v0, %v7378_v3  ;;  %v788_v27 = vpop.f32.mrb[5].mxu0 }
 0x368   : > { %v834_v34 = vsub.f32 %v826_v60, %v788_v27  ;;  %v6985_v41 = vadd.f32 %v788_v27, %v7372_v1  ;;  %v790_v49 = vpop.f32.mrb[6].mxu0  ;;  %v829_v1 = vld [vmem:[%s10059_s5 + $0x20] sm:$0xff]  ;;  %v7694_v60 = vcvt.s32.f32 %v7477_v48  ;;  %v7704_v27 = vcvt.s32.f32 %v1138_v35 }
 0x369   : > { %v841_v4 = vadd.f32 1.0, %v833_v62  ;;  %7000 = vst [vmem:[%s7648_s23] sm:$0xff] %v6984_v63  ;;  %v835_v8 = vsub.f32 %v827_v61, %v790_v49  ;;  %v6986_v9 = vadd.f32 %v790_v49, %v7383_v5  ;;  %v792_v12 = vpop.f32.mrb[7].mxu0  ;;  %v830_v5 = vld [vmem:[%s10059_s5 + $0x28] sm:$0xff] }
 0x36a   : > { %v842_v51 = vadd.f32 1.0, %v834_v34  ;;  %7001 = vst [vmem:[%s7648_s23 + $0x8] sm:$0xff] %v6985_v41  ;;  %v836_v3 = vsub.f32 %v828_v31, %v792_v12  ;;  %v6987_v13 = vadd.f32 %v792_v12, %v7375_v2  ;;  %v831_v2 = vld [vmem:[%s10059_s5 + $0x30] sm:$0xff] }
 0x36b   : > { %v849_v14 = vmul.f32 16.0, %v841_v4  ;;  %v843_v42 = vadd.f32 1.0, %v835_v8  ;;  %7002 = vst [vmem:[%s7648_s23 + $0x10] sm:$0xff] %v6986_v9 }
 0x36c   : > { %v850_v15 = vmul.f32 16.0, %v842_v51  ;;  %v844_v16 = vadd.f32 1.0, %v836_v3  ;;  %7003 = vst [vmem:[%s7648_s23 + $0x18] sm:$0xff] %v6987_v13 }
 0x36d   : > { %v7100_v17 = vadd.f32 -1.0, %v849_v14  ;;  %v851_v18 = vmul.f32 16.0, %v843_v42 }
 0x36e   : > { %v7101_v19 = vadd.f32 -1.0, %v850_v15  ;;  %v852_v43 = vmul.f32 16.0, %v844_v16  ;;  %v796_v54 = vpop.f32.mrb[8].mxu0 }
 0x36f   : > { %v865_v22 = vmul.f32 0.5, %v7100_v17  ;;  %v7102_v23 = vadd.f32 -1.0, %v851_v18  ;;  %v837_v24 = vsub.f32 %v829_v1, %v796_v54  ;;  %v6988_v56 = vadd.f32 %v796_v54, %v7396_v10  ;;  %v798_v44 = vpop.f32.mrb[9].mxu0 }
 0x370   : > { %v866_v26 = vmul.f32 0.5, %v7101_v19  ;;  %v7103_v28 = vadd.f32 -1.0, %v852_v43  ;;  %v838_v30 = vsub.f32 %v830_v5, %v798_v44  ;;  %v6989_v32 = vadd.f32 %v798_v44, %v7386_v6  ;;  %v800_v36 = vpop.f32.mrb[10].mxu0 }
 0x371   : > { %873 = vst [vmem:[#allocation2] sm:$0xff] %v865_v22  ;;  %v867_v37 = vmul.f32 0.5, %v7102_v23  ;;  %v845_v38 = vadd.f32 1.0, %v837_v24  ;;  %7004 = vst [vmem:[%s7648_s23 + $0x20] sm:$0xff] %v6988_v56  ;;  %v839_v20 = vsub.f32 %v831_v2, %v800_v36  ;;  %v6990_v10 = vadd.f32 %v800_v36, %v7399_v11  ;;  %v802_v39 = vpop.f32.mrb[11].mxu0 }
 0x372   : > { %874 = vst [vmem:[#allocation2 + $0x8] sm:$0xff] %v866_v26  ;;  %v868_v45 = vmul.f32 0.5, %v7103_v28  ;;  %v846_v46 = vadd.f32 1.0, %v838_v30  ;;  %7005 = vst [vmem:[%s7648_s23 + $0x28] sm:$0xff] %v6989_v32  ;;  %v840_v40 = vsub.f32 %v832_v25, %v802_v39  ;;  %v6991_v50 = vadd.f32 %v802_v39, %v7389_v7 }
 0x373   : > { %875 = vst [vmem:[#allocation2 + $0x10] sm:$0xff] %v867_v37  ;;  %v853_v6 = vmul.f32 16.0, %v845_v38  ;;  %v847_v21 = vadd.f32 1.0, %v839_v20  ;;  %7006 = vst [vmem:[%s7648_s23 + $0x30] sm:$0xff] %v6990_v10 }
 0x374   : > { %876 = vst [vmem:[#allocation2 + $0x18] sm:$0xff] %v868_v45  ;;  %v854_v29 = vmul.f32 16.0, %v846_v46  ;;  %v848_v33 = vadd.f32 1.0, %v840_v40  ;;  %7007 = vst [vmem:[%s7648_s23 + $0x38] sm:$0xff] %v6991_v50 }
 0x375   : > { %v7104_v55 = vadd.f32 -1.0, %v853_v6  ;;  %v855_v11 = vmul.f32 16.0, %v847_v21 }
 0x376   : > { %v7105_v47 = vadd.f32 -1.0, %v854_v29  ;;  %v856_v57 = vmul.f32 16.0, %v848_v33  ;;  %v7685_v58 = vpop.f32.mrb[12].mxu0 }
 0x377   : > { %v869_v59 = vmul.f32 0.5, %v7104_v55  ;;  %881 = vst.msk [vmem:[#allocation3] sm:$0xff] %vm659_vm1, %v7685_v58  ;;  %v7689_v7 = vpop.f32.mrb[13].mxu0  ;;  %889 = vrot.lane.b32.xlu0 %v7685_v58, %s7295_s19  ;;  %v7696_v61 = vadd.f32 -1.0, %v855_v11 }
 0x378   : > { %v870_v0 = vmul.f32 0.5, %v7105_v47  ;;  %v7698_v62 = vadd.f32 -1.0, %v856_v57  ;;  %1009 = vst.msk [vmem:[#allocation3 + $0x100] sm:$0xff] %vm659_vm1, %v7689_v7  ;;  %v7702_v63 = vpop.f32.mrb[14].mxu0 }
 0x379   : > { %877 = vst [vmem:[#allocation2 + $0x20] sm:$0xff] %v869_v59  ;;  %v1143_v31 = vld [vmem:[#allocation2 + $0x1] ss:$8 sm:$0x3]  ;;  %882 = vst.msk [vmem:[#allocation3 + $0x8] sm:$0xff] %vm659_vm1, %v7702_v63  ;;  %891 = vrot.lane.b32.xlu1 %v7702_v63, %s7295_s19  ;;  %v7751_v10 = vpop.f32.mrb[15].mxu0 }
 0x37a   : > { %v1844_v34 = vld [vmem:[#allocation2 + $0x5] ss:$8 sm:$0x3]  ;;  %878 = vst [vmem:[#allocation2 + $0x28] sm:$0xff] %v870_v0  ;;  %v7711_v48 = vrot.slane %v1143_v31, %v7484_v52  ;;  %v7714_v41 = vrot.slane %v1143_v31, %v7487_v53  ;;  %1010 = vst.msk [vmem:[#allocation3 + $0x108] sm:$0xff] %vm659_vm1, %v7751_v10 }
 0x37b   : > { %v7717_v49 = vrot.slane %v1844_v34, %v7484_v52  ;;  %v7720_v4 = vrot.slane %v1844_v34, %v7487_v53  ;;  %v1141_v8 = vld [vmem:[#allocation2] ss:$8 sm:$0x3]  ;;  %v1842_v9 = vld [vmem:[#allocation2 + $0x4] ss:$8 sm:$0x3]  ;;  %906 = vrot.lane.b32.xlu0 %v7685_v58, %s7297_s17 }
 0x37c   : > { %v1148_v12 = vrot.slane %v1141_v8, %v7484_v52  ;;  %v1152_v51 = vrot.slane %v1141_v8, %v7487_v53  ;;  %v1849_v3 = vrot.slane %v1842_v9, %v7484_v52  ;;  %v1853_v13 = vrot.slane %v1842_v9, %v7487_v53  ;;  %v1495_v14 = vld [vmem:[#allocation2 + $0x2] ss:$8 sm:$0x3]  ;;  %v2536_v32 = vld [vmem:[#allocation2 + $0x10] ss:$8 sm:$0x3] }
 0x37d   : > { %v1183_v42 = vsub.f32 %v7694_v60, %v7714_v41  ;;  %v1883_v15 = vsub.f32 %v7694_v60, %v7717_v49  ;;  %v1884_v16 = vsub.f32 %v7694_v60, %v7720_v4  ;;  %v7735_v1 = vrot.slane %v1495_v14, %v7484_v52  ;;  %908 = vrot.lane.b32.xlu1 %v7702_v63, %s7297_s17 }
 0x37e   : > { %v1156_v17 = vsub.f32 %v7694_v60, %v1152_v51  ;;  %v1158_v18 = vsub.f32 %v7704_v27, %v1152_v51  ;;  %v1857_v5 = vsub.f32 %v7694_v60, %v1853_v13  ;;  %v1859_v19 = vsub.f32 %v7704_v27, %v1853_v13 }
 0x37f   : > { %v1187_v43 = vand.u32 2147483647, %v1183_v42  ;;  %v7743_v54 = vand.u32 2147483647, %v1883_v15  ;;  %v1888_v2 = vand.u32 2147483647, %v1884_v16  ;;  %v1155_v22 = vsub.f32 %v7694_v60, %v1148_v12  ;;  %923 = vrot.lane.b32.xlu0 %v7685_v58, %s7298_s18 }
 0x380   : > { %v1160_v23 = vand.u32 2147483647, %v1156_v17  ;;  %v1162_v24 = vand.u32 2147483647, %v1158_v18  ;;  %v1861_v56 = vand.u32 2147483647, %v1857_v5  ;;  %v1157_v44 = vsub.f32 %v7704_v27, %v1148_v12 }
 0x381   : > { %v1191_v25 = vsub.f32 1.0, %v1187_v43  ;;  %v1892_v26 = vsub.f32 1.0, %v1888_v2  ;;  %v1863_v28 = vand.u32 2147483647, %v1859_v19  ;;  %v1159_v30 = vand.u32 2147483647, %v1155_v22  ;;  %925 = vrot.lane.b32.xlu1 %v7702_v63, %s7298_s18 }
 0x382   : > { %v1164_v36 = vsub.f32 1.0, %v1160_v23  ;;  %v1166_v37 = vsub.f32 1.0, %v1162_v24  ;;  %v1865_v38 = vsub.f32 1.0, %v1861_v56  ;;  %v1161_v20 = vand.u32 2147483647, %v1157_v44 }
 0x383   : > { %v1195_v39 = vmax.f32 %v1191_v25, 0.0  ;;  %v1896_v45 = vmax.f32 %v1892_v26, 0.0  ;;  %v1867_v46 = vsub.f32 1.0, %v1863_v28  ;;  %v1163_v40 = vsub.f32 1.0, %v1159_v30  ;;  %940 = vrot.lane.b32.xlu0 %v7685_v58, %s7299_s20 }
 0x384   : > { %v1168_v50 = vmax.f32 %v1164_v36, 0.0  ;;  %v1170_v6 = vmax.f32 %v1166_v37, 0.0  ;;  %v1869_v21 = vmax.f32 %v1865_v38, 0.0  ;;  %v1165_v29 = vsub.f32 1.0, %v1161_v20 }
 0x385   : > { %1262 = vmatprep.mubr.f32.mxu1 %v1195_v39  ;;  %1963 = vmatprep.mubr.f32.mxu0 %v1896_v45  ;;  %v1871_v33 = vmax.f32 %v1867_v46, 0.0  ;;  %v1167_v35 = vmax.f32 %v1163_v40, 0.0  ;;  %v1856_v55 = vsub.f32 %v7694_v60, %v1849_v3  ;;  %v1858_v11 = vsub.f32 %v7704_v27, %v1849_v3 }
 0x386   : > { %v7151_v47 = vpack.c.bf16 %v1170_v6, %v1168_v50  ;;  %v1169_v57 = vmax.f32 %v1165_v29, 0.0  ;;  %v1506_v59 = vrot.slane %v1495_v14, %v7487_v53  ;;  %v7761_v0 = vrot.slane %v2536_v32, %v7484_v52  ;;  %942 = vrot.lane.b32.xlu1 %v7702_v63, %s7299_s20  ;;  %v3230_v6 = vld [vmem:[#allocation2 + $0x14] ss:$8 sm:$0x3] }
 0x387   : > { %v7159_v31 = vpack.c.bf16 %v1871_v33, %v1869_v21  ;;  %v1860_v34 = vand.u32 2147483647, %v1856_v55  ;;  %v1862_v8 = vand.u32 2147483647, %v1858_v11  ;;  %v2547_v9 = vrot.slane %v2536_v32, %v7487_v53  ;;  %957 = vrot.lane.b32.xlu0 %v7685_v58, %s7300_s21 }
 0x388   : > { %7152 = vmatprep.subr.bf16.mxu1 %v7151_v47  ;;  %v7153_v12 = vpack.c.bf16 %v1169_v57, %v1167_v35  ;;  %v1510_v51 = vsub.f32 %v7694_v60, %v1506_v59  ;;  %v1512_v3 = vsub.f32 %v7704_v27, %v1506_v59  ;;  %v871_v13 = vmul.f32 0.5, %v7696_v61 }
 0x389   : > { %7160 = vmatprep.subr.bf16.mxu0 %v7159_v31  ;;  %v1864_v14 = vsub.f32 1.0, %v1860_v34  ;;  %v1866_v42 = vsub.f32 1.0, %v1862_v8  ;;  %v2551_v15 = vsub.f32 %v7694_v60, %v2547_v9  ;;  %v2553_v16 = vsub.f32 %v7704_v27, %v2547_v9  ;;  %v7803_v34 = vpop.f32.mrb[16].mxu0 }
 0x38a   : > { %7154 = vmatpush1.bf16.xpose.msra.mxu1 %v7153_v12  ;;  %v1514_v17 = vand.u32 2147483647, %v1510_v51  ;;  %v1516_v18 = vand.u32 2147483647, %v1512_v3  ;;  %879 = vst [vmem:[#allocation2 + $0x30] sm:$0xff] %v871_v13  ;;  %v1182_v5 = vsub.f32 %v7694_v60, %v7711_v48  ;;  %v1891_v61 = vsub.f32 1.0, %v7743_v54  ;;  %959 = vrot.lane.b32.xlu1 %v7702_v63, %s7300_s21 }
 0x38b   : > { %v1868_v19 = vmax.f32 %v1864_v14, 0.0  ;;  %v1870_v43 = vmax.f32 %v1866_v42, 0.0  ;;  %v2555_v2 = vand.u32 2147483647, %v2551_v15  ;;  %v2557_v22 = vand.u32 2147483647, %v2553_v16  ;;  %974 = vrot.lane.b32.xlu0 %v7685_v58, %s7301_s22 }
 0x38c   : > { %v1518_v23 = vsub.f32 1.0, %v1514_v17  ;;  %v1520_v24 = vsub.f32 1.0, %v1516_v18  ;;  %v1186_v56 = vand.u32 2147483647, %v1182_v5  ;;  %v1895_v44 = vmax.f32 %v1891_v61, 0.0  ;;  %883 = vst.msk [vmem:[#allocation3 + $0x10] sm:$0xff] %vm659_vm1, %v7803_v34 }
 0x38d   : > { %v7161_v25 = vpack.c.bf16 %v1870_v43, %v1868_v19  ;;  %v2559_v26 = vsub.f32 1.0, %v2555_v2  ;;  %v2561_v28 = vsub.f32 1.0, %v2557_v22  ;;  %v872_v54 = vmul.f32 0.5, %v7698_v62  ;;  %v2189_v62 = vld [vmem:[#allocation2 + $0x6] ss:$8 sm:$0x3] }
 0x38e   : > { %v1522_v30 = vmax.f32 %v1518_v23, 0.0  ;;  %v1524_v32 = vmax.f32 %v1520_v24, 0.0  ;;  %v1190_v36 = vsub.f32 1.0, %v1186_v56  ;;  %v1185_v37 = vsub.f32 %v7704_v27, %v7714_v41  ;;  %976 = vrot.lane.b32.xlu1 %v7702_v63, %s7301_s22  ;;  %v1497_v5 = vld [vmem:[#allocation2 + $0x3] ss:$8 sm:$0x3] }
 0x38f   : > { %7162 = vmatpush1.bf16.xpose.msra.mxu0 %v7161_v25  ;;  %v2563_v38 = vmax.f32 %v2559_v26, 0.0  ;;  %v2565_v20 = vmax.f32 %v2561_v28, 0.0  ;;  %880 = vst [vmem:[#allocation2 + $0x38] sm:$0xff] %v872_v54  ;;  %v1509_v39 = vsub.f32 %v7694_v60, %v7735_v1  ;;  %v1511_v45 = vsub.f32 %v7704_v27, %v7735_v1  ;;  %991 = vrot.lane.b32.xlu0 %v7685_v58, %s7290_s14  ;;  %v2538_v28 = vld [vmem:[#allocation2 + $0x11] ss:$8 sm:$0x3] }
 0x390   : > { %v7155_v46 = vpack.c.bf16 %v1524_v32, %v1522_v30  ;;  %v1194_v40 = vmax.f32 %v1190_v36, 0.0  ;;  %v1189_v50 = vand.u32 2147483647, %v1185_v37  ;;  %v1886_v41 = vsub.f32 %v7704_v27, %v7720_v4 }
 0x391   : > { %v7167_v21 = vpack.c.bf16 %v2565_v20, %v2563_v38  ;;  %v1513_v29 = vand.u32 2147483647, %v1509_v39  ;;  %v1515_v33 = vand.u32 2147483647, %v1511_v45  ;;  %v2550_v35 = vsub.f32 %v7694_v60, %v7761_v0 }
 0x392   : > { %7156 = vmatprep.subr.bf16.mxu1 %v7155_v46  ;;  %1263 = vmatmul.mubr.f32.vlgmr.msra.gmra.mrb[4].mxu1 %v1194_v40  ;;  %v1193_v1 = vsub.f32 1.0, %v1189_v50  ;;  %v1890_v55 = vand.u32 2147483647, %v1886_v41  ;;  %v2552_v11 = vsub.f32 %v7704_v27, %v7761_v0  ;;  %v7798_v47 = vrot.slane %v2189_v62, %v7484_v52  ;;  %v7812_v0 = vpop.f32.mrb[17].mxu0 }
 0x393   : > { %7168 = vmatprep.subr.bf16.mxu0 %v7167_v21  ;;  %v1517_v4 = vsub.f32 1.0, %v1513_v29  ;;  %v1519_v57 = vsub.f32 1.0, %v1515_v33  ;;  %v2554_v59 = vand.u32 2147483647, %v2550_v35  ;;  %v2200_v31 = vrot.slane %v2189_v62, %v7487_v53  ;;  %993 = vrot.lane.b32.xlu1 %v7702_v63, %s7290_s14  ;;  %1011 = vst.msk [vmem:[#allocation3 + $0x110] sm:$0xff] %vm659_vm1, %v7812_v0  ;;  %v7832_v37 = vpop.f32.mrb[18].mxu0 }
 0x394   : > { %v1197_v8 = vmax.f32 %v1193_v1, 0.0  ;;  %v1894_v9 = vsub.f32 1.0, %v1890_v55  ;;  %v2556_v12 = vand.u32 2147483647, %v2552_v11  ;;  %v7806_v51 = vrot.slane %v3230_v6, %v7484_v52  ;;  %1017 = vrot.lane.b32.xlu0 %v7689_v7, %s7295_s19  ;;  %10077 = vst [vmem:[#allocation4_spill] sm:$0xff] %v7832_v37  ;;  %884 = vst.msk [vmem:[#allocation3 + $0x18] sm:$0xff] %vm659_vm1, %v7832_v37 }
 0x395   : > { %v1521_v3 = vmax.f32 %v1517_v4, 0.0  ;;  %v1523_v13 = vmax.f32 %v1519_v57, 0.0  ;;  %v2558_v14 = vsub.f32 1.0, %v2554_v59  ;;  %v2204_v42 = vsub.f32 %v7694_v60, %v2200_v31  ;;  %v7847_v55 = vpop.f32.mrb[19].mxu0 }
 0x396   : > { %1964 = vmatmul.mubr.f32.vlgmr.msra.gmra.mrb[20].mxu0 %v1895_v44  ;;  %1267 = vmatprep.mubr.f32.mxu1 %v1197_v8  ;;  %v1898_v15 = vmax.f32 %v1894_v9, 0.0  ;;  %v2560_v16 = vsub.f32 1.0, %v2556_v12  ;;  %v2206_v17 = vsub.f32 %v7704_v27, %v2200_v31  ;;  %v3241_v18 = vrot.slane %v3230_v6, %v7487_v53  ;;  %10078 = vst [vmem:[#allocation5_spill] sm:$0xff] %v7847_v55 }
 0x397   : > { %v7157_v61 = vpack.c.bf16 %v1523_v13, %v1521_v3  ;;  %v2562_v19 = vmax.f32 %v2558_v14, 0.0  ;;  %v2208_v43 = vand.u32 2147483647, %v2204_v42  ;;  %v1184_v2 = vsub.f32 %v7704_v27, %v7711_v48  ;;  %1019 = vrot.lane.b32.xlu1 %v7751_v10, %s7295_s19  ;;  %1012 = vst.msk [vmem:[#allocation3 + $0x118] sm:$0xff] %vm659_vm1, %v7847_v55 }
 0x398   : > { %1968 = vmatprep.mubr.f32.mxu0 %v1898_v15  ;;  %v2564_v22 = vmax.f32 %v2560_v16, 0.0  ;;  %v2210_v23 = vand.u32 2147483647, %v2206_v17  ;;  %v3245_v24 = vsub.f32 %v7694_v60, %v3241_v18  ;;  %v3247_v56 = vsub.f32 %v7704_v27, %v3241_v18  ;;  %1034 = vrot.lane.b32.xlu0 %v7689_v7, %s7297_s17 }
 0x399   : > { %7158 = vmatpush1.bf16.xpose.msra.mxu1 %v7157_v61  ;;  %v2212_v44 = vsub.f32 1.0, %v2208_v43  ;;  %v1188_v25 = vand.u32 2147483647, %v1184_v2  ;;  %v1885_v26 = vsub.f32 %v7704_v27, %v7717_v49  ;;  %v7830_v48 = vrot.slane %v1497_v5, %v7484_v52 }
 0x39a   : > { %v7169_v54 = vpack.c.bf16 %v2564_v22, %v2562_v19  ;;  %v2214_v30 = vsub.f32 1.0, %v2210_v23  ;;  %v3249_v32 = vand.u32 2147483647, %v3245_v24  ;;  %v3251_v36 = vand.u32 2147483647, %v3247_v56 }
 0x39b   : > { %v2216_v38 = vmax.f32 %v2212_v44, 0.0  ;;  %v1192_v20 = vsub.f32 1.0, %v1188_v25  ;;  %v1889_v39 = vand.u32 2147483647, %v1885_v26  ;;  %v1533_v45 = vrot.slane %v1497_v5, %v7487_v53  ;;  %1036 = vrot.lane.b32.xlu1 %v7751_v10, %s7297_s17 }
 0x39c   : > { %7170 = vmatpush1.bf16.xpose.msra.mxu0 %v7169_v54  ;;  %v2218_v49 = vmax.f32 %v2214_v30, 0.0  ;;  %v3253_v62 = vsub.f32 1.0, %v3249_v32  ;;  %v3255_v46 = vsub.f32 1.0, %v3251_v36  ;;  %v1536_v40 = vsub.f32 %v7694_v60, %v7830_v48  ;;  %1051 = vrot.lane.b32.xlu0 %v7689_v7, %s7298_s18  ;;  %v2883_v5 = vld [vmem:[#allocation2 + $0x12] ss:$8 sm:$0x3] }
 0x39d   : > { %v1196_v50 = vmax.f32 %v1192_v20, 0.0  ;;  %v1893_v41 = vsub.f32 1.0, %v1889_v39  ;;  %v1537_v6 = vsub.f32 %v7694_v60, %v1533_v45  ;;  %v7845_v21 = vrot.slane %v2538_v28, %v7484_v52 }
 0x39e   : > { %v7163_v29 = vpack.c.bf16 %v2218_v49, %v2216_v38  ;;  %v3257_v33 = vmax.f32 %v3253_v62, 0.0  ;;  %v3259_v35 = vmax.f32 %v3255_v46, 0.0  ;;  %v1540_v1 = vand.u32 2147483647, %v1536_v40 }
 0x39f   : > { %1268 = vmatmul.mubr.f32.gmra.mrb[6].mxu1 %v1196_v50  ;;  %v1897_v11 = vmax.f32 %v1893_v41, 0.0  ;;  %v1541_v4 = vand.u32 2147483647, %v1537_v6  ;;  %v2574_v57 = vrot.slane %v2538_v28, %v7487_v53  ;;  %v2577_v59 = vsub.f32 %v7694_v60, %v7845_v21  ;;  %1053 = vrot.lane.b32.xlu1 %v7751_v10, %s7298_s18  ;;  %v2191_v28 = vld [vmem:[#allocation2 + $0x7] ss:$8 sm:$0x3] }
 0x3a0   : > { %7164 = vmatprep.subr.bf16.mxu1 %v7163_v29  ;;  %v7175_v31 = vpack.c.bf16 %v3259_v35, %v3257_v33  ;;  %v1544_v8 = vsub.f32 1.0, %v1540_v1  ;;  %v1539_v9 = vsub.f32 %v7704_v27, %v1533_v45  ;;  %v2203_v12 = vsub.f32 %v7694_v60, %v7798_v47  ;;  %1068 = vrot.lane.b32.xlu0 %v7689_v7, %s7299_s20  ;;  %v3232_v29 = vld [vmem:[#allocation2 + $0x15] ss:$8 sm:$0x3] }
 0x3a1   : > { %1969 = vmatmul.mubr.f32.gmra.mrb[22].mxu0 %v1897_v11  ;;  %v1545_v3 = vsub.f32 1.0, %v1541_v4  ;;  %v2578_v13 = vsub.f32 %v7694_v60, %v2574_v57  ;;  %v2581_v14 = vand.u32 2147483647, %v2577_v59  ;;  %v2205_v42 = vsub.f32 %v7704_v27, %v7798_v47 }
 0x3a2   : > { %7176 = vmatprep.subr.bf16.mxu0 %v7175_v31  ;;  %v1548_v15 = vmax.f32 %v1544_v8, 0.0  ;;  %v1543_v16 = vand.u32 2147483647, %v1539_v9  ;;  %v2207_v17 = vand.u32 2147483647, %v2203_v12  ;;  %v2580_v18 = vsub.f32 %v7704_v27, %v2574_v57 }
 0x3a3   : > { %v1549_v61 = vmax.f32 %v1545_v3, 0.0  ;;  %v2582_v19 = vand.u32 2147483647, %v2578_v13  ;;  %v2585_v43 = vsub.f32 1.0, %v2581_v14  ;;  %v2209_v2 = vand.u32 2147483647, %v2205_v42  ;;  %1070 = vrot.lane.b32.xlu1 %v7751_v10, %s7299_s20 }
 0x3a4   : > { %v1547_v22 = vsub.f32 1.0, %v1543_v16  ;;  %v2211_v23 = vsub.f32 1.0, %v2207_v17  ;;  %v2584_v24 = vand.u32 2147483647, %v2580_v18  ;;  %v3244_v47 = vsub.f32 %v7694_v60, %v7806_v51  ;;  %1085 = vrot.lane.b32.xlu0 %v7689_v7, %s7300_s21 }
 0x3a5   : > { %1616 = vmatprep.mubr.f32.mxu1 %v1549_v61  ;;  %v2586_v56 = vsub.f32 1.0, %v2582_v19  ;;  %v2589_v44 = vmax.f32 %v2585_v43, 0.0  ;;  %v2213_v25 = vsub.f32 1.0, %v2209_v2  ;;  %v3246_v26 = vsub.f32 %v7704_v27, %v7806_v51  ;;  %v3924_v42 = vld [vmem:[#allocation2 + $0x20] ss:$8 sm:$0x3] }
 0x3a6   : > { %1617 = vmatmul.mubr.f32.vlgmr.msra.gmra.mrb[8].mxu1 %v1548_v15  ;;  %v1551_v54 = vmax.f32 %v1547_v22, 0.0  ;;  %v2215_v30 = vmax.f32 %v2211_v23, 0.0  ;;  %v2588_v32 = vsub.f32 1.0, %v2584_v24  ;;  %v3248_v36 = vand.u32 2147483647, %v3244_v47 }
 0x3a7   : > { %v2590_v38 = vmax.f32 %v2586_v56, 0.0  ;;  %v2217_v20 = vmax.f32 %v2213_v25, 0.0  ;;  %v3250_v39 = vand.u32 2147483647, %v3246_v26  ;;  %v7874_v45 = vrot.slane %v2883_v5, %v7484_v52  ;;  %1087 = vrot.lane.b32.xlu1 %v7751_v10, %s7300_s21 }
 0x3a8   : > { %1621 = vmatprep.mubr.f32.mxu1 %v1551_v54  ;;  %v2592_v49 = vmax.f32 %v2588_v32, 0.0  ;;  %v3252_v62 = vsub.f32 1.0, %v3248_v36  ;;  %v2894_v51 = vrot.slane %v2883_v5, %v7487_v53  ;;  %v1538_v46 = vsub.f32 %v7704_v27, %v7830_v48  ;;  %1102 = vrot.lane.b32.xlu0 %v7689_v7, %s7301_s22 }
 0x3a9   : > { %2657 = vmatprep.mubr.f32.mxu0 %v2590_v38  ;;  %v7165_v40 = vpack.c.bf16 %v2217_v20, %v2215_v30  ;;  %v3254_v50 = vsub.f32 1.0, %v3250_v39  ;;  %v2579_v41 = vsub.f32 %v7704_v27, %v7845_v21  ;;  %v7886_v6 = vrot.slane %v2191_v28, %v7484_v52 }
 0x3aa   : > { %2658 = vmatmul.mubr.f32.vlgmr.msra.gmra.mrb[24].mxu0 %v2589_v44  ;;  %v3256_v33 = vmax.f32 %v3252_v62, 0.0  ;;  %v2898_v35 = vsub.f32 %v7694_v60, %v2894_v51  ;;  %v2900_v1 = vsub.f32 %v7704_v27, %v2894_v51  ;;  %v1542_v48 = vand.u32 2147483647, %v1538_v46 }
 0x3ab   : > { %7166 = vmatpush1.bf16.xpose.msra.mxu1 %v7165_v40  ;;  %2662 = vmatprep.mubr.f32.mxu0 %v2592_v49  ;;  %v3258_v11 = vmax.f32 %v3254_v50, 0.0  ;;  %v2583_v4 = vand.u32 2147483647, %v2579_v41  ;;  %v2227_v57 = vrot.slane %v2191_v28, %v7487_v53  ;;  %v2230_v21 = vsub.f32 %v7694_v60, %v7886_v6 }
 0x3ac   : > { %v2902_v59 = vand.u32 2147483647, %v2898_v35  ;;  %v2904_v31 = vand.u32 2147483647, %v2900_v1  ;;  %v1546_v8 = vsub.f32 1.0, %v1542_v48  ;;  %v7894_v9 = vrot.slane %v3232_v29, %v7484_v52  ;;  %1104 = vrot.lane.b32.xlu1 %v7751_v10, %s7301_s22  ;;  %1119 = vrot.lane.b32.xlu0 %v7689_v7, %s7290_s14 }
 0x3ad   : > { %v7177_v12 = vpack.c.bf16 %v3258_v11, %v3256_v33  ;;  %v2587_v3 = vsub.f32 1.0, %v2583_v4  ;;  %v2231_v13 = vsub.f32 %v7694_v60, %v2227_v57  ;;  %v2234_v14 = vand.u32 2147483647, %v2230_v21 }
 0x3ae   : > { %v2906_v15 = vsub.f32 1.0, %v2902_v59  ;;  %v2908_v16 = vsub.f32 1.0, %v2904_v31  ;;  %v1550_v17 = vmax.f32 %v1546_v8, 0.0  ;;  %v3268_v18 = vrot.slane %v3232_v29, %v7487_v53  ;;  %v3577_v29 = vld [vmem:[#allocation2 + $0x16] ss:$8 sm:$0x3] }
 0x3af   : > { %7178 = vmatpush1.bf16.xpose.msra.mxu0 %v7177_v12  ;;  %v2591_v5 = vmax.f32 %v2587_v3, 0.0  ;;  %v2235_v61 = vand.u32 2147483647, %v2231_v13  ;;  %v3271_v19 = vsub.f32 %v7694_v60, %v7894_v9  ;;  %v2238_v43 = vsub.f32 1.0, %v2234_v14 }
 0x3b0   : > { %v2910_v2 = vmax.f32 %v2906_v15, 0.0  ;;  %v2912_v22 = vmax.f32 %v2908_v16, 0.0  ;;  %1622 = vmatmul.mubr.f32.gmra.mrb[10].mxu1 %v1550_v17  ;;  %v3272_v23 = vsub.f32 %v7694_v60, %v3268_v18  ;;  %v3931_v24 = vrot.slane %v3924_v42, %v7484_v52  ;;  %1121 = vrot.lane.b32.xlu1 %v7751_v10, %s7290_s14 }
 0x3b1   : > { %2663 = vmatmul.mubr.f32.gmra.mrb[26].mxu0 %v2591_v5  ;;  %v2239_v47 = vsub.f32 1.0, %v2235_v61  ;;  %v3275_v56 = vand.u32 2147483647, %v3271_v19  ;;  %v2242_v44 = vmax.f32 %v2238_v43, 0.0  ;;  %v3935_v25 = vrot.slane %v3924_v42, %v7487_v53  ;;  %893 = vrot.lane.b32.xlu0 %v7803_v34, %s7295_s19 }
 0x3b2   : > { %v7171_v26 = vpack.c.bf16 %v2912_v22, %v2910_v2  ;;  %v3276_v28 = vand.u32 2147483647, %v3272_v23  ;;  %v2233_v54 = vsub.f32 %v7704_v27, %v2227_v57  ;;  %v2897_v30 = vsub.f32 %v7694_v60, %v7874_v45 }
 0x3b3   : > { %v2243_v32 = vmax.f32 %v2239_v47, 0.0  ;;  %v3279_v36 = vsub.f32 1.0, %v3275_v56  ;;  %v3939_v38 = vsub.f32 %v7694_v60, %v3935_v25  ;;  %v3941_v20 = vsub.f32 %v7704_v27, %v3935_v25  ;;  %v3926_v47 = vld [vmem:[#allocation2 + $0x21] ss:$8 sm:$0x3] }
 0x3b4   : > { %7172 = vmatprep.subr.bf16.mxu1 %v7171_v26  ;;  %v3280_v39 = vsub.f32 1.0, %v3276_v28  ;;  %v2237_v49 = vand.u32 2147483647, %v2233_v54  ;;  %v2899_v62 = vsub.f32 %v7704_v27, %v7874_v45  ;;  %v2901_v51 = vand.u32 2147483647, %v2897_v30  ;;  %895 = vrot.lane.b32.xlu1 %v7832_v37, %s7295_s19 }
 0x3b5   : > { %2310 = vmatprep.mubr.f32.mxu1 %v2243_v32  ;;  %v3283_v46 = vmax.f32 %v3279_v36, 0.0  ;;  %v3943_v40 = vand.u32 2147483647, %v3939_v38  ;;  %v3945_v50 = vand.u32 2147483647, %v3941_v20  ;;  %v3274_v41 = vsub.f32 %v7704_v27, %v3268_v18  ;;  %910 = vrot.lane.b32.xlu0 %v7803_v34, %s7297_s17 }
 0x3b6   : > { %v3284_v33 = vmax.f32 %v3280_v39, 0.0  ;;  %2311 = vmatmul.mubr.f32.vlgmr.msra.gmra.mrb[12].mxu1 %v2242_v44  ;;  %v2241_v35 = vsub.f32 1.0, %v2237_v49  ;;  %v2903_v1 = vand.u32 2147483647, %v2899_v62  ;;  %v2905_v48 = vsub.f32 1.0, %v2901_v51 }
 0x3b7   : > { %v3947_v45 = vsub.f32 1.0, %v3943_v40  ;;  %v3949_v11 = vsub.f32 1.0, %v3945_v50  ;;  %v3278_v4 = vand.u32 2147483647, %v3274_v41  ;;  %v3938_v57 = vsub.f32 %v7694_v60, %v3931_v24 }
 0x3b8   : > { %3351 = vmatprep.mubr.f32.mxu0 %v3284_v33  ;;  %v2245_v21 = vmax.f32 %v2241_v35, 0.0  ;;  %v2907_v59 = vsub.f32 1.0, %v2903_v1  ;;  %v2909_v31 = vmax.f32 %v2905_v48, 0.0  ;;  %v3940_v8 = vsub.f32 %v7704_v27, %v3931_v24  ;;  %912 = vrot.lane.b32.xlu1 %v7832_v37, %s7297_s17  ;;  %v2885_v18 = vld [vmem:[#allocation2 + $0x13] ss:$8 sm:$0x3] }
 0x3b9   : > { %3352 = vmatmul.mubr.f32.vlgmr.msra.gmra.mrb[28].mxu0 %v3283_v46  ;;  %v3951_v12 = vmax.f32 %v3947_v45, 0.0  ;;  %v3953_v3 = vmax.f32 %v3949_v11, 0.0  ;;  %v3282_v13 = vsub.f32 1.0, %v3278_v4  ;;  %v3942_v14 = vand.u32 2147483647, %v3938_v57  ;;  %927 = vrot.lane.b32.xlu0 %v7803_v34, %s7298_s18 }
 0x3ba   : > { %2315 = vmatprep.mubr.f32.mxu1 %v2245_v21  ;;  %v2911_v42 = vmax.f32 %v2907_v59, 0.0  ;;  %v3944_v15 = vand.u32 2147483647, %v3940_v8  ;;  %v7930_v16 = vrot.slane %v3577_v29, %v7484_v52  ;;  %v3588_v17 = vrot.slane %v3577_v29, %v7487_v53  ;;  %v4618_v51 = vld [vmem:[#allocation2 + $0x24] ss:$8 sm:$0x3] }
 0x3bb   : > { %v7183_v5 = vpack.c.bf16 %v3953_v3, %v3951_v12  ;;  %v3286_v61 = vmax.f32 %v3282_v13, 0.0  ;;  %v3946_v19 = vsub.f32 1.0, %v3942_v14  ;;  %v2232_v43 = vsub.f32 %v7704_v27, %v7886_v6 }
 0x3bc   : > { %v7173_v2 = vpack.c.bf16 %v2911_v42, %v2909_v31  ;;  %v3948_v22 = vsub.f32 1.0, %v3944_v15  ;;  %v3592_v23 = vsub.f32 %v7694_v60, %v3588_v17  ;;  %v3594_v24 = vsub.f32 %v7704_v27, %v3588_v17  ;;  %929 = vrot.lane.b32.xlu1 %v7832_v37, %s7298_s18 }
 0x3bd   : > { %7184 = vmatprep.subr.bf16.mxu0 %v7183_v5  ;;  %3356 = vmatprep.mubr.f32.mxu0 %v3286_v61  ;;  %v3950_v56 = vmax.f32 %v3946_v19, 0.0  ;;  %v2236_v44 = vand.u32 2147483647, %v2232_v43  ;;  %v3273_v25 = vsub.f32 %v7704_v27, %v7894_v9  ;;  %v7942_v26 = vrot.slane %v2885_v18, %v7484_v52 }
 0x3be   : > { %7174 = vmatpush1.bf16.xpose.msra.mxu1 %v7173_v2  ;;  %v3952_v6 = vmax.f32 %v3948_v22, 0.0  ;;  %v3596_v28 = vand.u32 2147483647, %v3592_v23  ;;  %v3598_v54 = vand.u32 2147483647, %v3594_v24  ;;  %v2921_v30 = vrot.slane %v2885_v18, %v7487_v53  ;;  %944 = vrot.lane.b32.xlu0 %v7803_v34, %s7299_s20 }
 0x3bf   : > { %v2240_v32 = vsub.f32 1.0, %v2236_v44  ;;  %v3277_v36 = vand.u32 2147483647, %v3273_v25  ;;  %v2924_v38 = vsub.f32 %v7694_v60, %v7942_v26  ;;  %v7950_v20 = vrot.slane %v3926_v47, %v7484_v52 }
 0x3c0   : > { %v7185_v9 = vpack.c.bf16 %v3952_v6, %v3950_v56  ;;  %v3600_v39 = vsub.f32 1.0, %v3596_v28  ;;  %v3602_v49 = vsub.f32 1.0, %v3598_v54  ;;  %v2925_v62 = vsub.f32 %v7694_v60, %v2921_v30  ;;  %946 = vrot.lane.b32.xlu1 %v7832_v37, %s7299_s20 }
 0x3c1   : > { %v2244_v46 = vmax.f32 %v2240_v32, 0.0  ;;  %v3281_v40 = vsub.f32 1.0, %v3277_v36  ;;  %v2928_v50 = vand.u32 2147483647, %v2924_v38  ;;  %v3962_v41 = vrot.slane %v3926_v47, %v7487_v53 }
 0x3c2   : > { %7186 = vmatpush1.bf16.xpose.msra.mxu0 %v7185_v9  ;;  %v3604_v29 = vmax.f32 %v3600_v39, 0.0  ;;  %v3606_v33 = vmax.f32 %v3602_v49, 0.0  ;;  %v2929_v35 = vand.u32 2147483647, %v2925_v62  ;;  %v3965_v1 = vsub.f32 %v7694_v60, %v7950_v20  ;;  %961 = vrot.lane.b32.xlu0 %v7803_v34, %s7300_s21 }
 0x3c3   : > { %2316 = vmatmul.mubr.f32.gmra.mrb[14].mxu1 %v2244_v46  ;;  %v3285_v48 = vmax.f32 %v3281_v40, 0.0  ;;  %v3966_v45 = vsub.f32 %v7694_v60, %v3962_v41  ;;  %v2932_v11 = vsub.f32 1.0, %v2928_v50  ;;  %v4625_v4 = vrot.slane %v4618_v51, %v7484_v52  ;;  %v3579_v38 = vld [vmem:[#allocation2 + $0x17] ss:$8 sm:$0x3] }
 0x3c4   : > { %v7179_v57 = vpack.c.bf16 %v3606_v33, %v3604_v29  ;;  %v2933_v21 = vsub.f32 1.0, %v2929_v35  ;;  %v3969_v59 = vand.u32 2147483647, %v3965_v1  ;;  %v4629_v31 = vrot.slane %v4618_v51, %v7487_v53  ;;  %963 = vrot.lane.b32.xlu1 %v7832_v37, %s7300_s21  ;;  %v4620_v29 = vld [vmem:[#allocation2 + $0x25] ss:$8 sm:$0x3] }
 0x3c5   : > { %3357 = vmatmul.mubr.f32.gmra.mrb[30].mxu0 %v3285_v48  ;;  %v3970_v8 = vand.u32 2147483647, %v3966_v45  ;;  %v2936_v12 = vmax.f32 %v2932_v11, 0.0  ;;  %v2927_v3 = vsub.f32 %v7704_v27, %v2921_v30  ;;  %v3591_v13 = vsub.f32 %v7694_v60, %v7930_v16 }
 0x3c6   : > { %7180 = vmatprep.subr.bf16.mxu1 %v7179_v57  ;;  %v2937_v14 = vmax.f32 %v2933_v21, 0.0  ;;  %v3973_v42 = vsub.f32 1.0, %v3969_v59  ;;  %v4633_v15 = vsub.f32 %v7694_v60, %v4629_v31  ;;  %v4635_v17 = vsub.f32 %v7704_v27, %v4629_v31  ;;  %978 = vrot.lane.b32.xlu0 %v7803_v34, %s7301_s22  ;;  %v4271_v59 = vld [vmem:[#allocation2 + $0x22] ss:$8 sm:$0x3] }
 0x3c7   : > { %v3974_v18 = vsub.f32 1.0, %v3970_v8  ;;  %v2931_v5 = vand.u32 2147483647, %v2927_v3  ;;  %v3593_v61 = vsub.f32 %v7704_v27, %v7930_v16  ;;  %v3595_v19 = vand.u32 2147483647, %v3591_v13 }
 0x3c8   : > { %3004 = vmatprep.mubr.f32.mxu1 %v2937_v14  ;;  %v3977_v43 = vmax.f32 %v3973_v42, 0.0  ;;  %v4637_v2 = vand.u32 2147483647, %v4633_v15  ;;  %v4639_v22 = vand.u32 2147483647, %v4635_v17  ;;  %v4632_v23 = vsub.f32 %v7694_v60, %v4625_v4  ;;  %980 = vrot.lane.b32.xlu1 %v7832_v37, %s7301_s22 }
 0x3c9   : > { %v3978_v24 = vmax.f32 %v3974_v18, 0.0  ;;  %3005 = vmatmul.mubr.f32.vlgmr.msra.gmra.mrb[16].mxu1 %v2936_v12  ;;  %v2935_v47 = vsub.f32 1.0, %v2931_v5  ;;  %v3597_v56 = vand.u32 2147483647, %v3593_v61  ;;  %v3599_v44 = vsub.f32 1.0, %v3595_v19 }
 0x3ca   : > { %v4641_v25 = vsub.f32 1.0, %v4637_v2  ;;  %v4643_v6 = vsub.f32 1.0, %v4639_v22  ;;  %v4634_v28 = vsub.f32 %v7704_v27, %v4625_v4  ;;  %v4636_v16 = vand.u32 2147483647, %v4632_v23  ;;  %995 = vrot.lane.b32.xlu0 %v7803_v34, %s7290_s14 }
 0x3cb   : > { %4045 = vmatprep.mubr.f32.mxu0 %v3978_v24  ;;  %v2939_v54 = vmax.f32 %v2935_v47, 0.0  ;;  %v3601_v30 = vsub.f32 1.0, %v3597_v56  ;;  %v3603_v32 = vmax.f32 %v3599_v44, 0.0  ;;  %v3968_v36 = vsub.f32 %v7704_v27, %v3962_v41  ;;  %v5312_v17 = vld [vmem:[#allocation2 + $0x30] ss:$8 sm:$0x3] }
 0x3cc   : > { %4046 = vmatmul.mubr.f32.vlgmr.msra.gmra.mrb[32].mxu0 %v3977_v43  ;;  %v4645_v9 = vmax.f32 %v4641_v25, 0.0  ;;  %v4647_v39 = vmax.f32 %v4643_v6, 0.0  ;;  %v4638_v49 = vand.u32 2147483647, %v4634_v28  ;;  %v4640_v62 = vsub.f32 1.0, %v4636_v16  ;;  %997 = vrot.lane.b32.xlu1 %v7832_v37, %s7290_s14 }
 0x3cd   : > { %3009 = vmatprep.mubr.f32.mxu1 %v2939_v54  ;;  %v3605_v51 = vmax.f32 %v3601_v30, 0.0  ;;  %v3972_v46 = vand.u32 2147483647, %v3968_v36  ;;  %v2926_v40 = vsub.f32 %v7704_v27, %v7942_v26  ;;  %v3967_v50 = vsub.f32 %v7704_v27, %v7950_v20 }
 0x3ce   : > { %v7191_v41 = vpack.c.bf16 %v4647_v39, %v4645_v9  ;;  %v4642_v33 = vsub.f32 1.0, %v4638_v49  ;;  %v4644_v35 = vmax.f32 %v4640_v62, 0.0  ;;  %v7988_v1 = vrot.slane %v3579_v38, %v7484_v52  ;;  %1021 = vrot.lane.b32.xlu0 %v7812_v0, %s7295_s19 }
 0x3cf   : > { %v7181_v48 = vpack.c.bf16 %v3605_v51, %v3603_v32  ;;  %v3976_v45 = vsub.f32 1.0, %v3972_v46  ;;  %v2930_v11 = vand.u32 2147483647, %v2926_v40  ;;  %v3971_v4 = vand.u32 2147483647, %v3967_v50 }
 0x3d0   : > { %7192 = vmatprep.subr.bf16.mxu0 %v7191_v41  ;;  %v4646_v57 = vmax.f32 %v4642_v33, 0.0  ;;  %v3615_v26 = vrot.slane %v3579_v38, %v7487_v53  ;;  %v3618_v20 = vsub.f32 %v7694_v60, %v7988_v1  ;;  %v7996_v21 = vrot.slane %v4620_v29, %v7484_v52  ;;  %1023 = vrot.lane.b32.xlu1 %v7847_v55, %s7295_s19 }
 0x3d1   : > { %7182 = vmatpush1.bf16.xpose.msra.mxu1 %v7181_v48  ;;  %v3980_v31 = vmax.f32 %v3976_v45, 0.0  ;;  %v2934_v8 = vsub.f32 1.0, %v2930_v11  ;;  %v3975_v12 = vsub.f32 1.0, %v3971_v4  ;;  %v8001_v3 = vrot.slane %v4620_v29, %v7487_v53 }
 0x3d2   : > { %v7193_v13 = vpack.c.bf16 %v4646_v57, %v4644_v35  ;;  %v3619_v14 = vsub.f32 %v7694_v60, %v3615_v26  ;;  %v3622_v42 = vand.u32 2147483647, %v3618_v20  ;;  %v4659_v15 = vsub.f32 %v7694_v60, %v7996_v21  ;;  %1038 = vrot.lane.b32.xlu0 %v7812_v0, %s7297_s17 }
 0x3d3   : > { %4050 = vmatprep.mubr.f32.mxu0 %v3980_v31  ;;  %v2938_v18 = vmax.f32 %v2934_v8, 0.0  ;;  %v3979_v5 = vmax.f32 %v3975_v12, 0.0  ;;  %v4660_v61 = vsub.f32 %v7694_v60, %v8001_v3  ;;  %v4278_v19 = vrot.slane %v4271_v59, %v7484_v52 }
 0x3d4   : > { %7194 = vmatpush1.bf16.xpose.msra.mxu0 %v7193_v13  ;;  %v3623_v43 = vand.u32 2147483647, %v3619_v14  ;;  %v4663_v2 = vand.u32 2147483647, %v4659_v15  ;;  %v3626_v22 = vsub.f32 1.0, %v3622_v42  ;;  %v4282_v23 = vrot.slane %v4271_v59, %v7487_v53  ;;  %1040 = vrot.lane.b32.xlu1 %v7847_v55, %s7297_s17 }
 0x3d5   : > { %3010 = vmatmul.mubr.f32.gmra.mrb[18].mxu1 %v2938_v18  ;;  %4051 = vmatmul.mubr.f32.gmra.mrb[34].mxu0 %v3979_v5  ;;  %v4664_v24 = vand.u32 2147483647, %v4660_v61  ;;  %v5319_v47 = vrot.slane %v5312_v17, %v7484_v52  ;;  %v5323_v56 = vrot.slane %v5312_v17, %v7487_v53  ;;  %v3621_v44 = vsub.f32 %v7704_v27, %v3615_v26  ;;  %v4273_v13 = vld [vmem:[#allocation2 + $0x23] ss:$8 sm:$0x3] }
 0x3d6   : > { %v3627_v25 = vsub.f32 1.0, %v3623_v43  ;;  %v3630_v6 = vmax.f32 %v3626_v22, 0.0  ;;  %v4286_v28 = vsub.f32 %v7694_v60, %v4282_v23  ;;  %v4288_v16 = vsub.f32 %v7704_v27, %v4282_v23  ;;  %1055 = vrot.lane.b32.xlu0 %v7812_v0, %s7298_s18 }
 0x3d7   : > { %v4668_v54 = vsub.f32 1.0, %v4664_v24  ;;  %v4667_v30 = vsub.f32 1.0, %v4663_v2  ;;  %v5327_v32 = vsub.f32 %v7694_v60, %v5323_v56  ;;  %v5329_v36 = vsub.f32 %v7704_v27, %v5323_v56 }
 0x3d8   : > { %v3631_v38 = vmax.f32 %v3627_v25, 0.0  ;;  %v4290_v9 = vand.u32 2147483647, %v4286_v28  ;;  %v4292_v39 = vand.u32 2147483647, %v4288_v16  ;;  %v4285_v49 = vsub.f32 %v7694_v60, %v4278_v19  ;;  %1057 = vrot.lane.b32.xlu1 %v7847_v55, %s7298_s18 }
 0x3d9   : > { %v4672_v62 = vmax.f32 %v4668_v54, 0.0  ;;  %v4671_v51 = vmax.f32 %v4667_v30, 0.0  ;;  %v5331_v46 = vand.u32 2147483647, %v5327_v32  ;;  %v5333_v40 = vand.u32 2147483647, %v5329_v36 }
 0x3da   : > { %3698 = vmatprep.mubr.f32.mxu1 %v3631_v38  ;;  %v4294_v50 = vsub.f32 1.0, %v4290_v9  ;;  %v4296_v29 = vsub.f32 1.0, %v4292_v39  ;;  %v3625_v41 = vand.u32 2147483647, %v3621_v44  ;;  %v4287_v33 = vsub.f32 %v7704_v27, %v4278_v19  ;;  %1072 = vrot.lane.b32.xlu0 %v7812_v0, %s7299_s20 }
 0x3db   : > { %4739 = vmatprep.mubr.f32.mxu0 %v4672_v62  ;;  %3699 = vmatmul.mubr.f32.vlgmr.msra.gmra.mrb[20].mxu1 %v3630_v6  ;;  %v5335_v35 = vsub.f32 1.0, %v5331_v46  ;;  %v5337_v48 = vsub.f32 1.0, %v5333_v40  ;;  %v4289_v45 = vand.u32 2147483647, %v4285_v49  ;;  %v5326_v11 = vsub.f32 %v7694_v60, %v5319_v47 }
 0x3dc   : > { %v4298_v4 = vmax.f32 %v4294_v50, 0.0  ;;  %v4300_v57 = vmax.f32 %v4296_v29, 0.0  ;;  %4740 = vmatmul.mubr.f32.vlgmr.msra.gmra.mrb[36].mxu0 %v4671_v51  ;;  %v3629_v26 = vsub.f32 1.0, %v3625_v41  ;;  %v4291_v20 = vand.u32 2147483647, %v4287_v33  ;;  %1074 = vrot.lane.b32.xlu1 %v7847_v55, %s7299_s20 }
 0x3dd   : > { %v5339_v59 = vmax.f32 %v5335_v35, 0.0  ;;  %v5341_v31 = vmax.f32 %v5337_v48, 0.0  ;;  %v4293_v8 = vsub.f32 1.0, %v4289_v45  ;;  %v5328_v12 = vsub.f32 %v7704_v27, %v5319_v47  ;;  %v4965_v32 = vld [vmem:[#allocation2 + $0x26] ss:$8 sm:$0x3] }
 0x3de   : > { %v7187_v14 = vpack.c.bf16 %v4300_v57, %v4298_v4  ;;  %v3633_v42 = vmax.f32 %v3629_v26, 0.0  ;;  %v4295_v15 = vsub.f32 1.0, %v4291_v20  ;;  %v5330_v17 = vand.u32 2147483647, %v5326_v11  ;;  %1089 = vrot.lane.b32.xlu0 %v7812_v0, %s7300_s21 }
 0x3df   : > { %v7199_v18 = vpack.c.bf16 %v5341_v31, %v5339_v59  ;;  %v4297_v5 = vmax.f32 %v4293_v8, 0.0  ;;  %v5332_v61 = vand.u32 2147483647, %v5328_v12  ;;  %v4662_v19 = vsub.f32 %v7704_v27, %v8001_v3  ;;  %v5314_v3 = vld [vmem:[#allocation2 + $0x31] ss:$8 sm:$0x3] }
 0x3e0   : > { %7188 = vmatprep.subr.bf16.mxu1 %v7187_v14  ;;  %3703 = vmatprep.mubr.f32.mxu1 %v3633_v42  ;;  %v4299_v43 = vmax.f32 %v4295_v15, 0.0  ;;  %v5334_v2 = vsub.f32 1.0, %v5330_v17  ;;  %v3620_v22 = vsub.f32 %v7704_v27, %v7988_v1  ;;  %v4661_v23 = vsub.f32 %v7704_v27, %v7996_v21  ;;  %v6006_v49 = vld [vmem:[#allocation2 + $0x34] ss:$8 sm:$0x3] }
 0x3e1   : > { %7200 = vmatprep.subr.bf16.mxu0 %v7199_v18  ;;  %v5336_v24 = vsub.f32 1.0, %v5332_v61  ;;  %v4666_v47 = vand.u32 2147483647, %v4662_v19  ;;  %v8042_v56 = vrot.slane %v4273_v13, %v7484_v52  ;;  %v8045_v44 = vrot.slane %v4273_v13, %v7487_v53  ;;  %1091 = vrot.lane.b32.xlu1 %v7847_v55, %s7300_s21 }
 0x3e2   : > { %v7189_v25 = vpack.c.bf16 %v4299_v43, %v4297_v5  ;;  %v5338_v6 = vmax.f32 %v5334_v2, 0.0  ;;  %v3624_v28 = vand.u32 2147483647, %v3620_v22  ;;  %v4665_v1 = vand.u32 2147483647, %v4661_v23  ;;  %1106 = vrot.lane.b32.xlu0 %v7812_v0, %s7301_s22 }
 0x3e3   : > { %v5340_v21 = vmax.f32 %v5336_v24, 0.0  ;;  %v4670_v16 = vsub.f32 1.0, %v4666_v47  ;;  %v4312_v54 = vsub.f32 %v7694_v60, %v8042_v56  ;;  %v4313_v30 = vsub.f32 %v7694_v60, %v8045_v44 }
 0x3e4   : > { %7190 = vmatpush1.bf16.xpose.msra.mxu1 %v7189_v25  ;;  %v3628_v36 = vsub.f32 1.0, %v3624_v28  ;;  %v4669_v38 = vsub.f32 1.0, %v4665_v1  ;;  %v8056_v9 = vrot.slane %v5314_v3, %v7484_v52  ;;  %v8059_v39 = vrot.slane %v5314_v3, %v7487_v53 }
 0x3e5   : > { %v7201_v62 = vpack.c.bf16 %v5340_v21, %v5338_v6  ;;  %v4674_v51 = vmax.f32 %v4670_v16, 0.0  ;;  %v4316_v46 = vand.u32 2147483647, %v4312_v54  ;;  %v4317_v40 = vand.u32 2147483647, %v4313_v30  ;;  %1108 = vrot.lane.b32.xlu1 %v7847_v55, %s7301_s22 }
 0x3e6   : > { %v3632_v50 = vmax.f32 %v3628_v36, 0.0  ;;  %v4673_v29 = vmax.f32 %v4669_v38, 0.0  ;;  %v5353_v41 = vsub.f32 %v7694_v60, %v8056_v9  ;;  %v5354_v33 = vsub.f32 %v7694_v60, %v8059_v39  ;;  %1123 = vrot.lane.b32.xlu0 %v7812_v0, %s7290_s14 }
 0x3e7   : > { %7202 = vmatpush1.bf16.xpose.msra.mxu0 %v7201_v62  ;;  %4744 = vmatprep.mubr.f32.mxu0 %v4674_v51  ;;  %v4321_v35 = vsub.f32 1.0, %v4317_v40  ;;  %v4320_v48 = vsub.f32 1.0, %v4316_v46  ;;  %v4972_v45 = vrot.slane %v4965_v32, %v7484_v52  ;;  %v4976_v11 = vrot.slane %v4965_v32, %v7487_v53 }
 0x3e8   : > { %3704 = vmatmul.mubr.f32.gmra.mrb[22].mxu1 %v3632_v50  ;;  %4745 = vmatmul.mubr.f32.gmra.mrb[38].mxu0 %v4673_v29  ;;  %v5357_v4 = vand.u32 2147483647, %v5353_v41  ;;  %v5358_v57 = vand.u32 2147483647, %v5354_v33  ;;  %v6013_v26 = vrot.slane %v6006_v49, %v7484_v52  ;;  %v6017_v20 = vrot.slane %v6006_v49, %v7487_v53 }
 0x3e9   : > { %v4325_v59 = vmax.f32 %v4321_v35, 0.0  ;;  %v4324_v31 = vmax.f32 %v4320_v48, 0.0  ;;  %v4980_v8 = vsub.f32 %v7694_v60, %v4976_v11  ;;  %v4982_v12 = vsub.f32 %v7704_v27, %v4976_v11  ;;  %1125 = vrot.lane.b32.xlu1 %v7847_v55, %s7290_s14  ;;  %v890_v17 = vpop.permute.xlu0 %889  ;;  %v4967_v35 = vld [vmem:[#allocation2 + $0x27] ss:$8 sm:$0x3] }
 0x3ea   : > { %v5362_v13 = vsub.f32 1.0, %v5358_v57  ;;  %v5361_v14 = vsub.f32 1.0, %v5357_v4  ;;  %v6021_v42 = vsub.f32 %v7694_v60, %v6017_v20  ;;  %v6023_v15 = vsub.f32 %v7704_v27, %v6017_v20  ;;  %902 = vst.msk [vmem:[#allocation3 + $0x20] sm:$0xff] %vm659_vm1, %v890_v17 }
 0x3eb   : > { %4392 = vmatprep.mubr.f32.mxu1 %v4325_v59  ;;  %v4984_v18 = vand.u32 2147483647, %v4980_v8  ;;  %v4986_v5 = vand.u32 2147483647, %v4982_v12  ;;  %v4979_v61 = vsub.f32 %v7694_v60, %v4972_v45  ;;  %v4981_v19 = vsub.f32 %v7704_v27, %v4972_v45  ;;  %v892_v24 = vpop.permute.xlu1 %891 }
 0x3ec   : > { %v5366_v43 = vmax.f32 %v5362_v13, 0.0  ;;  %4393 = vmatmul.mubr.f32.vlgmr.msra.gmra.mrb[24].mxu1 %v4324_v31  ;;  %v5365_v2 = vmax.f32 %v5361_v14, 0.0  ;;  %v6025_v22 = vand.u32 2147483647, %v6021_v42  ;;  %v6027_v23 = vand.u32 2147483647, %v6023_v15 }
 0x3ed   : > { %v4988_v47 = vsub.f32 1.0, %v4984_v18  ;;  %v4990_v3 = vsub.f32 1.0, %v4986_v5  ;;  %v4983_v25 = vand.u32 2147483647, %v4979_v61  ;;  %v4985_v6 = vand.u32 2147483647, %v4981_v19  ;;  %v907_v54 = vpop.permute.xlu0 %906 }
 0x3ee   : > { %903 = vst.msk [vmem:[#allocation3 + $0x28] sm:$0xff] %vm659_vm1, %v892_v24  ;;  %5433 = vmatprep.mubr.f32.mxu0 %v5366_v43  ;;  %v6029_v28 = vsub.f32 1.0, %v6025_v22  ;;  %v6031_v1 = vsub.f32 1.0, %v6027_v23  ;;  %v6020_v21 = vsub.f32 %v7694_v60, %v6013_v26  ;;  %v6022_v16 = vsub.f32 %v7704_v27, %v6013_v26  ;;  %919 = vst.msk [vmem:[#allocation3 + $0x40] sm:$0xff] %vm659_vm1, %v907_v54 }
 0x3ef   : > { %v4992_v30 = vmax.f32 %v4988_v47, 0.0  ;;  %v4994_v32 = vmax.f32 %v4990_v3, 0.0  ;;  %5434 = vmatmul.mubr.f32.vlgmr.msra.gmra.mrb[40].mxu0 %v5365_v2  ;;  %v4987_v36 = vsub.f32 1.0, %v4983_v25  ;;  %v4989_v38 = vsub.f32 1.0, %v4985_v6  ;;  %v909_v40 = vpop.permute.xlu1 %908 }
 0x3f0   : > { %v6033_v49 = vmax.f32 %v6029_v28, 0.0  ;;  %v6035_v62 = vmax.f32 %v6031_v1, 0.0  ;;  %v6024_v51 = vand.u32 2147483647, %v6020_v21  ;;  %v6026_v46 = vand.u32 2147483647, %v6022_v16 }
 0x3f1   : > { %v7195_v50 = vpack.c.bf16 %v4994_v32, %v4992_v30  ;;  %v4991_v29 = vmax.f32 %v4987_v36, 0.0  ;;  %v4993_v41 = vmax.f32 %v4989_v38, 0.0  ;;  %v4315_v33 = vsub.f32 %v7704_v27, %v8045_v44  ;;  %920 = vst.msk [vmem:[#allocation3 + $0x48] sm:$0xff] %vm659_vm1, %v909_v40  ;;  %v924_v57 = vpop.permute.xlu0 %923  ;;  %v6008_v44 = vld [vmem:[#allocation2 + $0x35] ss:$8 sm:$0x3] }
 0x3f2   : > { %v7207_v48 = vpack.c.bf16 %v6035_v62, %v6033_v49  ;;  %v6028_v45 = vsub.f32 1.0, %v6024_v51  ;;  %v6030_v11 = vsub.f32 1.0, %v6026_v46  ;;  %v5356_v4 = vsub.f32 %v7704_v27, %v8059_v39  ;;  %936 = vst.msk [vmem:[#allocation3 + $0x60] sm:$0xff] %vm659_vm1, %v924_v57  ;;  %v5659_v19 = vld [vmem:[#allocation2 + $0x32] ss:$8 sm:$0x3] }
 0x3f3   : > { %7196 = vmatprep.subr.bf16.mxu1 %v7195_v50  ;;  %v7197_v26 = vpack.c.bf16 %v4993_v41, %v4991_v29  ;;  %v4319_v20 = vand.u32 2147483647, %v4315_v33  ;;  %v4314_v59 = vsub.f32 %v7704_v27, %v8042_v56  ;;  %v5355_v31 = vsub.f32 %v7704_v27, %v8056_v9  ;;  %v926_v39 = vpop.permute.xlu1 %925 }
 0x3f4   : > { %7208 = vmatprep.subr.bf16.mxu0 %v7207_v48  ;;  %v6032_v8 = vmax.f32 %v6028_v45, 0.0  ;;  %v6034_v12 = vmax.f32 %v6030_v11, 0.0  ;;  %v5360_v13 = vand.u32 2147483647, %v5356_v4  ;;  %v8097_v14 = vrot.slane %v4967_v35, %v7484_v52  ;;  %937 = vst.msk [vmem:[#allocation3 + $0x68] sm:$0xff] %vm659_vm1, %v926_v39 }
 0x3f5   : > { %7198 = vmatpush1.bf16.xpose.msra.mxu1 %v7197_v26  ;;  %v4323_v42 = vsub.f32 1.0, %v4319_v20  ;;  %v4318_v15 = vand.u32 2147483647, %v4314_v59  ;;  %v5359_v17 = vand.u32 2147483647, %v5355_v31  ;;  %v5003_v56 = vrot.slane %v4967_v35, %v7487_v53  ;;  %v941_v43 = vpop.permute.xlu0 %940 }
 0x3f6   : > { %v7209_v9 = vpack.c.bf16 %v6034_v12, %v6032_v8  ;;  %v5364_v18 = vsub.f32 1.0, %v5360_v13  ;;  %v5006_v5 = vsub.f32 %v7694_v60, %v8097_v14  ;;  %v8104_v61 = vrot.slane %v6008_v44, %v7484_v52  ;;  %953 = vst.msk [vmem:[#allocation3 + $0x80] sm:$0xff] %vm659_vm1, %v941_v43  ;;  %v5661_v31 = vld [vmem:[#allocation2 + $0x33] ss:$8 sm:$0x3] }
 0x3f7   : > { %v4327_v2 = vmax.f32 %v4323_v42, 0.0  ;;  %v4322_v22 = vsub.f32 1.0, %v4318_v15  ;;  %v5363_v23 = vsub.f32 1.0, %v5359_v17  ;;  %v5007_v24 = vsub.f32 %v7694_v60, %v5003_v56 }
 0x3f8   : > { %7210 = vmatpush1.bf16.xpose.msra.mxu0 %v7209_v9  ;;  %v5368_v47 = vmax.f32 %v5364_v18, 0.0  ;;  %v5010_v3 = vand.u32 2147483647, %v5006_v5  ;;  %v6044_v25 = vrot.slane %v6008_v44, %v7487_v53  ;;  %v6047_v6 = vsub.f32 %v7694_v60, %v8104_v61  ;;  %v943_v28 = vpop.permute.xlu1 %942 }
 0x3f9   : > { %4397 = vmatprep.mubr.f32.mxu1 %v4327_v2  ;;  %v4326_v1 = vmax.f32 %v4322_v22, 0.0  ;;  %v5367_v21 = vmax.f32 %v5363_v23, 0.0  ;;  %v5011_v16 = vand.u32 2147483647, %v5007_v24  ;;  %v5666_v54 = vrot.slane %v5659_v19, %v7484_v52  ;;  %954 = vst.msk [vmem:[#allocation3 + $0x88] sm:$0xff] %vm659_vm1, %v943_v28  ;;  %v958_v49 = vpop.permute.xlu0 %957 }
 0x3fa   : > { %5438 = vmatprep.mubr.f32.mxu0 %v5368_v47  ;;  %v6048_v30 = vsub.f32 %v7694_v60, %v6044_v25  ;;  %v6051_v32 = vand.u32 2147483647, %v6047_v6  ;;  %v5014_v36 = vsub.f32 1.0, %v5010_v3  ;;  %v5670_v38 = vrot.slane %v5659_v19, %v7487_v53  ;;  %970 = vst.msk [vmem:[#allocation3 + $0xa0] sm:$0xff] %vm659_vm1, %v958_v49 }
 0x3fb   : > { %4398 = vmatmul.mubr.f32.gmra.mrb[26].mxu1 %v4326_v1  ;;  %5439 = vmatmul.mubr.f32.gmra.mrb[42].mxu0 %v5367_v21  ;;  %v5015_v62 = vsub.f32 1.0, %v5011_v16  ;;  %v5673_v51 = vsub.f32 %v7694_v60, %v5666_v54  ;;  %v5675_v46 = vsub.f32 %v7704_v27, %v5666_v54  ;;  %v5009_v40 = vsub.f32 %v7704_v27, %v5003_v56  ;;  %v6353_v47 = vld [vmem:[#allocation2 + $0x36] ss:$8 sm:$0x3] }
 0x3fc   : > { %v6052_v50 = vand.u32 2147483647, %v6048_v30  ;;  %v5018_v29 = vmax.f32 %v5014_v36, 0.0  ;;  %v5674_v41 = vsub.f32 %v7694_v60, %v5670_v38  ;;  %v5676_v33 = vsub.f32 %v7704_v27, %v5670_v38  ;;  %v960_v35 = vpop.permute.xlu1 %959 }
 0x3fd   : > { %v5019_v48 = vmax.f32 %v5015_v62, 0.0  ;;  %v6055_v45 = vsub.f32 1.0, %v6051_v32  ;;  %v5677_v11 = vand.u32 2147483647, %v5673_v51  ;;  %v5679_v4 = vand.u32 2147483647, %v5675_v46  ;;  %v975_v44 = vpop.permute.xlu0 %974 }
 0x3fe   : > { %971 = vst.msk [vmem:[#allocation3 + $0xa8] sm:$0xff] %vm659_vm1, %v960_v35  ;;  %v6056_v57 = vsub.f32 1.0, %v6052_v50  ;;  %v5678_v26 = vand.u32 2147483647, %v5674_v41  ;;  %v5680_v20 = vand.u32 2147483647, %v5676_v33  ;;  %v6050_v59 = vsub.f32 %v7704_v27, %v6044_v25 }
 0x3ff   : > { %5086 = vmatprep.mubr.f32.mxu1 %v5019_v48  ;;  %v6059_v8 = vmax.f32 %v6055_v45, 0.0  ;;  %v5681_v12 = vsub.f32 1.0, %v5677_v11  ;;  %v5683_v13 = vsub.f32 1.0, %v5679_v4  ;;  %v5013_v39 = vand.u32 2147483647, %v5009_v40  ;;  %987 = vst.msk [vmem:[#allocation3 + $0xc0] sm:$0xff] %vm659_vm1, %v975_v44 }
 0x400   : > { %v6060_v42 = vmax.f32 %v6056_v57, 0.0  ;;  %5087 = vmatmul.mubr.f32.vlgmr.msra.gmra.mrb[28].mxu1 %v5018_v29  ;;  %v5682_v15 = vsub.f32 1.0, %v5678_v26  ;;  %v5684_v17 = vsub.f32 1.0, %v5680_v20  ;;  %v6054_v56 = vand.u32 2147483647, %v6050_v59  ;;  %v977_v9 = vpop.permute.xlu1 %976 }
 0x401   : > { %v5685_v18 = vmax.f32 %v5681_v12, 0.0  ;;  %v5687_v5 = vmax.f32 %v5683_v13, 0.0  ;;  %v5017_v19 = vsub.f32 1.0, %v5013_v39  ;;  %v5008_v43 = vsub.f32 %v7704_v27, %v8097_v14  ;;  %988 = vst.msk [vmem:[#allocation3 + $0xc8] sm:$0xff] %vm659_vm1, %v977_v9  ;;  %v992_v3 = vpop.permute.xlu0 %991 }
 0x402   : > { %6127 = vmatprep.mubr.f32.mxu0 %v6060_v42  ;;  %v5686_v2 = vmax.f32 %v5682_v15, 0.0  ;;  %v5688_v22 = vmax.f32 %v5684_v17, 0.0  ;;  %v6058_v23 = vsub.f32 1.0, %v6054_v56  ;;  %v6049_v24 = vsub.f32 %v7704_v27, %v8104_v61  ;;  %1004 = vst.msk [vmem:[#allocation3 + $0xe0] sm:$0xff] %vm659_vm1, %v992_v3 }
 0x403   : > { %6128 = vmatmul.mubr.f32.vlgmr.msra.gmra.mrb[44].mxu0 %v6059_v8  ;;  %v7205_v25 = vpack.c.bf16 %v5687_v5, %v5685_v18  ;;  %v5021_v6 = vmax.f32 %v5017_v19, 0.0  ;;  %v5012_v28 = vand.u32 2147483647, %v5008_v43  ;;  %v5693_v1 = vrot.slane %v5661_v31, %v7484_v52  ;;  %v6355_v4 = vld [vmem:[#allocation2 + $0x37] ss:$8 sm:$0x3] }
 0x404   : > { %v7203_v14 = vpack.c.bf16 %v5688_v22, %v5686_v2  ;;  %v6062_v21 = vmax.f32 %v6058_v23, 0.0  ;;  %v6053_v16 = vand.u32 2147483647, %v6049_v24  ;;  %v5697_v54 = vrot.slane %v5661_v31, %v7487_v53 }
 0x405   : > { %5091 = vmatprep.mubr.f32.mxu1 %v5021_v6  ;;  %v5016_v30 = vsub.f32 1.0, %v5012_v28  ;;  %v5700_v32 = vsub.f32 %v7694_v60, %v5693_v1  ;;  %v6360_v61 = vrot.slane %v6353_v47, %v7484_v52  ;;  %v6364_v36 = vrot.slane %v6353_v47, %v7487_v53  ;;  %v994_v38 = vpop.permute.xlu1 %993 }
 0x406   : > { %7204 = vmatprep.subr.bf16.mxu1 %v7203_v14  ;;  %6132 = vmatprep.mubr.f32.mxu0 %v6062_v21  ;;  %v6057_v49 = vsub.f32 1.0, %v6053_v16  ;;  %v5701_v62 = vsub.f32 %v7694_v60, %v5697_v54  ;;  %v5703_v51 = vsub.f32 %v7704_v27, %v5697_v54  ;;  %v5702_v46 = vsub.f32 %v7704_v27, %v5693_v1  ;;  %v1018_v40 = vpop.permute.xlu0 %1017 }
 0x407   : > { %1005 = vst.msk [vmem:[#allocation3 + $0xe8] sm:$0xff] %vm659_vm1, %v994_v38  ;;  %7206 = vmatpush1.bf16.xpose.msra.mxu1 %v7205_v25  ;;  %v5020_v50 = vmax.f32 %v5016_v30, 0.0  ;;  %v5704_v29 = vand.u32 2147483647, %v5700_v32  ;;  %v6368_v41 = vsub.f32 %v7694_v60, %v6364_v36  ;;  %v6370_v33 = vsub.f32 %v7704_v27, %v6364_v36  ;;  %1030 = vst.msk [vmem:[#allocation3 + $0x120] sm:$0xff] %vm659_vm1, %v1018_v40 }
 0x408   : > { %v6061_v35 = vmax.f32 %v6057_v49, 0.0  ;;  %v5705_v48 = vand.u32 2147483647, %v5701_v62  ;;  %v5707_v45 = vand.u32 2147483647, %v5703_v51  ;;  %v6367_v11 = vsub.f32 %v7694_v60, %v6360_v61 }
 0x409   : > { %5092 = vmatmul.mubr.f32.gmra.mrb[30].mxu1 %v5020_v50  ;;  %v5708_v57 = vsub.f32 1.0, %v5704_v29  ;;  %v6372_v26 = vand.u32 2147483647, %v6368_v41  ;;  %v6374_v20 = vand.u32 2147483647, %v6370_v33  ;;  %v6369_v59 = vsub.f32 %v7704_v27, %v6360_v61  ;;  %v1020_v31 = vpop.permute.xlu1 %1019 }
 0x40a   : > { %6133 = vmatmul.mubr.f32.gmra.mrb[46].mxu0 %v6061_v35  ;;  %v5709_v44 = vsub.f32 1.0, %v5705_v48  ;;  %v5711_v8 = vsub.f32 1.0, %v5707_v45  ;;  %v6371_v12 = vand.u32 2147483647, %v6367_v11  ;;  %v5706_v13 = vand.u32 2147483647, %v5702_v46  ;;  %v1035_v39 = vpop.permute.xlu0 %1034 }
 0x40b   : > { %1031 = vst.msk [vmem:[#allocation3 + $0x128] sm:$0xff] %vm659_vm1, %v1020_v31  ;;  %v6376_v42 = vsub.f32 1.0, %v6372_v26  ;;  %v6378_v15 = vsub.f32 1.0, %v6374_v20  ;;  %v6373_v17 = vand.u32 2147483647, %v6369_v59  ;;  %1047 = vst.msk [vmem:[#allocation3 + $0x140] sm:$0xff] %vm659_vm1, %v1035_v39  ;;  %v6387_v2 = vrot.slane %v6355_v4, %v7484_v52 }
 0x40c   : > { %v5713_v56 = vmax.f32 %v5709_v44, 0.0  ;;  %v5712_v9 = vmax.f32 %v5708_v57, 0.0  ;;  %v6375_v18 = vsub.f32 1.0, %v6371_v12  ;;  %v5715_v23 = vmax.f32 %v5711_v8, 0.0 }
 0x40d   : > { %v6380_v5 = vmax.f32 %v6376_v42, 0.0  ;;  %v6382_v19 = vmax.f32 %v6378_v15, 0.0  ;;  %v6377_v43 = vsub.f32 1.0, %v6373_v17  ;;  %v1037_v22 = vpop.permute.xlu1 %1036  ;;  %v5710_v47 = vsub.f32 1.0, %v5706_v13 }
 0x40e   : > { %5780 = vmatprep.mubr.f32.mxu1 %v5713_v56  ;;  %v6379_v24 = vmax.f32 %v6375_v18, 0.0  ;;  %v6391_v3 = vrot.slane %v6355_v4, %v7487_v53  ;;  %1048 = vst.msk [vmem:[#allocation3 + $0x148] sm:$0xff] %vm659_vm1, %v1037_v22  ;;  %v1052_v25 = vpop.permute.xlu0 %1051  ;;  %v6394_v1 = vsub.f32 %v7694_v60, %v6387_v2  ;;  %v6396_v21 = vsub.f32 %v7704_v27, %v6387_v2 }
 0x40f   : > { %5781 = vmatmul.mubr.f32.vlgmr.msra.gmra.mrb[32].mxu1 %v5712_v9  ;;  %v7211_v6 = vpack.c.bf16 %v6382_v19, %v6380_v5  ;;  %v6381_v28 = vmax.f32 %v6377_v43, 0.0  ;;  %1064 = vst.msk [vmem:[#allocation3 + $0x160] sm:$0xff] %vm659_vm1, %v1052_v25  ;;  %v5714_v30 = vmax.f32 %v5710_v47, 0.0 }
 0x410   : > { %5785 = vmatprep.mubr.f32.mxu1 %v5715_v23  ;;  %v6395_v52 = vsub.f32 %v7694_v60, %v6391_v3  ;;  %v6397_v14 = vsub.f32 %v7704_v27, %v6391_v3  ;;  %v6398_v53 = vand.u32 2147483647, %v6394_v1  ;;  %v6400_v49 = vand.u32 2147483647, %v6396_v21  ;;  %v1276_v21 = vld [vmem:[#allocation3 + $0x60] sm:$0x1] }
 0x411   : > { %7212 = vmatprep.subr.bf16.mxu1 %v7211_v6  ;;  %v7213_v16 = vpack.c.bf16 %v6381_v28, %v6379_v24  ;;  %v1054_v54 = vpop.permute.xlu1 %1053  ;;  %v1273_v28 = vld [vmem:[#allocation3] sm:$0x1] }
 0x412   : > { %v6399_v32 = vand.u32 2147483647, %v6395_v52  ;;  %v6401_v61 = vand.u32 2147483647, %v6397_v14  ;;  %1065 = vst.msk [vmem:[#allocation3 + $0x168] sm:$0xff] %vm659_vm1, %v1054_v54  ;;  %v1069_v36 = vpop.permute.xlu0 %1068  ;;  %v6402_v60 = vsub.f32 1.0, %v6398_v53 }
 0x413   : > { %7214 = vmatpush1.bf16.xpose.msra.mxu1 %v7213_v16  ;;  %1081 = vst.msk [vmem:[#allocation3 + $0x180] sm:$0xff] %vm659_vm1, %v1069_v36  ;;  %v6404_v50 = vsub.f32 1.0, %v6400_v49  ;;  %v1274_v52 = vld [vmem:[#allocation3 + $0x20] sm:$0x1] }
 0x414   : > { %5786 = vmatmul.mubr.f32.gmra.mrb[34].mxu1 %v5714_v30  ;;  %v6403_v38 = vsub.f32 1.0, %v6399_v32  ;;  %v6405_v62 = vsub.f32 1.0, %v6401_v61  ;;  %v6406_v40 = vmax.f32 %v6402_v60, 0.0  ;;  %v1275_v14 = vld [vmem:[#allocation3 + $0x40] sm:$0x1] }
 0x415   : > { %v1071_v51 = vpop.permute.xlu1 %1070  ;;  %v6408_v35 = vmax.f32 %v6404_v50, 0.0  ;;  %v1403_v61 = vld [vmem:[#allocation3 + $0x1] sm:$0x1]  ;;  %v1277_v36 = vld [vmem:[#allocation3 + $0x80] sm:$0x1] }
 0x416   : > { %v6407_v27 = vmax.f32 %v6403_v38, 0.0  ;;  %1082 = vst.msk [vmem:[#allocation3 + $0x188] sm:$0xff] %vm659_vm1, %v1071_v51  ;;  %v1086_v46 = vpop.permute.xlu0 %1085  ;;  %v6409_v29 = vmax.f32 %v6405_v62, 0.0  ;;  %v1278_v51 = vld [vmem:[#allocation3 + $0xa0] sm:$0x1] }
 0x417   : > { %1098 = vst.msk [vmem:[#allocation3 + $0x1a0] sm:$0xff] %vm659_vm1, %v1086_v46  ;;  %v1280_v46 = vld [vmem:[#allocation3 + $0xe0] sm:$0x1] }
 0x418   : > { %6474 = vmatprep.mubr.f32.mxu1 %v6407_v27  ;;  %v1279_v27 = vld [vmem:[#allocation3 + $0xc0] sm:$0x1] }
 0x419   : > { %v1088_v41 = vpop.permute.xlu1 %1087 }
 0x41a   : > { %6475 = vmatmul.mubr.f32.vlgmr.msra.gmra.mrb[36].mxu1 %v6406_v40  ;;  %1099 = vst.msk [vmem:[#allocation3 + $0x1a8] sm:$0xff] %vm659_vm1, %v1088_v41  ;;  %v1103_v33 = vpop.permute.xlu0 %1102 }
 0x41b   : > { %6479 = vmatprep.mubr.f32.mxu1 %v6409_v29  ;;  %1115 = vst.msk [vmem:[#allocation3 + $0x1c0] sm:$0xff] %vm659_vm1, %v1103_v33 }
 0x41e   : > { %6480 = vmatmul.mubr.f32.gmra.mrb[38].mxu1 %v6408_v35  ;;  %v1105_v48 = vpop.permute.xlu1 %1104  ;;  %v1120_v45 = vpop.permute.xlu0 %1119 }
 0x41f   : > { %1116 = vst.msk [vmem:[#allocation3 + $0x1c8] sm:$0xff] %vm659_vm1, %v1105_v48  ;;  %1132 = vst.msk [vmem:[#allocation3 + $0x1e0] sm:$0xff] %vm659_vm1, %v1120_v45 }
 0x422   : > { %v1122_v11 = vpop.permute.xlu1 %1121 }
 0x423   : > { %1133 = vst.msk [vmem:[#allocation3 + $0x1e8] sm:$0xff] %vm659_vm1, %v1122_v11  ;;  %v894_v4 = vpop.permute.xlu0 %893 }
 0x424   : > { %904 = vst.msk [vmem:[#allocation3 + $0x30] sm:$0xff] %vm659_vm1, %v894_v4 }
 0x426   : > { %v896_v57 = vpop.permute.xlu1 %895 }
 0x427   : > { %905 = vst.msk [vmem:[#allocation3 + $0x38] sm:$0xff] %vm659_vm1, %v896_v57  ;;  %v911_v26 = vpop.permute.xlu0 %910 }
 0x428   : > { %921 = vst.msk [vmem:[#allocation3 + $0x50] sm:$0xff] %vm659_vm1, %v911_v26 }
 0x42a   : > { %v913_v20 = vpop.permute.xlu1 %912 }
 0x42b   : > { %922 = vst.msk [vmem:[#allocation3 + $0x58] sm:$0xff] %vm659_vm1, %v913_v20  ;;  %v928_v59 = vpop.permute.xlu0 %927 }
 0x42c   : > { %938 = vst.msk [vmem:[#allocation3 + $0x70] sm:$0xff] %vm659_vm1, %v928_v59 }
 0x42e   : > { %v930_v31 = vpop.permute.xlu1 %929 }
 0x42f   : > { %939 = vst.msk [vmem:[#allocation3 + $0x78] sm:$0xff] %vm659_vm1, %v930_v31 }
 0x430   : > { %v945_v44 = vpop.permute.xlu0 %944 }
 0x431   : > { %955 = vst.msk [vmem:[#allocation3 + $0x90] sm:$0xff] %vm659_vm1, %v945_v44 }
 0x432   : > { %v947_v8 = vpop.permute.xlu1 %946 }
 0x433   : > { %956 = vst.msk [vmem:[#allocation3 + $0x98] sm:$0xff] %vm659_vm1, %v947_v8 }
 0x434   : > { %v962_v12 = vpop.permute.xlu0 %961 }
 0x435   : > { %972 = vst.msk [vmem:[#allocation3 + $0xb0] sm:$0xff] %vm659_vm1, %v962_v12  ;;  %v1974_v12 = vld [vmem:[#allocation3 + $0x4] sm:$0x1] }
 0x436   : > { %v964_v13 = vpop.permute.xlu1 %963 }
 0x437   : > { %973 = vst.msk [vmem:[#allocation3 + $0xb8] sm:$0xff] %vm659_vm1, %v964_v13 }
 0x438   : > { %v979_v39 = vpop.permute.xlu0 %978 }
 0x439   : > { %989 = vst.msk [vmem:[#allocation3 + $0xd0] sm:$0xff] %vm659_vm1, %v979_v39 }
 0x43a   : > { %v981_v42 = vpop.permute.xlu1 %980 }
 0x43b   : > { %990 = vst.msk [vmem:[#allocation3 + $0xd8] sm:$0xff] %vm659_vm1, %v981_v42  ;;  %v1975_v42 = vld [vmem:[#allocation3 + $0x24] sm:$0x1] }
 0x43c   : > { %v996_v15 = vpop.permute.xlu0 %995 }
 0x43d   : > { %1006 = vst.msk [vmem:[#allocation3 + $0xf0] sm:$0xff] %vm659_vm1, %v996_v15 }
 0x43e   : > { %v998_v17 = vpop.permute.xlu1 %997 }
 0x43f   : > { %1007 = vst.msk [vmem:[#allocation3 + $0xf8] sm:$0xff] %vm659_vm1, %v998_v17 }
 0x440   : > { %v1022_v56 = vpop.permute.xlu0 %1021 }
 0x441   : > { %1032 = vst.msk [vmem:[#allocation3 + $0x130] sm:$0xff] %vm659_vm1, %v1022_v56 }
 0x442   : > { %v1024_v9 = vpop.permute.xlu1 %1023 }
 0x443   : > { %1033 = vst.msk [vmem:[#allocation3 + $0x138] sm:$0xff] %vm659_vm1, %v1024_v9 }
 0x444   : > { %v1039_v18 = vpop.permute.xlu0 %1038 }
 0x445   : > { %1049 = vst.msk [vmem:[#allocation3 + $0x150] sm:$0xff] %vm659_vm1, %v1039_v18  ;;  %v1976_v18 = vld [vmem:[#allocation3 + $0x44] sm:$0x1] }
 0x446   : > { %v1041_v5 = vpop.permute.xlu1 %1040 }
 0x447   : > { %1050 = vst.msk [vmem:[#allocation3 + $0x158] sm:$0xff] %vm659_vm1, %v1041_v5 }
 0x448   : > { %v1056_v19 = vpop.permute.xlu0 %1055 }
 0x449   : > { %1066 = vst.msk [vmem:[#allocation3 + $0x170] sm:$0xff] %vm659_vm1, %v1056_v19 }
 0x44a   : > { %v1058_v43 = vpop.permute.xlu1 %1057 }
 0x44b   : > { %1067 = vst.msk [vmem:[#allocation3 + $0x178] sm:$0xff] %vm659_vm1, %v1058_v43 }
 0x44c   : > { %v1073_v2 = vpop.permute.xlu0 %1072 }
 0x44d   : > { %1083 = vst.msk [vmem:[#allocation3 + $0x190] sm:$0xff] %vm659_vm1, %v1073_v2 }
 0x44e   : > { %v1075_v22 = vpop.permute.xlu1 %1074 }
 0x44f   : > { %1084 = vst.msk [vmem:[#allocation3 + $0x198] sm:$0xff] %vm659_vm1, %v1075_v22  ;;  %v1977_v22 = vld [vmem:[#allocation3 + $0x64] sm:$0x1] }
 0x450   : > { %v1090_v23 = vpop.permute.xlu0 %1089 }
 0x451   : > { %1100 = vst.msk [vmem:[#allocation3 + $0x1b0] sm:$0xff] %vm659_vm1, %v1090_v23  ;;  %v1978_v23 = vld [vmem:[#allocation3 + $0x84] sm:$0x1] }
 0x453   : > { %v1092_v24 = vpop.permute.xlu1 %1091 }
 0x454   : > { %1101 = vst.msk [vmem:[#allocation3 + $0x1b8] sm:$0xff] %vm659_vm1, %v1092_v24  ;;  %v1107_v47 = vpop.permute.xlu0 %1106  ;;  %v1979_v24 = vld [vmem:[#allocation3 + $0xa4] sm:$0x1] }
 0x455   : > { %1117 = vst.msk [vmem:[#allocation3 + $0x1d0] sm:$0xff] %vm659_vm1, %v1107_v47 }
 0x457   : > { %v1109_v3 = vpop.permute.xlu1 %1108 }
 0x458   : > { %1118 = vst.msk [vmem:[#allocation3 + $0x1d8] sm:$0xff] %vm659_vm1, %v1109_v3  ;;  %v1124_v25 = vpop.permute.xlu0 %1123 }
 0x459   : > { %1134 = vst.msk [vmem:[#allocation3 + $0x1f0] sm:$0xff] %vm659_vm1, %v1124_v25 }
 0x45b   : > { %v1126_v6 = vpop.permute.xlu1 %1125 }
 0x45c   : > { %1135 = vst.msk [vmem:[#allocation3 + $0x1f8] sm:$0xff] %vm659_vm1, %v1126_v6 }
 0x465   : > { %v8191_v1 = vpop.f32.mrb[4].mxu1 }
 0x466   : > { %v1266_v16 = vpop.f32.mrb[5].mxu1  ;;  %v1291_v53 = vrot.slane %v8191_v1, 1  ;;  %v1292_v54 = vrot.slane %v8191_v1, 2  ;;  %v1293_v30 = vrot.slane %v8191_v1, 3  ;;  %v1294_v32 = vrot.slane %v8191_v1, 4 }
 0x467   : > { %v1295_v38 = vrot.slane %v8191_v1, 5  ;;  %v1296_v60 = vrot.slane %v8191_v1, 6  ;;  %v1297_v49 = vrot.slane %v8191_v1, 7  ;;  %v1321_v62 = vmul.f32 %v1273_v28, %v8191_v1  ;;  %v1980_v28 = vld [vmem:[#allocation3 + $0xc4] sm:$0x1] }
 0x468   : > { %v1322_v40 = vmul.f32 %v1291_v53, %v1274_v52  ;;  %v1323_v50 = vmul.f32 %v1292_v54, %v1275_v14  ;;  %v1324_v29 = vmul.f32 %v1293_v30, %v1276_v21  ;;  %v1325_v41 = vmul.f32 %v1294_v32, %v1277_v36  ;;  %v1981_v52 = vld [vmem:[#allocation3 + $0xe4] sm:$0x1] }
 0x469   : > { %v8209_v33 = vpop.f32.mrb[20].mxu0  ;;  %v1326_v35 = vmul.f32 %v1295_v38, %v1278_v51  ;;  %v1327_v48 = vmul.f32 %v1296_v60, %v1279_v27  ;;  %v1328_v45 = vmul.f32 %v1297_v49, %v1280_v46  ;;  %v8218_v11 = vmul.f32 %v1403_v61, %v8191_v1  ;;  %v1404_v27 = vld [vmem:[#allocation3 + $0x21] sm:$0x1]  ;;  %v2099_v1 = vld [vmem:[#allocation3 + $0x45] sm:$0x1] }
 0x46a   : > { %v1967_v4 = vpop.f32.mrb[21].mxu0  ;;  %v1353_v57 = vrot.slane %v1322_v40, 7  ;;  %v1356_v26 = vrot.slane %v1323_v50, 6  ;;  %v1359_v20 = vrot.slane %v1324_v29, 5  ;;  %v1362_v59 = vrot.slane %v1325_v41, 4 }
 0x46b   : > { %v1365_v31 = vrot.slane %v1326_v35, 3  ;;  %v1368_v44 = vrot.slane %v1327_v48, 2  ;;  %v1371_v8 = vrot.slane %v1328_v45, 1  ;;  %v1992_v13 = vrot.slane %v8209_v33, 1  ;;  %v1405_v41 = vld [vmem:[#allocation3 + $0x41] sm:$0x1] }
 0x46c   : > { %v1355_v39 = vsel %vm1354_vm10, %v1353_v57, %v1321_v62  ;;  %v1993_v15 = vrot.slane %v8209_v33, 2  ;;  %v1994_v17 = vrot.slane %v8209_v33, 3  ;;  %v1995_v56 = vrot.slane %v8209_v33, 4  ;;  %v1406_v35 = vld [vmem:[#allocation3 + $0x61] sm:$0x1] }
 0x46d   : > { %v1358_v9 = vsel %vm1357_vm11, %v1356_v26, %v1355_v39  ;;  %v1996_v5 = vrot.slane %v8209_v33, 5  ;;  %v1997_v19 = vrot.slane %v8209_v33, 6  ;;  %v1998_v43 = vrot.slane %v8209_v33, 7  ;;  %v1408_v39 = vld [vmem:[#allocation3 + $0xa1] sm:$0x1] }
 0x46e   : > { %v1361_v2 = vsel %vm1360_vm12, %v1359_v20, %v1358_v9  ;;  %v2022_v47 = vmul.f32 %v1974_v12, %v8209_v33  ;;  %v2023_v3 = vmul.f32 %v1992_v13, %v1975_v42  ;;  %v2024_v25 = vmul.f32 %v1993_v15, %v1976_v18  ;;  %v1407_v20 = vld [vmem:[#allocation3 + $0x81] sm:$0x1] }
 0x46f   : > { %v1364_v6 = vsel %vm1363_vm13, %v1362_v59, %v1361_v2  ;;  %v2025_v14 = vmul.f32 %v1994_v17, %v1977_v22  ;;  %v2026_v21 = vmul.f32 %v1995_v56, %v1978_v23  ;;  %v2027_v16 = vmul.f32 %v1996_v5, %v1979_v24  ;;  %v1409_v18 = vld [vmem:[#allocation3 + $0xc1] sm:$0x1] }
 0x470   : > { %v1367_v61 = vsel %vm1366_vm14, %v1365_v31, %v1364_v6  ;;  %v2028_v36 = vmul.f32 %v1997_v19, %v1980_v28  ;;  %v2029_v62 = vmul.f32 %v1998_v43, %v1981_v52  ;;  %v2054_v51 = vrot.slane %v2023_v3, 7  ;;  %v1410_v2 = vld [vmem:[#allocation3 + $0xe1] sm:$0x1] }
 0x471   : > { %v1370_v46 = vsel %vm1369_vm15, %v1368_v44, %v1367_v61  ;;  %v2056_v40 = vrot.slane %v2024_v25, 6  ;;  %v2058_v50 = vrot.slane %v2025_v14, 5  ;;  %v2060_v29 = vrot.slane %v2026_v21, 4  ;;  %v2097_v14 = vld [vmem:[#allocation3 + $0x5] sm:$0x1] }
 0x472   : > { %v8248_v48 = vpop.f32.mrb[6].mxu1  ;;  %v1373_v45 = vsel %vm1372_vm0, %v1371_v8, %v1370_v46  ;;  %v2055_v4 = vsel %vm1354_vm10, %v2054_v51, %v2022_v47  ;;  %v2062_v57 = vrot.slane %v2027_v16, 3  ;;  %v2064_v26 = vrot.slane %v2028_v36, 2  ;;  %v2098_v36 = vld [vmem:[#allocation3 + $0x25] sm:$0x1] }
 0x473   : > { %v1271_v59 = vpop.f32.mrb[7].mxu1  ;;  %v1390_v31 = vsel %vm659_vm1, %v1373_v45, 0.0  ;;  %v2057_v12 = vsel %vm1357_vm11, %v2056_v40, %v2055_v4  ;;  %v2066_v44 = vrot.slane %v2029_v62, 1  ;;  %v1420_v42 = vmul.f32 %v1404_v27, %v1291_v53  ;;  %v2103_v4 = vld [vmem:[#allocation3 + $0xc5] sm:$0x1] }
 0x474   : > { %v8256_v9 = vpop.f32.mrb[22].mxu0  ;;  %1391 = vadd.xlane.f32.xlu0 %v1390_v31  ;;  %v2059_v8 = vsel %vm1360_vm12, %v2058_v50, %v2057_v12  ;;  %v1421_v22 = vmul.f32 %v1405_v41, %v1292_v54  ;;  %v1422_v23 = vmul.f32 %v1406_v35, %v1293_v30  ;;  %v1423_v24 = vmul.f32 %v1407_v20, %v1294_v32  ;;  %v2101_v50 = vld [vmem:[#allocation3 + $0x85] sm:$0x1] }
 0x475   : > { %v1972_v47 = vpop.f32.mrb[23].mxu0  ;;  %v2061_v3 = vsel %vm1363_vm13, %v2060_v29, %v2059_v8  ;;  %v1424_v53 = vmul.f32 %v1408_v39, %v1295_v38  ;;  %v1425_v25 = vmul.f32 %v1409_v18, %v1296_v60  ;;  %v1426_v6 = vmul.f32 %v1410_v2, %v1297_v49  ;;  %v2100_v49 = vld [vmem:[#allocation3 + $0x65] sm:$0x1] }
 0x476   : > { %v2063_v54 = vsel %vm1366_vm14, %v2062_v57, %v2061_v3  ;;  %v1451_v28 = vrot.slane %v1420_v42, 7  ;;  %v1453_v52 = vrot.slane %v1421_v22, 6  ;;  %v1455_v30 = vrot.slane %v1422_v23, 5  ;;  %v2102_v29 = vld [vmem:[#allocation3 + $0xa5] sm:$0x1] }
 0x477   : > { %v2065_v32 = vsel %vm1369_vm15, %v2064_v26, %v2063_v54  ;;  %v1457_v21 = vrot.slane %v1423_v24, 4  ;;  %v1459_v16 = vrot.slane %v1424_v53, 3  ;;  %v1461_v61 = vrot.slane %v1425_v25, 2  ;;  %v2104_v57 = vld [vmem:[#allocation3 + $0xe5] sm:$0x1] }
 0x478   : > { %v2067_v38 = vsel %vm1372_vm0, %v2066_v44, %v2065_v32  ;;  %v1452_v60 = vsel %vm1354_vm10, %v1451_v28, %v8218_v11  ;;  %v1463_v62 = vrot.slane %v1426_v6, 1  ;;  %v2113_v51 = vmul.f32 %v2097_v14, %v8209_v33  ;;  %v1411_v24 = vld [vmem:[#allocation3 + $0x101] sm:$0x1] }
 0x479   : > { %v8278_v27 = vpop.f32.mrb[8].mxu1  ;;  %v2084_v46 = vsel %vm659_vm1, %v2067_v38, 0.0  ;;  %v1454_v40 = vsel %vm1357_vm11, %v1453_v52, %v1452_v60  ;;  %v2114_v41 = vmul.f32 %v2098_v36, %v1992_v13  ;;  %v2115_v35 = vmul.f32 %v2099_v1, %v1993_v15  ;;  %v1412_v6 = vld [vmem:[#allocation3 + $0x121] sm:$0x1] }
 0x47a   : > { %v1620_v11 = vpop.f32.mrb[9].mxu1  ;;  %2085 = vadd.xlane.f32.xlu1 %v2084_v46  ;;  %v1456_v45 = vsel %vm1360_vm12, %v1455_v30, %v1454_v40  ;;  %v2116_v26 = vmul.f32 %v2100_v49, %v1994_v17  ;;  %v2117_v20 = vmul.f32 %v2101_v50, %v1995_v56  ;;  %v2118_v59 = vmul.f32 %v2102_v29, %v1996_v5  ;;  %v1413_v14 = vld [vmem:[#allocation3 + $0x141] sm:$0x1] }
 0x47b   : > { %v1458_v13 = vsel %vm1363_vm13, %v1457_v21, %v1456_v45  ;;  %v2119_v15 = vmul.f32 %v2103_v4, %v1997_v19  ;;  %v2120_v31 = vmul.f32 %v2104_v57, %v1998_v43  ;;  %v2145_v12 = vrot.slane %v2114_v41, 7  ;;  %v1417_v1 = vld [vmem:[#allocation3 + $0x1c1] sm:$0x1]  ;;  %v1281_v45 = vld [vmem:[#allocation3 + $0x100] sm:$0x1] }
 0x47c   : > { %v1460_v44 = vsel %vm1366_vm14, %v1459_v16, %v1458_v13  ;;  %v2147_v39 = vrot.slane %v2115_v35, 6  ;;  %v2149_v42 = vrot.slane %v2116_v26, 5  ;;  %v2151_v17 = vrot.slane %v2117_v20, 4  ;;  %v1414_v16 = vld [vmem:[#allocation3 + $0x161] sm:$0x1] }
 0x47d   : > { %v8299_v8 = vpop.f32.mrb[24].mxu0  ;;  %v1462_v56 = vsel %vm1369_vm15, %v1461_v61, %v1460_v44  ;;  %v2146_v5 = vsel %vm1354_vm10, %v2145_v12, %v2113_v51  ;;  %v2153_v18 = vrot.slane %v2118_v59, 3  ;;  %v2155_v2 = vrot.slane %v2119_v15, 2  ;;  %v1415_v61 = vld [vmem:[#allocation3 + $0x181] sm:$0x1] }
 0x47e   : > { %v2661_v22 = vpop.f32.mrb[25].mxu0  ;;  %v1464_v19 = vsel %vm1372_vm0, %v1463_v62, %v1462_v56  ;;  %v2148_v33 = vsel %vm1357_vm11, %v2147_v39, %v2146_v5  ;;  %v2157_v43 = vrot.slane %v2120_v31, 1  ;;  %v1298_v23 = vrot.slane %v8248_v48, 1  ;;  %v1416_v62 = vld [vmem:[#allocation3 + $0x1a1] sm:$0x1] }
 0x47f   : > { %v1481_v47 = vsel %vm659_vm1, %v1464_v19, 0.0  ;;  %v2150_v3 = vsel %vm1360_vm12, %v2149_v42, %v2148_v33  ;;  %v1299_v53 = vrot.slane %v8248_v48, 2  ;;  %v1300_v25 = vrot.slane %v8248_v48, 3  ;;  %v1418_v49 = vld [vmem:[#allocation3 + $0x1e1] sm:$0x1] }
 0x480   : > { %1482 = vadd.xlane.f32.xlu0 %v1481_v47  ;;  %v2152_v54 = vsel %vm1363_vm13, %v2151_v17, %v2150_v3  ;;  %v1301_v28 = vrot.slane %v8248_v48, 4  ;;  %v1302_v52 = vrot.slane %v8248_v48, 5  ;;  %v1303_v30 = vrot.slane %v8248_v48, 6  ;;  %v1282_v4 = vld [vmem:[#allocation3 + $0x120] sm:$0x1] }
 0x481   : > { %v2154_v32 = vsel %vm1366_vm14, %v2153_v18, %v2152_v54  ;;  %v1304_v21 = vrot.slane %v8248_v48, 7  ;;  %v1427_v36 = vmul.f32 %v1411_v24, %v8248_v48  ;;  %v1428_v38 = vmul.f32 %v1412_v6, %v1298_v23  ;;  %v1283_v57 = vld [vmem:[#allocation3 + $0x140] sm:$0x1] }
 0x482   : > { %v2156_v60 = vsel %vm1369_vm15, %v2155_v2, %v2154_v32  ;;  %v1429_v51 = vmul.f32 %v1413_v14, %v1299_v53  ;;  %v1430_v46 = vmul.f32 %v1414_v16, %v1300_v25  ;;  %v1431_v40 = vmul.f32 %v1415_v61, %v1301_v28  ;;  %v1284_v5 = vld [vmem:[#allocation3 + $0x160] sm:$0x1] }
 0x483   : > { %v8318_v50 = vpop.f32.mrb[10].mxu1  ;;  %v2158_v29 = vsel %vm1372_vm0, %v2157_v43, %v2156_v60  ;;  %v1432_v41 = vmul.f32 %v1416_v62, %v1302_v52  ;;  %v1433_v35 = vmul.f32 %v1417_v1, %v1303_v30  ;;  %v1434_v11 = vmul.f32 %v1418_v49, %v1304_v21  ;;  %v1285_v18 = vld [vmem:[#allocation3 + $0x180] sm:$0x1] }
 0x484   : > { %v8321_v26 = vpop.f32.mrb[26].mxu0  ;;  %v1625_v20 = vpop.f32.mrb[11].mxu1  ;;  %v2175_v59 = vsel %vm659_vm1, %v2158_v29, 0.0  ;;  %v1465_v13 = vrot.slane %v1428_v38, 7  ;;  %v1467_v15 = vrot.slane %v1429_v51, 6  ;;  %v1469_v31 = vrot.slane %v1430_v46, 5 }
 0x485   : > { %v2666_v12 = vpop.f32.mrb[27].mxu0  ;;  %2176 = vadd.xlane.f32.xlu1 %v2175_v59  ;;  %v1471_v44 = vrot.slane %v1431_v40, 4  ;;  %v1473_v39 = vrot.slane %v1432_v41, 3  ;;  %v1475_v42 = vrot.slane %v1433_v35, 2  ;;  %v1477_v17 = vrot.slane %v1434_v11, 1 }
 0x486   : > { %v1466_v56 = vsel %vm1354_vm10, %v1465_v13, %v1427_v36  ;;  %v1286_v2 = vld [vmem:[#allocation3 + $0x1a0] sm:$0x1]  ;;  %v1329_v22 = vmul.f32 %v1281_v45, %v8248_v48  ;;  %v1330_v19 = vmul.f32 %v1298_v23, %v1282_v4  ;;  %v1331_v33 = vmul.f32 %v1299_v53, %v1283_v57  ;;  %v1982_v29 = vld [vmem:[#allocation3 + $0x104] sm:$0x1] }
 0x487   : > { %v1468_v43 = vsel %vm1357_vm11, %v1467_v15, %v1466_v56  ;;  %v1287_v24 = vld [vmem:[#allocation3 + $0x1c0] sm:$0x1]  ;;  %v1332_v3 = vmul.f32 %v1300_v25, %v1284_v5  ;;  %v1333_v6 = vmul.f32 %v1301_v28, %v1285_v18  ;;  %v1334_v54 = vmul.f32 %v1302_v52, %v1286_v2  ;;  %v1983_v57 = vld [vmem:[#allocation3 + $0x124] sm:$0x1] }
 0x488   : > { %v1288_v47 = vld [vmem:[#allocation3 + $0x1e0] sm:$0x1]  ;;  %v1470_v14 = vsel %vm1360_vm12, %v1469_v31, %v1468_v43  ;;  %v1335_v32 = vmul.f32 %v1303_v30, %v1287_v24  ;;  %v1374_v61 = vrot.slane %v1330_v19, 7  ;;  %v1376_v60 = vrot.slane %v1331_v33, 6  ;;  %v1984_v15 = vld [vmem:[#allocation3 + $0x144] sm:$0x1] }
 0x489   : > { %v1336_v16 = vmul.f32 %v1304_v21, %v1288_v47  ;;  %v8328_v36 = vpop.f32.mrb[12].mxu1  ;;  %v1472_v38 = vsel %vm1363_vm13, %v1471_v44, %v1470_v14  ;;  %v1378_v48 = vrot.slane %v1332_v3, 5  ;;  %v1380_v23 = vrot.slane %v1333_v6, 4  ;;  %v1985_v31 = vld [vmem:[#allocation3 + $0x164] sm:$0x1] }
 0x48a   : > { %v2314_v53 = vpop.f32.mrb[13].mxu1  ;;  %v1474_v62 = vsel %vm1366_vm14, %v1473_v39, %v1472_v38  ;;  %v1375_v1 = vsel %vm1354_vm10, %v1374_v61, %v1329_v22  ;;  %v1382_v25 = vrot.slane %v1334_v54, 3  ;;  %v1384_v28 = vrot.slane %v1335_v32, 2  ;;  %v1987_v56 = vld [vmem:[#allocation3 + $0x1a4] sm:$0x1] }
 0x48b   : > { %v1476_v52 = vsel %vm1369_vm15, %v1475_v42, %v1474_v62  ;;  %v1377_v30 = vsel %vm1357_vm11, %v1376_v60, %v1375_v1  ;;  %v1386_v21 = vrot.slane %v1336_v16, 1  ;;  %v1999_v49 = vrot.slane %v8256_v9, 1  ;;  %v1988_v5 = vld [vmem:[#allocation3 + $0x1c4] sm:$0x1] }
 0x48c   : > { %v8336_v51 = vpop.f32.mrb[28].mxu0  ;;  %v1478_v46 = vsel %vm1372_vm0, %v1477_v17, %v1476_v52  ;;  %v1379_v40 = vsel %vm1360_vm12, %v1378_v48, %v1377_v30  ;;  %v2000_v41 = vrot.slane %v8256_v9, 2  ;;  %v2001_v35 = vrot.slane %v8256_v9, 3  ;;  %v1986_v17 = vld [vmem:[#allocation3 + $0x184] sm:$0x1] }
 0x48d   : > { %v3355_v11 = vpop.f32.mrb[29].mxu0  ;;  %v1484_v45 = vsel %vm659_vm1, %v1478_v46, 0.0  ;;  %v1381_v4 = vsel %vm1363_vm13, %v1380_v23, %v1379_v40  ;;  %v2002_v20 = vrot.slane %v8256_v9, 4  ;;  %v2003_v59 = vrot.slane %v8256_v9, 5  ;;  %v1989_v33 = vld [vmem:[#allocation3 + $0x1e4] sm:$0x1] }
 0x48e   : > { %1485 = vadd.xlane.f32.xlu0 %v1484_v45  ;;  %v1383_v13 = vsel %vm1366_vm14, %v1382_v25, %v1381_v4  ;;  %v2004_v12 = vrot.slane %v8256_v9, 6  ;;  %v2005_v44 = vrot.slane %v8256_v9, 7  ;;  %v2030_v39 = vmul.f32 %v1982_v29, %v8256_v9  ;;  %v2669_v48 = vld [vmem:[#allocation3 + $0x28] sm:$0x1] }
 0x48f   : > { %v1385_v42 = vsel %vm1369_vm15, %v1384_v28, %v1383_v13  ;;  %v2031_v18 = vmul.f32 %v1999_v49, %v1983_v57  ;;  %v2032_v2 = vmul.f32 %v2000_v41, %v1984_v15  ;;  %v2033_v22 = vmul.f32 %v2001_v35, %v1985_v31  ;;  %v2670_v23 = vld [vmem:[#allocation3 + $0x48] sm:$0x1] }
 0x490   : > { %v1387_v19 = vsel %vm1372_vm0, %v1386_v21, %v1385_v42  ;;  %v2034_v43 = vmul.f32 %v2002_v20, %v1986_v17  ;;  %v2035_v24 = vmul.f32 %v2003_v59, %v1987_v56  ;;  %v2036_v47 = vmul.f32 %v2004_v12, %v1988_v5  ;;  %v2671_v25 = vld [vmem:[#allocation3 + $0x68] sm:$0x1] }
 0x491   : > { %v1393_v3 = vsel %vm659_vm1, %v1387_v19, 0.0  ;;  %v2037_v6 = vmul.f32 %v2005_v44, %v1989_v33  ;;  %v2068_v54 = vrot.slane %v2031_v18, 7  ;;  %v2070_v14 = vrot.slane %v2032_v2, 6  ;;  %v2672_v40 = vld [vmem:[#allocation3 + $0x88] sm:$0x1] }
 0x492   : > { %1394 = vadd.xlane.f32.xlu1 %v1393_v3  ;;  %v2072_v32 = vrot.slane %v2033_v22, 5  ;;  %v2074_v16 = vrot.slane %v2034_v43, 4  ;;  %v2076_v61 = vrot.slane %v2035_v24, 3  ;;  %v2078_v60 = vrot.slane %v2036_v47, 2  ;;  %v2673_v57 = vld [vmem:[#allocation3 + $0xa8] sm:$0x1] }
 0x493   : > { %v2069_v38 = vsel %vm1354_vm10, %v2068_v54, %v2030_v39  ;;  %v2686_v53 = vrot.slane %v8299_v8, 1  ;;  %v2687_v62 = vrot.slane %v8299_v8, 2  ;;  %v2688_v28 = vrot.slane %v8299_v8, 3  ;;  %v2674_v13 = vld [vmem:[#allocation3 + $0xc8] sm:$0x1] }
 0x494   : > { %v2071_v1 = vsel %vm1357_vm11, %v2070_v14, %v2069_v38  ;;  %v2689_v52 = vrot.slane %v8299_v8, 4  ;;  %v2690_v30 = vrot.slane %v8299_v8, 5  ;;  %v2080_v46 = vrot.slane %v2037_v6, 1  ;;  %v2668_v56 = vld [vmem:[#allocation3 + $0x8] sm:$0x1] }
 0x495   : > { %v2073_v21 = vsel %vm1360_vm12, %v2072_v32, %v2071_v1  ;;  %v2691_v29 = vrot.slane %v8299_v8, 6  ;;  %v2692_v11 = vrot.slane %v8299_v8, 7  ;;  %v2717_v15 = vmul.f32 %v2686_v53, %v2669_v48  ;;  %v2675_v33 = vld [vmem:[#allocation3 + $0xe8] sm:$0x1]  ;;  %v2105_v3 = vld [vmem:[#allocation3 + $0x105] sm:$0x1] }
 0x496   : > { %v8377_v45 = vpop.f32.mrb[14].mxu1  ;;  %v2075_v4 = vsel %vm1363_vm13, %v2074_v16, %v2073_v21  ;;  %v2718_v31 = vmul.f32 %v2687_v62, %v2670_v23  ;;  %v2719_v39 = vmul.f32 %v2688_v28, %v2671_v25  ;;  %v2720_v5 = vmul.f32 %v2689_v52, %v2672_v40  ;;  %v2107_v1 = vld [vmem:[#allocation3 + $0x145] sm:$0x1] }
 0x497   : > { %v2319_v42 = vpop.f32.mrb[15].mxu1  ;;  %v2077_v17 = vsel %vm1366_vm14, %v2076_v61, %v2075_v4  ;;  %v2721_v18 = vmul.f32 %v2690_v30, %v2673_v57  ;;  %v2722_v2 = vmul.f32 %v2691_v29, %v2674_v13  ;;  %v2716_v43 = vmul.f32 %v2668_v56, %v8299_v8  ;;  %v2106_v61 = vld [vmem:[#allocation3 + $0x125] sm:$0x1] }
 0x498   : > { %v8393_v22 = vpop.f32.mrb[30].mxu0  ;;  %v2079_v19 = vsel %vm1369_vm15, %v2078_v60, %v2077_v17  ;;  %v2748_v24 = vrot.slane %v2717_v15, 7  ;;  %v2750_v47 = vrot.slane %v2718_v31, 6  ;;  %v2723_v14 = vmul.f32 %v2692_v11, %v2675_v33  ;;  %v2108_v21 = vld [vmem:[#allocation3 + $0x165] sm:$0x1] }
 0x499   : > { %v3360_v6 = vpop.f32.mrb[31].mxu0  ;;  %v2081_v54 = vsel %vm1372_vm0, %v2080_v46, %v2079_v19  ;;  %v2752_v32 = vrot.slane %v2719_v39, 5  ;;  %v2754_v16 = vrot.slane %v2720_v5, 4  ;;  %v2756_v60 = vrot.slane %v2721_v18, 3  ;;  %v2109_v40 = vld [vmem:[#allocation3 + $0x185] sm:$0x1] }
 0x49a   : > { %v2087_v38 = vsel %vm659_vm1, %v2081_v54, 0.0  ;;  %v2749_v48 = vsel %vm1354_vm10, %v2748_v24, %v2716_v43  ;;  %v2758_v23 = vrot.slane %v2722_v2, 2  ;;  %v2110_v4 = vld [vmem:[#allocation3 + $0x1a5] sm:$0x1]  ;;  %v2121_v46 = vmul.f32 %v2105_v3, %v8256_v9 }
 0x49b   : > { %2088 = vadd.xlane.f32.xlu0 %v2087_v38  ;;  %v2751_v25 = vsel %vm1357_vm11, %v2750_v47, %v2749_v48  ;;  %v2122_v57 = vmul.f32 %v2106_v61, %v1999_v49  ;;  %v2123_v13 = vmul.f32 %v2107_v1, %v2000_v41  ;;  %v2111_v39 = vld [vmem:[#allocation3 + $0x1c5] sm:$0x1]  ;;  %v2124_v17 = vmul.f32 %v2108_v21, %v2001_v35  ;;  %v2792_v47 = vld [vmem:[#allocation3 + $0x29] sm:$0x1] }
 0x49c   : > { %v8408_v15 = vpop.f32.mrb[16].mxu1  ;;  %v2753_v31 = vsel %vm1360_vm12, %v2752_v32, %v2751_v25  ;;  %v2112_v42 = vld [vmem:[#allocation3 + $0x1e5] sm:$0x1]  ;;  %v2125_v56 = vmul.f32 %v2109_v40, %v2002_v20  ;;  %v2126_v5 = vmul.f32 %v2110_v4, %v2003_v59  ;;  %v2127_v41 = vmul.f32 %v2111_v39, %v2004_v12  ;;  %v2793_v32 = vld [vmem:[#allocation3 + $0x49] sm:$0x1] }
 0x49d   : > { %v3008_v18 = vpop.f32.mrb[17].mxu1  ;;  %v2755_v49 = vsel %vm1363_vm13, %v2754_v16, %v2753_v31  ;;  %v2128_v2 = vmul.f32 %v2112_v42, %v2005_v44  ;;  %v2159_v19 = vrot.slane %v2122_v57, 7  ;;  %v2760_v43 = vrot.slane %v2723_v14, 1  ;;  %v2794_v14 = vld [vmem:[#allocation3 + $0x69] sm:$0x1] }
 0x49e   : > { %v2757_v33 = vsel %vm1366_vm14, %v2756_v60, %v2755_v49  ;;  %v2161_v35 = vrot.slane %v2123_v13, 6  ;;  %v2163_v24 = vrot.slane %v2124_v17, 5  ;;  %v2165_v6 = vrot.slane %v2125_v56, 4  ;;  %v2795_v60 = vld [vmem:[#allocation3 + $0x89] sm:$0x1] }
 0x49f   : > { %v8423_v20 = vpop.f32.mrb[32].mxu0  ;;  %v2759_v59 = vsel %vm1369_vm15, %v2758_v23, %v2757_v33  ;;  %v2160_v3 = vsel %vm1354_vm10, %v2159_v19, %v2121_v46  ;;  %v2167_v54 = vrot.slane %v2126_v5, 3  ;;  %v2169_v16 = vrot.slane %v2127_v41, 2  ;;  %v2796_v1 = vld [vmem:[#allocation3 + $0xa9] sm:$0x1] }
 0x4a0   : > { %v2761_v12 = vsel %vm1372_vm0, %v2760_v43, %v2759_v59  ;;  %v4049_v9 = vpop.f32.mrb[33].mxu0  ;;  %v2162_v44 = vsel %vm1357_vm11, %v2161_v35, %v2160_v3  ;;  %v2171_v61 = vrot.slane %v2128_v2, 1  ;;  %v2808_v23 = vmul.f32 %v2792_v47, %v2686_v53  ;;  %v2791_v40 = vld [vmem:[#allocation3 + $0x9] sm:$0x1]  ;;  %v1629_v33 = vld [vmem:[#allocation3 + $0x42] sm:$0x1] }
 0x4a1   : > { %v2778_v38 = vsel %vm659_vm1, %v2761_v12, 0.0  ;;  %v2164_v48 = vsel %vm1360_vm12, %v2163_v24, %v2162_v44  ;;  %v2809_v25 = vmul.f32 %v2793_v32, %v2687_v62  ;;  %v2797_v4 = vld [vmem:[#allocation3 + $0xc9] sm:$0x1]  ;;  %v2810_v46 = vmul.f32 %v2794_v14, %v2688_v28  ;;  %v1631_v35 = vld [vmem:[#allocation3 + $0x82] sm:$0x1] }
 0x4a2   : > { %2779 = vadd.xlane.f32.xlu1 %v2778_v38  ;;  %v2166_v21 = vsel %vm1363_vm13, %v2165_v6, %v2164_v48  ;;  %v2811_v57 = vmul.f32 %v2795_v60, %v2689_v52  ;;  %v2812_v13 = vmul.f32 %v2796_v1, %v2690_v30  ;;  %v2798_v53 = vld [vmem:[#allocation3 + $0xe9] sm:$0x1]  ;;  %v2807_v39 = vmul.f32 %v2791_v40, %v8299_v8  ;;  %v1632_v38 = vld [vmem:[#allocation3 + $0xa2] sm:$0x1] }
 0x4a3   : > { %v2168_v31 = vsel %vm1366_vm14, %v2167_v54, %v2166_v21  ;;  %v2813_v62 = vmul.f32 %v2797_v4, %v2691_v29  ;;  %v2839_v42 = vrot.slane %v2808_v23, 7  ;;  %v2814_v28 = vmul.f32 %v2798_v53, %v2692_v11  ;;  %v1628_v29 = vld [vmem:[#allocation3 + $0x22] sm:$0x1] }
 0x4a4   : > { %v2170_v17 = vsel %vm1369_vm15, %v2169_v16, %v2168_v31  ;;  %v2841_v56 = vrot.slane %v2809_v25, 6  ;;  %v2843_v5 = vrot.slane %v2810_v46, 5  ;;  %v2845_v18 = vrot.slane %v2811_v57, 4  ;;  %v1630_v11 = vld [vmem:[#allocation3 + $0x62] sm:$0x1] }
 0x4a5   : > { %v2172_v52 = vsel %vm1372_vm0, %v2171_v61, %v2170_v17  ;;  %v2840_v30 = vsel %vm1354_vm10, %v2839_v42, %v2807_v39  ;;  %v2847_v49 = vrot.slane %v2812_v13, 3  ;;  %v2849_v19 = vrot.slane %v2813_v62, 2  ;;  %v1627_v23 = vld [vmem:[#allocation3 + $0x2] sm:$0x1] }
 0x4a6   : > { %v2178_v41 = vsel %vm659_vm1, %v2172_v52, 0.0  ;;  %v2842_v2 = vsel %vm1357_vm11, %v2841_v56, %v2840_v30  ;;  %v1645_v43 = vrot.slane %v8278_v27, 1  ;;  %v1646_v24 = vrot.slane %v8278_v27, 2  ;;  %v1633_v25 = vld [vmem:[#allocation3 + $0xc2] sm:$0x1] }
 0x4a7   : > { %2179 = vadd.xlane.f32.xlu0 %v2178_v41  ;;  %v2844_v8 = vsel %vm1360_vm12, %v2843_v5, %v2842_v2  ;;  %v1647_v47 = vrot.slane %v8278_v27, 3  ;;  %v1648_v59 = vrot.slane %v8278_v27, 4  ;;  %v1649_v32 = vrot.slane %v8278_v27, 5  ;;  %v1634_v57 = vld [vmem:[#allocation3 + $0xe2] sm:$0x1] }
 0x4a8   : > { %v8458_v3 = vpop.f32.mrb[18].mxu1  ;;  %v8460_v6 = vpop.f32.mrb[34].mxu0  ;;  %v2846_v54 = vsel %vm1363_vm13, %v2845_v18, %v2844_v8  ;;  %v1650_v12 = vrot.slane %v8278_v27, 6  ;;  %v1651_v9 = vrot.slane %v8278_v27, 7  ;;  %v2851_v61 = vrot.slane %v2814_v28, 1 }
 0x4a9   : > { %v3013_v44 = vpop.f32.mrb[19].mxu1  ;;  %v2848_v16 = vsel %vm1366_vm14, %v2847_v49, %v2846_v54  ;;  %v4054_v14 = vpop.f32.mrb[35].mxu0  ;;  %v1676_v48 = vmul.f32 %v1645_v43, %v1628_v29  ;;  %v1677_v60 = vmul.f32 %v1646_v24, %v1629_v33  ;;  %v1678_v21 = vmul.f32 %v1647_v47, %v1630_v11  ;;  %v2677_v30 = vld [vmem:[#allocation3 + $0x128] sm:$0x1] }
 0x4aa   : > { %v2850_v1 = vsel %vm1369_vm15, %v2849_v19, %v2848_v16  ;;  %v1679_v40 = vmul.f32 %v1648_v59, %v1631_v35  ;;  %v1680_v4 = vmul.f32 %v1649_v32, %v1632_v38  ;;  %v1675_v13 = vmul.f32 %v1627_v23, %v8278_v27  ;;  %v2678_v41 = vld [vmem:[#allocation3 + $0x148] sm:$0x1] }
 0x4ab   : > { %v2852_v46 = vsel %vm1372_vm0, %v2851_v61, %v2850_v1  ;;  %v1681_v31 = vmul.f32 %v1650_v12, %v1633_v25  ;;  %v1707_v53 = vrot.slane %v1676_v48, 7  ;;  %v1682_v62 = vmul.f32 %v1651_v9, %v1634_v57  ;;  %v2679_v2 = vld [vmem:[#allocation3 + $0x168] sm:$0x1] }
 0x4ac   : > { %v2869_v39 = vsel %vm659_vm1, %v2852_v46, 0.0  ;;  %v1709_v42 = vrot.slane %v1677_v60, 6  ;;  %v1711_v17 = vrot.slane %v1678_v21, 5  ;;  %v1713_v56 = vrot.slane %v1679_v40, 4  ;;  %v2680_v38 = vld [vmem:[#allocation3 + $0x188] sm:$0x1] }
 0x4ad   : > { %2870 = vadd.xlane.f32.xlu1 %v2869_v39  ;;  %v1708_v28 = vsel %vm1354_vm10, %v1707_v53, %v1675_v13  ;;  %v1715_v5 = vrot.slane %v1680_v4, 3  ;;  %v1717_v52 = vrot.slane %v1681_v31, 2  ;;  %v2693_v19 = vrot.slane %v8321_v26, 1  ;;  %v2681_v25 = vld [vmem:[#allocation3 + $0x1a8] sm:$0x1] }
 0x4ae   : > { %v8486_v18 = vpop.f32.mrb[20].mxu1  ;;  %v1710_v49 = vsel %vm1357_vm11, %v1709_v42, %v1708_v28  ;;  %v2694_v29 = vrot.slane %v8321_v26, 2  ;;  %v2695_v33 = vrot.slane %v8321_v26, 3  ;;  %v2696_v54 = vrot.slane %v8321_v26, 4  ;;  %v2682_v21 = vld [vmem:[#allocation3 + $0x1c8] sm:$0x1] }
 0x4af   : > { %v8492_v8 = vpop.f32.mrb[36].mxu0  ;;  %v3702_v11 = vpop.f32.mrb[21].mxu1  ;;  %v1712_v35 = vsel %vm1360_vm12, %v1711_v17, %v1710_v49  ;;  %v2697_v44 = vrot.slane %v8321_v26, 5  ;;  %v2698_v16 = vrot.slane %v8321_v26, 6  ;;  %v1719_v14 = vrot.slane %v1682_v62, 1 }
 0x4b0   : > { %v1714_v61 = vsel %vm1363_vm13, %v1713_v56, %v1712_v35  ;;  %v2699_v48 = vrot.slane %v8321_v26, 7  ;;  %v2725_v60 = vmul.f32 %v2693_v19, %v2677_v30  ;;  %v4743_v1 = vpop.f32.mrb[37].mxu0  ;;  %v2683_v40 = vld [vmem:[#allocation3 + $0x1e8] sm:$0x1]  ;;  %v2726_v4 = vmul.f32 %v2694_v29, %v2678_v41 }
 0x4b1   : > { %v1716_v23 = vsel %vm1366_vm14, %v1715_v5, %v1714_v61  ;;  %v2727_v46 = vmul.f32 %v2695_v33, %v2679_v2  ;;  %v2728_v57 = vmul.f32 %v2696_v54, %v2680_v38  ;;  %v2676_v31 = vld [vmem:[#allocation3 + $0x108] sm:$0x1]  ;;  %v2729_v53 = vmul.f32 %v2697_v44, %v2681_v25  ;;  %v1751_v5 = vld [vmem:[#allocation3 + $0x23] sm:$0x1] }
 0x4b2   : > { %v1718_v13 = vsel %vm1369_vm15, %v1717_v52, %v1716_v23  ;;  %v2730_v39 = vmul.f32 %v2698_v16, %v2682_v21  ;;  %v2731_v62 = vmul.f32 %v2699_v48, %v2683_v40  ;;  %v2724_v17 = vmul.f32 %v2676_v31, %v8321_v26  ;;  %v1752_v2 = vld [vmem:[#allocation3 + $0x43] sm:$0x1] }
 0x4b3   : > { %v1720_v42 = vsel %vm1372_vm0, %v1719_v14, %v1718_v13  ;;  %v2762_v28 = vrot.slane %v2725_v60, 7  ;;  %v2764_v56 = vrot.slane %v2726_v4, 6  ;;  %v2766_v52 = vrot.slane %v2727_v46, 5  ;;  %v1753_v38 = vld [vmem:[#allocation3 + $0x63] sm:$0x1] }
 0x4b4   : > { %v1737_v30 = vsel %vm659_vm1, %v1720_v42, 0.0  ;;  %v2768_v49 = vrot.slane %v2728_v57, 4  ;;  %v2770_v41 = vrot.slane %v2729_v53, 3  ;;  %v2772_v35 = vrot.slane %v2730_v39, 2  ;;  %v1754_v1 = vld [vmem:[#allocation3 + $0x83] sm:$0x1] }
 0x4b5   : > { %1738 = vadd.xlane.f32.xlu1 %v1737_v30  ;;  %v2763_v11 = vsel %vm1354_vm10, %v2762_v28, %v2724_v17  ;;  %v2774_v61 = vrot.slane %v2731_v62, 1  ;;  %v1767_v14 = vmul.f32 %v1751_v5, %v1645_v43  ;;  %v1755_v23 = vld [vmem:[#allocation3 + $0xa3] sm:$0x1]  ;;  %v1768_v40 = vmul.f32 %v1752_v2, %v1646_v24  ;;  %v2802_v2 = vld [vmem:[#allocation3 + $0x169] sm:$0x1] }
 0x4b6   : > { %v2765_v60 = vsel %vm1357_vm11, %v2764_v56, %v2763_v11  ;;  %v1756_v25 = vld [vmem:[#allocation3 + $0xc3] sm:$0x1]  ;;  %v1769_v4 = vmul.f32 %v1753_v38, %v1647_v47  ;;  %v1770_v46 = vmul.f32 %v1754_v1, %v1648_v59  ;;  %v1771_v43 = vmul.f32 %v1755_v23, %v1649_v32  ;;  %v2800_v56 = vld [vmem:[#allocation3 + $0x129] sm:$0x1] }
 0x4b7   : > { %v1757_v21 = vld [vmem:[#allocation3 + $0xe3] sm:$0x1]  ;;  %v2767_v57 = vsel %vm1360_vm12, %v2766_v52, %v2765_v60  ;;  %v1772_v31 = vmul.f32 %v1756_v25, %v1650_v12  ;;  %v1798_v47 = vrot.slane %v1767_v14, 7  ;;  %v1800_v62 = vrot.slane %v1768_v40, 6  ;;  %v2799_v52 = vld [vmem:[#allocation3 + $0x109] sm:$0x1] }
 0x4b8   : > { %v1750_v13 = vld [vmem:[#allocation3 + $0x3] sm:$0x1]  ;;  %v1773_v53 = vmul.f32 %v1757_v21, %v1651_v9  ;;  %v2769_v24 = vsel %vm1363_vm13, %v2768_v49, %v2767_v57  ;;  %v1802_v42 = vrot.slane %v1769_v4, 5  ;;  %v1804_v17 = vrot.slane %v1770_v46, 4  ;;  %v2801_v9 = vld [vmem:[#allocation3 + $0x149] sm:$0x1] }
 0x4b9   : > { %v1766_v39 = vmul.f32 %v1750_v13, %v8278_v27  ;;  %v2771_v59 = vsel %vm1366_vm14, %v2770_v41, %v2769_v24  ;;  %v1806_v28 = vrot.slane %v1771_v43, 3  ;;  %v1808_v12 = vrot.slane %v1772_v31, 2  ;;  %v2803_v38 = vld [vmem:[#allocation3 + $0x189] sm:$0x1] }
 0x4ba   : > { %v2773_v32 = vsel %vm1369_vm15, %v2772_v35, %v2771_v59  ;;  %v1810_v30 = vrot.slane %v1773_v53, 1  ;;  %v2804_v1 = vld [vmem:[#allocation3 + $0x1a9] sm:$0x1]  ;;  %v2816_v35 = vmul.f32 %v2800_v56, %v2693_v19  ;;  %v2817_v14 = vmul.f32 %v2801_v9, %v2694_v29  ;;  %v1637_v56 = vld [vmem:[#allocation3 + $0x142] sm:$0x1] }
 0x4bb   : > { %v1799_v5 = vsel %vm1354_vm10, %v1798_v47, %v1766_v39  ;;  %v2775_v49 = vsel %vm1372_vm0, %v2774_v61, %v2773_v32  ;;  %v8542_v27 = vpop.f32.mrb[22].mxu1  ;;  %v8544_v11 = vpop.f32.mrb[38].mxu0  ;;  %v2805_v61 = vld [vmem:[#allocation3 + $0x1c9] sm:$0x1]  ;;  %v2818_v21 = vmul.f32 %v2802_v2, %v2695_v33  ;;  %v2819_v40 = vmul.f32 %v2803_v38, %v2696_v54 }
 0x4bc   : > { %v1801_v41 = vsel %vm1357_vm11, %v1800_v62, %v1799_v5  ;;  %v2781_v60 = vsel %vm659_vm1, %v2775_v49, 0.0  ;;  %v3707_v23 = vpop.f32.mrb[23].mxu1  ;;  %v4748_v4 = vpop.f32.mrb[39].mxu0  ;;  %v2806_v19 = vld [vmem:[#allocation3 + $0x1e9] sm:$0x1]  ;;  %v2815_v57 = vmul.f32 %v2799_v52, %v8321_v26  ;;  %v2820_v29 = vmul.f32 %v2804_v1, %v2697_v44 }
 0x4bd   : > { %v1803_v25 = vsel %vm1360_vm12, %v1802_v42, %v1801_v41  ;;  %2782 = vadd.xlane.f32.xlu0 %v2781_v60  ;;  %v2821_v13 = vmul.f32 %v2805_v61, %v2698_v16  ;;  %v2822_v33 = vmul.f32 %v2806_v19, %v2699_v48  ;;  %v2853_v31 = vrot.slane %v2816_v35, 7  ;;  %v1638_v52 = vld [vmem:[#allocation3 + $0x162] sm:$0x1] }
 0x4be   : > { %v1805_v46 = vsel %vm1363_vm13, %v1804_v17, %v1803_v25  ;;  %v2855_v54 = vrot.slane %v2817_v14, 6  ;;  %v2857_v24 = vrot.slane %v2818_v21, 5  ;;  %v2859_v39 = vrot.slane %v2819_v40, 4  ;;  %v1636_v17 = vld [vmem:[#allocation3 + $0x122] sm:$0x1] }
 0x4bf   : > { %v1807_v43 = vsel %vm1366_vm14, %v1806_v28, %v1805_v46  ;;  %v2861_v47 = vrot.slane %v2820_v29, 3  ;;  %v8567_v62 = vpop.f32.mrb[24].mxu1  ;;  %v2854_v44 = vsel %vm1354_vm10, %v2853_v31, %v2815_v57  ;;  %v2863_v42 = vrot.slane %v2821_v13, 2  ;;  %v1639_v1 = vld [vmem:[#allocation3 + $0x182] sm:$0x1] }
 0x4c0   : > { %v1809_v53 = vsel %vm1369_vm15, %v1808_v12, %v1807_v43  ;;  %v4396_v16 = vpop.f32.mrb[25].mxu1  ;;  %v1652_v28 = vrot.slane %v8318_v50, 1  ;;  %v2856_v48 = vsel %vm1357_vm11, %v2855_v54, %v2854_v44  ;;  %v1653_v32 = vrot.slane %v8318_v50, 2  ;;  %v1635_v25 = vld [vmem:[#allocation3 + $0x102] sm:$0x1] }
 0x4c1   : > { %v1811_v59 = vsel %vm1372_vm0, %v1810_v30, %v1809_v53  ;;  %v1654_v5 = vrot.slane %v8318_v50, 3  ;;  %v2858_v12 = vsel %vm1360_vm12, %v2857_v24, %v2856_v48  ;;  %v1655_v9 = vrot.slane %v8318_v50, 4  ;;  %v1640_v61 = vld [vmem:[#allocation3 + $0x1a2] sm:$0x1]  ;;  %v3363_v16 = vld [vmem:[#allocation3 + $0x2c] sm:$0x1] }
 0x4c2   : > { %v1828_v26 = vsel %vm659_vm1, %v1811_v59, 0.0  ;;  %v8577_v30 = vpop.f32.mrb[40].mxu0  ;;  %v1656_v2 = vrot.slane %v8318_v50, 5  ;;  %v1657_v49 = vrot.slane %v8318_v50, 6  ;;  %v2860_v41 = vsel %vm1363_vm13, %v2859_v39, %v2858_v12  ;;  %v1641_v21 = vld [vmem:[#allocation3 + $0x1c2] sm:$0x1] }
 0x4c3   : > { %1829 = vadd.xlane.f32.xlu1 %v1828_v26  ;;  %v2865_v38 = vrot.slane %v2822_v33, 1  ;;  %v1658_v35 = vrot.slane %v8318_v50, 7  ;;  %v1684_v14 = vmul.f32 %v1652_v28, %v1636_v17  ;;  %v5437_v60 = vpop.f32.mrb[41].mxu0  ;;  %v2862_v23 = vsel %vm1366_vm14, %v2861_v47, %v2860_v41  ;;  %v1642_v57 = vld [vmem:[#allocation3 + $0x1e2] sm:$0x1] }
 0x4c4   : > { %v1685_v40 = vmul.f32 %v1653_v32, %v1637_v56  ;;  %v1686_v4 = vmul.f32 %v1654_v5, %v1638_v52  ;;  %v1687_v46 = vmul.f32 %v1655_v9, %v1639_v1  ;;  %v2864_v19 = vsel %vm1369_vm15, %v2863_v42, %v2862_v23  ;;  %v3364_v56 = vld [vmem:[#allocation3 + $0x4c] sm:$0x1] }
 0x4c5   : > { %v1683_v29 = vmul.f32 %v1635_v25, %v8318_v50  ;;  %v1688_v13 = vmul.f32 %v1656_v2, %v1640_v61  ;;  %v1689_v43 = vmul.f32 %v1657_v49, %v1641_v21  ;;  %v2866_v33 = vsel %vm1372_vm0, %v2865_v38, %v2864_v19  ;;  %v3366_v61 = vld [vmem:[#allocation3 + $0x8c] sm:$0x1] }
 0x4c6   : > { %v1690_v31 = vmul.f32 %v1658_v35, %v1642_v57  ;;  %v1721_v54 = vrot.slane %v1684_v14, 7  ;;  %v1723_v53 = vrot.slane %v1685_v40, 6  ;;  %v2872_v24 = vsel %vm659_vm1, %v2866_v33, 0.0  ;;  %v3365_v14 = vld [vmem:[#allocation3 + $0x6c] sm:$0x1] }
 0x4c7   : > { %v1725_v39 = vrot.slane %v1686_v4, 5  ;;  %v1727_v47 = vrot.slane %v1687_v46, 4  ;;  %v1729_v59 = vrot.slane %v1688_v13, 3  ;;  %2873 = vadd.xlane.f32.xlu0 %v2872_v24  ;;  %v1731_v42 = vrot.slane %v1689_v43, 2  ;;  %v3367_v21 = vld [vmem:[#allocation3 + $0xac] sm:$0x1] }
 0x4c8   : > { %v1722_v44 = vsel %vm1354_vm10, %v1721_v54, %v1683_v29  ;;  %v3380_v17 = vrot.slane %v8336_v51, 1  ;;  %v3381_v26 = vrot.slane %v8336_v51, 2  ;;  %v3382_v12 = vrot.slane %v8336_v51, 3  ;;  %v3368_v40 = vld [vmem:[#allocation3 + $0xcc] sm:$0x1] }
 0x4c9   : > { %v1724_v48 = vsel %vm1357_vm11, %v1723_v53, %v1722_v44  ;;  %v3383_v52 = vrot.slane %v8336_v51, 4  ;;  %v3384_v41 = vrot.slane %v8336_v51, 5  ;;  %v1733_v1 = vrot.slane %v1690_v31, 1  ;;  %v3362_v29 = vld [vmem:[#allocation3 + $0xc] sm:$0x1] }
 0x4ca   : > { %v1726_v38 = vsel %vm1360_vm12, %v1725_v39, %v1724_v48  ;;  %v3385_v60 = vrot.slane %v8336_v51, 6  ;;  %v3386_v23 = vrot.slane %v8336_v51, 7  ;;  %v3411_v4 = vmul.f32 %v3380_v17, %v3363_v16  ;;  %v3369_v54 = vld [vmem:[#allocation3 + $0xec] sm:$0x1]  ;;  %v1759_v44 = vld [vmem:[#allocation3 + $0x123] sm:$0x1] }
 0x4cb   : > { %v1728_v25 = vsel %vm1363_vm13, %v1727_v47, %v1726_v38  ;;  %v3412_v46 = vmul.f32 %v3381_v26, %v3364_v56  ;;  %v3413_v19 = vmul.f32 %v3382_v12, %v3365_v14  ;;  %v3414_v13 = vmul.f32 %v3383_v52, %v3366_v61  ;;  %v1758_v47 = vld [vmem:[#allocation3 + $0x103] sm:$0x1] }
 0x4cc   : > { %v1730_v57 = vsel %vm1366_vm14, %v1729_v59, %v1728_v25  ;;  %v3415_v43 = vmul.f32 %v3384_v41, %v3367_v21  ;;  %v3416_v33 = vmul.f32 %v3385_v60, %v3368_v40  ;;  %v3410_v53 = vmul.f32 %v3362_v29, %v8336_v51  ;;  %v1760_v25 = vld [vmem:[#allocation3 + $0x143] sm:$0x1] }
 0x4cd   : > { %v1732_v31 = vsel %vm1369_vm15, %v1731_v42, %v1730_v57  ;;  %v3442_v24 = vrot.slane %v3411_v4, 7  ;;  %v3444_v39 = vrot.slane %v3412_v46, 6  ;;  %v3417_v16 = vmul.f32 %v3386_v23, %v3369_v54  ;;  %v1761_v57 = vld [vmem:[#allocation3 + $0x163] sm:$0x1] }
 0x4ce   : > { %v1734_v59 = vsel %vm1372_vm0, %v1733_v1, %v1732_v31  ;;  %v3446_v48 = vrot.slane %v3413_v19, 5  ;;  %v3448_v56 = vrot.slane %v3414_v13, 4  ;;  %v8632_v38 = vpop.f32.mrb[26].mxu1  ;;  %v8634_v14 = vpop.f32.mrb[42].mxu0  ;;  %v3450_v21 = vrot.slane %v3415_v43, 3 }
 0x4cf   : > { %v1740_v42 = vsel %vm659_vm1, %v1734_v59, 0.0  ;;  %v3443_v61 = vsel %vm1354_vm10, %v3442_v24, %v3410_v53  ;;  %v3452_v40 = vrot.slane %v3416_v33, 2  ;;  %v4401_v4 = vpop.f32.mrb[27].mxu1  ;;  %v5442_v46 = vpop.f32.mrb[43].mxu0  ;;  %v1762_v29 = vld [vmem:[#allocation3 + $0x183] sm:$0x1]  ;;  %v1774_v13 = vmul.f32 %v1758_v47, %v8318_v50 }
 0x4d0   : > { %1741 = vadd.xlane.f32.xlu0 %v1740_v42  ;;  %v3445_v1 = vsel %vm1357_vm11, %v3444_v39, %v3443_v61  ;;  %v1763_v19 = vld [vmem:[#allocation3 + $0x1a3] sm:$0x1]  ;;  %v1775_v31 = vmul.f32 %v1759_v44, %v1652_v28  ;;  %v1776_v54 = vmul.f32 %v1760_v25, %v1653_v32  ;;  %v1777_v24 = vmul.f32 %v1761_v57, %v1654_v5  ;;  %v3486_v46 = vld [vmem:[#allocation3 + $0x2d] sm:$0x1] }
 0x4d1   : > { %v3447_v53 = vsel %vm1360_vm12, %v3446_v48, %v3445_v1  ;;  %v1764_v43 = vld [vmem:[#allocation3 + $0x1c3] sm:$0x1]  ;;  %v1778_v39 = vmul.f32 %v1762_v29, %v1655_v9  ;;  %v1779_v59 = vmul.f32 %v1763_v19, %v1656_v2  ;;  %v3454_v25 = vrot.slane %v3417_v16, 1  ;;  %v3488_v16 = vld [vmem:[#allocation3 + $0x6d] sm:$0x1] }
 0x4d2   : > { %v1765_v33 = vld [vmem:[#allocation3 + $0x1e3] sm:$0x1]  ;;  %v3449_v47 = vsel %vm1363_vm13, %v3448_v56, %v3447_v53  ;;  %v1780_v28 = vmul.f32 %v1764_v43, %v1657_v49  ;;  %v1812_v44 = vrot.slane %v1775_v31, 7  ;;  %v1814_v42 = vrot.slane %v1776_v54, 6  ;;  %v3489_v31 = vld [vmem:[#allocation3 + $0x8d] sm:$0x1] }
 0x4d3   : > { %v1781_v32 = vmul.f32 %v1765_v33, %v1658_v35  ;;  %v3451_v48 = vsel %vm1366_vm14, %v3450_v21, %v3449_v47  ;;  %v1816_v5 = vrot.slane %v1777_v24, 5  ;;  %v8657_v61 = vpop.f32.mrb[28].mxu1  ;;  %v1818_v4 = vrot.slane %v1778_v39, 4  ;;  %v3487_v21 = vld [vmem:[#allocation3 + $0x4d] sm:$0x1] }
 0x4d4   : > { %v3453_v9 = vsel %vm1369_vm15, %v3452_v40, %v3451_v48  ;;  %v1813_v2 = vsel %vm1354_vm10, %v1812_v44, %v1774_v13  ;;  %v1820_v56 = vrot.slane %v1779_v59, 3  ;;  %v5090_v1 = vpop.f32.mrb[29].mxu1  ;;  %v1822_v35 = vrot.slane %v1780_v28, 2  ;;  %v3490_v40 = vld [vmem:[#allocation3 + $0xad] sm:$0x1] }
 0x4d5   : > { %v3455_v49 = vsel %vm1372_vm0, %v3454_v25, %v3453_v9  ;;  %v1815_v50 = vsel %vm1357_vm11, %v1814_v42, %v1813_v2  ;;  %v1824_v57 = vrot.slane %v1781_v32, 1  ;;  %v3502_v13 = vmul.f32 %v3486_v46, %v3380_v17  ;;  %v3485_v33 = vld [vmem:[#allocation3 + $0xd] sm:$0x1]  ;;  %v2323_v1 = vld [vmem:[#allocation3 + $0x46] sm:$0x1] }
 0x4d6   : > { %v3472_v29 = vsel %vm659_vm1, %v3455_v49, 0.0  ;;  %v1817_v19 = vsel %vm1360_vm12, %v1816_v5, %v1815_v50  ;;  %v3503_v54 = vmul.f32 %v3487_v21, %v3381_v26  ;;  %v8669_v53 = vpop.f32.mrb[44].mxu0  ;;  %v3491_v24 = vld [vmem:[#allocation3 + $0xcd] sm:$0x1]  ;;  %v3504_v39 = vmul.f32 %v3488_v16, %v3382_v12 }
 0x4d7   : > { %3473 = vadd.xlane.f32.xlu1 %v3472_v29  ;;  %v1819_v43 = vsel %vm1363_vm13, %v1818_v4, %v1817_v19  ;;  %v3505_v59 = vmul.f32 %v3489_v31, %v3383_v52  ;;  %v3506_v47 = vmul.f32 %v3490_v40, %v3384_v41  ;;  %v6131_v17 = vpop.f32.mrb[45].mxu0  ;;  %v3492_v26 = vld [vmem:[#allocation3 + $0xed] sm:$0x1]  ;;  %v3501_v32 = vmul.f32 %v3485_v33, %v8336_v51  ;;  %v2325_v33 = vld [vmem:[#allocation3 + $0x86] sm:$0x1] }
 0x4d8   : > { %v1821_v28 = vsel %vm1366_vm14, %v1820_v56, %v1819_v43  ;;  %v3507_v44 = vmul.f32 %v3491_v24, %v3385_v60  ;;  %v3533_v48 = vrot.slane %v3502_v13, 7  ;;  %v3508_v12 = vmul.f32 %v3492_v26, %v3386_v23  ;;  %v2322_v60 = vld [vmem:[#allocation3 + $0x26] sm:$0x1] }
 0x4d9   : > { %v1823_v25 = vsel %vm1369_vm15, %v1822_v35, %v1821_v28  ;;  %v3535_v42 = vrot.slane %v3503_v54, 6  ;;  %v3537_v52 = vrot.slane %v3504_v39, 5  ;;  %v3539_v9 = vrot.slane %v3505_v59, 4  ;;  %v2324_v23 = vld [vmem:[#allocation3 + $0x66] sm:$0x1] }
 0x4da   : > { %v1825_v5 = vsel %vm1372_vm0, %v1824_v57, %v1823_v25  ;;  %v3534_v41 = vsel %vm1354_vm10, %v3533_v48, %v3501_v32  ;;  %v3541_v2 = vrot.slane %v3506_v47, 3  ;;  %v3543_v46 = vrot.slane %v3507_v44, 2  ;;  %v2326_v24 = vld [vmem:[#allocation3 + $0xa6] sm:$0x1] }
 0x4db   : > { %v1831_v4 = vsel %vm659_vm1, %v1825_v5, 0.0  ;;  %v3536_v56 = vsel %vm1357_vm11, %v3535_v42, %v3534_v41  ;;  %v2339_v49 = vrot.slane %v8328_v36, 1  ;;  %v2340_v50 = vrot.slane %v8328_v36, 2  ;;  %v2321_v28 = vld [vmem:[#allocation3 + $0x6] sm:$0x1] }
 0x4dc   : > { %1832 = vadd.xlane.f32.xlu0 %v1831_v4  ;;  %v3538_v51 = vsel %vm1360_vm12, %v3537_v52, %v3536_v56  ;;  %v2341_v35 = vrot.slane %v8328_v36, 3  ;;  %v2342_v57 = vrot.slane %v8328_v36, 4  ;;  %v8694_v21 = vpop.f32.mrb[30].mxu1  ;;  %v2343_v29 = vrot.slane %v8328_v36, 5  ;;  %v2327_v26 = vld [vmem:[#allocation3 + $0xc6] sm:$0x1] }
 0x4dd   : > { %v3540_v16 = vsel %vm1363_vm13, %v3539_v9, %v3538_v51  ;;  %v2344_v19 = vrot.slane %v8328_v36, 6  ;;  %v2345_v31 = vrot.slane %v8328_v36, 7  ;;  %v8700_v40 = vpop.f32.mrb[46].mxu0  ;;  %v5095_v13 = vpop.f32.mrb[31].mxu1  ;;  %v3545_v43 = vrot.slane %v3508_v12, 1 }
 0x4de   : > { %v3542_v54 = vsel %vm1366_vm14, %v3541_v2, %v3540_v16  ;;  %v2370_v39 = vmul.f32 %v2339_v49, %v2322_v60  ;;  %v2371_v59 = vmul.f32 %v2340_v50, %v2323_v1  ;;  %v6136_v47 = vpop.f32.mrb[47].mxu0  ;;  %v2372_v32 = vmul.f32 %v2341_v35, %v2324_v23  ;;  %v2328_v12 = vld [vmem:[#allocation3 + $0xe6] sm:$0x1]  ;;  %v3371_v16 = vld [vmem:[#allocation3 + $0x12c] sm:$0x1] }
 0x4df   : > { %v3544_v17 = vsel %vm1369_vm15, %v3543_v46, %v3542_v54  ;;  %v2373_v44 = vmul.f32 %v2342_v57, %v2325_v33  ;;  %v2374_v48 = vmul.f32 %v2343_v29, %v2326_v24  ;;  %v2369_v42 = vmul.f32 %v2321_v28, %v8328_v36 }
 0x4e0   : > { %v3546_v25 = vsel %vm1372_vm0, %v3545_v43, %v3544_v17  ;;  %v2375_v52 = vmul.f32 %v2344_v19, %v2327_v26  ;;  %v2401_v5 = vrot.slane %v2370_v39, 7  ;;  %v2376_v9 = vmul.f32 %v2345_v31, %v2328_v12  ;;  %v3372_v39 = vld [vmem:[#allocation3 + $0x14c] sm:$0x1] }
 0x4e1   : > { %v3563_v41 = vsel %vm659_vm1, %v3546_v25, 0.0  ;;  %v2403_v2 = vrot.slane %v2371_v59, 6  ;;  %v2405_v4 = vrot.slane %v2372_v32, 5  ;;  %v2407_v46 = vrot.slane %v2373_v44, 4  ;;  %v3373_v32 = vld [vmem:[#allocation3 + $0x16c] sm:$0x1] }
 0x4e2   : > { %3564 = vadd.xlane.f32.xlu1 %v3563_v41  ;;  %v2402_v56 = vsel %vm1354_vm10, %v2401_v5, %v2369_v42  ;;  %v2409_v60 = vrot.slane %v2374_v48, 3  ;;  %v2411_v1 = vrot.slane %v2375_v52, 2  ;;  %v8722_v51 = vpop.f32.mrb[32].mxu1  ;;  %v3387_v13 = vrot.slane %v8393_v22, 1  ;;  %v3374_v44 = vld [vmem:[#allocation3 + $0x18c] sm:$0x1] }
 0x4e3   : > { %v2404_v23 = vsel %vm1357_vm11, %v2403_v2, %v2402_v56  ;;  %v3388_v54 = vrot.slane %v8393_v22, 2  ;;  %v10067_v43 = vrot.slane %v8393_v22, 3  ;;  %v5784_v33 = vpop.f32.mrb[33].mxu1  ;;  %v10064_v59 = vrot.slane %v8393_v22, 4  ;;  %v3375_v42 = vld [vmem:[#allocation3 + $0x1ac] sm:$0x1] }
 0x4e4   : > { %v2406_v24 = vsel %vm1360_vm12, %v2405_v4, %v2404_v23  ;;  %v10063_v47 = vrot.slane %v8393_v22, 5  ;;  %v10066_v17 = vrot.slane %v8393_v22, 6  ;;  %v2413_v26 = vrot.slane %v2376_v9, 1  ;;  %v3376_v52 = vld [vmem:[#allocation3 + $0x1cc] sm:$0x1] }
 0x4e5   : > { %v2408_v28 = vsel %vm1363_vm13, %v2407_v46, %v2406_v24  ;;  %v10065_v48 = vrot.slane %v8393_v22, 7  ;;  %v3419_v25 = vmul.f32 %v3387_v13, %v3371_v16  ;;  %v3377_v5 = vld [vmem:[#allocation3 + $0x1ec] sm:$0x1]  ;;  %v3420_v41 = vmul.f32 %v3388_v54, %v3372_v39 }
 0x4e6   : > { %v2410_v12 = vsel %vm1366_vm14, %v2409_v60, %v2408_v28  ;;  %v3421_v2 = vmul.f32 %v10067_v43, %v3373_v32  ;;  %v3422_v9 = vmul.f32 %v10064_v59, %v3374_v44  ;;  %v3370_v56 = vld [vmem:[#allocation3 + $0x10c] sm:$0x1]  ;;  %v3423_v46 = vmul.f32 %v10063_v47, %v3375_v42  ;;  %v2445_v32 = vld [vmem:[#allocation3 + $0x27] sm:$0x1] }
 0x4e7   : > { %v2412_v4 = vsel %vm1369_vm15, %v2411_v1, %v2410_v12  ;;  %v3424_v60 = vmul.f32 %v10066_v17, %v3376_v52  ;;  %v3425_v23 = vmul.f32 %v10065_v48, %v3377_v5  ;;  %v8750_v16 = vpop.f32.mrb[34].mxu1  ;;  %v3418_v24 = vmul.f32 %v3370_v56, %v8393_v22  ;;  %v2446_v59 = vld [vmem:[#allocation3 + $0x47] sm:$0x1] }
 0x4e8   : > { %v2414_v33 = vsel %vm1372_vm0, %v2413_v26, %v2412_v4  ;;  %v3456_v39 = vrot.slane %v3419_v25, 7  ;;  %v3458_v28 = vrot.slane %v3420_v41, 6  ;;  %v5789_v1 = vpop.f32.mrb[35].mxu1  ;;  %v3460_v12 = vrot.slane %v3421_v2, 5  ;;  %v2447_v17 = vld [vmem:[#allocation3 + $0x67] sm:$0x1] }
 0x4e9   : > { %v2431_v44 = vsel %vm659_vm1, %v2414_v33, 0.0  ;;  %v3462_v42 = vrot.slane %v3422_v9, 4  ;;  %v3464_v47 = vrot.slane %v3423_v46, 3  ;;  %v3466_v5 = vrot.slane %v3424_v60, 2  ;;  %v2448_v43 = vld [vmem:[#allocation3 + $0x87] sm:$0x1] }
 0x4ea   : > { %2432 = vadd.xlane.f32.xlu1 %v2431_v44  ;;  %v3457_v52 = vsel %vm1354_vm10, %v3456_v39, %v3418_v24  ;;  %v3468_v48 = vrot.slane %v3425_v23, 1  ;;  %v2461_v26 = vmul.f32 %v2445_v32, %v2339_v49  ;;  %v2449_v41 = vld [vmem:[#allocation3 + $0xa7] sm:$0x1]  ;;  %v2462_v2 = vmul.f32 %v2446_v59, %v2340_v50 }
 0x4eb   : > { %v3459_v25 = vsel %vm1357_vm11, %v3458_v28, %v3457_v52  ;;  %v2450_v4 = vld [vmem:[#allocation3 + $0xc7] sm:$0x1]  ;;  %v2463_v9 = vmul.f32 %v2447_v17, %v2341_v35  ;;  %v2464_v46 = vmul.f32 %v2448_v43, %v2342_v57  ;;  %v2465_v49 = vmul.f32 %v2449_v41, %v2343_v29  ;;  %v3497_v41 = vld [vmem:[#allocation3 + $0x18d] sm:$0x1] }
 0x4ec   : > { %v2451_v56 = vld [vmem:[#allocation3 + $0xe7] sm:$0x1]  ;;  %v3461_v60 = vsel %vm1360_vm12, %v3460_v12, %v3459_v25  ;;  %v2466_v33 = vmul.f32 %v2450_v4, %v2344_v19  ;;  %v2492_v35 = vrot.slane %v2461_v26, 7  ;;  %v2494_v17 = vrot.slane %v2462_v2, 6  ;;  %v3494_v12 = vld [vmem:[#allocation3 + $0x12d] sm:$0x1] }
 0x4ed   : > { %v2444_v23 = vld [vmem:[#allocation3 + $0x7] sm:$0x1]  ;;  %v2467_v24 = vmul.f32 %v2451_v56, %v2345_v31  ;;  %v3463_v50 = vsel %vm1363_vm13, %v3462_v42, %v3461_v60  ;;  %v8774_v39 = vpop.f32.mrb[36].mxu1  ;;  %v2496_v43 = vrot.slane %v2463_v9, 5  ;;  %v2498_v28 = vrot.slane %v2464_v46, 4 }
 0x4ee   : > { %v2460_v59 = vmul.f32 %v2444_v23, %v8328_v36  ;;  %v3465_v57 = vsel %vm1366_vm14, %v3464_v47, %v3463_v50  ;;  %v2500_v32 = vrot.slane %v2465_v49, 3  ;;  %v6478_v29 = vpop.f32.mrb[37].mxu1  ;;  %v2502_v44 = vrot.slane %v2466_v33, 2  ;;  %v3495_v42 = vld [vmem:[#allocation3 + $0x14d] sm:$0x1] }
 0x4ef   : > { %v3467_v1 = vsel %vm1369_vm15, %v3466_v5, %v3465_v57  ;;  %v2504_v31 = vrot.slane %v2467_v24, 1  ;;  %v3493_v26 = vld [vmem:[#allocation3 + $0x10d] sm:$0x1]  ;;  %v3510_v47 = vmul.f32 %v3494_v12, %v3387_v13  ;;  %v3511_v4 = vmul.f32 %v3495_v42, %v3388_v54 }
 0x4f0   : > { %v2493_v19 = vsel %vm1354_vm10, %v2492_v35, %v2460_v59  ;;  %v3469_v36 = vsel %vm1372_vm0, %v3468_v48, %v3467_v1  ;;  %v3496_v25 = vld [vmem:[#allocation3 + $0x16d] sm:$0x1]  ;;  %v10079_v46 = vrot.slane %v8393_v22, 3  ;;  %v10080_v60 = vrot.slane %v8393_v22, 4 }
 0x4f1   : > { %v2495_v52 = vsel %vm1357_vm11, %v2494_v17, %v2493_v19  ;;  %v3475_v5 = vsel %vm659_vm1, %v3469_v36, 0.0  ;;  %v3498_v2 = vld [vmem:[#allocation3 + $0x1ad] sm:$0x1]  ;;  %v8791_v49 = vpop.f32.mrb[38].mxu1  ;;  %v3509_v54 = vmul.f32 %v3493_v26, %v8393_v22  ;;  %v10081_v24 = vrot.slane %v8393_v22, 5 }
 0x4f2   : > { %v2497_v56 = vsel %vm1360_vm12, %v2496_v43, %v2495_v52  ;;  %v3499_v9 = vld [vmem:[#allocation3 + $0x1cd] sm:$0x1]  ;;  %v3512_v48 = vmul.f32 %v3496_v25, %v10079_v46  ;;  %v3513_v23 = vmul.f32 %v3497_v41, %v10080_v60  ;;  %3476 = vadd.xlane.f32.xlu0 %v3475_v5  ;;  %v10082_v59 = vrot.slane %v8393_v22, 6  ;;  %v6483_v17 = vpop.f32.mrb[39].mxu1  ;;  %v3018_v60 = vld [vmem:[#allocation3 + $0x6a] sm:$0x1] }
 0x4f3   : > { %v2499_v13 = vsel %vm1363_vm13, %v2498_v28, %v2497_v56  ;;  %v3500_v33 = vld [vmem:[#allocation3 + $0x1ed] sm:$0x1]  ;;  %v3514_v50 = vmul.f32 %v3498_v2, %v10081_v24  ;;  %v10083_v43 = vrot.slane %v8393_v22, 7  ;;  %v3547_v1 = vrot.slane %v3510_v47, 7  ;;  %v3016_v22 = vld [vmem:[#allocation3 + $0x2a] sm:$0x1] }
 0x4f4   : > { %v3515_v35 = vmul.f32 %v3499_v9, %v10082_v59  ;;  %v2501_v57 = vsel %vm1366_vm14, %v2500_v32, %v2499_v13  ;;  %v3549_v19 = vrot.slane %v3511_v4, 6  ;;  %v3551_v28 = vrot.slane %v3512_v48, 5  ;;  %v3017_v56 = vld [vmem:[#allocation3 + $0x4a] sm:$0x1] }
 0x4f5   : > { %v3516_v29 = vmul.f32 %v3500_v33, %v10083_v43  ;;  %v2503_v12 = vsel %vm1369_vm15, %v2502_v44, %v2501_v57  ;;  %v3553_v42 = vrot.slane %v3513_v23, 4  ;;  %v3555_v36 = vrot.slane %v3514_v50, 3  ;;  %v3019_v23 = vld [vmem:[#allocation3 + $0x8a] sm:$0x1] }
 0x4f6   : > { %v2505_v52 = vsel %vm1372_vm0, %v2504_v31, %v2503_v12  ;;  %v3548_v26 = vsel %vm1354_vm10, %v3547_v1, %v3509_v54  ;;  %v3557_v25 = vrot.slane %v3515_v35, 2  ;;  %v3033_v41 = vrot.slane %v8408_v15, 1  ;;  %v3015_v24 = vld [vmem:[#allocation3 + $0xa] sm:$0x1] }
 0x4f7   : > { %v2522_v5 = vsel %vm659_vm1, %v2505_v52, 0.0  ;;  %v3550_v32 = vsel %vm1357_vm11, %v3549_v19, %v3548_v26  ;;  %v3034_v47 = vrot.slane %v8408_v15, 2  ;;  %v3035_v4 = vrot.slane %v8408_v15, 3  ;;  %v3020_v50 = vld [vmem:[#allocation3 + $0xaa] sm:$0x1] }
 0x4f8   : > { %2523 = vadd.xlane.f32.xlu1 %v2522_v5  ;;  %v3552_v44 = vsel %vm1360_vm12, %v3551_v28, %v3550_v32  ;;  %v3036_v31 = vrot.slane %v8408_v15, 4  ;;  %v3037_v2 = vrot.slane %v8408_v15, 5  ;;  %v3038_v9 = vrot.slane %v8408_v15, 6  ;;  %v3021_v59 = vld [vmem:[#allocation3 + $0xca] sm:$0x1] }
 0x4f9   : > { %v3554_v46 = vsel %vm1363_vm13, %v3553_v42, %v3552_v44  ;;  %v3559_v48 = vrot.slane %v3516_v29, 1  ;;  %v3039_v13 = vrot.slane %v8408_v15, 7  ;;  %v3064_v33 = vmul.f32 %v3033_v41, %v3016_v22  ;;  %v3022_v29 = vld [vmem:[#allocation3 + $0xea] sm:$0x1] }
 0x4fa   : > { %v3556_v54 = vsel %vm1366_vm14, %v3555_v36, %v3554_v46  ;;  %v3065_v35 = vmul.f32 %v3034_v47, %v3017_v56  ;;  %v3066_v17 = vmul.f32 %v3035_v4, %v3018_v60  ;;  %v3067_v57 = vmul.f32 %v3036_v31, %v3019_v23  ;;  %v2330_v56 = vld [vmem:[#allocation3 + $0x126] sm:$0x1] }
 0x4fb   : > { %v3558_v43 = vsel %vm1369_vm15, %v3557_v25, %v3556_v54  ;;  %v3063_v1 = vmul.f32 %v3015_v24, %v8408_v15  ;;  %v3068_v19 = vmul.f32 %v3037_v2, %v3020_v50  ;;  %v3069_v12 = vmul.f32 %v3038_v9, %v3021_v59  ;;  %v2331_v23 = vld [vmem:[#allocation3 + $0x146] sm:$0x1] }
 0x4fc   : > { %v3560_v28 = vsel %vm1372_vm0, %v3559_v48, %v3558_v43  ;;  %v3070_v42 = vmul.f32 %v3039_v13, %v3022_v29  ;;  %v3095_v36 = vrot.slane %v3064_v33, 7  ;;  %v3097_v52 = vrot.slane %v3065_v35, 6  ;;  %v2332_v35 = vld [vmem:[#allocation3 + $0x166] sm:$0x1] }
 0x4fd   : > { %v3566_v26 = vsel %vm659_vm1, %v3560_v28, 0.0  ;;  %v3099_v5 = vrot.slane %v3066_v17, 5  ;;  %v3101_v25 = vrot.slane %v3067_v57, 4  ;;  %v3103_v32 = vrot.slane %v3068_v19, 3  ;;  %v2333_v29 = vld [vmem:[#allocation3 + $0x186] sm:$0x1] }
 0x4fe   : > { %3567 = vadd.xlane.f32.xlu0 %v3566_v26  ;;  %v3096_v22 = vsel %vm1354_vm10, %v3095_v36, %v3063_v1  ;;  %v3105_v44 = vrot.slane %v3069_v12, 2  ;;  %v2346_v46 = vrot.slane %v8377_v45, 1  ;;  %v2347_v60 = vrot.slane %v8377_v45, 2  ;;  %v2334_v1 = vld [vmem:[#allocation3 + $0x1a6] sm:$0x1] }
 0x4ff   : > { %v3098_v48 = vsel %vm1357_vm11, %v3097_v52, %v3096_v22  ;;  %v10069_v33 = vrot.slane %v8377_v45, 3  ;;  %v10068_v54 = vrot.slane %v8377_v45, 4  ;;  %v2350_v24 = vrot.slane %v8377_v45, 5  ;;  %v2335_v19 = vld [vmem:[#allocation3 + $0x1c6] sm:$0x1] }
 0x500   : > { %v3100_v50 = vsel %vm1360_vm12, %v3099_v5, %v3098_v48  ;;  %v3107_v59 = vrot.slane %v3070_v42, 1  ;;  %v10070_v17 = vrot.slane %v8377_v45, 6  ;;  %v2352_v57 = vrot.slane %v8377_v45, 7  ;;  %v2329_v52 = vld [vmem:[#allocation3 + $0x106] sm:$0x1] }
 0x501   : > { %v3102_v43 = vsel %vm1363_vm13, %v3101_v25, %v3100_v50  ;;  %v2378_v12 = vmul.f32 %v2346_v46, %v2330_v56  ;;  %v2379_v28 = vmul.f32 %v2347_v60, %v2331_v23  ;;  %v2380_v36 = vmul.f32 %v10069_v33, %v2332_v35  ;;  %v2336_v56 = vld [vmem:[#allocation3 + $0x1e6] sm:$0x1]  ;;  %v3139_v33 = vld [vmem:[#allocation3 + $0x2b] sm:$0x1] }
 0x502   : > { %v3104_v42 = vsel %vm1366_vm14, %v3103_v32, %v3102_v43  ;;  %v2381_v26 = vmul.f32 %v10068_v54, %v2333_v29  ;;  %v2382_v5 = vmul.f32 %v2350_v24, %v2334_v1  ;;  %v2383_v25 = vmul.f32 %v10070_v17, %v2335_v19  ;;  %v3138_v54 = vld [vmem:[#allocation3 + $0xb] sm:$0x1] }
 0x503   : > { %v3106_v22 = vsel %vm1369_vm15, %v3105_v44, %v3104_v42  ;;  %v2377_v48 = vmul.f32 %v2329_v52, %v8377_v45  ;;  %v2415_v23 = vrot.slane %v2378_v12, 7  ;;  %v2417_v50 = vrot.slane %v2379_v28, 6  ;;  %v3140_v42 = vld [vmem:[#allocation3 + $0x4b] sm:$0x1] }
 0x504   : > { %v3108_v35 = vsel %vm1372_vm0, %v3107_v59, %v3106_v22  ;;  %v2384_v32 = vmul.f32 %v2352_v57, %v2336_v56  ;;  %v2419_v43 = vrot.slane %v2380_v36, 5  ;;  %v2421_v29 = vrot.slane %v2381_v26, 4  ;;  %v3141_v28 = vld [vmem:[#allocation3 + $0x6b] sm:$0x1] }
 0x505   : > { %v3125_v1 = vsel %vm659_vm1, %v3108_v35, 0.0  ;;  %v2416_v19 = vsel %vm1354_vm10, %v2415_v23, %v2377_v48  ;;  %v2423_v17 = vrot.slane %v2382_v5, 3  ;;  %v2425_v44 = vrot.slane %v2383_v25, 2  ;;  %v3142_v52 = vld [vmem:[#allocation3 + $0x8b] sm:$0x1] }
 0x506   : > { %3126 = vadd.xlane.f32.xlu1 %v3125_v1  ;;  %v2418_v12 = vsel %vm1357_vm11, %v2417_v50, %v2416_v19  ;;  %v3143_v59 = vld [vmem:[#allocation3 + $0xab] sm:$0x1]  ;;  %v3154_v22 = vmul.f32 %v3138_v54, %v8408_v15  ;;  %v3155_v36 = vmul.f32 %v3139_v33, %v3033_v41  ;;  %v3156_v26 = vmul.f32 %v3140_v42, %v3034_v47 }
 0x507   : > { %v2420_v56 = vsel %vm1360_vm12, %v2419_v43, %v2418_v12  ;;  %v3144_v48 = vld [vmem:[#allocation3 + $0xcb] sm:$0x1]  ;;  %v3157_v25 = vmul.f32 %v3141_v28, %v3035_v4  ;;  %v3158_v23 = vmul.f32 %v3142_v52, %v3036_v31  ;;  %v3159_v50 = vmul.f32 %v3143_v59, %v3037_v2  ;;  %v2453_v12 = vld [vmem:[#allocation3 + $0x127] sm:$0x1] }
 0x508   : > { %v3145_v5 = vld [vmem:[#allocation3 + $0xeb] sm:$0x1]  ;;  %v2422_v54 = vsel %vm1363_vm13, %v2421_v29, %v2420_v56  ;;  %v3160_v41 = vmul.f32 %v3144_v48, %v3038_v9  ;;  %v3186_v33 = vrot.slane %v3155_v36, 7  ;;  %v2427_v43 = vrot.slane %v2384_v32, 1  ;;  %v2455_v52 = vld [vmem:[#allocation3 + $0x167] sm:$0x1] }
 0x509   : > { %v3161_v47 = vmul.f32 %v3145_v5, %v3039_v13  ;;  %v2424_v35 = vsel %vm1366_vm14, %v2423_v17, %v2422_v54  ;;  %v3188_v1 = vrot.slane %v3156_v26, 6  ;;  %v3190_v4 = vrot.slane %v3157_v25, 5  ;;  %v2454_v13 = vld [vmem:[#allocation3 + $0x147] sm:$0x1] }
 0x50a   : > { %v2426_v19 = vsel %vm1369_vm15, %v2425_v44, %v2424_v35  ;;  %v3187_v31 = vsel %vm1354_vm10, %v3186_v33, %v3154_v22  ;;  %v3192_v42 = vrot.slane %v3158_v23, 4  ;;  %v3194_v2 = vrot.slane %v3159_v50, 3  ;;  %v2456_v59 = vld [vmem:[#allocation3 + $0x187] sm:$0x1] }
 0x50b   : > { %v2428_v29 = vsel %vm1372_vm0, %v2427_v43, %v2426_v19  ;;  %v3189_v9 = vsel %vm1357_vm11, %v3188_v1, %v3187_v31  ;;  %v3196_v28 = vrot.slane %v3160_v41, 2  ;;  %v3198_v15 = vrot.slane %v3161_v47, 1  ;;  %v2457_v36 = vld [vmem:[#allocation3 + $0x1a7] sm:$0x1] }
 0x50c   : > { %v2434_v17 = vsel %vm659_vm1, %v2428_v29, 0.0  ;;  %v3191_v32 = vsel %vm1360_vm12, %v3190_v4, %v3189_v9  ;;  %v2469_v44 = vmul.f32 %v2453_v12, %v2346_v46  ;;  %v2470_v22 = vmul.f32 %v2454_v13, %v2347_v60  ;;  %v2452_v56 = vld [vmem:[#allocation3 + $0x107] sm:$0x1]  ;;  %v3024_v13 = vld [vmem:[#allocation3 + $0x12a] sm:$0x1] }
 0x50d   : > { %2435 = vadd.xlane.f32.xlu0 %v2434_v17  ;;  %v3193_v26 = vsel %vm1363_vm13, %v3192_v42, %v3191_v32  ;;  %v2458_v48 = vld [vmem:[#allocation3 + $0x1c7] sm:$0x1]  ;;  %v10084_v5 = vrot.slane %v8377_v45, 3  ;;  %v10085_v23 = vrot.slane %v8377_v45, 4  ;;  %v2473_v54 = vmul.f32 %v2457_v36, %v2350_v24 }
 0x50e   : > { %v3195_v41 = vsel %vm1366_vm14, %v3194_v2, %v3193_v26  ;;  %v2459_v46 = vld [vmem:[#allocation3 + $0x1e7] sm:$0x1]  ;;  %v2468_v47 = vmul.f32 %v2452_v56, %v8377_v45  ;;  %v10086_v60 = vrot.slane %v8377_v45, 6  ;;  %v2506_v35 = vrot.slane %v2469_v44, 7 }
 0x50f   : > { %v2471_v25 = vmul.f32 %v2455_v52, %v10084_v5  ;;  %v2472_v50 = vmul.f32 %v2456_v59, %v10085_v23  ;;  %v3197_v43 = vsel %vm1369_vm15, %v3196_v28, %v3195_v41  ;;  %v2475_v1 = vmul.f32 %v2459_v46, %v2352_v57  ;;  %v3025_v57 = vld [vmem:[#allocation3 + $0x14a] sm:$0x1] }
 0x510   : > { %v2474_v33 = vmul.f32 %v2458_v48, %v10086_v60  ;;  %v2508_v4 = vrot.slane %v2470_v22, 6  ;;  %v3199_v31 = vsel %vm1372_vm0, %v3198_v15, %v3197_v43  ;;  %v2507_v24 = vsel %vm1354_vm10, %v2506_v35, %v2468_v47  ;;  %v3026_v59 = vld [vmem:[#allocation3 + $0x16a] sm:$0x1] }
 0x511   : > { %v2510_v19 = vrot.slane %v2471_v25, 5  ;;  %v2512_v42 = vrot.slane %v2472_v50, 4  ;;  %v2514_v2 = vrot.slane %v2473_v54, 3  ;;  %v3216_v12 = vsel %vm659_vm1, %v3199_v31, 0.0  ;;  %v3027_v48 = vld [vmem:[#allocation3 + $0x18a] sm:$0x1] }
 0x512   : > { %v2509_v29 = vsel %vm1357_vm11, %v2508_v4, %v2507_v24  ;;  %v2516_v9 = vrot.slane %v2474_v33, 2  ;;  %v3040_v52 = vrot.slane %v8458_v3, 1  ;;  %3217 = vadd.xlane.f32.xlu1 %v3216_v12  ;;  %v3041_v28 = vrot.slane %v8458_v3, 2  ;;  %v3028_v5 = vld [vmem:[#allocation3 + $0x1aa] sm:$0x1] }
 0x513   : > { %v2511_v45 = vsel %vm1360_vm12, %v2510_v19, %v2509_v29  ;;  %v3042_v15 = vrot.slane %v8458_v3, 3  ;;  %v3043_v17 = vrot.slane %v8458_v3, 4  ;;  %v3044_v36 = vrot.slane %v8458_v3, 5  ;;  %v3023_v54 = vld [vmem:[#allocation3 + $0x10a] sm:$0x1] }
 0x514   : > { %v2513_v32 = vsel %vm1363_vm13, %v2512_v42, %v2511_v45  ;;  %v3045_v44 = vrot.slane %v8458_v3, 6  ;;  %v3046_v22 = vrot.slane %v8458_v3, 7  ;;  %v2518_v56 = vrot.slane %v2475_v1, 1  ;;  %v3029_v41 = vld [vmem:[#allocation3 + $0x1ca] sm:$0x1] }
 0x515   : > { %v2515_v26 = vsel %vm1366_vm14, %v2514_v2, %v2513_v32  ;;  %v3072_v25 = vmul.f32 %v3040_v52, %v3024_v13  ;;  %v3073_v23 = vmul.f32 %v3041_v28, %v3025_v57  ;;  %v3074_v46 = vmul.f32 %v3042_v15, %v3026_v59  ;;  %v3030_v35 = vld [vmem:[#allocation3 + $0x1ea] sm:$0x1]  ;;  %v4057_v45 = vld [vmem:[#allocation3 + $0x30] sm:$0x1] }
 0x516   : > { %v2517_v50 = vsel %vm1369_vm15, %v2516_v9, %v2515_v26  ;;  %v3075_v47 = vmul.f32 %v3043_v17, %v3027_v48  ;;  %v3076_v60 = vmul.f32 %v3044_v36, %v3028_v5  ;;  %v3071_v43 = vmul.f32 %v3023_v54, %v8458_v3  ;;  %v4059_v54 = vld [vmem:[#allocation3 + $0x70] sm:$0x1] }
 0x517   : > { %v2519_v33 = vsel %vm1372_vm0, %v2518_v56, %v2517_v50  ;;  %v3077_v1 = vmul.f32 %v3045_v44, %v3029_v41  ;;  %v3109_v4 = vrot.slane %v3072_v25, 7  ;;  %v3078_v31 = vmul.f32 %v3046_v22, %v3030_v35  ;;  %v4058_v56 = vld [vmem:[#allocation3 + $0x50] sm:$0x1] }
 0x518   : > { %v2525_v19 = vsel %vm659_vm1, %v2519_v33, 0.0  ;;  %v3111_v24 = vrot.slane %v3073_v23, 6  ;;  %v3113_v42 = vrot.slane %v3074_v46, 5  ;;  %v3115_v12 = vrot.slane %v3075_v47, 4  ;;  %v4060_v41 = vld [vmem:[#allocation3 + $0x90] sm:$0x1] }
 0x519   : > { %2526 = vadd.xlane.f32.xlu0 %v2525_v19  ;;  %v3110_v2 = vsel %vm1354_vm10, %v3109_v4, %v3071_v43  ;;  %v3117_v29 = vrot.slane %v3076_v60, 3  ;;  %v3119_v9 = vrot.slane %v3077_v1, 2  ;;  %v4074_v57 = vrot.slane %v8423_v20, 1  ;;  %v4061_v33 = vld [vmem:[#allocation3 + $0xb0] sm:$0x1] }
 0x51a   : > { %v3112_v13 = vsel %vm1357_vm11, %v3111_v24, %v3110_v2  ;;  %v4075_v32 = vrot.slane %v8423_v20, 2  ;;  %v4076_v59 = vrot.slane %v8423_v20, 3  ;;  %v4077_v48 = vrot.slane %v8423_v20, 4  ;;  %v4062_v35 = vld [vmem:[#allocation3 + $0xd0] sm:$0x1] }
 0x51b   : > { %v3114_v26 = vsel %vm1360_vm12, %v3113_v42, %v3112_v13  ;;  %v10072_v5 = vrot.slane %v8423_v20, 5  ;;  %v10071_v25 = vrot.slane %v8423_v20, 6  ;;  %v3121_v50 = vrot.slane %v3078_v31, 1  ;;  %v4063_v43 = vld [vmem:[#allocation3 + $0xf0] sm:$0x1] }
 0x51c   : > { %v3116_v23 = vsel %vm1363_vm13, %v3115_v12, %v3114_v26  ;;  %v4080_v46 = vrot.slane %v8423_v20, 7  ;;  %v4105_v47 = vmul.f32 %v4074_v57, %v4057_v45  ;;  %v4106_v1 = vmul.f32 %v4075_v32, %v4058_v56  ;;  %v4056_v24 = vld [vmem:[#allocation3 + $0x10] sm:$0x1]  ;;  %v3147_v56 = vld [vmem:[#allocation3 + $0x12b] sm:$0x1] }
 0x51d   : > { %v3118_v60 = vsel %vm1366_vm14, %v3117_v29, %v3116_v23  ;;  %v4107_v4 = vmul.f32 %v4076_v59, %v4059_v54  ;;  %v4108_v19 = vmul.f32 %v4077_v48, %v4060_v41  ;;  %v4109_v42 = vmul.f32 %v10072_v5, %v4061_v33  ;;  %v3149_v5 = vld [vmem:[#allocation3 + $0x16b] sm:$0x1] }
 0x51e   : > { %v3120_v31 = vsel %vm1369_vm15, %v3119_v9, %v3118_v60  ;;  %v4110_v2 = vmul.f32 %v10071_v25, %v4062_v35  ;;  %v4111_v12 = vmul.f32 %v4080_v46, %v4063_v43  ;;  %v4104_v13 = vmul.f32 %v4056_v24, %v8423_v20  ;;  %v3148_v60 = vld [vmem:[#allocation3 + $0x14b] sm:$0x1] }
 0x51f   : > { %v3122_v29 = vsel %vm1372_vm0, %v3121_v50, %v3120_v31  ;;  %v4136_v45 = vrot.slane %v4105_v47, 7  ;;  %v4138_v26 = vrot.slane %v4106_v1, 6  ;;  %v4140_v9 = vrot.slane %v4107_v4, 5  ;;  %v3150_v43 = vld [vmem:[#allocation3 + $0x18b] sm:$0x1] }
 0x520   : > { %v3128_v23 = vsel %vm659_vm1, %v3122_v29, 0.0  ;;  %v4142_v54 = vrot.slane %v4108_v19, 4  ;;  %v4144_v41 = vrot.slane %v4109_v42, 3  ;;  %v4146_v35 = vrot.slane %v4110_v2, 2  ;;  %v3151_v1 = vld [vmem:[#allocation3 + $0x1ab] sm:$0x1] }
 0x521   : > { %3129 = vadd.xlane.f32.xlu0 %v3128_v23  ;;  %v4137_v33 = vsel %vm1354_vm10, %v4136_v45, %v4104_v13  ;;  %v4148_v25 = vrot.slane %v4111_v12, 1  ;;  %v3163_v50 = vmul.f32 %v3147_v56, %v3040_v52  ;;  %v3152_v31 = vld [vmem:[#allocation3 + $0x1cb] sm:$0x1]  ;;  %v3164_v4 = vmul.f32 %v3148_v60, %v3041_v28 }
 0x522   : > { %v4139_v47 = vsel %vm1357_vm11, %v4138_v26, %v4137_v33  ;;  %v3153_v24 = vld [vmem:[#allocation3 + $0x1eb] sm:$0x1]  ;;  %v3165_v19 = vmul.f32 %v3149_v5, %v3042_v15  ;;  %v3166_v42 = vmul.f32 %v3150_v43, %v3043_v17  ;;  %v3167_v52 = vmul.f32 %v3151_v1, %v3044_v36  ;;  %v4180_v33 = vld [vmem:[#allocation3 + $0x31] sm:$0x1] }
 0x523   : > { %v4141_v2 = vsel %vm1360_vm12, %v4140_v9, %v4139_v47  ;;  %v3146_v12 = vld [vmem:[#allocation3 + $0x10b] sm:$0x1]  ;;  %v3168_v29 = vmul.f32 %v3152_v31, %v3045_v44  ;;  %v3169_v13 = vmul.f32 %v3153_v24, %v3046_v22  ;;  %v3200_v15 = vrot.slane %v3163_v50, 7  ;;  %v4181_v43 = vld [vmem:[#allocation3 + $0x51] sm:$0x1] }
 0x524   : > { %v4143_v28 = vsel %vm1363_vm13, %v4142_v54, %v4141_v2  ;;  %v3162_v45 = vmul.f32 %v3146_v12, %v8458_v3  ;;  %v3202_v5 = vrot.slane %v3164_v4, 6  ;;  %v3204_v26 = vrot.slane %v3165_v19, 5  ;;  %v4179_v3 = vld [vmem:[#allocation3 + $0x11] sm:$0x1] }
 0x525   : > { %v4145_v17 = vsel %vm1366_vm14, %v4144_v41, %v4143_v28  ;;  %v3206_v56 = vrot.slane %v3166_v42, 4  ;;  %v3208_v23 = vrot.slane %v3167_v52, 3  ;;  %v3210_v60 = vrot.slane %v3168_v29, 2  ;;  %v4182_v50 = vld [vmem:[#allocation3 + $0x71] sm:$0x1] }
 0x526   : > { %v4147_v9 = vsel %vm1369_vm15, %v4146_v35, %v4145_v17  ;;  %v3201_v36 = vsel %vm1354_vm10, %v3200_v15, %v3162_v45  ;;  %v3212_v44 = vrot.slane %v3169_v13, 1  ;;  %v4183_v47 = vld [vmem:[#allocation3 + $0x91] sm:$0x1]  ;;  %v4196_v41 = vmul.f32 %v4180_v33, %v4074_v57 }
 0x527   : > { %v4149_v22 = vsel %vm1372_vm0, %v4148_v25, %v4147_v9  ;;  %v3203_v54 = vsel %vm1357_vm11, %v3202_v5, %v3201_v36  ;;  %v4197_v1 = vmul.f32 %v4181_v43, %v4075_v32  ;;  %v4184_v24 = vld [vmem:[#allocation3 + $0xb1] sm:$0x1]  ;;  %v4198_v25 = vmul.f32 %v4182_v50, %v4076_v59 }
 0x528   : > { %v4166_v35 = vsel %vm659_vm1, %v4149_v22, 0.0  ;;  %v3205_v31 = vsel %vm1360_vm12, %v3204_v26, %v3203_v54  ;;  %v4185_v4 = vld [vmem:[#allocation3 + $0xd1] sm:$0x1]  ;;  %v4199_v19 = vmul.f32 %v4183_v47, %v4077_v48  ;;  %v4195_v57 = vmul.f32 %v4179_v3, %v8423_v20  ;;  %v3711_v22 = vld [vmem:[#allocation3 + $0x4e] sm:$0x1] }
 0x529   : > { %4167 = vadd.xlane.f32.xlu1 %v4166_v35  ;;  %v3207_v42 = vsel %vm1363_vm13, %v3206_v56, %v3205_v31  ;;  %v4186_v2 = vld [vmem:[#allocation3 + $0xf1] sm:$0x1]  ;;  %v10087_v32 = vrot.slane %v8423_v20, 5  ;;  %v10088_v52 = vrot.slane %v8423_v20, 6  ;;  %v4227_v28 = vrot.slane %v4196_v41, 7 }
 0x52a   : > { %v3209_v13 = vsel %vm1366_vm14, %v3208_v23, %v3207_v42  ;;  %v4202_v59 = vmul.f32 %v4186_v2, %v4080_v46  ;;  %v4229_v45 = vrot.slane %v4197_v1, 6  ;;  %v4231_v15 = vrot.slane %v4198_v25, 5  ;;  %v3710_v20 = vld [vmem:[#allocation3 + $0x2e] sm:$0x1] }
 0x52b   : > { %v4200_v12 = vmul.f32 %v4184_v24, %v10087_v32  ;;  %v4201_v29 = vmul.f32 %v4185_v4, %v10088_v52  ;;  %v3211_v48 = vsel %vm1369_vm15, %v3210_v60, %v3209_v13  ;;  %v4233_v5 = vrot.slane %v4199_v19, 4  ;;  %v3712_v41 = vld [vmem:[#allocation3 + $0x6e] sm:$0x1] }
 0x52c   : > { %v3213_v26 = vsel %vm1372_vm0, %v3212_v44, %v3211_v48  ;;  %v4228_v56 = vsel %vm1354_vm10, %v4227_v28, %v4195_v57  ;;  %v3727_v36 = vrot.slane %v8486_v18, 1  ;;  %v3728_v46 = vrot.slane %v8486_v18, 2  ;;  %v3713_v1 = vld [vmem:[#allocation3 + $0x8e] sm:$0x1] }
 0x52d   : > { %v4235_v17 = vrot.slane %v4200_v12, 3  ;;  %v4237_v9 = vrot.slane %v4201_v29, 2  ;;  %v3219_v33 = vsel %vm659_vm1, %v3213_v26, 0.0  ;;  %v4230_v23 = vsel %vm1357_vm11, %v4229_v45, %v4228_v56  ;;  %v3709_v4 = vld [vmem:[#allocation3 + $0xe] sm:$0x1] }
 0x52e   : > { %v3729_v43 = vrot.slane %v8486_v18, 3  ;;  %3220 = vadd.xlane.f32.xlu0 %v3219_v33  ;;  %v4232_v60 = vsel %vm1360_vm12, %v4231_v15, %v4230_v23  ;;  %v3730_v44 = vrot.slane %v8486_v18, 4  ;;  %v3731_v54 = vrot.slane %v8486_v18, 5  ;;  %v3714_v25 = vld [vmem:[#allocation3 + $0xae] sm:$0x1] }
 0x52f   : > { %v3732_v3 = vrot.slane %v8486_v18, 6  ;;  %v4234_v50 = vsel %vm1363_vm13, %v4233_v5, %v4232_v60  ;;  %v4239_v47 = vrot.slane %v4202_v59, 1  ;;  %v3733_v35 = vrot.slane %v8486_v18, 7  ;;  %v3715_v19 = vld [vmem:[#allocation3 + $0xce] sm:$0x1] }
 0x530   : > { %v3758_v31 = vmul.f32 %v3727_v36, %v3710_v20  ;;  %v4236_v24 = vsel %vm1366_vm14, %v4235_v17, %v4234_v50  ;;  %v3759_v42 = vmul.f32 %v3728_v46, %v3711_v22  ;;  %v3760_v2 = vmul.f32 %v3729_v43, %v3712_v41  ;;  %v3716_v12 = vld [vmem:[#allocation3 + $0xee] sm:$0x1]  ;;  %v4065_v33 = vld [vmem:[#allocation3 + $0x130] sm:$0x1] }
 0x531   : > { %v3761_v57 = vmul.f32 %v3730_v44, %v3713_v1  ;;  %v4238_v32 = vsel %vm1369_vm15, %v4237_v9, %v4236_v24  ;;  %v3757_v52 = vmul.f32 %v3709_v4, %v8486_v18  ;;  %v3762_v29 = vmul.f32 %v3731_v54, %v3714_v25  ;;  %v4066_v22 = vld [vmem:[#allocation3 + $0x150] sm:$0x1] }
 0x532   : > { %v3763_v13 = vmul.f32 %v3732_v3, %v3715_v19  ;;  %v4240_v59 = vsel %vm1372_vm0, %v4239_v47, %v4238_v32  ;;  %v3764_v28 = vmul.f32 %v3733_v35, %v3716_v12  ;;  %v3789_v45 = vrot.slane %v3758_v31, 7  ;;  %v4067_v24 = vld [vmem:[#allocation3 + $0x170] sm:$0x1] }
 0x533   : > { %v3791_v48 = vrot.slane %v3759_v42, 6  ;;  %v4257_v15 = vsel %vm659_vm1, %v4240_v59, 0.0  ;;  %v3793_v5 = vrot.slane %v3760_v2, 5  ;;  %v3795_v17 = vrot.slane %v3761_v57, 4  ;;  %v4068_v42 = vld [vmem:[#allocation3 + $0x190] sm:$0x1] }
 0x534   : > { %v3797_v26 = vrot.slane %v3762_v29, 3  ;;  %4258 = vadd.xlane.f32.xlu1 %v4257_v15  ;;  %v3790_v56 = vsel %vm1354_vm10, %v3789_v45, %v3757_v52  ;;  %v3799_v9 = vrot.slane %v3763_v13, 2  ;;  %v4081_v23 = vrot.slane %v8460_v6, 1  ;;  %v4069_v2 = vld [vmem:[#allocation3 + $0x1b0] sm:$0x1] }
 0x535   : > { %v4082_v20 = vrot.slane %v8460_v6, 2  ;;  %v3792_v60 = vsel %vm1357_vm11, %v3791_v48, %v3790_v56  ;;  %v4083_v50 = vrot.slane %v8460_v6, 3  ;;  %v4084_v47 = vrot.slane %v8460_v6, 4  ;;  %v4070_v57 = vld [vmem:[#allocation3 + $0x1d0] sm:$0x1] }
 0x536   : > { %v4085_v41 = vrot.slane %v8460_v6, 5  ;;  %v3794_v1 = vsel %vm1360_vm12, %v3793_v5, %v3792_v60  ;;  %v3801_v31 = vrot.slane %v3764_v28, 1  ;;  %v4086_v4 = vrot.slane %v8460_v6, 6  ;;  %v4064_v13 = vld [vmem:[#allocation3 + $0x110] sm:$0x1] }
 0x537   : > { %v4087_v25 = vrot.slane %v8460_v6, 7  ;;  %v3796_v19 = vsel %vm1363_vm13, %v3795_v17, %v3794_v1  ;;  %v4113_v32 = vmul.f32 %v4081_v23, %v4065_v33  ;;  %v4114_v12 = vmul.f32 %v4082_v20, %v4066_v22  ;;  %v4071_v15 = vld [vmem:[#allocation3 + $0x1f0] sm:$0x1]  ;;  %v3832_v1 = vld [vmem:[#allocation3 + $0xf] sm:$0x1] }
 0x538   : > { %v4115_v52 = vmul.f32 %v4083_v50, %v4067_v24  ;;  %v3798_v29 = vsel %vm1366_vm14, %v3797_v26, %v3796_v19  ;;  %v4116_v59 = vmul.f32 %v4084_v47, %v4068_v42  ;;  %v4117_v28 = vmul.f32 %v4085_v41, %v4069_v2  ;;  %v3833_v24 = vld [vmem:[#allocation3 + $0x2f] sm:$0x1] }
 0x539   : > { %v4118_v45 = vmul.f32 %v4086_v4, %v4070_v57  ;;  %v3800_v48 = vsel %vm1369_vm15, %v3799_v9, %v3798_v29  ;;  %v4112_v5 = vmul.f32 %v4064_v13, %v8460_v6  ;;  %v4150_v17 = vrot.slane %v4113_v32, 7  ;;  %v3834_v57 = vld [vmem:[#allocation3 + $0x4f] sm:$0x1] }
 0x53a   : > { %v4152_v56 = vrot.slane %v4114_v12, 6  ;;  %v3802_v33 = vsel %vm1372_vm0, %v3801_v31, %v3800_v48  ;;  %v4119_v26 = vmul.f32 %v4087_v25, %v4071_v15  ;;  %v4154_v60 = vrot.slane %v4115_v52, 5  ;;  %v3835_v12 = vld [vmem:[#allocation3 + $0x6f] sm:$0x1] }
 0x53b   : > { %v4156_v22 = vrot.slane %v4116_v59, 4  ;;  %v3819_v19 = vsel %vm659_vm1, %v3802_v33, 0.0  ;;  %v4151_v42 = vsel %vm1354_vm10, %v4150_v17, %v4112_v5  ;;  %v4158_v2 = vrot.slane %v4117_v28, 3  ;;  %v3836_v29 = vld [vmem:[#allocation3 + $0x8f] sm:$0x1] }
 0x53c   : > { %v4160_v9 = vrot.slane %v4118_v45, 2  ;;  %3820 = vadd.xlane.f32.xlu1 %v3819_v19  ;;  %v4153_v32 = vsel %vm1357_vm11, %v4152_v56, %v4151_v42  ;;  %v3837_v31 = vld [vmem:[#allocation3 + $0xaf] sm:$0x1]  ;;  %v3848_v13 = vmul.f32 %v3832_v1, %v8486_v18  ;;  %v3849_v52 = vmul.f32 %v3833_v24, %v3727_v36 }
 0x53d   : > { %v3850_v59 = vmul.f32 %v3834_v57, %v3728_v46  ;;  %v4155_v48 = vsel %vm1360_vm12, %v4154_v60, %v4153_v32  ;;  %v3838_v15 = vld [vmem:[#allocation3 + $0xcf] sm:$0x1]  ;;  %v3851_v45 = vmul.f32 %v3835_v12, %v3729_v43  ;;  %v3852_v5 = vmul.f32 %v3836_v29, %v3730_v44  ;;  %v4188_v57 = vld [vmem:[#allocation3 + $0x131] sm:$0x1] }
 0x53e   : > { %v3839_v28 = vld [vmem:[#allocation3 + $0xef] sm:$0x1]  ;;  %v3853_v17 = vmul.f32 %v3837_v31, %v3731_v54  ;;  %v4157_v56 = vsel %vm1363_vm13, %v4156_v22, %v4155_v48  ;;  %v3854_v36 = vmul.f32 %v3838_v15, %v3732_v3  ;;  %v3880_v33 = vrot.slane %v3849_v52, 7  ;;  %v4190_v12 = vld [vmem:[#allocation3 + $0x171] sm:$0x1] }
 0x53f   : > { %v3855_v46 = vmul.f32 %v3839_v28, %v3733_v35  ;;  %v4159_v60 = vsel %vm1366_vm14, %v4158_v2, %v4157_v56  ;;  %v4162_v1 = vrot.slane %v4119_v26, 1  ;;  %v3882_v24 = vrot.slane %v3850_v59, 6  ;;  %v4189_v35 = vld [vmem:[#allocation3 + $0x151] sm:$0x1] }
 0x540   : > { %v3884_v43 = vrot.slane %v3851_v45, 5  ;;  %v4161_v19 = vsel %vm1369_vm15, %v4160_v9, %v4159_v60  ;;  %v3881_v44 = vsel %vm1354_vm10, %v3880_v33, %v3848_v13  ;;  %v3886_v42 = vrot.slane %v3852_v5, 4  ;;  %v4191_v29 = vld [vmem:[#allocation3 + $0x191] sm:$0x1] }
 0x541   : > { %v3888_v54 = vrot.slane %v3853_v17, 3  ;;  %v4163_v22 = vsel %vm1372_vm0, %v4162_v1, %v4161_v19  ;;  %v3883_v3 = vsel %vm1357_vm11, %v3882_v24, %v3881_v44  ;;  %v3890_v32 = vrot.slane %v3854_v36, 2  ;;  %v4192_v31 = vld [vmem:[#allocation3 + $0x1b1] sm:$0x1] }
 0x542   : > { %v3892_v18 = vrot.slane %v3855_v46, 1  ;;  %v4169_v2 = vsel %vm659_vm1, %v4163_v22, 0.0  ;;  %v3885_v26 = vsel %vm1360_vm12, %v3884_v43, %v3883_v3  ;;  %v4204_v9 = vmul.f32 %v4188_v57, %v4081_v23  ;;  %v4187_v59 = vld [vmem:[#allocation3 + $0x111] sm:$0x1]  ;;  %v3720_v3 = vld [vmem:[#allocation3 + $0x16e] sm:$0x1] }
 0x543   : > { %v4205_v13 = vmul.f32 %v4189_v35, %v4082_v20  ;;  %4170 = vadd.xlane.f32.xlu0 %v4169_v2  ;;  %v3887_v52 = vsel %vm1363_vm13, %v3886_v42, %v3885_v26  ;;  %v4193_v48 = vld [vmem:[#allocation3 + $0x1d1] sm:$0x1]  ;;  %v4206_v15 = vmul.f32 %v4190_v12, %v4083_v50  ;;  %v4207_v28 = vmul.f32 %v4191_v29, %v4084_v47  ;;  %v3721_v26 = vld [vmem:[#allocation3 + $0x18e] sm:$0x1] }
 0x544   : > { %v4208_v45 = vmul.f32 %v4192_v31, %v4085_v41  ;;  %v3889_v5 = vsel %vm1366_vm14, %v3888_v54, %v3887_v52  ;;  %v4194_v23 = vld [vmem:[#allocation3 + $0x1f1] sm:$0x1]  ;;  %v4203_v17 = vmul.f32 %v4187_v59, %v8460_v6  ;;  %v4209_v20 = vmul.f32 %v4193_v48, %v4086_v4  ;;  %v3718_v4 = vld [vmem:[#allocation3 + $0x12e] sm:$0x1] }
 0x545   : > { %v4241_v56 = vrot.slane %v4204_v9, 7  ;;  %v3891_v36 = vsel %vm1369_vm15, %v3890_v32, %v3889_v5  ;;  %v4210_v50 = vmul.f32 %v4194_v23, %v4087_v25  ;;  %v4243_v46 = vrot.slane %v4205_v13, 6  ;;  %v3719_v25 = vld [vmem:[#allocation3 + $0x14e] sm:$0x1] }
 0x546   : > { %v4245_v33 = vrot.slane %v4206_v15, 5  ;;  %v3893_v47 = vsel %vm1372_vm0, %v3892_v18, %v3891_v36  ;;  %v4247_v60 = vrot.slane %v4207_v28, 4  ;;  %v4249_v1 = vrot.slane %v4208_v45, 3  ;;  %v3722_v29 = vld [vmem:[#allocation3 + $0x1ae] sm:$0x1] }
 0x547   : > { %v4242_v41 = vsel %vm1354_vm10, %v4241_v56, %v4203_v17  ;;  %v3910_v24 = vsel %vm659_vm1, %v3893_v47, 0.0  ;;  %v4251_v19 = vrot.slane %v4209_v20, 2  ;;  %v3734_v44 = vrot.slane %v8542_v27, 1  ;;  %v3717_v52 = vld [vmem:[#allocation3 + $0x10e] sm:$0x1] }
 0x548   : > { %v4244_v43 = vsel %vm1357_vm11, %v4243_v46, %v4242_v41  ;;  %3911 = vadd.xlane.f32.xlu1 %v3910_v24  ;;  %v3735_v42 = vrot.slane %v8542_v27, 2  ;;  %v3736_v54 = vrot.slane %v8542_v27, 3  ;;  %v3737_v57 = vrot.slane %v8542_v27, 4  ;;  %v3723_v59 = vld [vmem:[#allocation3 + $0x1ce] sm:$0x1] }
 0x549   : > { %v4246_v6 = vsel %vm1360_vm12, %v4245_v33, %v4244_v43  ;;  %v3738_v32 = vrot.slane %v8542_v27, 5  ;;  %v3739_v18 = vrot.slane %v8542_v27, 6  ;;  %v3740_v35 = vrot.slane %v8542_v27, 7  ;;  %v3724_v5 = vld [vmem:[#allocation3 + $0x1ee] sm:$0x1] }
 0x54a   : > { %v4248_v22 = vsel %vm1363_vm13, %v4247_v60, %v4246_v6  ;;  %v4253_v2 = vrot.slane %v4210_v50, 1  ;;  %v3766_v31 = vmul.f32 %v3734_v44, %v3718_v4  ;;  %v3767_v9 = vmul.f32 %v3735_v42, %v3719_v25  ;;  %v4751_v24 = vld [vmem:[#allocation3 + $0x34] sm:$0x1] }
 0x54b   : > { %v4250_v12 = vsel %vm1366_vm14, %v4249_v1, %v4248_v22  ;;  %v3768_v48 = vmul.f32 %v3736_v54, %v3720_v3  ;;  %v3769_v15 = vmul.f32 %v3737_v57, %v3721_v26  ;;  %v3770_v28 = vmul.f32 %v3738_v32, %v3722_v29  ;;  %v4752_v25 = vld [vmem:[#allocation3 + $0x54] sm:$0x1] }
 0x54c   : > { %v4252_v13 = vsel %vm1369_vm15, %v4251_v19, %v4250_v12  ;;  %v3765_v23 = vmul.f32 %v3717_v52, %v8542_v27  ;;  %v3771_v17 = vmul.f32 %v3739_v18, %v3723_v59  ;;  %v3803_v20 = vrot.slane %v3766_v31, 7  ;;  %v4753_v29 = vld [vmem:[#allocation3 + $0x74] sm:$0x1] }
 0x54d   : > { %v4254_v45 = vsel %vm1372_vm0, %v4253_v2, %v4252_v13  ;;  %v3772_v36 = vmul.f32 %v3740_v35, %v3724_v5  ;;  %v3805_v50 = vrot.slane %v3767_v9, 6  ;;  %v3807_v46 = vrot.slane %v3768_v48, 5  ;;  %v4754_v31 = vld [vmem:[#allocation3 + $0x94] sm:$0x1] }
 0x54e   : > { %v4260_v56 = vsel %vm659_vm1, %v4254_v45, 0.0  ;;  %v3804_v33 = vsel %vm1354_vm10, %v3803_v20, %v3765_v23  ;;  %v3809_v47 = vrot.slane %v3769_v15, 4  ;;  %v3811_v41 = vrot.slane %v3770_v28, 3  ;;  %v4755_v59 = vld [vmem:[#allocation3 + $0xb4] sm:$0x1] }
 0x54f   : > { %4261 = vadd.xlane.f32.xlu0 %v4260_v56  ;;  %v3813_v60 = vrot.slane %v3771_v17, 2  ;;  %v3806_v1 = vsel %vm1357_vm11, %v3805_v50, %v3804_v33  ;;  %v4768_v43 = vrot.slane %v8492_v8, 1  ;;  %v4769_v19 = vrot.slane %v8492_v8, 2  ;;  %v4756_v48 = vld [vmem:[#allocation3 + $0xd4] sm:$0x1] }
 0x550   : > { %v4770_v4 = vrot.slane %v8492_v8, 3  ;;  %v3808_v6 = vsel %vm1360_vm12, %v3807_v46, %v3806_v1  ;;  %v4771_v22 = vrot.slane %v8492_v8, 4  ;;  %v4772_v3 = vrot.slane %v8492_v8, 5  ;;  %v4757_v15 = vld [vmem:[#allocation3 + $0xf4] sm:$0x1] }
 0x551   : > { %v4773_v12 = vrot.slane %v8492_v8, 6  ;;  %v3810_v2 = vsel %vm1363_vm13, %v3809_v47, %v3808_v6  ;;  %v3815_v26 = vrot.slane %v3772_v36, 1  ;;  %v4774_v9 = vrot.slane %v8492_v8, 7  ;;  %v4750_v17 = vld [vmem:[#allocation3 + $0x14] sm:$0x1] }
 0x552   : > { %v4799_v13 = vmul.f32 %v4768_v43, %v4751_v24  ;;  %v3812_v52 = vsel %vm1366_vm14, %v3811_v41, %v3810_v2  ;;  %v4800_v28 = vmul.f32 %v4769_v19, %v4752_v25  ;;  %v4801_v45 = vmul.f32 %v4770_v4, %v4753_v29  ;;  %v3841_v41 = vld [vmem:[#allocation3 + $0x12f] sm:$0x1] }
 0x553   : > { %v4802_v5 = vmul.f32 %v4771_v22, %v4754_v31  ;;  %v3814_v23 = vsel %vm1369_vm15, %v3813_v60, %v3812_v52  ;;  %v4803_v20 = vmul.f32 %v4772_v3, %v4755_v59  ;;  %v4804_v56 = vmul.f32 %v4773_v12, %v4756_v48  ;;  %v3842_v25 = vld [vmem:[#allocation3 + $0x14f] sm:$0x1] }
 0x554   : > { %v4805_v36 = vmul.f32 %v4774_v9, %v4757_v15  ;;  %v3816_v50 = vsel %vm1372_vm0, %v3815_v26, %v3814_v23  ;;  %v4798_v46 = vmul.f32 %v4750_v17, %v8492_v8  ;;  %v4830_v33 = vrot.slane %v4799_v13, 7  ;;  %v3843_v52 = vld [vmem:[#allocation3 + $0x16f] sm:$0x1] }
 0x555   : > { %v4832_v47 = vrot.slane %v4800_v28, 6  ;;  %v3822_v1 = vsel %vm659_vm1, %v3816_v50, 0.0  ;;  %v4834_v60 = vrot.slane %v4801_v45, 5  ;;  %v4836_v24 = vrot.slane %v4802_v5, 4  ;;  %v3844_v59 = vld [vmem:[#allocation3 + $0x18f] sm:$0x1] }
 0x556   : > { %v4838_v6 = vrot.slane %v4803_v20, 3  ;;  %3823 = vadd.xlane.f32.xlu0 %v3822_v1  ;;  %v4831_v2 = vsel %vm1354_vm10, %v4830_v33, %v4798_v46  ;;  %v4840_v29 = vrot.slane %v4804_v56, 2  ;;  %v4842_v31 = vrot.slane %v4805_v36, 1  ;;  %v3845_v48 = vld [vmem:[#allocation3 + $0x1af] sm:$0x1] }
 0x557   : > { %v3857_v26 = vmul.f32 %v3841_v41, %v3734_v44  ;;  %v4833_v13 = vsel %vm1357_vm11, %v4832_v47, %v4831_v2  ;;  %v3846_v15 = vld [vmem:[#allocation3 + $0x1cf] sm:$0x1]  ;;  %v3858_v45 = vmul.f32 %v3842_v25, %v3735_v42  ;;  %v3859_v5 = vmul.f32 %v3843_v52, %v3736_v54  ;;  %v4874_v25 = vld [vmem:[#allocation3 + $0x35] sm:$0x1] }
 0x558   : > { %v3847_v28 = vld [vmem:[#allocation3 + $0x1ef] sm:$0x1]  ;;  %v3860_v23 = vmul.f32 %v3844_v59, %v3737_v57  ;;  %v4835_v17 = vsel %vm1360_vm12, %v4834_v60, %v4833_v13  ;;  %v3861_v44 = vmul.f32 %v3845_v48, %v3738_v32  ;;  %v3862_v56 = vmul.f32 %v3846_v15, %v3739_v18  ;;  %v4875_v2 = vld [vmem:[#allocation3 + $0x55] sm:$0x1] }
 0x559   : > { %v3840_v20 = vld [vmem:[#allocation3 + $0x10f] sm:$0x1]  ;;  %v3863_v36 = vmul.f32 %v3847_v28, %v3740_v35  ;;  %v4837_v42 = vsel %vm1363_vm13, %v4836_v24, %v4835_v17  ;;  %v3894_v54 = vrot.slane %v3857_v26, 7  ;;  %v3896_v46 = vrot.slane %v3858_v45, 6  ;;  %v4876_v52 = vld [vmem:[#allocation3 + $0x75] sm:$0x1] }
 0x55a   : > { %v3856_v50 = vmul.f32 %v3840_v20, %v8542_v27  ;;  %v4839_v57 = vsel %vm1366_vm14, %v4838_v6, %v4837_v42  ;;  %v3898_v33 = vrot.slane %v3859_v5, 5  ;;  %v3900_v47 = vrot.slane %v3860_v23, 4  ;;  %v4873_v27 = vld [vmem:[#allocation3 + $0x15] sm:$0x1] }
 0x55b   : > { %v3902_v41 = vrot.slane %v3861_v44, 3  ;;  %v4841_v1 = vsel %vm1369_vm15, %v4840_v29, %v4839_v57  ;;  %v3904_v60 = vrot.slane %v3862_v56, 2  ;;  %v3906_v18 = vrot.slane %v3863_v36, 1  ;;  %v4877_v59 = vld [vmem:[#allocation3 + $0x95] sm:$0x1] }
 0x55c   : > { %v3895_v32 = vsel %vm1354_vm10, %v3894_v54, %v3856_v50  ;;  %v4843_v35 = vsel %vm1372_vm0, %v4842_v31, %v4841_v1  ;;  %v4890_v6 = vmul.f32 %v4874_v25, %v4768_v43  ;;  %v4891_v26 = vmul.f32 %v4875_v2, %v4769_v19  ;;  %v4878_v48 = vld [vmem:[#allocation3 + $0xb5] sm:$0x1]  ;;  %v4761_v2 = vld [vmem:[#allocation3 + $0x174] sm:$0x1] }
 0x55d   : > { %v3897_v24 = vsel %vm1357_vm11, %v3896_v46, %v3895_v32  ;;  %v4860_v29 = vsel %vm659_vm1, %v4843_v35, 0.0  ;;  %v4879_v15 = vld [vmem:[#allocation3 + $0xd5] sm:$0x1]  ;;  %v4892_v31 = vmul.f32 %v4876_v52, %v4770_v4  ;;  %v4893_v28 = vmul.f32 %v4877_v59, %v4771_v22  ;;  %v4762_v35 = vld [vmem:[#allocation3 + $0x194] sm:$0x1] }
 0x55e   : > { %v3899_v13 = vsel %vm1360_vm12, %v3898_v33, %v3897_v24  ;;  %4861 = vadd.xlane.f32.xlu1 %v4860_v29  ;;  %v4880_v5 = vld [vmem:[#allocation3 + $0xf5] sm:$0x1]  ;;  %v4889_v43 = vmul.f32 %v4873_v27, %v8492_v8  ;;  %v4894_v19 = vmul.f32 %v4878_v48, %v4772_v3  ;;  %v4895_v23 = vmul.f32 %v4879_v15, %v4773_v12  ;;  %v4759_v8 = vld [vmem:[#allocation3 + $0x134] sm:$0x1] }
 0x55f   : > { %v3901_v45 = vsel %vm1363_vm13, %v3900_v47, %v3899_v13  ;;  %v4896_v4 = vmul.f32 %v4880_v5, %v4774_v9  ;;  %v4921_v20 = vrot.slane %v4890_v6, 7  ;;  %v4923_v44 = vrot.slane %v4891_v26, 6  ;;  %v4758_v59 = vld [vmem:[#allocation3 + $0x114] sm:$0x1] }
 0x560   : > { %v3903_v17 = vsel %vm1366_vm14, %v3902_v41, %v3901_v45  ;;  %v4925_v56 = vrot.slane %v4892_v31, 5  ;;  %v4927_v36 = vrot.slane %v4893_v28, 4  ;;  %v4929_v42 = vrot.slane %v4894_v19, 3  ;;  %v4760_v41 = vld [vmem:[#allocation3 + $0x154] sm:$0x1] }
 0x561   : > { %v3905_v22 = vsel %vm1369_vm15, %v3904_v60, %v3903_v17  ;;  %v4922_v54 = vsel %vm1354_vm10, %v4921_v20, %v4889_v43  ;;  %v4931_v3 = vrot.slane %v4895_v23, 2  ;;  %v4775_v46 = vrot.slane %v8544_v11, 1  ;;  %v4763_v6 = vld [vmem:[#allocation3 + $0x1b4] sm:$0x1] }
 0x562   : > { %v3907_v50 = vsel %vm1372_vm0, %v3906_v18, %v3905_v22  ;;  %v4924_v57 = vsel %vm1357_vm11, %v4923_v44, %v4922_v54  ;;  %v4776_v9 = vrot.slane %v8544_v11, 2  ;;  %v4777_v33 = vrot.slane %v8544_v11, 3  ;;  %v4764_v26 = vld [vmem:[#allocation3 + $0x1d4] sm:$0x1] }
 0x563   : > { %v3913_v12 = vsel %vm659_vm1, %v3907_v50, 0.0  ;;  %v4926_v47 = vsel %vm1360_vm12, %v4925_v56, %v4924_v57  ;;  %v4778_v1 = vrot.slane %v8544_v11, 4  ;;  %v4779_v32 = vrot.slane %v8544_v11, 5  ;;  %v4765_v31 = vld [vmem:[#allocation3 + $0x1f4] sm:$0x1] }
 0x564   : > { %3914 = vadd.xlane.f32.xlu0 %v3913_v12  ;;  %v4780_v60 = vrot.slane %v8544_v11, 6  ;;  %v4928_v18 = vsel %vm1363_vm13, %v4927_v36, %v4926_v47  ;;  %v4933_v25 = vrot.slane %v4896_v4, 1  ;;  %v4781_v24 = vrot.slane %v8544_v11, 7  ;;  %v5446_v12 = vld [vmem:[#allocation3 + $0x58] sm:$0x1] }
 0x565   : > { %v4807_v27 = vmul.f32 %v4775_v46, %v4759_v8  ;;  %v4930_v52 = vsel %vm1366_vm14, %v4929_v42, %v4928_v18  ;;  %v4808_v29 = vmul.f32 %v4776_v9, %v4760_v41  ;;  %v4809_v13 = vmul.f32 %v4777_v33, %v4761_v2  ;;  %v5445_v42 = vld [vmem:[#allocation3 + $0x38] sm:$0x1] }
 0x566   : > { %v4810_v48 = vmul.f32 %v4778_v1, %v4762_v35  ;;  %v4932_v15 = vsel %vm1369_vm15, %v4931_v3, %v4930_v52  ;;  %v4806_v28 = vmul.f32 %v4758_v59, %v8544_v11  ;;  %v4811_v45 = vmul.f32 %v4779_v32, %v4763_v6  ;;  %v5448_v52 = vld [vmem:[#allocation3 + $0x98] sm:$0x1] }
 0x567   : > { %v4812_v5 = vmul.f32 %v4780_v60, %v4764_v26  ;;  %v4934_v43 = vsel %vm1372_vm0, %v4933_v25, %v4932_v15  ;;  %v4813_v19 = vmul.f32 %v4781_v24, %v4765_v31  ;;  %v4844_v23 = vrot.slane %v4807_v27, 7  ;;  %v5447_v25 = vld [vmem:[#allocation3 + $0x78] sm:$0x1] }
 0x568   : > { %v4846_v17 = vrot.slane %v4808_v29, 6  ;;  %v4951_v4 = vsel %vm659_vm1, %v4934_v43, 0.0  ;;  %v4848_v20 = vrot.slane %v4809_v13, 5  ;;  %v4850_v44 = vrot.slane %v4810_v48, 4  ;;  %v5449_v59 = vld [vmem:[#allocation3 + $0xb8] sm:$0x1] }
 0x569   : > { %v4852_v22 = vrot.slane %v4811_v45, 3  ;;  %4952 = vadd.xlane.f32.xlu1 %v4951_v4  ;;  %v4845_v56 = vsel %vm1354_vm10, %v4844_v23, %v4806_v28  ;;  %v4854_v36 = vrot.slane %v4812_v5, 2  ;;  %v5462_v50 = vrot.slane %v8577_v30, 1  ;;  %v5450_v6 = vld [vmem:[#allocation3 + $0xd8] sm:$0x1] }
 0x56a   : > { %v5463_v54 = vrot.slane %v8577_v30, 2  ;;  %v4847_v3 = vsel %vm1357_vm11, %v4846_v17, %v4845_v56  ;;  %v5464_v57 = vrot.slane %v8577_v30, 3  ;;  %v5465_v8 = vrot.slane %v8577_v30, 4  ;;  %v5444_v15 = vld [vmem:[#allocation3 + $0x18] sm:$0x1] }
 0x56b   : > { %v5466_v47 = vrot.slane %v8577_v30, 5  ;;  %v4849_v41 = vsel %vm1360_vm12, %v4848_v20, %v4847_v3  ;;  %v4856_v18 = vrot.slane %v4813_v19, 1  ;;  %v5467_v2 = vrot.slane %v8577_v30, 6  ;;  %v5451_v43 = vld [vmem:[#allocation3 + $0xf8] sm:$0x1] }
 0x56c   : > { %v5468_v35 = vrot.slane %v8577_v30, 7  ;;  %v4851_v27 = vsel %vm1363_vm13, %v4850_v44, %v4849_v41  ;;  %v5493_v26 = vmul.f32 %v5462_v50, %v5445_v42  ;;  %v5494_v29 = vmul.f32 %v5463_v54, %v5446_v12  ;;  %v4881_v56 = vld [vmem:[#allocation3 + $0x115] sm:$0x1] }
 0x56d   : > { %v5495_v13 = vmul.f32 %v5464_v57, %v5447_v25  ;;  %v4853_v48 = vsel %vm1366_vm14, %v4852_v22, %v4851_v27  ;;  %v5496_v31 = vmul.f32 %v5465_v8, %v5448_v52  ;;  %v5497_v28 = vmul.f32 %v5466_v47, %v5449_v59  ;;  %v4882_v42 = vld [vmem:[#allocation3 + $0x135] sm:$0x1] }
 0x56e   : > { %v5498_v45 = vmul.f32 %v5467_v2, %v5450_v6  ;;  %v4855_v5 = vsel %vm1369_vm15, %v4854_v36, %v4853_v48  ;;  %v5492_v19 = vmul.f32 %v5444_v15, %v8577_v30  ;;  %v5524_v23 = vrot.slane %v5493_v26, 7  ;;  %v4883_v25 = vld [vmem:[#allocation3 + $0x155] sm:$0x1] }
 0x56f   : > { %v5526_v17 = vrot.slane %v5494_v29, 6  ;;  %v4857_v4 = vsel %vm1372_vm0, %v4856_v18, %v4855_v5  ;;  %v5499_v20 = vmul.f32 %v5468_v35, %v5451_v43  ;;  %v5528_v44 = vrot.slane %v5495_v13, 5  ;;  %v4884_v52 = vld [vmem:[#allocation3 + $0x175] sm:$0x1] }
 0x570   : > { %v5530_v22 = vrot.slane %v5496_v31, 4  ;;  %v4863_v3 = vsel %vm659_vm1, %v4857_v4, 0.0  ;;  %v5525_v12 = vsel %vm1354_vm10, %v5524_v23, %v5492_v19  ;;  %v5532_v41 = vrot.slane %v5497_v28, 3  ;;  %v4885_v59 = vld [vmem:[#allocation3 + $0x195] sm:$0x1] }
 0x571   : > { %v5534_v36 = vrot.slane %v5498_v45, 2  ;;  %4864 = vadd.xlane.f32.xlu0 %v4863_v3  ;;  %v5527_v27 = vsel %vm1357_vm11, %v5526_v17, %v5525_v12  ;;  %v4886_v18 = vld [vmem:[#allocation3 + $0x1b5] sm:$0x1]  ;;  %v4897_v6 = vmul.f32 %v4881_v56, %v8544_v11  ;;  %v4898_v26 = vmul.f32 %v4882_v42, %v4775_v46  ;;  %v5568_v56 = vld [vmem:[#allocation3 + $0x39] sm:$0x1] }
 0x572   : > { %v4899_v29 = vmul.f32 %v4883_v25, %v4776_v9  ;;  %v5529_v13 = vsel %vm1360_vm12, %v5528_v44, %v5527_v27  ;;  %v4887_v48 = vld [vmem:[#allocation3 + $0x1d5] sm:$0x1]  ;;  %v4900_v31 = vmul.f32 %v4884_v52, %v4777_v33  ;;  %v4901_v28 = vmul.f32 %v4885_v59, %v4778_v1  ;;  %v5570_v3 = vld [vmem:[#allocation3 + $0x79] sm:$0x1] }
 0x573   : > { %v4888_v15 = vld [vmem:[#allocation3 + $0x1f5] sm:$0x1]  ;;  %v4902_v45 = vmul.f32 %v4886_v18, %v4779_v32  ;;  %v5531_v5 = vsel %vm1363_vm13, %v5530_v22, %v5529_v13  ;;  %v4903_v46 = vmul.f32 %v4887_v48, %v4780_v60  ;;  %v4935_v43 = vrot.slane %v4898_v26, 7  ;;  %v5572_v25 = vld [vmem:[#allocation3 + $0xb9] sm:$0x1] }
 0x574   : > { %v4904_v9 = vmul.f32 %v4888_v15, %v4781_v24  ;;  %v5533_v19 = vsel %vm1366_vm14, %v5532_v41, %v5531_v5  ;;  %v5536_v23 = vrot.slane %v5499_v20, 1  ;;  %v4937_v17 = vrot.slane %v4899_v29, 6  ;;  %v5569_v24 = vld [vmem:[#allocation3 + $0x59] sm:$0x1] }
 0x575   : > { %v4939_v33 = vrot.slane %v4900_v31, 5  ;;  %v5535_v4 = vsel %vm1369_vm15, %v5534_v36, %v5533_v19  ;;  %v4936_v1 = vsel %vm1354_vm10, %v4935_v43, %v4897_v6  ;;  %v4941_v44 = vrot.slane %v4901_v28, 4  ;;  %v5571_v41 = vld [vmem:[#allocation3 + $0x99] sm:$0x1] }
 0x576   : > { %v4943_v32 = vrot.slane %v4902_v45, 3  ;;  %v5537_v22 = vsel %vm1372_vm0, %v5536_v23, %v5535_v4  ;;  %v4938_v60 = vsel %vm1357_vm11, %v4937_v17, %v4936_v1  ;;  %v4945_v42 = vrot.slane %v4903_v46, 2  ;;  %v5567_v59 = vld [vmem:[#allocation3 + $0x19] sm:$0x1] }
 0x577   : > { %v4947_v11 = vrot.slane %v4904_v9, 1  ;;  %v5554_v12 = vsel %vm659_vm1, %v5537_v22, 0.0  ;;  %v4940_v20 = vsel %vm1360_vm12, %v4939_v33, %v4938_v60  ;;  %v5584_v36 = vmul.f32 %v5568_v56, %v5462_v50  ;;  %v5573_v18 = vld [vmem:[#allocation3 + $0xd9] sm:$0x1] }
 0x578   : > { %v5585_v27 = vmul.f32 %v5569_v24, %v5463_v54  ;;  %5555 = vadd.xlane.f32.xlu1 %v5554_v12  ;;  %v4942_v52 = vsel %vm1363_vm13, %v4941_v44, %v4940_v20  ;;  %v5586_v6 = vmul.f32 %v5570_v3, %v5464_v57  ;;  %v5587_v26 = vmul.f32 %v5571_v41, %v5465_v8  ;;  %v5574_v50 = vld [vmem:[#allocation3 + $0xf9] sm:$0x1]  ;;  %v4406_v44 = vld [vmem:[#allocation3 + $0x72] sm:$0x1] }
 0x579   : > { %v5588_v29 = vmul.f32 %v5572_v25, %v5466_v47  ;;  %v4944_v13 = vsel %vm1366_vm14, %v4943_v32, %v4942_v52  ;;  %v5583_v48 = vmul.f32 %v5567_v59, %v8577_v30  ;;  %v5589_v54 = vmul.f32 %v5573_v18, %v5467_v2  ;;  %v4404_v2 = vld [vmem:[#allocation3 + $0x32] sm:$0x1] }
 0x57a   : > { %v5615_v15 = vrot.slane %v5584_v36, 7  ;;  %v4946_v31 = vsel %vm1369_vm15, %v4945_v42, %v4944_v13  ;;  %v5590_v57 = vmul.f32 %v5574_v50, %v5468_v35  ;;  %v5617_v28 = vrot.slane %v5585_v27, 6  ;;  %v4405_v35 = vld [vmem:[#allocation3 + $0x52] sm:$0x1] }
 0x57b   : > { %v5619_v45 = vrot.slane %v5586_v6, 5  ;;  %v4948_v8 = vsel %vm1372_vm0, %v4947_v11, %v4946_v31  ;;  %v5621_v5 = vrot.slane %v5587_v26, 4  ;;  %v5623_v46 = vrot.slane %v5588_v29, 3  ;;  %v4407_v11 = vld [vmem:[#allocation3 + $0x92] sm:$0x1] }
 0x57c   : > { %v5616_v47 = vsel %vm1354_vm10, %v5615_v15, %v5583_v48  ;;  %v4954_v9 = vsel %vm659_vm1, %v4948_v8, 0.0  ;;  %v5625_v19 = vrot.slane %v5589_v54, 2  ;;  %v4421_v23 = vrot.slane %v8567_v62, 1  ;;  %v4408_v24 = vld [vmem:[#allocation3 + $0xb2] sm:$0x1] }
 0x57d   : > { %v5618_v43 = vsel %vm1357_vm11, %v5617_v28, %v5616_v47  ;;  %4955 = vadd.xlane.f32.xlu0 %v4954_v9  ;;  %v4422_v17 = vrot.slane %v8567_v62, 2  ;;  %v4423_v33 = vrot.slane %v8567_v62, 3  ;;  %v4424_v4 = vrot.slane %v8567_v62, 4  ;;  %v4403_v41 = vld [vmem:[#allocation3 + $0x12] sm:$0x1] }
 0x57e   : > { %v5620_v30 = vsel %vm1360_vm12, %v5619_v45, %v5618_v43  ;;  %v4425_v32 = vrot.slane %v8567_v62, 5  ;;  %v4426_v56 = vrot.slane %v8567_v62, 6  ;;  %v4427_v22 = vrot.slane %v8567_v62, 7  ;;  %v4409_v25 = vld [vmem:[#allocation3 + $0xd2] sm:$0x1] }
 0x57f   : > { %v5622_v1 = vsel %vm1363_vm13, %v5621_v5, %v5620_v30  ;;  %v5627_v42 = vrot.slane %v5590_v57, 1  ;;  %v4452_v3 = vmul.f32 %v4421_v23, %v4404_v2  ;;  %v4453_v12 = vmul.f32 %v4422_v17, %v4405_v35  ;;  %v4410_v18 = vld [vmem:[#allocation3 + $0xf2] sm:$0x1]  ;;  %v5453_v8 = vld [vmem:[#allocation3 + $0x138] sm:$0x1] }
 0x580   : > { %v5624_v60 = vsel %vm1366_vm14, %v5623_v46, %v5622_v1  ;;  %v4454_v36 = vmul.f32 %v4423_v33, %v4406_v44  ;;  %v4455_v27 = vmul.f32 %v4424_v4, %v4407_v11  ;;  %v4456_v52 = vmul.f32 %v4425_v32, %v4408_v24  ;;  %v5454_v43 = vld [vmem:[#allocation3 + $0x158] sm:$0x1] }
 0x581   : > { %v5626_v20 = vsel %vm1369_vm15, %v5625_v19, %v5624_v60  ;;  %v4451_v6 = vmul.f32 %v4403_v41, %v8567_v62  ;;  %v4457_v26 = vmul.f32 %v4426_v56, %v4409_v25  ;;  %v4483_v29 = vrot.slane %v4452_v3, 7  ;;  %v5455_v44 = vld [vmem:[#allocation3 + $0x178] sm:$0x1] }
 0x582   : > { %v5628_v59 = vsel %vm1372_vm0, %v5627_v42, %v5626_v20  ;;  %v4458_v50 = vmul.f32 %v4427_v22, %v4410_v18  ;;  %v4485_v48 = vrot.slane %v4453_v12, 6  ;;  %v4487_v54 = vrot.slane %v4454_v36, 5  ;;  %v5456_v60 = vld [vmem:[#allocation3 + $0x198] sm:$0x1] }
 0x583   : > { %v5645_v13 = vsel %vm659_vm1, %v5628_v59, 0.0  ;;  %v4484_v15 = vsel %vm1354_vm10, %v4483_v29, %v4451_v6  ;;  %v4489_v31 = vrot.slane %v4455_v27, 4  ;;  %v4491_v57 = vrot.slane %v4456_v52, 3  ;;  %v5457_v3 = vld [vmem:[#allocation3 + $0x1b8] sm:$0x1] }
 0x584   : > { %5646 = vadd.xlane.f32.xlu1 %v5645_v13  ;;  %v4493_v28 = vrot.slane %v4457_v26, 2  ;;  %v4486_v45 = vsel %vm1357_vm11, %v4485_v48, %v4484_v15  ;;  %v5469_v47 = vrot.slane %v8634_v14, 1  ;;  %v5470_v5 = vrot.slane %v8634_v14, 2  ;;  %v5458_v12 = vld [vmem:[#allocation3 + $0x1d8] sm:$0x1] }
 0x585   : > { %v5471_v46 = vrot.slane %v8634_v14, 3  ;;  %v4488_v9 = vsel %vm1360_vm12, %v4487_v54, %v4486_v45  ;;  %v5472_v19 = vrot.slane %v8634_v14, 4  ;;  %v5473_v2 = vrot.slane %v8634_v14, 5  ;;  %v5459_v20 = vld [vmem:[#allocation3 + $0x1f8] sm:$0x1] }
 0x586   : > { %v5474_v30 = vrot.slane %v8634_v14, 6  ;;  %v4490_v35 = vsel %vm1363_vm13, %v4489_v31, %v4488_v9  ;;  %v4495_v1 = vrot.slane %v4458_v50, 1  ;;  %v5475_v42 = vrot.slane %v8634_v14, 7  ;;  %v5452_v52 = vld [vmem:[#allocation3 + $0x118] sm:$0x1] }
 0x587   : > { %v5501_v11 = vmul.f32 %v5469_v47, %v5453_v8  ;;  %v4492_v24 = vsel %vm1366_vm14, %v4491_v57, %v4490_v35  ;;  %v5502_v41 = vmul.f32 %v5470_v5, %v5454_v43  ;;  %v5503_v25 = vmul.f32 %v5471_v46, %v5455_v44  ;;  %v4527_v48 = vld [vmem:[#allocation3 + $0x33] sm:$0x1] }
 0x588   : > { %v5504_v36 = vmul.f32 %v5472_v19, %v5456_v60  ;;  %v4494_v27 = vsel %vm1369_vm15, %v4493_v28, %v4492_v24  ;;  %v5505_v59 = vmul.f32 %v5473_v2, %v5457_v3  ;;  %v5506_v18 = vmul.f32 %v5474_v30, %v5458_v12  ;;  %v4528_v28 = vld [vmem:[#allocation3 + $0x53] sm:$0x1] }
 0x589   : > { %v5507_v6 = vmul.f32 %v5475_v42, %v5459_v20  ;;  %v4496_v26 = vsel %vm1372_vm0, %v4495_v1, %v4494_v27  ;;  %v5500_v29 = vmul.f32 %v5452_v52, %v8634_v14  ;;  %v5538_v13 = vrot.slane %v5501_v11, 7  ;;  %v4529_v43 = vld [vmem:[#allocation3 + $0x73] sm:$0x1] }
 0x58a   : > { %v5540_v50 = vrot.slane %v5502_v41, 6  ;;  %v4513_v54 = vsel %vm659_vm1, %v4496_v26, 0.0  ;;  %v5542_v15 = vrot.slane %v5503_v25, 5  ;;  %v5544_v31 = vrot.slane %v5504_v36, 4  ;;  %v4530_v35 = vld [vmem:[#allocation3 + $0x93] sm:$0x1] }
 0x58b   : > { %v5546_v57 = vrot.slane %v5505_v59, 3  ;;  %4514 = vadd.xlane.f32.xlu1 %v4513_v54  ;;  %v5539_v45 = vsel %vm1354_vm10, %v5538_v13, %v5500_v29  ;;  %v5548_v8 = vrot.slane %v5506_v18, 2  ;;  %v5550_v9 = vrot.slane %v5507_v6, 1  ;;  %v4531_v60 = vld [vmem:[#allocation3 + $0xb3] sm:$0x1] }
 0x58c   : > { %v4543_v1 = vmul.f32 %v4527_v48, %v4421_v23  ;;  %v5541_v44 = vsel %vm1357_vm11, %v5540_v50, %v5539_v45  ;;  %v4532_v11 = vld [vmem:[#allocation3 + $0xd3] sm:$0x1]  ;;  %v4544_v3 = vmul.f32 %v4528_v28, %v4422_v17  ;;  %v4545_v12 = vmul.f32 %v4529_v43, %v4423_v33  ;;  %v5576_v50 = vld [vmem:[#allocation3 + $0x139] sm:$0x1] }
 0x58d   : > { %v4533_v24 = vld [vmem:[#allocation3 + $0xf3] sm:$0x1]  ;;  %v4546_v20 = vmul.f32 %v4530_v35, %v4424_v4  ;;  %v5543_v41 = vsel %vm1360_vm12, %v5542_v15, %v5541_v44  ;;  %v4547_v23 = vmul.f32 %v4531_v60, %v4425_v32  ;;  %v4548_v36 = vmul.f32 %v4532_v11, %v4426_v56  ;;  %v5577_v48 = vld [vmem:[#allocation3 + $0x159] sm:$0x1] }
 0x58e   : > { %v4526_v25 = vld [vmem:[#allocation3 + $0x13] sm:$0x1]  ;;  %v4549_v27 = vmul.f32 %v4533_v24, %v4427_v22  ;;  %v5545_v17 = vsel %vm1363_vm13, %v5544_v31, %v5543_v41  ;;  %v4574_v33 = vrot.slane %v4543_v1, 7  ;;  %v4576_v59 = vrot.slane %v4544_v3, 6  ;;  %v5578_v15 = vld [vmem:[#allocation3 + $0x179] sm:$0x1] }
 0x58f   : > { %v4542_v52 = vmul.f32 %v4526_v25, %v8567_v62  ;;  %v5547_v4 = vsel %vm1366_vm14, %v5546_v57, %v5545_v17  ;;  %v4578_v18 = vrot.slane %v4545_v12, 5  ;;  %v4580_v6 = vrot.slane %v4546_v20, 4  ;;  %v5575_v62 = vld [vmem:[#allocation3 + $0x119] sm:$0x1] }
 0x590   : > { %v4582_v26 = vrot.slane %v4547_v23, 3  ;;  %v5549_v29 = vsel %vm1369_vm15, %v5548_v8, %v5547_v4  ;;  %v4584_v13 = vrot.slane %v4548_v36, 2  ;;  %v4586_v56 = vrot.slane %v4549_v27, 1  ;;  %v5579_v31 = vld [vmem:[#allocation3 + $0x199] sm:$0x1] }
 0x591   : > { %v4575_v32 = vsel %vm1354_vm10, %v4574_v33, %v4542_v52  ;;  %v5551_v22 = vsel %vm1372_vm0, %v5550_v9, %v5549_v29  ;;  %v5592_v57 = vmul.f32 %v5576_v50, %v5469_v47  ;;  %v5593_v28 = vmul.f32 %v5577_v48, %v5470_v5  ;;  %v5580_v43 = vld [vmem:[#allocation3 + $0x1b9] sm:$0x1] }
 0x592   : > { %v4577_v54 = vsel %vm1357_vm11, %v4576_v59, %v4575_v32  ;;  %v5557_v45 = vsel %vm659_vm1, %v5551_v22, 0.0  ;;  %v5581_v35 = vld [vmem:[#allocation3 + $0x1d9] sm:$0x1]  ;;  %v5594_v9 = vmul.f32 %v5578_v15, %v5471_v46  ;;  %v5595_v1 = vmul.f32 %v5579_v31, %v5472_v19  ;;  %v6140_v59 = vld [vmem:[#allocation3 + $0x5c] sm:$0x1] }
 0x593   : > { %v4579_v8 = vsel %vm1360_vm12, %v4578_v18, %v4577_v54  ;;  %5558 = vadd.xlane.f32.xlu0 %v5557_v45  ;;  %v5582_v60 = vld [vmem:[#allocation3 + $0x1f9] sm:$0x1]  ;;  %v5591_v47 = vmul.f32 %v5575_v62, %v8634_v14  ;;  %v5596_v5 = vmul.f32 %v5580_v43, %v5473_v2  ;;  %v5597_v11 = vmul.f32 %v5581_v35, %v5474_v30  ;;  %v6139_v14 = vld [vmem:[#allocation3 + $0x3c] sm:$0x1] }
 0x594   : > { %v4581_v44 = vsel %vm1363_vm13, %v4580_v6, %v4579_v8  ;;  %v5598_v46 = vmul.f32 %v5582_v60, %v5475_v42  ;;  %v5629_v3 = vrot.slane %v5592_v57, 7  ;;  %v5631_v12 = vrot.slane %v5593_v28, 6  ;;  %v6141_v32 = vld [vmem:[#allocation3 + $0x7c] sm:$0x1] }
 0x595   : > { %v4583_v24 = vsel %vm1366_vm14, %v4582_v26, %v4581_v44  ;;  %v5633_v20 = vrot.slane %v5594_v9, 5  ;;  %v5635_v41 = vrot.slane %v5595_v1, 4  ;;  %v5637_v25 = vrot.slane %v5596_v5, 3  ;;  %v6138_v22 = vld [vmem:[#allocation3 + $0x1c] sm:$0x1] }
 0x596   : > { %v4585_v19 = vsel %vm1369_vm15, %v4584_v13, %v4583_v24  ;;  %v5630_v36 = vsel %vm1354_vm10, %v5629_v3, %v5591_v47  ;;  %v5639_v2 = vrot.slane %v5597_v11, 2  ;;  %v6156_v27 = vrot.slane %v8669_v53, 1  ;;  %v6142_v13 = vld [vmem:[#allocation3 + $0x9c] sm:$0x1] }
 0x597   : > { %v4587_v23 = vsel %vm1372_vm0, %v4586_v56, %v4585_v19  ;;  %v5632_v17 = vsel %vm1357_vm11, %v5631_v12, %v5630_v36  ;;  %v6157_v42 = vrot.slane %v8669_v53, 2  ;;  %v6158_v52 = vrot.slane %v8669_v53, 3  ;;  %v6143_v54 = vld [vmem:[#allocation3 + $0xbc] sm:$0x1]  ;;  %v4412_v12 = vld [vmem:[#allocation3 + $0x132] sm:$0x1] }
 0x598   : > { %v4604_v30 = vsel %vm659_vm1, %v4587_v23, 0.0  ;;  %v5634_v33 = vsel %vm1360_vm12, %v5633_v20, %v5632_v17  ;;  %v6159_v4 = vrot.slane %v8669_v53, 4  ;;  %v6160_v18 = vrot.slane %v8669_v53, 5  ;;  %v6144_v62 = vld [vmem:[#allocation3 + $0xdc] sm:$0x1] }
 0x599   : > { %4605 = vadd.xlane.f32.xlu1 %v4604_v30  ;;  %v6161_v6 = vrot.slane %v8669_v53, 6  ;;  %v5636_v26 = vsel %vm1363_vm13, %v5635_v41, %v5634_v33  ;;  %v5641_v29 = vrot.slane %v5598_v46, 1  ;;  %v6162_v56 = vrot.slane %v8669_v53, 7  ;;  %v6145_v45 = vld [vmem:[#allocation3 + $0xfc] sm:$0x1] }
 0x59a   : > { %v6187_v50 = vmul.f32 %v6156_v27, %v6139_v14  ;;  %v5638_v48 = vsel %vm1366_vm14, %v5637_v25, %v5636_v26  ;;  %v6188_v15 = vmul.f32 %v6157_v42, %v6140_v59  ;;  %v6189_v31 = vmul.f32 %v6158_v52, %v6141_v32  ;;  %v4413_v25 = vld [vmem:[#allocation3 + $0x152] sm:$0x1] }
 0x59b   : > { %v6190_v57 = vmul.f32 %v6159_v4, %v6142_v13  ;;  %v5640_v28 = vsel %vm1369_vm15, %v5639_v2, %v5638_v48  ;;  %v6186_v8 = vmul.f32 %v6138_v22, %v8669_v53  ;;  %v6191_v43 = vmul.f32 %v6160_v18, %v6143_v54  ;;  %v4414_v14 = vld [vmem:[#allocation3 + $0x172] sm:$0x1] }
 0x59c   : > { %v6192_v35 = vmul.f32 %v6161_v6, %v6144_v62  ;;  %v5642_v9 = vsel %vm1372_vm0, %v5641_v29, %v5640_v28  ;;  %v6193_v1 = vmul.f32 %v6162_v56, %v6145_v45  ;;  %v6218_v44 = vrot.slane %v6187_v50, 7  ;;  %v4415_v29 = vld [vmem:[#allocation3 + $0x192] sm:$0x1] }
 0x59d   : > { %v6220_v60 = vrot.slane %v6188_v15, 6  ;;  %v5648_v47 = vsel %vm659_vm1, %v5642_v9, 0.0  ;;  %v6222_v5 = vrot.slane %v6189_v31, 5  ;;  %v6224_v11 = vrot.slane %v6190_v57, 4  ;;  %v4416_v32 = vld [vmem:[#allocation3 + $0x1b2] sm:$0x1] }
 0x59e   : > { %v6226_v24 = vrot.slane %v6191_v43, 3  ;;  %5649 = vadd.xlane.f32.xlu0 %v5648_v47  ;;  %v6219_v46 = vsel %vm1354_vm10, %v6218_v44, %v6186_v8  ;;  %v6228_v3 = vrot.slane %v6192_v35, 2  ;;  %v4428_v19 = vrot.slane %v8632_v38, 1  ;;  %v4417_v13 = vld [vmem:[#allocation3 + $0x1d2] sm:$0x1] }
 0x59f   : > { %v4429_v20 = vrot.slane %v8632_v38, 2  ;;  %v6221_v41 = vsel %vm1357_vm11, %v6220_v60, %v6219_v46  ;;  %v4430_v23 = vrot.slane %v8632_v38, 3  ;;  %v4431_v36 = vrot.slane %v8632_v38, 4  ;;  %v4411_v62 = vld [vmem:[#allocation3 + $0x112] sm:$0x1] }
 0x5a0   : > { %v4432_v2 = vrot.slane %v8632_v38, 5  ;;  %v6223_v30 = vsel %vm1360_vm12, %v6222_v5, %v6221_v41  ;;  %v6230_v17 = vrot.slane %v6193_v1, 1  ;;  %v4433_v33 = vrot.slane %v8632_v38, 6  ;;  %v4418_v45 = vld [vmem:[#allocation3 + $0x1f2] sm:$0x1] }
 0x5a1   : > { %v4434_v59 = vrot.slane %v8632_v38, 7  ;;  %v6225_v26 = vsel %vm1363_vm13, %v6224_v11, %v6223_v30  ;;  %v4460_v50 = vmul.f32 %v4428_v19, %v4412_v12  ;;  %v4461_v48 = vmul.f32 %v4429_v20, %v4413_v25  ;;  %v6261_v47 = vld [vmem:[#allocation3 + $0x1d] sm:$0x1] }
 0x5a2   : > { %v4462_v22 = vmul.f32 %v4430_v23, %v4414_v14  ;;  %v6227_v54 = vsel %vm1366_vm14, %v6226_v24, %v6225_v26  ;;  %v4463_v15 = vmul.f32 %v4431_v36, %v4415_v29  ;;  %v4464_v31 = vmul.f32 %v4432_v2, %v4416_v32  ;;  %v6262_v5 = vld [vmem:[#allocation3 + $0x3d] sm:$0x1] }
 0x5a3   : > { %v4465_v57 = vmul.f32 %v4433_v33, %v4417_v13  ;;  %v6229_v28 = vsel %vm1369_vm15, %v6228_v3, %v6227_v54  ;;  %v4459_v8 = vmul.f32 %v4411_v62, %v8632_v38  ;;  %v4497_v43 = vrot.slane %v4460_v50, 7  ;;  %v6263_v12 = vld [vmem:[#allocation3 + $0x5d] sm:$0x1] }
 0x5a4   : > { %v4499_v35 = vrot.slane %v4461_v48, 6  ;;  %v6231_v9 = vsel %vm1372_vm0, %v6230_v17, %v6229_v28  ;;  %v4466_v1 = vmul.f32 %v4434_v59, %v4418_v45  ;;  %v4501_v44 = vrot.slane %v4462_v22, 5  ;;  %v6264_v25 = vld [vmem:[#allocation3 + $0x7d] sm:$0x1] }
 0x5a5   : > { %v4503_v60 = vrot.slane %v4463_v15, 4  ;;  %v6248_v11 = vsel %vm659_vm1, %v6231_v9, 0.0  ;;  %v4498_v24 = vsel %vm1354_vm10, %v4497_v43, %v4459_v8  ;;  %v4505_v46 = vrot.slane %v4464_v31, 3  ;;  %v6265_v30 = vld [vmem:[#allocation3 + $0x9d] sm:$0x1] }
 0x5a6   : > { %v4507_v3 = vrot.slane %v4465_v57, 2  ;;  %6249 = vadd.xlane.f32.xlu1 %v6248_v11  ;;  %v4500_v41 = vsel %vm1357_vm11, %v4499_v35, %v4498_v24  ;;  %v6266_v17 = vld [vmem:[#allocation3 + $0xbd] sm:$0x1]  ;;  %v6277_v14 = vmul.f32 %v6261_v47, %v8669_v53  ;;  %v6278_v26 = vmul.f32 %v6262_v5, %v6156_v27  ;;  %v4535_v43 = vld [vmem:[#allocation3 + $0x133] sm:$0x1] }
 0x5a7   : > { %v6279_v29 = vmul.f32 %v6263_v12, %v6157_v42  ;;  %v4502_v32 = vsel %vm1360_vm12, %v4501_v44, %v4500_v41  ;;  %v6267_v13 = vld [vmem:[#allocation3 + $0xdd] sm:$0x1]  ;;  %v6280_v48 = vmul.f32 %v6264_v25, %v6158_v52  ;;  %v6281_v22 = vmul.f32 %v6265_v30, %v6159_v4  ;;  %v4537_v44 = vld [vmem:[#allocation3 + $0x173] sm:$0x1] }
 0x5a8   : > { %v6268_v50 = vld [vmem:[#allocation3 + $0xfd] sm:$0x1]  ;;  %v6282_v54 = vmul.f32 %v6266_v17, %v6160_v18  ;;  %v4504_v62 = vsel %vm1363_vm13, %v4503_v60, %v4502_v32  ;;  %v6283_v27 = vmul.f32 %v6267_v13, %v6161_v6  ;;  %v6309_v15 = vrot.slane %v6278_v26, 7  ;;  %v4538_v47 = vld [vmem:[#allocation3 + $0x193] sm:$0x1] }
 0x5a9   : > { %v6284_v42 = vmul.f32 %v6268_v50, %v6162_v56  ;;  %v4506_v31 = vsel %vm1366_vm14, %v4505_v46, %v4504_v62  ;;  %v4509_v57 = vrot.slane %v4466_v1, 1  ;;  %v6311_v28 = vrot.slane %v6279_v29, 6  ;;  %v4536_v56 = vld [vmem:[#allocation3 + $0x153] sm:$0x1] }
 0x5aa   : > { %v6313_v52 = vrot.slane %v6280_v48, 5  ;;  %v4508_v45 = vsel %vm1369_vm15, %v4507_v3, %v4506_v31  ;;  %v6310_v4 = vsel %vm1354_vm10, %v6309_v15, %v6277_v14  ;;  %v6315_v8 = vrot.slane %v6281_v22, 4  ;;  %v4539_v5 = vld [vmem:[#allocation3 + $0x1b3] sm:$0x1] }
 0x5ab   : > { %v6317_v18 = vrot.slane %v6282_v54, 3  ;;  %v4510_v35 = vsel %vm1372_vm0, %v4509_v57, %v4508_v45  ;;  %v6312_v6 = vsel %vm1357_vm11, %v6311_v28, %v6310_v4  ;;  %v6319_v9 = vrot.slane %v6283_v27, 2  ;;  %v4534_v3 = vld [vmem:[#allocation3 + $0x113] sm:$0x1]  ;;  %v5100_v28 = vld [vmem:[#allocation3 + $0x76] sm:$0x1] }
 0x5ac   : > { %v6321_v53 = vrot.slane %v6284_v42, 1  ;;  %v4516_v60 = vsel %vm659_vm1, %v4510_v35, 0.0  ;;  %v6314_v1 = vsel %vm1360_vm12, %v6313_v52, %v6312_v6  ;;  %v4551_v11 = vmul.f32 %v4535_v43, %v4428_v19  ;;  %v4540_v12 = vld [vmem:[#allocation3 + $0x1d3] sm:$0x1]  ;;  %v5101_v43 = vld [vmem:[#allocation3 + $0x96] sm:$0x1] }
 0x5ad   : > { %v4552_v24 = vmul.f32 %v4536_v56, %v4429_v20  ;;  %4517 = vadd.xlane.f32.xlu0 %v4516_v60  ;;  %v6316_v46 = vsel %vm1363_vm13, %v6315_v8, %v6314_v1  ;;  %v4553_v41 = vmul.f32 %v4537_v44, %v4430_v23  ;;  %v4554_v25 = vmul.f32 %v4538_v47, %v4431_v36  ;;  %v4541_v19 = vld [vmem:[#allocation3 + $0x1f3] sm:$0x1]  ;;  %v5102_v35 = vld [vmem:[#allocation3 + $0xb6] sm:$0x1] }
 0x5ae   : > { %v4555_v30 = vmul.f32 %v4539_v5, %v4432_v2  ;;  %v6318_v17 = vsel %vm1366_vm14, %v6317_v18, %v6316_v46  ;;  %v4550_v14 = vmul.f32 %v4534_v3, %v8632_v38  ;;  %v4556_v20 = vmul.f32 %v4540_v12, %v4433_v33  ;;  %v5098_v33 = vld [vmem:[#allocation3 + $0x36] sm:$0x1] }
 0x5af   : > { %v4588_v26 = vrot.slane %v4551_v11, 7  ;;  %v6320_v29 = vsel %vm1369_vm15, %v6319_v9, %v6318_v17  ;;  %v4557_v23 = vmul.f32 %v4541_v19, %v4434_v59  ;;  %v4590_v32 = vrot.slane %v4552_v24, 6  ;;  %v5099_v59 = vld [vmem:[#allocation3 + $0x56] sm:$0x1] }
 0x5b0   : > { %v4592_v13 = vrot.slane %v4553_v41, 5  ;;  %v6322_v36 = vsel %vm1372_vm0, %v6321_v53, %v6320_v29  ;;  %v4594_v50 = vrot.slane %v4554_v25, 4  ;;  %v4596_v48 = vrot.slane %v4555_v30, 3  ;;  %v5097_v56 = vld [vmem:[#allocation3 + $0x16] sm:$0x1] }
 0x5b1   : > { %v4589_v2 = vsel %vm1354_vm10, %v4588_v26, %v4550_v14  ;;  %v6339_v22 = vsel %vm659_vm1, %v6322_v36, 0.0  ;;  %v4598_v62 = vrot.slane %v4556_v20, 2  ;;  %v5115_v27 = vrot.slane %v8657_v61, 1  ;;  %v5103_v44 = vld [vmem:[#allocation3 + $0xd6] sm:$0x1] }
 0x5b2   : > { %v4591_v54 = vsel %vm1357_vm11, %v4590_v32, %v4589_v2  ;;  %6340 = vadd.xlane.f32.xlu1 %v6339_v22  ;;  %v5116_v42 = vrot.slane %v8657_v61, 2  ;;  %v5117_v15 = vrot.slane %v8657_v61, 3  ;;  %v5118_v31 = vrot.slane %v8657_v61, 4  ;;  %v5104_v11 = vld [vmem:[#allocation3 + $0xf6] sm:$0x1] }
 0x5b3   : > { %v4593_v38 = vsel %vm1360_vm12, %v4592_v13, %v4591_v54  ;;  %v5119_v52 = vrot.slane %v8657_v61, 5  ;;  %v5120_v45 = vrot.slane %v8657_v61, 6  ;;  %v5121_v4 = vrot.slane %v8657_v61, 7  ;;  %v6147_v29 = vld [vmem:[#allocation3 + $0x13c] sm:$0x1] }
 0x5b4   : > { %v4595_v57 = vsel %vm1363_vm13, %v4594_v50, %v4593_v38  ;;  %v4600_v18 = vrot.slane %v4557_v23, 1  ;;  %v5146_v6 = vmul.f32 %v5115_v27, %v5098_v33  ;;  %v5147_v9 = vmul.f32 %v5116_v42, %v5099_v59  ;;  %v6148_v2 = vld [vmem:[#allocation3 + $0x15c] sm:$0x1] }
 0x5b5   : > { %v4597_v8 = vsel %vm1366_vm14, %v4596_v48, %v4595_v57  ;;  %v5148_v60 = vmul.f32 %v5117_v15, %v5100_v28  ;;  %v5149_v1 = vmul.f32 %v5118_v31, %v5101_v43  ;;  %v5150_v47 = vmul.f32 %v5119_v52, %v5102_v35  ;;  %v6149_v33 = vld [vmem:[#allocation3 + $0x17c] sm:$0x1] }
 0x5b6   : > { %v4599_v53 = vsel %vm1369_vm15, %v4598_v62, %v4597_v8  ;;  %v5145_v24 = vmul.f32 %v5097_v56, %v8657_v61  ;;  %v5151_v46 = vmul.f32 %v5120_v45, %v5103_v44  ;;  %v5177_v3 = vrot.slane %v5146_v6, 7  ;;  %v6150_v38 = vld [vmem:[#allocation3 + $0x19c] sm:$0x1] }
 0x5b7   : > { %v4601_v5 = vsel %vm1372_vm0, %v4600_v18, %v4599_v53  ;;  %v5152_v41 = vmul.f32 %v5121_v4, %v5104_v11  ;;  %v5179_v25 = vrot.slane %v5147_v9, 6  ;;  %v5181_v30 = vrot.slane %v5148_v60, 5  ;;  %v6151_v8 = vld [vmem:[#allocation3 + $0x1bc] sm:$0x1] }
 0x5b8   : > { %v4607_v12 = vsel %vm659_vm1, %v4601_v5, 0.0  ;;  %v5178_v17 = vsel %vm1354_vm10, %v5177_v3, %v5145_v24  ;;  %v5183_v19 = vrot.slane %v5149_v1, 4  ;;  %v5185_v14 = vrot.slane %v5150_v47, 3  ;;  %v6152_v18 = vld [vmem:[#allocation3 + $0x1dc] sm:$0x1]  ;;  %v9606_v3 = vpop.xlane.xlu0 %1391 }
 0x5b9   : > { %4608 = vadd.xlane.f32.xlu0 %v4607_v12  ;;  %v5187_v20 = vrot.slane %v5151_v46, 2  ;;  %v5180_v26 = vsel %vm1357_vm11, %v5179_v25, %v5178_v17  ;;  %v6163_v23 = vrot.slane %v8700_v40, 1  ;;  %v6164_v32 = vrot.slane %v8700_v40, 2  ;;  %v6153_v43 = vld [vmem:[#allocation3 + $0x1fc] sm:$0x1] }
 0x5ba   : > { %v6165_v13 = vrot.slane %v8700_v40, 3  ;;  %v5182_v36 = vsel %vm1360_vm12, %v5181_v30, %v5180_v26  ;;  %v6166_v50 = vrot.slane %v8700_v40, 4  ;;  %v6167_v48 = vrot.slane %v8700_v40, 5  ;;  %v6146_v56 = vld [vmem:[#allocation3 + $0x11c] sm:$0x1] }
 0x5bb   : > { %v6168_v22 = vrot.slane %v8700_v40, 6  ;;  %v5184_v54 = vsel %vm1363_vm13, %v5183_v19, %v5182_v36  ;;  %v5189_v62 = vrot.slane %v5152_v41, 1  ;;  %v6169_v59 = vrot.slane %v8700_v40, 7  ;;  %v5221_v46 = vld [vmem:[#allocation3 + $0x37] sm:$0x1] }
 0x5bc   : > { %v6195_v57 = vmul.f32 %v6163_v23, %v6147_v29  ;;  %v5186_v28 = vsel %vm1366_vm14, %v5185_v14, %v5184_v54  ;;  %v6196_v35 = vmul.f32 %v6164_v32, %v6148_v2  ;;  %v6197_v6 = vmul.f32 %v6165_v13, %v6149_v33  ;;  %v5222_v17 = vld [vmem:[#allocation3 + $0x57] sm:$0x1] }
 0x5bd   : > { %v6198_v9 = vmul.f32 %v6166_v50, %v6150_v38  ;;  %v5188_v53 = vsel %vm1369_vm15, %v5187_v20, %v5186_v28  ;;  %v6199_v44 = vmul.f32 %v6167_v48, %v6151_v8  ;;  %v6200_v60 = vmul.f32 %v6168_v22, %v6152_v18  ;;  %v5223_v26 = vld [vmem:[#allocation3 + $0x77] sm:$0x1] }
 0x5be   : > { %v6201_v1 = vmul.f32 %v6169_v59, %v6153_v43  ;;  %v5190_v47 = vsel %vm1372_vm0, %v5189_v62, %v5188_v53  ;;  %v6194_v5 = vmul.f32 %v6146_v56, %v8700_v40  ;;  %v6232_v11 = vrot.slane %v6195_v57, 7  ;;  %v5224_v29 = vld [vmem:[#allocation3 + $0x97] sm:$0x1] }
 0x5bf   : > { %v6234_v24 = vrot.slane %v6196_v35, 6  ;;  %v5207_v12 = vsel %vm659_vm1, %v5190_v47, 0.0  ;;  %v6236_v41 = vrot.slane %v6197_v6, 5  ;;  %v6238_v25 = vrot.slane %v6198_v9, 4  ;;  %v5225_v54 = vld [vmem:[#allocation3 + $0xb7] sm:$0x1] }
 0x5c0   : > { %v6240_v30 = vrot.slane %v6199_v44, 3  ;;  %5208 = vadd.xlane.f32.xlu1 %v5207_v12  ;;  %v6233_v19 = vsel %vm1354_vm10, %v6232_v11, %v6194_v5  ;;  %v6242_v14 = vrot.slane %v6200_v60, 2  ;;  %v6244_v20 = vrot.slane %v6201_v1, 1  ;;  %v5226_v62 = vld [vmem:[#allocation3 + $0xd7] sm:$0x1]  ;;  %v9629_v60 = vpop.xlane.xlu0 %1482 }
 0x5c1   : > { %v5237_v36 = vmul.f32 %v5221_v46, %v5115_v27  ;;  %v6235_v2 = vsel %vm1357_vm11, %v6234_v24, %v6233_v19  ;;  %v5227_v33 = vld [vmem:[#allocation3 + $0xf7] sm:$0x1]  ;;  %v5238_v38 = vmul.f32 %v5222_v17, %v5116_v42  ;;  %v5239_v57 = vmul.f32 %v5223_v26, %v5117_v15  ;;  %v6271_v5 = vld [vmem:[#allocation3 + $0x15d] sm:$0x1] }
 0x5c2   : > { %v5240_v28 = vmul.f32 %v5224_v29, %v5118_v31  ;;  %v6237_v8 = vsel %vm1360_vm12, %v6236_v41, %v6235_v2  ;;  %v5220_v18 = vld [vmem:[#allocation3 + $0x17] sm:$0x1]  ;;  %v5241_v27 = vmul.f32 %v5225_v54, %v5119_v52  ;;  %v5242_v43 = vmul.f32 %v5226_v62, %v5120_v45  ;;  %v6269_v24 = vld [vmem:[#allocation3 + $0x11d] sm:$0x1] }
 0x5c3   : > { %v5243_v35 = vmul.f32 %v5227_v33, %v5121_v4  ;;  %v6239_v42 = vsel %vm1363_vm13, %v6238_v25, %v6237_v8  ;;  %v5236_v6 = vmul.f32 %v5220_v18, %v8657_v61  ;;  %v5268_v15 = vrot.slane %v5237_v36, 7  ;;  %v6270_v4 = vld [vmem:[#allocation3 + $0x13d] sm:$0x1] }
 0x5c4   : > { %v5270_v9 = vrot.slane %v5238_v38, 6  ;;  %v6241_v31 = vsel %vm1366_vm14, %v6240_v30, %v6239_v42  ;;  %v5272_v53 = vrot.slane %v5239_v57, 5  ;;  %v5274_v56 = vrot.slane %v5240_v28, 4  ;;  %v6272_v46 = vld [vmem:[#allocation3 + $0x17d] sm:$0x1]  ;;  %v9655_v8 = vpop.xlane.xlu0 %1485 }
 0x5c5   : > { %v5276_v44 = vrot.slane %v5241_v27, 3  ;;  %v6243_v52 = vsel %vm1369_vm15, %v6242_v14, %v6241_v31  ;;  %v5269_v45 = vsel %vm1354_vm10, %v5268_v15, %v5236_v6  ;;  %v5278_v1 = vrot.slane %v5242_v43, 2  ;;  %v6273_v12 = vld [vmem:[#allocation3 + $0x19d] sm:$0x1]  ;;  %v9664_v6 = vpop.xlane.xlu1 %2085 }
 0x5c6   : > { %v5280_v47 = vrot.slane %v5243_v35, 1  ;;  %v6245_v11 = vsel %vm1372_vm0, %v6244_v20, %v6243_v52  ;;  %v5271_v61 = vsel %vm1357_vm11, %v5270_v9, %v5269_v45  ;;  %v6286_v41 = vmul.f32 %v6270_v4, %v6163_v23  ;;  %v6274_v19 = vld [vmem:[#allocation3 + $0x1bd] sm:$0x1]  ;;  %v5793_v9 = vld [vmem:[#allocation3 + $0x5a] sm:$0x1] }
 0x5c7   : > { %v6287_v25 = vmul.f32 %v6271_v5, %v6164_v32  ;;  %v6251_v30 = vsel %vm659_vm1, %v6245_v11, 0.0  ;;  %v5273_v17 = vsel %vm1360_vm12, %v5272_v53, %v5271_v61  ;;  %v6275_v14 = vld [vmem:[#allocation3 + $0x1dd] sm:$0x1]  ;;  %v6288_v20 = vmul.f32 %v6272_v46, %v6165_v13  ;;  %v5794_v45 = vld [vmem:[#allocation3 + $0x7a] sm:$0x1] }
 0x5c8   : > { %v6289_v26 = vmul.f32 %v6273_v12, %v6166_v50  ;;  %6252 = vadd.xlane.f32.xlu0 %v6251_v30  ;;  %v5275_v29 = vsel %vm1363_vm13, %v5274_v56, %v5273_v17  ;;  %v6276_v36 = vld [vmem:[#allocation3 + $0x1fd] sm:$0x1]  ;;  %v6285_v23 = vmul.f32 %v6269_v24, %v8700_v40  ;;  %v6290_v32 = vmul.f32 %v6274_v19, %v6167_v48  ;;  %v5791_v11 = vld [vmem:[#allocation3 + $0x1a] sm:$0x1] }
 0x5c9   : > { %v6291_v2 = vmul.f32 %v6275_v14, %v6168_v22  ;;  %v5277_v54 = vsel %vm1366_vm14, %v5276_v44, %v5275_v29  ;;  %v6292_v13 = vmul.f32 %v6276_v36, %v6169_v59  ;;  %v6323_v62 = vrot.slane %v6286_v41, 7  ;;  %v5792_v59 = vld [vmem:[#allocation3 + $0x3a] sm:$0x1] }
 0x5ca   : > { %v6325_v33 = vrot.slane %v6287_v25, 6  ;;  %v5279_v50 = vsel %vm1369_vm15, %v5278_v1, %v5277_v54  ;;  %v6327_v38 = vrot.slane %v6288_v20, 5  ;;  %v6329_v57 = vrot.slane %v6289_v26, 4  ;;  %v5795_v1 = vld [vmem:[#allocation3 + $0x9a] sm:$0x1]  ;;  %v9687_v20 = vpop.xlane.xlu0 %2088 }
 0x5cb   : > { %v6331_v28 = vrot.slane %v6290_v32, 3  ;;  %v5281_v18 = vsel %vm1372_vm0, %v5280_v47, %v5279_v50  ;;  %v6324_v48 = vsel %vm1354_vm10, %v6323_v62, %v6285_v23  ;;  %v6333_v27 = vrot.slane %v6291_v2, 2  ;;  %v5796_v61 = vld [vmem:[#allocation3 + $0xba] sm:$0x1]  ;;  %v9693_v62 = vpop.xlane.xlu1 %2176 }
 0x5cc   : > { %v5809_v22 = vrot.slane %v8722_v51, 1  ;;  %v5298_v43 = vsel %vm659_vm1, %v5281_v18, 0.0  ;;  %v6326_v40 = vsel %vm1357_vm11, %v6325_v33, %v6324_v48  ;;  %v5810_v35 = vrot.slane %v8722_v51, 2  ;;  %v5797_v24 = vld [vmem:[#allocation3 + $0xda] sm:$0x1] }
 0x5cd   : > { %v5811_v42 = vrot.slane %v8722_v51, 3  ;;  %5299 = vadd.xlane.f32.xlu1 %v5298_v43  ;;  %v6328_v15 = vsel %vm1360_vm12, %v6327_v38, %v6326_v40  ;;  %v5812_v31 = vrot.slane %v8722_v51, 4  ;;  %v5813_v53 = vrot.slane %v8722_v51, 5  ;;  %v5798_v30 = vld [vmem:[#allocation3 + $0xfa] sm:$0x1] }
 0x5ce   : > { %v5814_v56 = vrot.slane %v8722_v51, 6  ;;  %v6330_v44 = vsel %vm1363_vm13, %v6329_v57, %v6328_v15  ;;  %v6335_v52 = vrot.slane %v6292_v13, 1  ;;  %v5815_v47 = vrot.slane %v8722_v51, 7  ;;  %v5106_v38 = vld [vmem:[#allocation3 + $0x136] sm:$0x1] }
 0x5cf   : > { %v5840_v4 = vmul.f32 %v5809_v22, %v5792_v59  ;;  %v6332_v5 = vsel %vm1366_vm14, %v6331_v28, %v6330_v44  ;;  %v5841_v46 = vmul.f32 %v5810_v35, %v5793_v9  ;;  %v5842_v12 = vmul.f32 %v5811_v42, %v5794_v45  ;;  %v5107_v48 = vld [vmem:[#allocation3 + $0x156] sm:$0x1] }
 0x5d0   : > { %v5843_v41 = vmul.f32 %v5812_v31, %v5795_v1  ;;  %v6334_v25 = vsel %vm1369_vm15, %v6333_v27, %v6332_v5  ;;  %v5839_v17 = vmul.f32 %v5791_v11, %v8722_v51  ;;  %v5844_v19 = vmul.f32 %v5813_v53, %v5796_v61  ;;  %v5108_v9 = vld [vmem:[#allocation3 + $0x176] sm:$0x1] }
 0x5d1   : > { %v5845_v14 = vmul.f32 %v5814_v56, %v5797_v24  ;;  %v6336_v26 = vsel %vm1372_vm0, %v6335_v52, %v6334_v25  ;;  %v5846_v29 = vmul.f32 %v5815_v47, %v5798_v30  ;;  %v5871_v36 = vrot.slane %v5840_v4, 7  ;;  %v5109_v1 = vld [vmem:[#allocation3 + $0x196] sm:$0x1] }
 0x5d2   : > { %v5873_v23 = vrot.slane %v5841_v46, 6  ;;  %v6342_v32 = vsel %vm659_vm1, %v6336_v26, 0.0  ;;  %v5875_v2 = vrot.slane %v5842_v12, 5  ;;  %v5877_v54 = vrot.slane %v5843_v41, 4  ;;  %v5110_v4 = vld [vmem:[#allocation3 + $0x1b6] sm:$0x1]  ;;  %v9712_v46 = vpop.xlane.xlu0 %2179 }
 0x5d3   : > { %v5879_v13 = vrot.slane %v5844_v19, 3  ;;  %6343 = vadd.xlane.f32.xlu0 %v6342_v32  ;;  %v5872_v33 = vsel %vm1354_vm10, %v5871_v36, %v5839_v17  ;;  %v5881_v50 = vrot.slane %v5845_v14, 2  ;;  %v5122_v57 = vrot.slane %v8694_v21, 1  ;;  %v5111_v5 = vld [vmem:[#allocation3 + $0x1d6] sm:$0x1] }
 0x5d4   : > { %v5123_v28 = vrot.slane %v8694_v21, 2  ;;  %v5874_v18 = vsel %vm1357_vm11, %v5873_v23, %v5872_v33  ;;  %v5124_v27 = vrot.slane %v8694_v21, 3  ;;  %v5125_v43 = vrot.slane %v8694_v21, 4  ;;  %v5105_v41 = vld [vmem:[#allocation3 + $0x116] sm:$0x1]  ;;  %v9723_v23 = vpop.xlane.xlu1 %1394 }
 0x5d5   : > { %v5126_v40 = vrot.slane %v8694_v21, 5  ;;  %v5876_v59 = vsel %vm1360_vm12, %v5875_v2, %v5874_v18  ;;  %v5883_v15 = vrot.slane %v5846_v29, 1  ;;  %v5127_v44 = vrot.slane %v8694_v21, 6  ;;  %v5112_v14 = vld [vmem:[#allocation3 + $0x1f6] sm:$0x1] }
 0x5d6   : > { %v5128_v52 = vrot.slane %v8694_v21, 7  ;;  %v5878_v45 = vsel %vm1363_vm13, %v5877_v54, %v5876_v59  ;;  %v5154_v11 = vmul.f32 %v5122_v57, %v5106_v38  ;;  %v5155_v61 = vmul.f32 %v5123_v28, %v5107_v48  ;;  %v5914_v33 = vld [vmem:[#allocation3 + $0x1b] sm:$0x1] }
 0x5d7   : > { %v5156_v24 = vmul.f32 %v5124_v27, %v5108_v9  ;;  %v5880_v12 = vsel %vm1366_vm14, %v5879_v13, %v5878_v45  ;;  %v5157_v25 = vmul.f32 %v5125_v43, %v5109_v1  ;;  %v5158_v30 = vmul.f32 %v5126_v40, %v5110_v4  ;;  %v5915_v38 = vld [vmem:[#allocation3 + $0x3b] sm:$0x1] }
 0x5d8   : > { %v5159_v17 = vmul.f32 %v5127_v44, %v5111_v5  ;;  %v5882_v19 = vsel %vm1369_vm15, %v5881_v50, %v5880_v12  ;;  %v5153_v26 = vmul.f32 %v5105_v41, %v8694_v21  ;;  %v5191_v29 = vrot.slane %v5154_v11, 7  ;;  %v5916_v9 = vld [vmem:[#allocation3 + $0x5b] sm:$0x1] }
 0x5d9   : > { %v5193_v36 = vrot.slane %v5155_v61, 6  ;;  %v5884_v32 = vsel %vm1372_vm0, %v5883_v15, %v5882_v19  ;;  %v5160_v2 = vmul.f32 %v5128_v52, %v5112_v14  ;;  %v5195_v54 = vrot.slane %v5156_v24, 5  ;;  %v5917_v1 = vld [vmem:[#allocation3 + $0x7b] sm:$0x1]  ;;  %v9743_v19 = vpop.xlane.xlu0 %2782 }
 0x5da   : > { %v5197_v13 = vrot.slane %v5157_v25, 4  ;;  %v5901_v18 = vsel %vm659_vm1, %v5884_v32, 0.0  ;;  %v5192_v50 = vsel %vm1354_vm10, %v5191_v29, %v5153_v26  ;;  %v5199_v48 = vrot.slane %v5158_v30, 3  ;;  %v5918_v4 = vld [vmem:[#allocation3 + $0x9b] sm:$0x1] }
 0x5db   : > { %v5201_v59 = vrot.slane %v5159_v17, 2  ;;  %5902 = vadd.xlane.f32.xlu1 %v5901_v18  ;;  %v5194_v45 = vsel %vm1357_vm11, %v5193_v36, %v5192_v50  ;;  %v5919_v15 = vld [vmem:[#allocation3 + $0xbb] sm:$0x1]  ;;  %v5930_v5 = vmul.f32 %v5914_v33, %v8722_v51  ;;  %v5931_v11 = vmul.f32 %v5915_v38, %v5809_v22  ;;  %v5229_v38 = vld [vmem:[#allocation3 + $0x137] sm:$0x1] }
 0x5dc   : > { %v5932_v61 = vmul.f32 %v5916_v9, %v5810_v35  ;;  %v5196_v24 = vsel %vm1360_vm12, %v5195_v54, %v5194_v45  ;;  %v5920_v12 = vld [vmem:[#allocation3 + $0xdb] sm:$0x1]  ;;  %v5933_v25 = vmul.f32 %v5917_v1, %v5811_v42  ;;  %v5934_v30 = vmul.f32 %v5918_v4, %v5812_v31  ;;  %v9751_v31 = vpop.xlane.xlu1 %2779  ;;  %v5230_v50 = vld [vmem:[#allocation3 + $0x157] sm:$0x1] }
 0x5dd   : > { %v5921_v41 = vld [vmem:[#allocation3 + $0xfb] sm:$0x1]  ;;  %v5935_v17 = vmul.f32 %v5919_v15, %v5813_v53  ;;  %v5198_v22 = vsel %vm1363_vm13, %v5197_v13, %v5196_v24  ;;  %v5936_v35 = vmul.f32 %v5920_v12, %v5814_v56  ;;  %v5962_v26 = vrot.slane %v5931_v11, 7  ;;  %v5232_v45 = vld [vmem:[#allocation3 + $0x197] sm:$0x1] }
 0x5de   : > { %v5937_v14 = vmul.f32 %v5921_v41, %v5815_v47  ;;  %v5200_v29 = vsel %vm1366_vm14, %v5199_v48, %v5198_v22  ;;  %v5203_v42 = vrot.slane %v5160_v2, 1  ;;  %v5964_v36 = vrot.slane %v5932_v61, 6  ;;  %v5231_v48 = vld [vmem:[#allocation3 + $0x177] sm:$0x1]  ;;  %v9770_v41 = vpop.xlane.xlu0 %2873 }
 0x5df   : > { %v5966_v32 = vrot.slane %v5933_v25, 5  ;;  %v5202_v53 = vsel %vm1369_vm15, %v5201_v59, %v5200_v29  ;;  %v5963_v54 = vsel %vm1354_vm10, %v5962_v26, %v5930_v5  ;;  %v5968_v33 = vrot.slane %v5934_v30, 4  ;;  %v5233_v1 = vld [vmem:[#allocation3 + $0x1b7] sm:$0x1] }
 0x5e0   : > { %v5970_v13 = vrot.slane %v5935_v17, 3  ;;  %v5204_v56 = vsel %vm1372_vm0, %v5203_v42, %v5202_v53  ;;  %v5965_v51 = vsel %vm1357_vm11, %v5964_v36, %v5963_v54  ;;  %v5972_v47 = vrot.slane %v5936_v35, 2  ;;  %v5228_v5 = vld [vmem:[#allocation3 + $0x117] sm:$0x1]  ;;  %v6486_v53 = vld [vmem:[#allocation3 + $0x3e] sm:$0x1] }
 0x5e1   : > { %v5974_v18 = vrot.slane %v5937_v14, 1  ;;  %v5210_v2 = vsel %vm659_vm1, %v5204_v56, 0.0  ;;  %v5967_v9 = vsel %vm1360_vm12, %v5966_v32, %v5965_v51  ;;  %v5245_v59 = vmul.f32 %v5229_v38, %v5122_v57  ;;  %v5234_v11 = vld [vmem:[#allocation3 + $0x1d7] sm:$0x1]  ;;  %v9779_v14 = vpop.xlane.xlu1 %2870  ;;  %v6488_v51 = vld [vmem:[#allocation3 + $0x7e] sm:$0x1] }
 0x5e2   : > { %v5246_v4 = vmul.f32 %v5230_v50, %v5123_v28  ;;  %5211 = vadd.xlane.f32.xlu0 %v5210_v2  ;;  %v5969_v15 = vsel %vm1363_vm13, %v5968_v33, %v5967_v9  ;;  %v5247_v61 = vmul.f32 %v5231_v48, %v5124_v27  ;;  %v5248_v24 = vmul.f32 %v5232_v45, %v5125_v43  ;;  %v5235_v25 = vld [vmem:[#allocation3 + $0x1f7] sm:$0x1]  ;;  %v9794_v48 = vpop.xlane.xlu0 %1741  ;;  %v6489_v45 = vld [vmem:[#allocation3 + $0x9e] sm:$0x1] }
 0x5e3   : > { %v5249_v12 = vmul.f32 %v5233_v1, %v5126_v40  ;;  %v5971_v57 = vsel %vm1366_vm14, %v5970_v13, %v5969_v15  ;;  %v5244_v28 = vmul.f32 %v5228_v5, %v8694_v21  ;;  %v5250_v30 = vmul.f32 %v5234_v11, %v5127_v44  ;;  %v6490_v1 = vld [vmem:[#allocation3 + $0xbe] sm:$0x1] }
 0x5e4   : > { %v5282_v17 = vrot.slane %v5245_v59, 7  ;;  %v5973_v22 = vsel %vm1369_vm15, %v5972_v47, %v5971_v57  ;;  %v5251_v27 = vmul.f32 %v5235_v25, %v5128_v52  ;;  %v5284_v43 = vrot.slane %v5246_v4, 6  ;;  %v6487_v52 = vld [vmem:[#allocation3 + $0x5e] sm:$0x1] }
 0x5e5   : > { %v5286_v35 = vrot.slane %v5247_v61, 5  ;;  %v5975_v40 = vsel %vm1372_vm0, %v5974_v18, %v5973_v22  ;;  %v5288_v29 = vrot.slane %v5248_v24, 4  ;;  %v5290_v42 = vrot.slane %v5249_v12, 3  ;;  %v6485_v5 = vld [vmem:[#allocation3 + $0x1e] sm:$0x1]  ;;  %v9808_v57 = vpop.xlane.xlu1 %1738 }
 0x5e6   : > { %v5283_v26 = vsel %vm1354_vm10, %v5282_v17, %v5244_v28  ;;  %v5992_v36 = vsel %vm659_vm1, %v5975_v40, 0.0  ;;  %v5292_v32 = vrot.slane %v5250_v30, 2  ;;  %v6503_v54 = vrot.slane %v8774_v39, 1  ;;  %v6491_v11 = vld [vmem:[#allocation3 + $0xde] sm:$0x1] }
 0x5e7   : > { %v5285_v44 = vsel %vm1357_vm11, %v5284_v43, %v5283_v26  ;;  %5993 = vadd.xlane.f32.xlu1 %v5992_v36  ;;  %v6504_v33 = vrot.slane %v8774_v39, 2  ;;  %v6505_v13 = vrot.slane %v8774_v39, 3  ;;  %v6506_v38 = vrot.slane %v8774_v39, 4  ;;  %v6492_v28 = vld [vmem:[#allocation3 + $0xfe] sm:$0x1] }
 0x5e8   : > { %v5287_v21 = vsel %vm1360_vm12, %v5286_v35, %v5285_v44  ;;  %v6507_v47 = vrot.slane %v8774_v39, 5  ;;  %v6508_v18 = vrot.slane %v8774_v39, 6  ;;  %v6509_v50 = vrot.slane %v8774_v39, 7 }
 0x5e9   : > { %v5289_v56 = vsel %vm1363_vm13, %v5288_v29, %v5287_v21  ;;  %v5294_v9 = vrot.slane %v5251_v27, 1  ;;  %v6534_v59 = vmul.f32 %v6503_v54, %v6486_v53  ;;  %v6535_v4 = vmul.f32 %v6504_v33, %v6487_v52 }
 0x5ea   : > { %v5291_v2 = vsel %vm1366_vm14, %v5290_v42, %v5289_v56  ;;  %v6536_v61 = vmul.f32 %v6505_v13, %v6488_v51  ;;  %v6537_v24 = vmul.f32 %v6506_v38, %v6489_v45  ;;  %v6538_v12 = vmul.f32 %v6507_v47, %v6490_v1  ;;  %v9822_v56 = vpop.xlane.xlu0 %1832 }
 0x5eb   : > { %v5293_v15 = vsel %vm1369_vm15, %v5292_v32, %v5291_v2  ;;  %v6533_v30 = vmul.f32 %v6485_v5, %v8774_v39  ;;  %v6539_v17 = vmul.f32 %v6508_v18, %v6491_v11  ;;  %v6565_v22 = vrot.slane %v6534_v59, 7  ;;  %v5800_v32 = vld [vmem:[#allocation3 + $0x13a] sm:$0x1] }
 0x5ec   : > { %v5295_v25 = vsel %vm1372_vm0, %v5294_v9, %v5293_v15  ;;  %v6540_v43 = vmul.f32 %v6509_v50, %v6492_v28  ;;  %v6567_v35 = vrot.slane %v6535_v4, 6  ;;  %v6569_v40 = vrot.slane %v6536_v61, 5  ;;  %v5801_v2 = vld [vmem:[#allocation3 + $0x15a] sm:$0x1] }
 0x5ed   : > { %v5301_v27 = vsel %vm659_vm1, %v5295_v25, 0.0  ;;  %v6566_v26 = vsel %vm1354_vm10, %v6565_v22, %v6533_v30  ;;  %v6571_v29 = vrot.slane %v6537_v24, 4  ;;  %v6573_v42 = vrot.slane %v6538_v12, 3  ;;  %v5802_v15 = vld [vmem:[#allocation3 + $0x17a] sm:$0x1]  ;;  %v9832_v24 = vpop.xlane.xlu1 %1829 }
 0x5ee   : > { %5302 = vadd.xlane.f32.xlu0 %v5301_v27  ;;  %v6575_v36 = vrot.slane %v6539_v17, 2  ;;  %v6568_v44 = vsel %vm1357_vm11, %v6567_v35, %v6566_v26  ;;  %v5816_v53 = vrot.slane %v8750_v16, 1  ;;  %v5817_v21 = vrot.slane %v8750_v16, 2  ;;  %v5803_v5 = vld [vmem:[#allocation3 + $0x19a] sm:$0x1] }
 0x5ef   : > { %v5818_v52 = vrot.slane %v8750_v16, 3  ;;  %v6570_v51 = vsel %vm1360_vm12, %v6569_v40, %v6568_v44  ;;  %v5819_v9 = vrot.slane %v8750_v16, 4  ;;  %v5820_v45 = vrot.slane %v8750_v16, 5  ;;  %v5804_v25 = vld [vmem:[#allocation3 + $0x1ba] sm:$0x1] }
 0x5f0   : > { %v10073_v1 = vrot.slane %v8750_v16, 6  ;;  %v6572_v59 = vsel %vm1363_vm13, %v6571_v29, %v6570_v51  ;;  %v6577_v4 = vrot.slane %v6540_v43, 1  ;;  %v10074_v11 = vrot.slane %v8750_v16, 7  ;;  %v5805_v28 = vld [vmem:[#allocation3 + $0x1da] sm:$0x1] }
 0x5f1   : > { %v5848_v61 = vmul.f32 %v5816_v53, %v5800_v32  ;;  %v6574_v12 = vsel %vm1366_vm14, %v6573_v42, %v6572_v59  ;;  %v5806_v30 = vld [vmem:[#allocation3 + $0x1fa] sm:$0x1]  ;;  %v5849_v17 = vmul.f32 %v5817_v21, %v5801_v2  ;;  %v5850_v22 = vmul.f32 %v5818_v52, %v5802_v15  ;;  %v6609_v2 = vld [vmem:[#allocation3 + $0x3f] sm:$0x1] }
 0x5f2   : > { %v5851_v27 = vmul.f32 %v5819_v9, %v5803_v5  ;;  %v6576_v43 = vsel %vm1369_vm15, %v6575_v36, %v6574_v12  ;;  %v5799_v35 = vld [vmem:[#allocation3 + $0x11a] sm:$0x1]  ;;  %v5852_v40 = vmul.f32 %v5820_v45, %v5804_v25  ;;  %v5853_v26 = vmul.f32 %v10073_v1, %v5805_v28  ;;  %v6610_v12 = vld [vmem:[#allocation3 + $0x5f] sm:$0x1]  ;;  %v9851_v25 = vpop.xlane.xlu0 %3476 }
 0x5f3   : > { %v5854_v29 = vmul.f32 %v10074_v11, %v5806_v30  ;;  %v6578_v42 = vsel %vm1372_vm0, %v6577_v4, %v6576_v43  ;;  %v5847_v44 = vmul.f32 %v5799_v35, %v8750_v16  ;;  %v5885_v32 = vrot.slane %v5848_v61, 7  ;;  %v6611_v11 = vld [vmem:[#allocation3 + $0x7f] sm:$0x1] }
 0x5f4   : > { %v5887_v51 = vrot.slane %v5849_v17, 6  ;;  %v6595_v59 = vsel %vm659_vm1, %v6578_v42, 0.0  ;;  %v5889_v36 = vrot.slane %v5850_v22, 5  ;;  %v5891_v15 = vrot.slane %v5851_v27, 4  ;;  %v6612_v4 = vld [vmem:[#allocation3 + $0x9f] sm:$0x1] }
 0x5f5   : > { %v5893_v5 = vrot.slane %v5852_v40, 3  ;;  %6596 = vadd.xlane.f32.xlu1 %v6595_v59  ;;  %v5886_v28 = vsel %vm1354_vm10, %v5885_v32, %v5847_v44  ;;  %v5895_v1 = vrot.slane %v5853_v26, 2  ;;  %v5897_v30 = vrot.slane %v5854_v29, 1  ;;  %v6613_v43 = vld [vmem:[#allocation3 + $0xbf] sm:$0x1]  ;;  %v9863_v29 = vpop.xlane.xlu1 %3473 }
 0x5f6   : > { %v6625_v61 = vmul.f32 %v6609_v2, %v6503_v54  ;;  %v5888_v17 = vsel %vm1357_vm11, %v5887_v51, %v5886_v28  ;;  %v6614_v35 = vld [vmem:[#allocation3 + $0xdf] sm:$0x1]  ;;  %v6626_v27 = vmul.f32 %v6610_v12, %v6504_v33  ;;  %v6627_v40 = vmul.f32 %v6611_v11, %v6505_v13 }
 0x5f7   : > { %v6615_v22 = vld [vmem:[#allocation3 + $0xff] sm:$0x1]  ;;  %v6628_v26 = vmul.f32 %v6612_v4, %v6506_v38  ;;  %v5890_v42 = vsel %vm1360_vm12, %v5889_v36, %v5888_v17  ;;  %v6629_v54 = vmul.f32 %v6613_v43, %v6507_v47  ;;  %v6630_v32 = vmul.f32 %v6614_v35, %v6508_v18  ;;  %v5923_v17 = vld [vmem:[#allocation3 + $0x13b] sm:$0x1] }
 0x5f8   : > { %v6608_v44 = vld [vmem:[#allocation3 + $0x1f] sm:$0x1]  ;;  %v6631_v33 = vmul.f32 %v6615_v22, %v6509_v50  ;;  %v5892_v51 = vsel %vm1363_vm13, %v5891_v15, %v5890_v42  ;;  %v6656_v11 = vrot.slane %v6625_v61, 7  ;;  %v6658_v38 = vrot.slane %v6626_v27, 6  ;;  %v5924_v43 = vld [vmem:[#allocation3 + $0x15b] sm:$0x1]  ;;  %v9877_v50 = vpop.xlane.xlu0 %3567 }
 0x5f9   : > { %v6624_v13 = vmul.f32 %v6608_v44, %v8774_v39  ;;  %v5894_v2 = vsel %vm1366_vm14, %v5893_v5, %v5892_v51  ;;  %v6660_v59 = vrot.slane %v6627_v40, 5  ;;  %v6662_v36 = vrot.slane %v6628_v26, 4  ;;  %v5922_v61 = vld [vmem:[#allocation3 + $0x11b] sm:$0x1] }
 0x5fa   : > { %v6664_v12 = vrot.slane %v6629_v54, 3  ;;  %v5896_v28 = vsel %vm1369_vm15, %v5895_v1, %v5894_v2  ;;  %v6666_v4 = vrot.slane %v6630_v32, 2  ;;  %v6668_v18 = vrot.slane %v6631_v33, 1  ;;  %v5925_v35 = vld [vmem:[#allocation3 + $0x17b] sm:$0x1]  ;;  %v9891_v54 = vpop.xlane.xlu1 %3564 }
 0x5fb   : > { %v6657_v47 = vsel %vm1354_vm10, %v6656_v11, %v6624_v13  ;;  %v5898_v15 = vsel %vm1372_vm0, %v5897_v30, %v5896_v28  ;;  %v5926_v5 = vld [vmem:[#allocation3 + $0x19b] sm:$0x1]  ;;  %v5939_v22 = vmul.f32 %v5923_v17, %v5816_v53  ;;  %v5940_v1 = vmul.f32 %v5924_v43, %v5817_v21 }
 0x5fc   : > { %v6659_v39 = vsel %vm1357_vm11, %v6658_v38, %v6657_v47  ;;  %v5904_v27 = vsel %vm659_vm1, %v5898_v15, 0.0  ;;  %v5927_v26 = vld [vmem:[#allocation3 + $0x1bb] sm:$0x1]  ;;  %v5941_v30 = vmul.f32 %v5925_v35, %v5818_v52  ;;  %v5942_v44 = vmul.f32 %v5926_v5, %v5819_v9 }
 0x5fd   : > { %v6661_v40 = vsel %vm1360_vm12, %v6660_v59, %v6659_v39  ;;  %v5928_v42 = vld [vmem:[#allocation3 + $0x1db] sm:$0x1]  ;;  %5905 = vadd.xlane.f32.xlu0 %v5904_v27  ;;  %v5938_v21 = vmul.f32 %v5922_v61, %v8750_v16  ;;  %v5943_v33 = vmul.f32 %v5927_v26, %v5820_v45  ;;  %v10089_v51 = vrot.slane %v8750_v16, 6  ;;  %v9906_v39 = vpop.xlane.xlu0 %2435  ;;  %v6494_v61 = vld [vmem:[#allocation3 + $0x13e] sm:$0x1] }
 0x5fe   : > { %v6663_v53 = vsel %vm1363_vm13, %v6662_v36, %v6661_v40  ;;  %v5929_v32 = vld [vmem:[#allocation3 + $0x1fb] sm:$0x1]  ;;  %v10090_v52 = vrot.slane %v8750_v16, 7  ;;  %v5976_v9 = vrot.slane %v5939_v22, 7  ;;  %v5978_v2 = vrot.slane %v5940_v1, 6  ;;  %v9916_v40 = vpop.xlane.xlu1 %2432 }
 0x5ff   : > { %v5944_v13 = vmul.f32 %v5928_v42, %v10089_v51  ;;  %v6665_v11 = vsel %vm1366_vm14, %v6664_v12, %v6663_v53  ;;  %v5980_v28 = vrot.slane %v5941_v30, 5  ;;  %v5982_v36 = vrot.slane %v5942_v44, 4  ;;  %v6496_v30 = vld [vmem:[#allocation3 + $0x17e] sm:$0x1] }
 0x600   : > { %v5945_v38 = vmul.f32 %v5929_v32, %v10090_v52  ;;  %v6667_v59 = vsel %vm1369_vm15, %v6666_v4, %v6665_v11  ;;  %v5984_v47 = vrot.slane %v5943_v33, 3  ;;  %v5977_v43 = vsel %vm1354_vm10, %v5976_v9, %v5938_v21  ;;  %v6497_v44 = vld [vmem:[#allocation3 + $0x19e] sm:$0x1] }
 0x601   : > { %v6669_v17 = vsel %vm1372_vm0, %v6668_v18, %v6667_v59  ;;  %v5986_v45 = vrot.slane %v5944_v13, 2  ;;  %v6510_v15 = vrot.slane %v8791_v49, 1  ;;  %v5979_v16 = vsel %vm1357_vm11, %v5978_v2, %v5977_v43  ;;  %v6495_v18 = vld [vmem:[#allocation3 + $0x15e] sm:$0x1] }
 0x602   : > { %v6686_v12 = vsel %vm659_vm1, %v6669_v17, 0.0  ;;  %v6511_v35 = vrot.slane %v8791_v49, 2  ;;  %v6512_v4 = vrot.slane %v8791_v49, 3  ;;  %v5981_v5 = vsel %vm1360_vm12, %v5980_v28, %v5979_v16  ;;  %v6493_v33 = vld [vmem:[#allocation3 + $0x11e] sm:$0x1]  ;;  %v9924_v16 = vpop.xlane.xlu0 %2526 }
 0x603   : > { %6687 = vadd.xlane.f32.xlu1 %v6686_v12  ;;  %v6513_v22 = vrot.slane %v8791_v49, 4  ;;  %v6514_v1 = vrot.slane %v8791_v49, 5  ;;  %v6515_v27 = vrot.slane %v8791_v49, 6  ;;  %v5983_v26 = vsel %vm1363_vm13, %v5982_v36, %v5981_v5  ;;  %v6498_v51 = vld [vmem:[#allocation3 + $0x1be] sm:$0x1] }
 0x604   : > { %v5988_v42 = vrot.slane %v5945_v38, 1  ;;  %v6516_v53 = vrot.slane %v8791_v49, 7  ;;  %v6542_v32 = vmul.f32 %v6510_v15, %v6494_v61  ;;  %v5985_v21 = vsel %vm1366_vm14, %v5984_v47, %v5983_v26  ;;  %v6499_v2 = vld [vmem:[#allocation3 + $0x1de] sm:$0x1]  ;;  %v6617_v5 = vld [vmem:[#allocation3 + $0x13f] sm:$0x1] }
 0x605   : > { %v6543_v13 = vmul.f32 %v6511_v35, %v6495_v18  ;;  %v6544_v11 = vmul.f32 %v6512_v4, %v6496_v30  ;;  %v6545_v52 = vmul.f32 %v6513_v22, %v6497_v44  ;;  %v5987_v9 = vsel %vm1369_vm15, %v5986_v45, %v5985_v21  ;;  %v6500_v36 = vld [vmem:[#allocation3 + $0x1fe] sm:$0x1]  ;;  %v6618_v30 = vld [vmem:[#allocation3 + $0x15f] sm:$0x1] }
 0x606   : > { %v6541_v59 = vmul.f32 %v6493_v33, %v8791_v49  ;;  %v6546_v28 = vmul.f32 %v6514_v1, %v6498_v51  ;;  %v5989_v38 = vsel %vm1372_vm0, %v5988_v42, %v5987_v9  ;;  %v6547_v17 = vmul.f32 %v6515_v27, %v6499_v2  ;;  %v6619_v44 = vld [vmem:[#allocation3 + $0x17f] sm:$0x1]  ;;  %v9928_v33 = vpop.xlane.xlu1 %2523 }
 0x607   : > { %v6579_v43 = vrot.slane %v6542_v32, 7  ;;  %v6581_v12 = vrot.slane %v6543_v13, 6  ;;  %v5995_v47 = vsel %vm659_vm1, %v5989_v38, 0.0  ;;  %v6548_v61 = vmul.f32 %v6516_v53, %v6500_v36  ;;  %v6616_v51 = vld [vmem:[#allocation3 + $0x11f] sm:$0x1] }
 0x608   : > { %5996 = vadd.xlane.f32.xlu0 %v5995_v47  ;;  %v6583_v45 = vrot.slane %v6544_v11, 5  ;;  %v6585_v26 = vrot.slane %v6545_v52, 4  ;;  %v6633_v21 = vmul.f32 %v6617_v5, %v6510_v15  ;;  %v6587_v32 = vrot.slane %v6546_v28, 3  ;;  %v6620_v13 = vld [vmem:[#allocation3 + $0x19f] sm:$0x1] }
 0x609   : > { %v6580_v18 = vsel %vm1354_vm10, %v6579_v43, %v6541_v59  ;;  %v6634_v9 = vmul.f32 %v6618_v30, %v6511_v35  ;;  %v6635_v2 = vmul.f32 %v6619_v44, %v6512_v4  ;;  %v6589_v36 = vrot.slane %v6547_v17, 2  ;;  %v6621_v47 = vld [vmem:[#allocation3 + $0x1bf] sm:$0x1]  ;;  %v3130_v35 = vpop.xlane.xlu0 %3129 }
 0x60a   : > { %v6582_v42 = vsel %vm1357_vm11, %v6581_v12, %v6580_v18  ;;  %v6632_v59 = vmul.f32 %v6616_v51, %v8791_v49  ;;  %v6636_v11 = vmul.f32 %v6620_v13, %v6513_v22  ;;  %v6622_v43 = vld [vmem:[#allocation3 + $0x1df] sm:$0x1]  ;;  %v6637_v15 = vmul.f32 %v6621_v47, %v6514_v1  ;;  %v3127_v1 = vpop.xlane.xlu1 %3126 }
 0x60b   : > { %v6584_v38 = vsel %vm1360_vm12, %v6583_v45, %v6582_v42  ;;  %v6670_v5 = vrot.slane %v6633_v21, 7  ;;  %v6672_v55 = vrot.slane %v6634_v9, 6  ;;  %v6591_v28 = vrot.slane %v6548_v61, 1  ;;  %v6623_v18 = vld [vmem:[#allocation3 + $0x1ff] sm:$0x1] }
 0x60c   : > { %v6586_v52 = vsel %vm1363_vm13, %v6585_v26, %v6584_v38  ;;  %v6638_v37 = vmul.f32 %v6622_v43, %v6515_v27  ;;  %v6639_v45 = vmul.f32 %v6623_v18, %v6516_v53  ;;  %v6674_v30 = vrot.slane %v6635_v2, 5 }
 0x60d   : > { %v6588_v12 = vsel %vm1366_vm14, %v6587_v32, %v6586_v52  ;;  %v6671_v17 = vsel %vm1354_vm10, %v6670_v5, %v6632_v59  ;;  %v6676_v26 = vrot.slane %v6636_v11, 4  ;;  %v6678_v61 = vrot.slane %v6637_v15, 3  ;;  %v3221_v9 = vpop.xlane.xlu0 %3220 }
 0x60e   : > { %v6590_v4 = vsel %vm1369_vm15, %v6589_v36, %v6588_v12  ;;  %v6673_v22 = vsel %vm1357_vm11, %v6672_v55, %v6671_v17  ;;  %v1487_v27 = vadd.f32 %v9655_v8, %v9629_v60  ;;  %v6680_v42 = vrot.slane %v6638_v37, 2  ;;  %v3218_v47 = vpop.xlane.xlu1 %3217 }
 0x60f   : > { %v6592_v49 = vsel %vm1372_vm0, %v6591_v28, %v6590_v4  ;;  %v6675_v21 = vsel %vm1360_vm12, %v6674_v30, %v6673_v22  ;;  %v6682_v51 = vrot.slane %v6639_v45, 1  ;;  %v1396_v55 = vadd.f32 %v9723_v23, %v9606_v3 }
 0x610   : > { %v6598_v44 = vsel %vm659_vm1, %v6592_v49, 0.0  ;;  %v6677_v53 = vsel %vm1363_vm13, %v6676_v26, %v6675_v21  ;;  %v1488_v38 = vrot.slane %v1487_v27, 4  ;;  %v2090_v60 = vadd.f32 %v9687_v20, %v9664_v6 }
 0x611   : > { %6599 = vadd.xlane.f32.xlu0 %v6598_v44  ;;  %v6679_v32 = vsel %vm1366_vm14, %v6678_v61, %v6677_v53  ;;  %v2875_v37 = vadd.f32 %v9770_v41, %v9779_v14  ;;  %v1397_v8 = vrot.slane %v1396_v55, 4  ;;  %v2181_v59 = vadd.f32 %v9712_v46, %v9693_v62  ;;  %v9960_v43 = vpop.xlane.xlu0 %4170 }
 0x612   : > { %v6681_v13 = vsel %vm1369_vm15, %v6680_v42, %v6679_v32  ;;  %v2784_v3 = vadd.f32 %v9743_v19, %v9751_v31  ;;  %v1743_v23 = vadd.f32 %v9794_v48, %v9808_v57  ;;  %v1489_v11 = vadd.f32 %v1488_v38, %v1487_v27  ;;  %v9962_v41 = vpop.xlane.xlu1 %4167 }
 0x613   : > { %v6683_v2 = vsel %vm1372_vm0, %v6682_v51, %v6681_v13  ;;  %v2091_v15 = vrot.slane %v2090_v60, 4  ;;  %v2876_v5 = vrot.slane %v2875_v37, 4  ;;  %v1398_v6 = vadd.f32 %v1397_v8, %v1396_v55 }
 0x614   : > { %v6689_v36 = vsel %vm659_vm1, %v6683_v2, 0.0  ;;  %v1744_v52 = vrot.slane %v1743_v23, 4  ;;  %v2182_v20 = vrot.slane %v2181_v59, 4  ;;  %v2785_v12 = vrot.slane %v2784_v3, 4 }
 0x615   : > { %6690 = vadd.xlane.f32.xlu0 %v6689_v36  ;;  %v1490_v14 = vrot.slane %v1489_v11, 2  ;;  %v1834_v62 = vadd.f32 %v9822_v56, %v9832_v24  ;;  %v3478_v46 = vadd.f32 %v9851_v25, %v9863_v29  ;;  %v2092_v19 = vadd.f32 %v2091_v15, %v2090_v60  ;;  %v9970_v17 = vpop.xlane.xlu0 %4261 }
 0x616   : > { %v1745_v28 = vadd.f32 %v1744_v52, %v1743_v23  ;;  %v2877_v31 = vadd.f32 %v2876_v5, %v2875_v37  ;;  %v1399_v57 = vrot.slane %v1398_v6, 2  ;;  %v2183_v18 = vadd.f32 %v2182_v20, %v2181_v59  ;;  %v9976_v44 = vpop.xlane.xlu1 %4258 }
 0x617   : > { %v1835_v48 = vrot.slane %v1834_v62, 4  ;;  %v2786_v4 = vadd.f32 %v2785_v12, %v2784_v3  ;;  %v2437_v45 = vadd.f32 %v9906_v39, %v9916_v40  ;;  %v1491_v30 = vadd.f32 %v1490_v14, %v1489_v11 }
 0x618   : > { %v1746_v49 = vrot.slane %v1745_v28, 2  ;;  %v3569_v56 = vadd.f32 %v9877_v50, %v9891_v54  ;;  %v3479_v24 = vrot.slane %v3478_v46, 4  ;;  %v2528_v25 = vadd.f32 %v9924_v16, %v9928_v33 }
 0x619   : > { %v1836_v22 = vadd.f32 %v1835_v48, %v1834_v62  ;;  %v2438_v26 = vrot.slane %v2437_v45, 4  ;;  %v3131_v29 = vadd.f32 %v3130_v35, %v3127_v1  ;;  %v2093_v21 = vrot.slane %v2092_v19, 2  ;;  %v3824_v33 = vpop.xlane.xlu0 %3823 }
 0x61a   : > { %v2878_v61 = vrot.slane %v2877_v31, 2  ;;  %v3222_v39 = vadd.f32 %v3221_v9, %v3218_v47  ;;  %v1400_v40 = vadd.f32 %v1399_v57, %v1398_v6  ;;  %v2184_v53 = vrot.slane %v2183_v18, 2  ;;  %v3821_v8 = vpop.xlane.xlu1 %3820 }
 0x61b   : > { %v1837_v27 = vrot.slane %v1836_v22, 2  ;;  %v2529_v42 = vrot.slane %v2528_v25, 4  ;;  %v3132_v32 = vrot.slane %v3131_v29, 4  ;;  %v1492_v51 = vrot.slane %v1491_v30, 1 }
 0x61c   : > { %vm6699_vm1 = vcmask 1040384   ;;  %v2787_v13 = vrot.slane %v2786_v4, 2  ;;  %v3570_v50 = vrot.slane %v3569_v56, 4  ;;  %v3223_v54 = vrot.slane %v3222_v39, 4 }
 0x61d   : > { %v1747_v55 = vadd.f32 %v1746_v49, %v1745_v28  ;;  %v3480_v2 = vadd.f32 %v3479_v24, %v3478_v46  ;;  %v2439_v38 = vadd.f32 %v2438_v26, %v2437_v45  ;;  %v3133_v16 = vadd.f32 %v3132_v32, %v3131_v29 }
 0x61e   : > { %v2879_v35 = vadd.f32 %v2878_v61, %v2877_v31  ;;  %v1838_v1 = vadd.f32 %v1837_v27, %v1836_v22  ;;  %v2530_v36 = vadd.f32 %v2529_v42, %v2528_v25  ;;  %v3224_v60 = vadd.f32 %v3223_v54, %v3222_v39 }
 0x61f   : > { %v1401_v9 = vrot.slane %v1400_v40, 1  ;;  %v2094_v47 = vadd.f32 %v2093_v21, %v2092_v19  ;;  %v3134_v37 = vrot.slane %v3133_v16, 2  ;;  %v2185_v59 = vadd.f32 %v2184_v53, %v2183_v18  ;;  %v3915_v19 = vpop.xlane.xlu0 %3914 }
 0x620   : > { %v2788_v3 = vadd.f32 %v2787_v13, %v2786_v4  ;;  %v3571_v23 = vadd.f32 %v3570_v50, %v3569_v56  ;;  %v3225_v11 = vrot.slane %v3224_v60, 2  ;;  %v1748_v52 = vrot.slane %v1747_v55, 1  ;;  %v3912_v56 = vpop.xlane.xlu1 %3911 }
 0x621   : > { %v3481_v15 = vrot.slane %v3480_v2, 2  ;;  %v2440_v5 = vrot.slane %v2439_v38, 2  ;;  %v3135_v6 = vadd.f32 %v3134_v37, %v3133_v16  ;;  %v2880_v20 = vrot.slane %v2879_v35, 1 }
 0x622   : > { %v1839_v12 = vrot.slane %v1838_v1, 1  ;;  %v2531_v14 = vrot.slane %v2530_v36, 2  ;;  %v3226_v28 = vadd.f32 %v3225_v11, %v3224_v60  ;;  %v1493_v62 = vadd.f32 %v1492_v51, %v1491_v30 }
 0x623   : > { %v1402_v46 = vadd.f32 %v1401_v9, %v1400_v40  ;;  %v2095_v31 = vrot.slane %v2094_v47, 1  ;;  %v3136_v48 = vrot.slane %v3135_v6, 1  ;;  %v2789_v57 = vrot.slane %v2788_v3, 1 }
 0x624   : > { %v3572_v45 = vrot.slane %v3571_v23, 2  ;;  %v3227_v18 = vrot.slane %v3226_v28, 1  ;;  %v1749_v4 = vadd.f32 %v1748_v52, %v1747_v55  ;;  %v3482_v49 = vadd.f32 %v3481_v15, %v3480_v2 }
 0x625   : > { %v2441_v22 = vadd.f32 %v2440_v5, %v2439_v38  ;;  %v3825_v24 = vadd.f32 %v3824_v33, %v3821_v8  ;;  %v2881_v26 = vadd.f32 %v2880_v20, %v2879_v35  ;;  %v1840_v25 = vadd.f32 %v1839_v12, %v1838_v1 }
 0x626   : > { %v2532_v29 = vadd.f32 %v2531_v14, %v2530_v36  ;;  %v3916_v21 = vadd.f32 %v3915_v19, %v3912_v56  ;;  %v6700_v61 = vsel %vm6699_vm1, %v1402_v46, %v1493_v62  ;;  %v2186_v30 = vrot.slane %v2185_v59, 1 }
 0x627   : > { %v3137_v27 = vadd.f32 %v3136_v48, %v3135_v6  ;;  %v3826_v39 = vrot.slane %v3825_v24, 4  ;;  %v2790_v40 = vadd.f32 %v2789_v57, %v2788_v3  ;;  %v3573_v53 = vadd.f32 %v3572_v45, %v3571_v23 }
 0x628   : > { %v3228_v42 = vadd.f32 %v3227_v18, %v3226_v28  ;;  %v3917_v32 = vrot.slane %v3916_v21, 4  ;;  %v6702_v51 = vsel %vm6701_vm2, %v6700_v61, %v1749_v4  ;;  %v3483_v13 = vrot.slane %v3482_v49, 1 }
 0x629   : > { %v2442_v50 = vrot.slane %v2441_v22, 1  ;;  %v3827_v54 = vadd.f32 %v3826_v39, %v3825_v24  ;;  %v6713_v55 = vsel %vm6699_vm1, %v2790_v40, %v2881_v26  ;;  %v6704_v2 = vsel %vm6703_vm3, %v6702_v51, %v1840_v25 }
 0x62a   : > { %v2533_v38 = vrot.slane %v2532_v29, 1  ;;  %v3918_v16 = vadd.f32 %v3917_v32, %v3916_v21  ;;  %v2096_v33 = vadd.f32 %v2095_v31, %v2094_v47  ;;  %v2187_v35 = vadd.f32 %v2186_v30, %v2185_v59 }
 0x62b   : > { %v6714_v1 = vsel %vm6701_vm2, %v6713_v55, %v3137_v27  ;;  %v3828_v36 = vrot.slane %v3827_v54, 2  ;;  %v3574_v60 = vrot.slane %v3573_v53, 1  ;;  %v3484_v3 = vadd.f32 %v3483_v13, %v3482_v49  ;;  %v4862_v49 = vpop.xlane.xlu1 %4861 }
 0x62c   : > { %v6715_v9 = vsel %vm6703_vm3, %v6714_v1, %v3228_v42  ;;  %v3919_v37 = vrot.slane %v3918_v16, 2  ;;  %v6706_v8 = vsel %vm6705_vm4, %v6704_v2, %v2096_v33  ;;  %v2443_v23 = vadd.f32 %v2442_v50, %v2441_v22  ;;  %v4865_v22 = vpop.xlane.xlu0 %4864 }
 0x62d   : > { %v3829_v11 = vadd.f32 %v3828_v36, %v3827_v54  ;;  %v2534_v52 = vadd.f32 %v2533_v38, %v2532_v29  ;;  %v6716_v5 = vsel %vm6705_vm4, %v6715_v9, %v3484_v3  ;;  %v7302_v59 = vmov 0.0|0.0  }
 0x62e   : > { %v3920_v15 = vadd.f32 %v3919_v37, %v3918_v16  ;;  %7215 = vmatprep.subr.bf16.mxu1 %v7302_v59  ;;  %v3575_v6 = vadd.f32 %v3574_v60, %v3573_v53  ;;  %v6708_v20 = vsel %vm6707_vm5, %v6706_v8, %v2187_v35  ;;  %v7304_v18 = vmov 0.0  }
 0x62f   : > { %v3830_v47 = vrot.slane %v3829_v11, 1  ;;  %v6710_v14 = vsel %vm6709_vm6, %v6708_v20, %v2443_v23  ;;  %7140 = vmatprep.mubr.msk.f32.mxu1 %vm7303_vm8, %v7304_v18  ;;  %v4953_v56 = vpop.xlane.xlu1 %4952  ;;  %v4172_v55 = vadd.f32 %v9960_v43, %v9962_v41  ;;  %v4263_v2 = vadd.f32 %v9970_v17, %v9976_v44 }
 0x630   : > { %v3921_v12 = vrot.slane %v3920_v15, 1  ;;  %v6717_v62 = vsel %vm6707_vm5, %v6716_v5, %v3575_v6  ;;  %v6712_v31 = vsel %vm6711_vm7, %v6710_v14, %v2534_v52  ;;  %v4956_v24 = vpop.xlane.xlu0 %4955  ;;  %v4866_v43 = vadd.f32 %v4865_v22, %v4862_v49 }
 0x631   : > { %v3831_v28 = vadd.f32 %v3830_v47, %v3829_v11  ;;  %v6734_v57 = vmul.f32 0.00390625, %v6712_v31  ;;  %v4173_v60 = vrot.slane %v4172_v55, 4  ;;  %v4264_v9 = vrot.slane %v4263_v2, 4 }
 0x632   : > { %v3922_v46 = vadd.f32 %v3921_v12, %v3920_v15  ;;  %v4957_v41 = vadd.f32 %v4956_v24, %v4953_v56  ;;  %v4867_v31 = vrot.slane %v4866_v43, 4  ;;  %vm6818_vm10 = vcmask 15360  }
 0x633   : > { %v6718_v48 = vsel %vm6709_vm6, %v6717_v62, %v3831_v28  ;;  %v5556_v26 = vpop.xlane.xlu1 %5555  ;;  %v4174_v15 = vadd.f32 %v4173_v60, %v4172_v55  ;;  %v4265_v5 = vadd.f32 %v4264_v9, %v4263_v2 }
 0x634   : > { %v6719_v19 = vsel %vm6711_vm7, %v6718_v48, %v3922_v46  ;;  %v5559_v25 = vpop.xlane.xlu0 %5558  ;;  %v4958_v48 = vrot.slane %v4957_v41, 4 }
 0x635   : > { %v6735_v45 = vmul.f32 0.00390625, %v6719_v19  ;;  %v5560_v38 = vadd.f32 %v5559_v25, %v5556_v26  ;;  %v4175_v14 = vrot.slane %v4174_v15, 2  ;;  %v4266_v28 = vrot.slane %v4265_v5, 2 }
 0x637   : > { %v7216_v4 = vpack.c.bf16 %v6735_v45, %v6734_v57  ;;  %v5647_v29 = vpop.xlane.xlu1 %5646  ;;  %v5561_v8 = vrot.slane %v5560_v38, 4  ;;  %v4176_v25 = vadd.f32 %v4175_v14, %v4174_v15 }
 0x638   : > { %v5650_v21 = vpop.xlane.xlu0 %5649 }
 0x639   : > { %7217 = vmatpush3.bf16.msra.mxu1 %v7216_v4  ;;  %v5651_v16 = vadd.f32 %v5650_v21, %v5647_v29  ;;  %v5562_v17 = vadd.f32 %v5561_v8, %v5560_v38  ;;  %v4267_v29 = vadd.f32 %v4266_v28, %v4265_v5  ;;  %v4177_v55 = vrot.slane %v4176_v25, 1 }
 0x63a   : > { %7218 = vmatprep.subr.bf16.mxu1 %v7302_v59 }
 0x63b   : > { %v4515_v61 = vpop.xlane.xlu1 %4514  ;;  %v5652_v3 = vrot.slane %v5651_v16, 4  ;;  %v5563_v57 = vrot.slane %v5562_v17, 2  ;;  %v4268_v2 = vrot.slane %v4267_v29, 1 }
 0x63c   : > { %v4518_v30 = vpop.xlane.xlu0 %4517 }
 0x63d   : > { %v4519_v33 = vadd.f32 %v4518_v30, %v4515_v61  ;;  %v5653_v44 = vadd.f32 %v5652_v3, %v5651_v16  ;;  %v4868_v30 = vadd.f32 %v4867_v31, %v4866_v43  ;;  %v4178_v43 = vadd.f32 %v4177_v55, %v4176_v25 }
 0x63f   : > { %v4606_v27 = vpop.xlane.xlu1 %4605  ;;  %v4520_v23 = vrot.slane %v4519_v33, 4  ;;  %v5654_v45 = vrot.slane %v5653_v44, 2 }
 0x641   : > { %v4521_v59 = vadd.f32 %v4520_v23, %v4519_v33  ;;  %v4869_v33 = vrot.slane %v4868_v30, 2 }
 0x643   : > { %v6250_v40 = vpop.xlane.xlu1 %6249  ;;  %v4522_v18 = vrot.slane %v4521_v59, 2 }
 0x646   : > { %v4609_v39 = vpop.xlane.xlu0 %4608 }
 0x647   : > { %v6341_v42 = vpop.xlane.xlu1 %6340  ;;  %v4610_v35 = vadd.f32 %v4609_v39, %v4606_v27  ;;  %v4959_v27 = vadd.f32 %v4958_v48, %v4957_v41  ;;  %v4269_v41 = vadd.f32 %v4268_v2, %v4267_v29 }
 0x649   : > { %v4611_v11 = vrot.slane %v4610_v35, 4 }
 0x64b   : > { %v4612_v6 = vadd.f32 %v4611_v11, %v4610_v35  ;;  %v4960_v35 = vrot.slane %v4959_v27, 2 }
 0x64d   : > { %v5209_v51 = vpop.xlane.xlu1 %5208  ;;  %v4613_v4 = vrot.slane %v4612_v6, 2 }
 0x655   : > { %v6253_v53 = vpop.xlane.xlu0 %6252 }
 0x656   : > { %v6254_v47 = vadd.f32 %v6253_v53, %v6250_v40  ;;  %v5564_v53 = vadd.f32 %v5563_v57, %v5562_v17 }
 0x658   : > { %v6255_v19 = vrot.slane %v6254_v47, 4  ;;  %v5565_v9 = vrot.slane %v5564_v53, 1 }
 0x65a   : > { %v5300_v50 = vpop.xlane.xlu1 %5299  ;;  %v6256_v39 = vadd.f32 %v6255_v19, %v6254_v47  ;;  %v5566_v14 = vadd.f32 %v5565_v9, %v5564_v53 }
 0x660   : > { %v6344_v32 = vpop.xlane.xlu0 %6343 }
 0x661   : > { %v6345_v62 = vadd.f32 %v6344_v32, %v6341_v42  ;;  %v5655_v42 = vadd.f32 %v5654_v45, %v5653_v44  ;;  %v4523_v32 = vadd.f32 %v4522_v18, %v4521_v59  ;;  %v4870_v44 = vadd.f32 %v4869_v33, %v4868_v30 }
 0x663   : > { %v6346_v21 = vrot.slane %v6345_v62, 4  ;;  %v4524_v8 = vrot.slane %v4523_v32, 1 }
 0x665   : > { %v6347_v38 = vadd.f32 %v6346_v21, %v6345_v62  ;;  %v4525_v62 = vadd.f32 %v4524_v8, %v4523_v32 }
 0x667   : > { %v6348_v47 = vrot.slane %v6347_v38, 2 }
 0x668   : > { %v5903_v1 = vpop.xlane.xlu1 %5902 }
 0x669   : > { %v6349_v18 = vadd.f32 %v6348_v47, %v6347_v38 }
 0x66f   : > { %v5212_v13 = vpop.xlane.xlu0 %5211 }
 0x670   : > { %v5213_v20 = vadd.f32 %v5212_v13, %v5209_v51  ;;  %v4614_v51 = vadd.f32 %v4613_v4, %v4612_v6 }
 0x672   : > { %v5214_v56 = vrot.slane %v5213_v20, 4  ;;  %v4615_v3 = vrot.slane %v4614_v51, 1 }
 0x674   : > { %v5994_v49 = vpop.xlane.xlu1 %5993  ;;  %v5215_v13 = vadd.f32 %v5214_v56, %v5213_v20  ;;  %v6720_v56 = vsel %vm6699_vm1, %v4178_v43, %v4269_v41 }
 0x676   : > { %v5216_v11 = vrot.slane %v5215_v13, 2 }
 0x678   : > { %v5217_v31 = vadd.f32 %v5216_v11, %v5215_v13 }
 0x67b   : > { %v5303_v54 = vpop.xlane.xlu0 %5302 }
 0x67c   : > { %v5304_v46 = vadd.f32 %v5303_v54, %v5300_v50 }
 0x67e   : > { %v5305_v61 = vrot.slane %v5304_v46, 4 }
 0x680   : > { %v5306_v16 = vadd.f32 %v5305_v61, %v5304_v46  ;;  %v4616_v46 = vadd.f32 %v4615_v3, %v4614_v51  ;;  %v6721_v61 = vsel %vm6701_vm2, %v6720_v56, %v4525_v62 }
 0x682   : > { %v5307_v17 = vrot.slane %v5306_v16, 2 }
 0x684   : > { %v5308_v4 = vadd.f32 %v5307_v17, %v5306_v16  ;;  %v6738_v17 = vld [vmem:[%s10060_s6] sm:$0x3] }
 0x686   : > { %v5309_v32 = vrot.slane %v5308_v4, 1 }
 0x68a   : > { %v5906_v36 = vpop.xlane.xlu0 %5905 }
 0x68b   : > { %v5907_v37 = vadd.f32 %v5906_v36, %v5903_v1  ;;  %v6257_v1 = vrot.slane %v6256_v39, 2  ;;  %v6597_v36 = vpop.xlane.xlu1 %6596 }
 0x68d   : > { %v5908_v52 = vrot.slane %v5907_v37, 4  ;;  %v6258_v59 = vadd.f32 %v6257_v1, %v6256_v39  ;;  %v5218_v39 = vrot.slane %v5217_v31, 1 }
 0x68f   : > { %v5909_v12 = vadd.f32 %v5908_v52, %v5907_v37  ;;  %v5656_v37 = vrot.slane %v5655_v42, 1  ;;  %v5219_v16 = vadd.f32 %v5218_v39, %v5217_v31 }
 0x690   : > { %v6688_v19 = vpop.xlane.xlu1 %6687 }
 0x691   : > { %v5910_v24 = vrot.slane %v5909_v12, 2  ;;  %v5657_v28 = vadd.f32 %v5656_v37, %v5655_v42  ;;  %v6350_v42 = vrot.slane %v6349_v18, 1 }
 0x693   : > { %v5911_v50 = vadd.f32 %v5910_v24, %v5909_v12  ;;  %v4961_v12 = vadd.f32 %v4960_v35, %v4959_v27  ;;  %v4871_v24 = vrot.slane %v4870_v44, 1  ;;  %v6727_v21 = vsel %vm6699_vm1, %v5566_v14, %v5657_v28  ;;  %v6816_v14 = vld [vmem:[%s10061_s7 + $0x10] sm:$0xff]  ;;  %v6817_v28 = vld [vmem:[%s10061_s7 + $0x18] sm:$0xff] }
 0x694   : > { %v6722_v27 = vsel %vm6703_vm3, %v6721_v61, %v4616_v46  ;;  %v6351_v1 = vadd.f32 %v6350_v42, %v6349_v18 }
 0x695   : > { %v5997_v22 = vpop.xlane.xlu0 %5996  ;;  %v5912_v52 = vrot.slane %v5911_v50, 1  ;;  %v4962_v29 = vrot.slane %v4961_v12, 1 }
 0x696   : > { %v5998_v26 = vadd.f32 %v5997_v22, %v5994_v49 }
 0x697   : > { %v5913_v48 = vadd.f32 %v5912_v52, %v5911_v50  ;;  %v4872_v50 = vadd.f32 %v4871_v24, %v4870_v44  ;;  %v4963_v35 = vadd.f32 %v4962_v29, %v4961_v12  ;;  %v6814_v44 = vld [vmem:[%s10061_s7] sm:$0xff]  ;;  %v6815_v12 = vld [vmem:[%s10061_s7 + $0x8] sm:$0xff] }
 0x698   : > { %v5999_v40 = vrot.slane %v5998_v26, 4  ;;  %7145 = vmatprep.mubr.msk.f32.mxu0 %vm6818_vm10, %v6814_v44 }
 0x699   : > { %v6723_v38 = vsel %vm6705_vm4, %v6722_v27, %v4872_v50 }
 0x69a   : > { %v6000_v54 = vadd.f32 %v5999_v40, %v5998_v26  ;;  %v6259_v26 = vrot.slane %v6258_v59, 1  ;;  %v6728_v40 = vsel %vm6701_vm2, %v6727_v21, %v5913_v48  ;;  %v6724_v37 = vsel %vm6707_vm5, %v6723_v38, %v4963_v35 }
 0x69c   : > { %v6001_v60 = vrot.slane %v6000_v54, 2 }
 0x69e   : > { %v6600_v23 = vpop.xlane.xlu0 %6599  ;;  %v6002_v15 = vadd.f32 %v6001_v60, %v6000_v54  ;;  %v6260_v54 = vadd.f32 %v6259_v26, %v6258_v59 }
 0x69f   : > { %v6601_v5 = vadd.f32 %v6600_v23, %v6597_v36  ;;  %v5310_v36 = vadd.f32 %v5309_v32, %v5308_v4  ;;  %v6725_v23 = vsel %vm6709_vm6, %v6724_v37, %v5219_v16 }
 0x6a0   : > { %v6003_v6 = vrot.slane %v6002_v15, 1 }
 0x6a1   : > { %v6602_v20 = vrot.slane %v6601_v5, 4  ;;  %v6726_v52 = vsel %vm6711_vm7, %v6725_v23, %v5310_v36  ;;  %v7278_v23 = vld [vmem:[%s7369_s10 + $0x70] sm:$0xff] }
 0x6a2   : > { %v6691_v45 = vpop.xlane.xlu0 %6690  ;;  %v6004_v49 = vadd.f32 %v6003_v6, %v6002_v15  ;;  %v6736_v43 = vmul.f32 0.00390625, %v6726_v52  ;;  %v7279_v52 = vld [vmem:[%s7369_s10 + $0x78] sm:$0xff] }
 0x6a3   : > { %v6603_v57 = vadd.f32 %v6602_v20, %v6601_v5  ;;  %v6692_v22 = vadd.f32 %v6691_v45, %v6688_v19 }
 0x6a4   : > { %v6729_v51 = vsel %vm6703_vm3, %v6728_v40, %v6004_v49 }
 0x6a5   : > { %v6604_v25 = vrot.slane %v6603_v57, 2  ;;  %v6693_v30 = vrot.slane %v6692_v22, 4  ;;  %v6730_v33 = vsel %vm6705_vm4, %v6729_v51, %v6260_v54  ;;  %v7273_v54 = vld [vmem:[%s7369_s10 + $0x58] sm:$0xff] }
 0x6a6   : > { %v6731_v8 = vsel %vm6707_vm5, %v6730_v33, %v6351_v1  ;;  %v7276_v33 = vld [vmem:[%s7369_s10 + $0x60] sm:$0xff]  ;;  %v7277_v1 = vld [vmem:[%s7369_s10 + $0x68] sm:$0xff] }
 0x6a7   : > { %v6605_v53 = vadd.f32 %v6604_v25, %v6603_v57  ;;  %v6694_v13 = vadd.f32 %v6693_v30, %v6692_v22 }
 0x6a9   : > { %v6606_v55 = vrot.slane %v6605_v53, 1  ;;  %v6695_v2 = vrot.slane %v6694_v13, 2 }
 0x6ab   : > { %v6696_v60 = vadd.f32 %v6695_v2, %v6694_v13  ;;  %v6607_v9 = vadd.f32 %v6606_v55, %v6605_v53  ;;  %v7272_v13 = vld [vmem:[%s7369_s10 + $0x50] sm:$0xff]  ;;  %v7274_v2 = vld [vmem:[%s7369_s10 + $0x40] sm:$0xff] }
 0x6ad   : > { %v6697_v3 = vrot.slane %v6696_v60, 1  ;;  %v6732_v15 = vsel %vm6709_vm6, %v6731_v8, %v6607_v9  ;;  %v10091_v9 = vld [vmem:[#allocation4_spill] sm:$0xff]  ;;  %v10092_v8 = vld [vmem:[#allocation5_spill] sm:$0xff] }
 0x6af   : > { %v6698_v11 = vadd.f32 %v6697_v3, %v6696_v60 }
 0x6b1   : > { %v6733_v5 = vsel %vm6711_vm7, %v6732_v15, %v6698_v11 }
 0x6b2   : > { %v6737_v41 = vmul.f32 0.00390625, %v6733_v5 }
 0x6b4   : > { %v7219_v47 = vpack.c.bf16 %v6737_v41, %v6736_v43 }
 0x6b6   : > { %7220 = vmatpush3.bf16.msra.mxu1 %v7219_v47 }
 0x6b9   : > { %7141 = vmatmul.mubr.msk.f32.vlgmr.msra.gmra.mrb[40].mxu1 %vm6739_vm9, %v6738_v17 }
 0x78c   : > { %v6809_v59 = vpop.f32.mrb[40].mxu1 }
 0x78d   : > { %v6813_v6 = vmax.f32 %v6809_v59, 0.0  ;;  %v7142_v20 = vpop.f32.mrb[41].mxu1 }
 0x78f   : > { %7143 = vmatprep.subr.msk.mxu0 %vm6701_vm2, %v6813_v6 }
 0x790   : > { %7144 = vmatpush3.msk.msra.mxu0 %vm6701_vm2, %v6813_v6 }
 0x791   : > { %7146 = vmatmul.mubr.msk.f32.vlgmr.msra.gmra.mrb[48].mxu0 %vm6818_vm10, %v6815_v12 }
 0x792   : > { %7148 = vmatprep.mubr.msk.f32.mxu0 %vm6818_vm10, %v6816_v14 }
 0x795   : > { %7149 = vmatmul.mubr.msk.f32.gmra.mrb[50].mxu0 %vm6818_vm10, %v6817_v28 }
 0x864   : > { %v7147_v62 = vpop.f32.mrb[48].mxu0 }
 0x865   : > { %v7115_v46 = vmul.f32 -1.442695, %v7147_v62  ;;  %v6900_v31 = vpop.f32.mrb[49].mxu0 }
 0x866   : > { %v7114_v48 = vmul.f32 -1.442695, %v6900_v31 }
 0x867   : > { %7256 = vpow2.f32 %v7115_v46 }
 0x868   : > { %7258 = vpow2.f32 %v7114_v48  ;;  %v7150_v19 = vpop.f32.mrb[50].mxu0 }
 0x869   : > { %v7117_v57 = vmul.f32 -1.442695, %v7150_v19  ;;  %v6910_v45 = vpop.f32.mrb[51].mxu0 }
 0x86a   : > { %v7116_v18 = vmul.f32 -1.442695, %v6910_v45 }
 0x86b   : > { %7260 = vpow2.f32 %v7117_v57 }
 0x86c   : > { %7262 = vpow2.f32 %v7116_v18 }
 0x871   : > { %v7257_v4 = vpop.eup %7256 }
 0x872   : > { %v7259_v49 = vpop.eup %7258  ;;  %v6932_v22 = vadd.f32 1.0, %v7257_v4 }
 0x873   : > { %v6931_v56 = vadd.f32 1.0, %v7259_v49 }
 0x874   : > { %7264 = vrcp.f32 %v6932_v22 }
 0x875   : > { %v7261_v24 = vpop.eup %7260  ;;  %7266 = vrcp.f32 %v6931_v56 }
 0x876   : > { %v7263_v26 = vpop.eup %7262  ;;  %v6934_v29 = vadd.f32 1.0, %v7261_v24 }
 0x877   : > { %v6933_v25 = vadd.f32 1.0, %v7263_v26 }
 0x879   : > { %7268 = vrcp.f32 %v6933_v25 }
 0x87a   : > { %7270 = vrcp.f32 %v6934_v29 }
 0x87e   : > { %v7265_v21 = vpop.eup %7264 }
 0x87f   : > { %v7267_v61 = vpop.eup %7266  ;;  %6955 = vperm.xlu0 %7247, %v7265_v21  }
 0x880   : > { %6950 = vperm.xlu1 %7246, %v7267_v61  }
 0x883   : > { %v7269_v30 = vpop.eup %7268 }
 0x884   : > { %6960 = vperm.xlu1 %7246, %v7269_v30   ;;  %v7271_v27 = vpop.eup %7270 }
 0x888   : > { %6965 = vperm.xlu1 %7246, %v7271_v27  }
 0x8fe   : > { %v6956_v39 = vpop.permute.xlu0 %6955 }
 0x8ff   : > { %v6978_v40 = vmul.f32 %v6956_v39, %v7702_v63  ;;  %v6979_v53 = vmul.f32 %v6956_v39, %v7751_v10  ;;  %v6951_v42 = vpop.permute.xlu1 %6950  ;;  %v7275_v63 = vld [vmem:[%s7369_s10 + $0x48] sm:$0xff] }
 0x900   : > { %v6976_v32 = vmul.f32 %v6951_v42, %v7685_v58  ;;  %v6977_v51 = vmul.f32 %v6951_v42, %v7689_v7 }
 0x901   : > { %v6994_v50 = vadd.f32 %v7272_v13, %v6978_v40  ;;  %v6995_v55 = vadd.f32 %v7273_v54, %v6979_v53 }
 0x902   : > { %v6992_v38 = vadd.f32 %v7274_v2, %v6976_v32  ;;  %v6993_v16 = vadd.f32 %v7275_v63, %v6977_v51 }
 0x903   : > { %7010 = vst [vmem:[%s7648_s23 + $0x50] sm:$0xff] %v6994_v50  ;;  %7011 = vst [vmem:[%s7648_s23 + $0x58] sm:$0xff] %v6995_v55  ;;  %v6961_v10 = vpop.permute.xlu1 %6960 }
 0x904   : > { %7008 = vst [vmem:[%s7648_s23 + $0x40] sm:$0xff] %v6992_v38  ;;  %7009 = vst [vmem:[%s7648_s23 + $0x48] sm:$0xff] %v6993_v16  ;;  %v6980_v58 = vmul.f32 %v6961_v10, %v7803_v34  ;;  %v6981_v7 = vmul.f32 %v6961_v10, %v7812_v0 }
 0x906   : > { %v6996_v35 = vadd.f32 %v7276_v33, %v6980_v58  ;;  %v6997_v36 = vadd.f32 %v7277_v1, %v6981_v7 }
 0x907   : > { %v6966_v60 = vpop.permute.xlu1 %6965 }
 0x908   : > { %7012 = vst [vmem:[%s7648_s23 + $0x60] sm:$0xff] %v6996_v35  ;;  %7013 = vst [vmem:[%s7648_s23 + $0x68] sm:$0xff] %v6997_v36  ;;  %v6982_v37 = vmul.f32 %v6966_v60, %v10091_v9  ;;  %v6983_v3 = vmul.f32 %v6966_v60, %v10092_v8 }
 0x90a   : > { %v6998_v11 = vadd.f32 %v7278_v23, %v6982_v37  ;;  %v6999_v15 = vadd.f32 %v7279_v52, %v6983_v3 }
 0x90c   : > { %7014 = vst [vmem:[%s7648_s23 + $0x70] sm:$0xff] %v6998_v11  ;;  %7015 = vst [vmem:[%s7648_s23 + $0x78] sm:$0xff] %v6999_v15 }
 0x90d PF: > { %s18_s27 = sadd.s32 1, %s7286_s27  }
 0x90e   : > { %p15_p4 = scmp.ge.s32.totalorder %s18_s27, 4  }
 0x910   :  { %17 = sbr.rel (!%p15_p4) target bundleno = 1 (0x1), region = 135 }

</bundles_post_ra>
